<compile_context>
chip_gen: v5e
topology: v5e:2x2
jax: 0.10.0
libtpu: 0.0.40
codegen_flags: <defaults>
</compile_context>

<pallas_src>
import functools

import numpy as np

import jax
import jax.numpy as jnp
from jax.experimental import pallas as pl
from jax.experimental.pallas import tpu as pltpu


# ------------------------------- helpers ----------------------------------- #

def _round_up(x, m):
    return ((x + m - 1) // m) * m


def bn_scale_shift(bn, eps=1e-5):
    scale = bn["gamma"] / jnp.sqrt(bn["var"] + eps)
    shift = bn["beta"] - bn["mean"] * scale
    return scale, shift


def fold_conv_weight(w_hwio, bias, scale=None, shift=None):
    """-> (Cout, KH*KW*Cin) weight (tap-major, channel-minor) and (Cout,1) bias,
    with eval-mode BatchNorm folded in."""
    kh, kw, cin, cout = w_hwio.shape
    if scale is None:
        scale = jnp.ones((cout,), jnp.float32)
        shift = jnp.zeros((cout,), jnp.float32)
    w2 = jnp.transpose(w_hwio, (3, 0, 1, 2)).reshape(cout, kh * kw * cin)
    w2 = (w2 * scale[:, None]).astype(jnp.float32)
    b2 = (bias * scale + shift).reshape(cout, 1).astype(jnp.float32)
    return w2, b2


# --------------------------- static fusion plan ----------------------------- #

def build_static_plan(in_channels, out_channels, input_size, embedding_size,
                      cfg, batch):
    """Static (pure python/numpy) geometry of the fused network."""
    H, W = input_size
    E = embedding_size
    s1 = (H // 2, W // 2)
    s2 = (H // 4, W // 4)
    s3 = (H // 8, W // 8)
    assert s3 == (E, E), "final concat requires H//8 == W//8 == embedding_size"

    # channel-planar stage buffers: one flattened zero-padded (Hp, Wp) plane per
    # (batch, channel) row; padding ring of 1 (for the 'same' 3x3 convs).
    bufs = {
        "x":    dict(cpb=in_channels,  h=H,     w=W,     pad=1),
        "buf1": dict(cpb=out_channels, h=s1[0], w=s1[1], pad=1),
        "buf2": dict(cpb=out_channels, h=s2[0], w=s2[1], pad=1),
        "buf3": dict(cpb=out_channels, h=s3[0], w=s3[1], pad=1),
        "buf4": dict(cpb=4,            h=s3[0], w=s3[1], pad=1),
    }
    for g in bufs.values():
        g["hp"] = g["h"] + 2 * g["pad"]
        g["wp"] = g["w"] + 2 * g["pad"]

    def conv(name, src, dst, cin, cout, ksize, pad, dil, pooled, dst_ch):
        sg = bufs[src]
        kh, kw = ksize
        dh, dw = dil
        poh, pow_ = sg["pad"] - pad[0], sg["pad"] - pad[1]
        assert poh >= 0 and pow_ >= 0
        wp = sg["wp"]
        ho = sg["h"] + 2 * pad[0] - dh * (kh - 1)
        wo = sg["w"] + 2 * pad[1] - dw * (kw - 1)
        lo = ho * wp                                  # flat output (incl. garbage cols)
        lx = lo + (wp + 1 if pooled else 0)           # extra lanes for pooling shifts
        lxp = _round_up(lx, 128)                      # full-vreg slice loads
        off_max = (poh + dh * (kh - 1)) * wp + (pow_ + dw * (kw - 1))
        return dict(name=name, src=src, dst=dst, cin=cin, cout=cout,
                    kh=kh, kw=kw, dh=dh, dw=dw, poh=poh, pow=pow_,
                    wp=wp, ho=ho, wo=wo, lo=lo, lxp=lxp,
                    read_end=off_max + lxp, pooled=pooled, dst_ch=dst_ch)

    k1 = (3 + H % 2, 3 + W % 2)
    k2 = (3 + s1[0] % 2, 3 + s1[1] % 2)
    k3 = (3 + s2[0] % 2, 3 + s2[1] % 2)

    convs = [
        conv("resconv1", "x",    "buf4", in_channels,  1, k1, cfg["pad1"], cfg["dil1"], False, 1),
        conv("conv1",    "x",    "buf1", in_channels,  out_channels, (3, 3), (1, 1), (1, 1), True, 0),
        conv("resconv2", "buf1", "buf4", out_channels, 1, k2, cfg["pad2"], cfg["dil2"], False, 2),
        conv("conv2",    "buf1", "buf2", out_channels, out_channels, (3, 3), (1, 1), (1, 1), True, 0),
        conv("resconv3", "buf2", "buf4", out_channels, 1, k3, cfg["pad3"], cfg["dil3"], False, 3),
        conv("conv3",    "buf2", "buf3", out_channels, out_channels, (3, 3), (1, 1), (1, 1), True, 0),
        conv("conv4",    "buf3", "buf4", out_channels, 1, (3, 3), (1, 1), (1, 1), False, 0),
        conv("conv5",    "buf4", "final", 4,           1, (3, 3), (1, 1), (1, 1), False, 0),
    ]

    # buffer lane widths: big enough for every reader's furthest shifted slice.
    for name, g in bufs.items():
        need = g["hp"] * g["wp"]
        for c in convs:
            if c["src"] == name:
                need = max(need, c["read_end"])
        g["L"] = _round_up(need, 128)

    # consistency checks (trace-time only)
    for c in convs:
        assert bufs[c["src"]]["cpb"] == c["cin"], c["name"]
        if c["dst"] == "final":
            assert c["ho"] == E and c["wo"] == E, c["name"]
        else:
            dg = bufs[c["dst"]]
            oh = c["ho"] // 2 if c["pooled"] else c["ho"]
            ow = c["wo"] // 2 if c["pooled"] else c["wo"]
            assert (oh, ow) == (dg["h"], dg["w"]), c["name"]

    # tiny (1, ldst) int32 "which source column feeds this destination lane"
    # maps (-1 = pad ring / unused lane).  The dense 0/1 scatter matrix is
    # rebuilt in-kernel from an iota == map compare, so no ~2 MiB HBM DMA.
    for c in convs:
        if c["dst"] == "final":
            ldst = E * E
            dst_index = lambda y, x: y * E + x
        else:
            dg = bufs[c["dst"]]
            ldst = dg["L"]
            dst_index = lambda y, x, dg=dg: (y + dg["pad"]) * dg["wp"] + (x + dg["pad"])
        m = np.full((1, ldst), -1, np.int32)
        if c["pooled"]:
            for yo in range(c["ho"] // 2):
                for xo in range(c["wo"] // 2):
                    m[0, dst_index(yo, xo)] = (2 * yo) * c["wp"] + 2 * xo
        else:
            for y in range(c["ho"]):
                for x in range(c["wo"]):
                    m[0, dst_index(y, x)] = y * c["wp"] + x
        c["ldst"] = ldst
        c["dst_map"] = m

    k_max = max(c["kh"] * c["kw"] * batch * c["cin"] for c in convs)
    lx_max = max(c["lxp"] for c in convs)
    return bufs, convs, k_max, lx_max


# ------------------------------ fused kernel -------------------------------- #

def make_fused_kernel(bufs, convs, B, E):
    nconv = len(convs)

    def kernel(x_ref, *rest):
        wrefs = rest[:3 * nconv]
        emb_ref = rest[3 * nconv]        # (B, 3E) pre-gathered embeddings
        wfh_ref = rest[3 * nconv + 1]    # (E*E, 5) final_conv weight, conv part
        wft_ref = rest[3 * nconv + 2]    # (3E, 5)  final_conv weight, embedding part
        bf_ref = rest[3 * nconv + 3]     # (1, 5)
        out_ref = rest[3 * nconv + 4]
        buf1, buf2, buf3, buf4, patch = rest[3 * nconv + 5:]
        refs = {"x": x_ref, "buf1": buf1, "buf2": buf2, "buf3": buf3, "buf4": buf4}

        conv5_out = None
        for n, c in enumerate(convs):
            w = wrefs[3 * n][...]         # (B*cout, kh*kw*B*cin) block-diag, BN folded
            bias = wrefs[3 * n + 1][...]  # (B*cout, 1), BN folded
            smap = wrefs[3 * n + 2][...]  # (1, ldst) int32 destination map
            src = refs[c["src"]]
            bcin = B * c["cin"]
            bcout = B * c["cout"]
            kh, kw, dh, dw = c["kh"], c["kw"], c["dh"], c["dw"]
            wp, lo, lxp, ldst = c["wp"], c["lo"], c["lxp"], c["ldst"]
            nk = kh * kw * bcin

            # implicit im2col: copy the kh*kw shifted (B*cin, lxp) slices into
            # the patch scratch (all batches at once), then a single MXU matmul
            # against the block-diagonal tap-major weight.
            for t in range(kh * kw):
                i, j = divmod(t, kw)
                off = (c["poh"] + i * dh) * wp + (c["pow"] + j * dw)
                patch[t * bcin:(t + 1) * bcin, 0:lxp] = src[0:bcin, off:off + lxp]
            acc = jnp.dot(w, patch[0:nk, 0:lxp],
                          preferred_element_type=jnp.float32)   # (B*cout, lxp)

            if c["pooled"]:
                # fused MaxPool2d(2): max over the 4 window corners
                vals = jnp.maximum(
                    jnp.maximum(acc[:, 0:lo], acc[:, 1:lo + 1]),
                    jnp.maximum(acc[:, wp:lo + wp], acc[:, wp + 1:lo + wp + 1]))
            else:
                vals = acc[:, 0:lo]
            vals = vals + bias            # after pool (exact), before scatter

            # scatter (drop garbage columns, pool-stride select, re-pad into the
            # next stage's plane layout) via a 0/1 matrix built in-kernel.
            rows = jax.lax.broadcasted_iota(jnp.int32, (lo, ldst), 0)
            rmat = (rows == smap).astype(jnp.float32)
            scat = jnp.dot(vals, rmat, preferred_element_type=jnp.float32)

            if c["dst"] == "final":
                conv5_out = scat                          # (B, E*E)
            elif c["cout"] == bufs[c["dst"]]["cpb"] and c["dst_ch"] == 0:
                refs[c["dst"]][0:bcout, :] = scat         # all batches, one store
            else:
                cpb = bufs[c["dst"]]["cpb"]
                for b in range(B):
                    r = b * cpb + c["dst_ch"]
                    refs[c["dst"]][r:r + 1, :] = scat[b:b + 1, :]

        # final_conv (kernel == whole (E+3, E) map) + bias + flatten, split into
        # the conv-map part and the pre-gathered embedding part.
        out_ref[...] = (
            jnp.dot(conv5_out, wfh_ref[...], preferred_element_type=jnp.float32)
            + jnp.dot(emb_ref[...], wft_ref[...], preferred_element_type=jnp.float32)
            + bf_ref[...])

    return kernel


# --------------------------------- forward ---------------------------------- #

def cnn_tc_forward(params, cfg, fields_nchw, lat, lon, ldt):
    B, Cin, H, W = fields_nchw.shape
    Cmain = params["conv1_w"].shape[-1]
    E = params["emb1"].shape[-1]
    bufs, convs, k_max, lx_max = build_static_plan(Cin, Cmain, (H, W), E, cfg, B)

    # one-time glue: zero-pad with the conv1 'same' ring and flatten each
    # (batch, channel) plane into the lane dimension.
    xg = bufs["x"]
    xp = jnp.pad(fields_nchw.astype(jnp.float32),
                 ((0, 0), (0, 0), (xg["pad"], xg["pad"]), (xg["pad"], xg["pad"])))
    x_planes = xp.reshape(B * Cin, xg["hp"] * xg["wp"])
    x_planes = jnp.pad(x_planes, ((0, 0), (0, xg["L"] - xg["hp"] * xg["wp"])))

    # embedding gather outside the kernel: 3*B*E floats instead of lane-padded
    # 721/1440/28-row tables DMA'd to VMEM every call.
    # TODO(synk): torch trunc-divides and raises on out-of-range indices; here
    #             indices are floored and clamped to the table range.
    lat_idx = jnp.clip(jnp.floor((lat + 90.0) / 0.25), 0, 720).astype(jnp.int32)
    lon_idx = jnp.clip(jnp.floor(lon / 0.25), 0, 1439).astype(jnp.int32)
    ldt_idx = jnp.clip(jnp.floor(ldt / 6.0) - 1.0, 0, 27).astype(jnp.int32)
    emb_slab = jnp.concatenate(
        [params["emb1"][lat_idx], params["emb2"][lon_idx], params["emb3"][ldt_idx]],
        axis=-1).astype(jnp.float32)                               # (B, 3E)

    # fold eval-mode BatchNorm into conv weights / biases (reference order is
    # conv -> BN -> pool, which the fused max-pool epilogue matches exactly).
    s1_, t1 = bn_scale_shift(params["bn1"])
    s2_, t2 = bn_scale_shift(params["bn2"])
    s3_, t3 = bn_scale_shift(params["bn3"])
    s4_, t4 = bn_scale_shift(params["bn4"])
    folded = {
        "resconv1": fold_conv_weight(params["resconv1_w"], params["resconv1_b"]),
        "conv1":    fold_conv_weight(params["conv1_w"], params["conv1_b"], s1_, t1),
        "resconv2": fold_conv_weight(params["resconv2_w"], params["resconv2_b"]),
        "conv2":    fold_conv_weight(params["conv2_w"], params["conv2_b"], s2_, t2),
        "resconv3": fold_conv_weight(params["resconv3_w"], params["resconv3_b"]),
        "conv3":    fold_conv_weight(params["conv3_w"], params["conv3_b"], s3_, t3),
        "conv4":    fold_conv_weight(params["conv4_w"], params["conv4_b"], s4_, t4),
        "conv5":    fold_conv_weight(params["conv5_w"], params["conv5_b"]),
    }

    conv_args = []
    for c in convs:
        w2, b2 = folded[c["name"]]
        cin, cout, taps = c["cin"], c["cout"], c["kh"] * c["kw"]
        assert w2.shape == (cout, taps * cin), c["name"]
        # block-diagonal kron(I_B, W_t) weights: every tap matmul and the
        # scatter matmul are batched across B in a single MXU op.
        wt = w2.reshape(cout, taps, cin)
        wblk = jnp.zeros((B * cout, taps, B * cin), jnp.float32)
        for b in range(B):
            wblk = wblk.at[b * cout:(b + 1) * cout, :, b * cin:(b + 1) * cin].set(wt)
        wblk = wblk.reshape(B * cout, taps * B * cin)
        bblk = jnp.tile(b2, (B, 1))
        conv_args += [wblk, bblk, jnp.asarray(c["dst_map"])]

    wf = params["final_w"].reshape((E + 3) * E, 5).astype(jnp.float32)
    wf_head, wf_tail = wf[:E * E, :], wf[E * E:, :]
    bf = params["final_b"].reshape(1, 5).astype(jnp.float32)

    n_in = 1 + 3 * len(convs) + 4
    in_specs = [pl.BlockSpec(memory_space=pltpu.MemorySpace.VMEM)] * n_in
    scratch_shapes = [
        pltpu.VMEM((B * Cmain, bufs["buf1"]["L"]), jnp.float32),
        pltpu.VMEM((B * Cmain, bufs["buf2"]["L"]), jnp.float32),
        pltpu.VMEM((B * Cmain, bufs["buf3"]["L"]), jnp.float32),
        pltpu.VMEM((B * 4,     bufs["buf4"]["L"]), jnp.float32),
        pltpu.VMEM((k_max, lx_max), jnp.float32),        # im2col patch scratch
    ]

    out = pl.pallas_call(
        make_fused_kernel(bufs, convs, B, E),
        out_shape=jax.ShapeDtypeStruct((B, 5), jnp.float32),
        in_specs=in_specs,
        out_specs=pl.BlockSpec(memory_space=pltpu.MemorySpace.VMEM),
        scratch_shapes=scratch_shapes,
        compiler_params=pltpu.CompilerParams(vmem_limit_bytes=32 * 1024 * 1024),
    )(x_planes, *conv_args, emb_slab, wf_head, wf_tail, bf)
    return out


# ------------------------- parameters / configuration ----------------------- #

def init_params(key, in_channels, out_channels, input_size, embedding_size):
    H, W = input_size
    s1 = (H // 2, W // 2)
    s2 = (H // 4, W // 4)
    s3 = (H // 8, W // 8)
    ksize1 = (3 + H % 2, 3 + W % 2)
    ksize2 = (3 + s1[0] % 2, 3 + s1[1] % 2)
    ksize3 = (3 + s2[0] % 2, 3 + s2[1] % 2)
    pad1 = (H % 2, W % 2)
    pad2 = (s1[0] % 2, s1[1] % 2)
    pad3 = (s2[0] % 2, s2[1] % 2)
    div1 = (2 + H % 2, 2 + W % 2)
    div2 = (2 + s1[0] % 2, 2 + s1[1] % 2)
    div3 = (2 + s2[0] % 2, 2 + s2[1] % 2)
    dil1 = ((H - s3[0] + 2 * pad1[0]) // div1[0], (W - s3[1] + 2 * pad1[1]) // div1[1])
    dil2 = ((s1[0] - s3[0] + 2 * pad2[0]) // div2[0], (s1[1] - s3[1] + 2 * pad2[1]) // div2[1])
    dil3 = ((s2[0] - s3[0] + 2 * pad3[0]) // div3[0], (s2[1] - s3[1] + 2 * pad3[1]) // div3[1])
    cfg = dict(pad1=pad1, pad2=pad2, pad3=pad3, dil1=dil1, dil2=dil2, dil3=dil3)

    keys = iter(jax.random.split(key, 64))

    def w_init(shape, scl=0.1):
        return (scl * jax.random.normal(next(keys), shape)).astype(jnp.float32)

    def bn_init(c):
        return dict(gamma=1.0 + 0.1 * jax.random.normal(next(keys), (c,)),
                    beta=0.1 * jax.random.normal(next(keys), (c,)),
                    mean=0.1 * jax.random.normal(next(keys), (c,)),
                    var=0.5 + jnp.abs(jax.random.normal(next(keys), (c,))))

    E = embedding_size
    params = dict(
        conv1_w=w_init((3, 3, in_channels, out_channels)), conv1_b=w_init((out_channels,)),
        conv2_w=w_init((3, 3, out_channels, out_channels)), conv2_b=w_init((out_channels,)),
        conv3_w=w_init((3, 3, out_channels, out_channels)), conv3_b=w_init((out_channels,)),
        conv4_w=w_init((3, 3, out_channels, 1)), conv4_b=w_init((1,)),
        conv5_w=w_init((3, 3, 4, 1)), conv5_b=w_init((1,)),
        bn1=bn_init(out_channels), bn2=bn_init(out_channels),
        bn3=bn_init(out_channels), bn4=bn_init(1),
        emb1=w_init((721, E), 1.0), emb2=w_init((1440, E), 1.0), emb3=w_init((28, E), 1.0),
        resconv1_w=w_init((ksize1[0], ksize1[1], in_channels, 1)), resconv1_b=w_init((1,)),
        resconv2_w=w_init((ksize2[0], ksize2[1], out_channels, 1)), resconv2_b=w_init((1,)),
        resconv3_w=w_init((ksize3[0], ksize3[1], out_channels, 1)), resconv3_b=w_init((1,)),
        final_w=w_init((E + 3, E, 1, 5)), final_b=w_init((5,)),
    )
    return params, cfg


# ----------------------------------- main ------------------------------------ #

if __name__ == "__main__":
    B = 2
    in_channels, out_channels = 4, 8
    input_size = (32, 32)
    embedding_size = input_size[1] // 8   # = 4; must equal W//8 for the final concat

    key = jax.random.PRNGKey(0)
    kp, kf = jax.random.split(key)
    params, cfg = init_params(kp, in_channels, out_channels, input_size, embedding_size)

    fields = jax.random.normal(kf, (B, in_channels) + input_size, jnp.float32)
    lat = jnp.array([12.5, -45.25], jnp.float32)
    lon = jnp.array([100.0, 359.75], jnp.float32)
    ldt = jnp.array([6.0, 24.0], jnp.float32)

    fwd = jax.jit(functools.partial(cnn_tc_forward, params, cfg))
    out = jax.block_until_ready(fwd(fields, lat, lon, ldt))
    assert out.shape == (B, 5), out.shape
    assert bool(jnp.all(jnp.isfinite(out)))
    print("KERNEL_OK")
</pallas_src>

<mosaic_0001>
module attributes {stable_mosaic.version = 11 : i64} {
  func.func @kernel(%arg0: memref<8x1280xf32, #tpu.memory_space<vmem>>, %arg1: memref<2x72xf32, #tpu.memory_space<vmem>>, %arg2: memref<2x1xf32, #tpu.memory_space<vmem>>, %arg3: memref<1x256xi32, #tpu.memory_space<vmem>>, %arg4: memref<16x72xf32, #tpu.memory_space<vmem>>, %arg5: memref<16x1xf32, #tpu.memory_space<vmem>>, %arg6: memref<1x512xi32, #tpu.memory_space<vmem>>, %arg7: memref<2x144xf32, #tpu.memory_space<vmem>>, %arg8: memref<2x1xf32, #tpu.memory_space<vmem>>, %arg9: memref<1x256xi32, #tpu.memory_space<vmem>>, %arg10: memref<16x144xf32, #tpu.memory_space<vmem>>, %arg11: memref<16x1xf32, #tpu.memory_space<vmem>>, %arg12: memref<1x256xi32, #tpu.memory_space<vmem>>, %arg13: memref<2x144xf32, #tpu.memory_space<vmem>>, %arg14: memref<2x1xf32, #tpu.memory_space<vmem>>, %arg15: memref<1x256xi32, #tpu.memory_space<vmem>>, %arg16: memref<16x144xf32, #tpu.memory_space<vmem>>, %arg17: memref<16x1xf32, #tpu.memory_space<vmem>>, %arg18: memref<1x256xi32, #tpu.memory_space<vmem>>, %arg19: memref<2x144xf32, #tpu.memory_space<vmem>>, %arg20: memref<2x1xf32, #tpu.memory_space<vmem>>, %arg21: memref<1x256xi32, #tpu.memory_space<vmem>>, %arg22: memref<2x72xf32, #tpu.memory_space<vmem>>, %arg23: memref<2x1xf32, #tpu.memory_space<vmem>>, %arg24: memref<1x16xi32, #tpu.memory_space<vmem>>, %arg25: memref<2x12xf32, #tpu.memory_space<vmem>>, %arg26: memref<16x5xf32, #tpu.memory_space<vmem>>, %arg27: memref<12x5xf32, #tpu.memory_space<vmem>>, %arg28: memref<1x5xf32, #tpu.memory_space<vmem>>, %arg29: memref<2x5xf32, #tpu.memory_space<vmem>>, %arg30: memref<16x512xf32, #tpu.memory_space<vmem>>, %arg31: memref<16x256xf32, #tpu.memory_space<vmem>>, %arg32: memref<16x256xf32, #tpu.memory_space<vmem>>, %arg33: memref<8x256xf32, #tpu.memory_space<vmem>>, %arg34: memref<144x1152xf32, #tpu.memory_space<vmem>>) attributes {dimension_semantics = [], scalar_prefetch = 0 : i64, scratch_operands = 5 : i64, tpu.core_type = #tpu.core_type<tc>} {
    %c0 = arith.constant 0 : index
    %c0_0 = arith.constant 0 : index
    %0 = vector.load %arg1[%c0, %c0_0] : memref<2x72xf32, #tpu.memory_space<vmem>>, vector<2x72xf32>
    %c0_1 = arith.constant 0 : index
    %c0_2 = arith.constant 0 : index
    %1 = vector.load %arg2[%c0_1, %c0_2] : memref<2x1xf32, #tpu.memory_space<vmem>>, vector<2x1xf32>
    %c0_3 = arith.constant 0 : index
    %c0_4 = arith.constant 0 : index
    %2 = vector.load %arg3[%c0_3, %c0_4] : memref<1x256xi32, #tpu.memory_space<vmem>>, vector<1x256xi32>
    %c0_5 = arith.constant 0 : index
    %c35 = arith.constant 35 : index
    %3 = vector.load %arg0[%c0_5, %c35] : memref<8x1280xf32, #tpu.memory_space<vmem>>, vector<8x256xf32>
    %c0_6 = arith.constant 0 : index
    %c0_7 = arith.constant 0 : index
    %4 = vector.load %arg34[%c0_6, %c0_7] : memref<144x1152xf32, #tpu.memory_space<vmem>>, vector<8x256xf32>
    tpu.vector_store %arg34[%c0_6, %c0_7], %3 {strides = array<i32>} : memref<144x1152xf32, #tpu.memory_space<vmem>>, vector<8x256xf32>,
    %c0_8 = arith.constant 0 : index
    %c49 = arith.constant 49 : index
    %5 = vector.load %arg0[%c0_8, %c49] : memref<8x1280xf32, #tpu.memory_space<vmem>>, vector<8x256xf32>
    %c8 = arith.constant 8 : index
    %c0_9 = arith.constant 0 : index
    %6 = vector.load %arg34[%c8, %c0_9] : memref<144x1152xf32, #tpu.memory_space<vmem>>, vector<8x256xf32>
    tpu.vector_store %arg34[%c8, %c0_9], %5 {strides = array<i32>} : memref<144x1152xf32, #tpu.memory_space<vmem>>, vector<8x256xf32>,
    %c0_10 = arith.constant 0 : index
    %c63 = arith.constant 63 : index
    %7 = vector.load %arg0[%c0_10, %c63] : memref<8x1280xf32, #tpu.memory_space<vmem>>, vector<8x256xf32>
    %c16 = arith.constant 16 : index
    %c0_11 = arith.constant 0 : index
    %8 = vector.load %arg34[%c16, %c0_11] : memref<144x1152xf32, #tpu.memory_space<vmem>>, vector<8x256xf32>
    tpu.vector_store %arg34[%c16, %c0_11], %7 {strides = array<i32>} : memref<144x1152xf32, #tpu.memory_space<vmem>>, vector<8x256xf32>,
    %c0_12 = arith.constant 0 : index
    %c511 = arith.constant 511 : index
    %9 = vector.load %arg0[%c0_12, %c511] : memref<8x1280xf32, #tpu.memory_space<vmem>>, vector<8x256xf32>
    %c24 = arith.constant 24 : index
    %c0_13 = arith.constant 0 : index
    %10 = vector.load %arg34[%c24, %c0_13] : memref<144x1152xf32, #tpu.memory_space<vmem>>, vector<8x256xf32>
    tpu.vector_store %arg34[%c24, %c0_13], %9 {strides = array<i32>} : memref<144x1152xf32, #tpu.memory_space<vmem>>, vector<8x256xf32>,
    %c0_14 = arith.constant 0 : index
    %c525 = arith.constant 525 : index
    %11 = vector.load %arg0[%c0_14, %c525] : memref<8x1280xf32, #tpu.memory_space<vmem>>, vector<8x256xf32>
    %c32 = arith.constant 32 : index
    %c0_15 = arith.constant 0 : index
    %12 = vector.load %arg34[%c32, %c0_15] : memref<144x1152xf32, #tpu.memory_space<vmem>>, vector<8x256xf32>
    tpu.vector_store %arg34[%c32, %c0_15], %11 {strides = array<i32>} : memref<144x1152xf32, #tpu.memory_space<vmem>>, vector<8x256xf32>,
    %c0_16 = arith.constant 0 : index
    %c539 = arith.constant 539 : index
    %13 = vector.load %arg0[%c0_16, %c539] : memref<8x1280xf32, #tpu.memory_space<vmem>>, vector<8x256xf32>
    %c40 = arith.constant 40 : index
    %c0_17 = arith.constant 0 : index
    %14 = vector.load %arg34[%c40, %c0_17] : memref<144x1152xf32, #tpu.memory_space<vmem>>, vector<8x256xf32>
    tpu.vector_store %arg34[%c40, %c0_17], %13 {strides = array<i32>} : memref<144x1152xf32, #tpu.memory_space<vmem>>, vector<8x256xf32>,
    %c0_18 = arith.constant 0 : index
    %c987 = arith.constant 987 : index
    %15 = vector.load %arg0[%c0_18, %c987] : memref<8x1280xf32, #tpu.memory_space<vmem>>, vector<8x256xf32>
    %c48 = arith.constant 48 : index
    %c0_19 = arith.constant 0 : index
    %16 = vector.load %arg34[%c48, %c0_19] : memref<144x1152xf32, #tpu.memory_space<vmem>>, vector<8x256xf32>
    tpu.vector_store %arg34[%c48, %c0_19], %15 {strides = array<i32>} : memref<144x1152xf32, #tpu.memory_space<vmem>>, vector<8x256xf32>,
    %c0_20 = arith.constant 0 : index
    %c1001 = arith.constant 1001 : index
    %17 = vector.load %arg0[%c0_20, %c1001] : memref<8x1280xf32, #tpu.memory_space<vmem>>, vector<8x256xf32>
    %c56 = arith.constant 56 : index
    %c0_21 = arith.constant 0 : index
    %18 = vector.load %arg34[%c56, %c0_21] : memref<144x1152xf32, #tpu.memory_space<vmem>>, vector<8x256xf32>
    tpu.vector_store %arg34[%c56, %c0_21], %17 {strides = array<i32>} : memref<144x1152xf32, #tpu.memory_space<vmem>>, vector<8x256xf32>,
    %c0_22 = arith.constant 0 : index
    %c1015 = arith.constant 1015 : index
    %19 = vector.load %arg0[%c0_22, %c1015] : memref<8x1280xf32, #tpu.memory_space<vmem>>, vector<8x256xf32>
    %c64 = arith.constant 64 : index
    %c0_23 = arith.constant 0 : index
    %20 = vector.load %arg34[%c64, %c0_23] : memref<144x1152xf32, #tpu.memory_space<vmem>>, vector<8x256xf32>
    tpu.vector_store %arg34[%c64, %c0_23], %19 {strides = array<i32>} : memref<144x1152xf32, #tpu.memory_space<vmem>>, vector<8x256xf32>,
    %c0_24 = arith.constant 0 : index
    %c0_25 = arith.constant 0 : index
    %21 = vector.load %arg34[%c0_24, %c0_25] : memref<144x1152xf32, #tpu.memory_space<vmem>>, vector<72x256xf32>
    %cst = arith.constant dense<0.000000e+00> : vector<2x256xf32>
    %22 = tpu.matmul %0, %21, %cst {dimension_numbers = #tpu.dot_dimension_numbers<[1], [0], [0], [1], [0, 0, 1, 1], [], []>} : vector<2x72xf32>, vector<72x256xf32>, vector<2x256xf32> -> vector<2x256xf32>
    %23 = vector.extract_strided_slice %22 {offsets = [0, 0], sizes = [2, 136], strides = [1, 1]} : vector<2x256xf32> to vector<2x136xf32>
    %24 = vector.broadcast %1 : vector<2x1xf32> to vector<2x136xf32>
    %25 = arith.addf %23, %24 : vector<2x136xf32>
    %26 = tpu.iota {dimensions = array<i32: 0>} : vector<136x256xi32>
    %27 = vector.broadcast %2 : vector<1x256xi32> to vector<136x256xi32>
    %28 = arith.cmpi eq, %26, %27 : vector<136x256xi32>
    %29 = arith.extui %28 : vector<136x256xi1> to vector<136x256xi32>
    %30 = arith.sitofp %29 : vector<136x256xi32> to vector<136x256xf32>
    %cst_26 = arith.constant dense<0.000000e+00> : vector<2x256xf32>
    %31 = tpu.matmul %25, %30, %cst_26 {dimension_numbers = #tpu.dot_dimension_numbers<[1], [0], [0], [1], [0, 0, 1, 1], [], []>} : vector<2x136xf32>, vector<136x256xf32>, vector<2x256xf32> -> vector<2x256xf32>
    %32 = vector.extract_strided_slice %31 {offsets = [0, 0], sizes = [1, 256], strides = [1, 1]} : vector<2x256xf32> to vector<1x256xf32>
    %c1 = arith.constant 1 : index
    %c0_27 = arith.constant 0 : index
    %33 = vector.load %arg33[%c1, %c0_27] : memref<8x256xf32, #tpu.memory_space<vmem>>, vector<1x256xf32>
    tpu.vector_store %arg33[%c1, %c0_27], %32 {strides = array<i32>} : memref<8x256xf32, #tpu.memory_space<vmem>>, vector<1x256xf32>,
    %34 = vector.extract_strided_slice %31 {offsets = [1, 0], sizes = [1, 256], strides = [1, 1]} : vector<2x256xf32> to vector<1x256xf32>
    %c5 = arith.constant 5 : index
    %c0_28 = arith.constant 0 : index
    %35 = vector.load %arg33[%c5, %c0_28] : memref<8x256xf32, #tpu.memory_space<vmem>>, vector<1x256xf32>
    tpu.vector_store %arg33[%c5, %c0_28], %34 {strides = array<i32>} : memref<8x256xf32, #tpu.memory_space<vmem>>, vector<1x256xf32>,
    %c0_29 = arith.constant 0 : index
    %c0_30 = arith.constant 0 : index
    %36 = vector.load %arg4[%c0_29, %c0_30] : memref<16x72xf32, #tpu.memory_space<vmem>>, vector<16x72xf32>
    %c0_31 = arith.constant 0 : index
    %c0_32 = arith.constant 0 : index
    %37 = vector.load %arg5[%c0_31, %c0_32] : memref<16x1xf32, #tpu.memory_space<vmem>>, vector<16x1xf32>
    %c0_33 = arith.constant 0 : index
    %c0_34 = arith.constant 0 : index
    %38 = vector.load %arg6[%c0_33, %c0_34] : memref<1x512xi32, #tpu.memory_space<vmem>>, vector<1x512xi32>
    %c0_35 = arith.constant 0 : index
    %c0_36 = arith.constant 0 : index
    %39 = vector.load %arg0[%c0_35, %c0_36] : memref<8x1280xf32, #tpu.memory_space<vmem>>, vector<8x1152xf32>
    %c0_37 = arith.constant 0 : index
    %c0_38 = arith.constant 0 : index
    %40 = vector.load %arg34[%c0_37, %c0_38] : memref<144x1152xf32, #tpu.memory_space<vmem>>, vector<8x1152xf32>
    tpu.vector_store %arg34[%c0_37, %c0_38], %39 {strides = array<i32>} : memref<144x1152xf32, #tpu.memory_space<vmem>>, vector<8x1152xf32>,
    %c0_39 = arith.constant 0 : index
    %c1_40 = arith.constant 1 : index
    %41 = vector.load %arg0[%c0_39, %c1_40] : memref<8x1280xf32, #tpu.memory_space<vmem>>, vector<8x1152xf32>
    %c8_41 = arith.constant 8 : index
    %c0_42 = arith.constant 0 : index
    %42 = vector.load %arg34[%c8_41, %c0_42] : memref<144x1152xf32, #tpu.memory_space<vmem>>, vector<8x1152xf32>
    tpu.vector_store %arg34[%c8_41, %c0_42], %41 {strides = array<i32>} : memref<144x1152xf32, #tpu.memory_space<vmem>>, vector<8x1152xf32>,
    %c0_43 = arith.constant 0 : index
    %c2 = arith.constant 2 : index
    %43 = vector.load %arg0[%c0_43, %c2] : memref<8x1280xf32, #tpu.memory_space<vmem>>, vector<8x1152xf32>
    %c16_44 = arith.constant 16 : index
    %c0_45 = arith.constant 0 : index
    %44 = vector.load %arg34[%c16_44, %c0_45] : memref<144x1152xf32, #tpu.memory_space<vmem>>, vector<8x1152xf32>
    tpu.vector_store %arg34[%c16_44, %c0_45], %43 {strides = array<i32>} : memref<144x1152xf32, #tpu.memory_space<vmem>>, vector<8x1152xf32>,
    %c0_46 = arith.constant 0 : index
    %c34 = arith.constant 34 : index
    %45 = vector.load %arg0[%c0_46, %c34] : memref<8x1280xf32, #tpu.memory_space<vmem>>, vector<8x1152xf32>
    %c24_47 = arith.constant 24 : index
    %c0_48 = arith.constant 0 : index
    %46 = vector.load %arg34[%c24_47, %c0_48] : memref<144x1152xf32, #tpu.memory_space<vmem>>, vector<8x1152xf32>
    tpu.vector_store %arg34[%c24_47, %c0_48], %45 {strides = array<i32>} : memref<144x1152xf32, #tpu.memory_space<vmem>>, vector<8x1152xf32>,
    %c0_49 = arith.constant 0 : index
    %c35_50 = arith.constant 35 : index
    %47 = vector.load %arg0[%c0_49, %c35_50] : memref<8x1280xf32, #tpu.memory_space<vmem>>, vector<8x1152xf32>
    %c32_51 = arith.constant 32 : index
    %c0_52 = arith.constant 0 : index
    %48 = vector.load %arg34[%c32_51, %c0_52] : memref<144x1152xf32, #tpu.memory_space<vmem>>, vector<8x1152xf32>
    tpu.vector_store %arg34[%c32_51, %c0_52], %47 {strides = array<i32>} : memref<144x1152xf32, #tpu.memory_space<vmem>>, vector<8x1152xf32>,
    %c0_53 = arith.constant 0 : index
    %c36 = arith.constant 36 : index
    %49 = vector.load %arg0[%c0_53, %c36] : memref<8x1280xf32, #tpu.memory_space<vmem>>, vector<8x1152xf32>
    %c40_54 = arith.constant 40 : index
    %c0_55 = arith.constant 0 : index
    %50 = vector.load %arg34[%c40_54, %c0_55] : memref<144x1152xf32, #tpu.memory_space<vmem>>, vector<8x1152xf32>
    tpu.vector_store %arg34[%c40_54, %c0_55], %49 {strides = array<i32>} : memref<144x1152xf32, #tpu.memory_space<vmem>>, vector<8x1152xf32>,
    %c0_56 = arith.constant 0 : index
    %c68 = arith.constant 68 : index
    %51 = vector.load %arg0[%c0_56, %c68] : memref<8x1280xf32, #tpu.memory_space<vmem>>, vector<8x1152xf32>
    %c48_57 = arith.constant 48 : index
    %c0_58 = arith.constant 0 : index
    %52 = vector.load %arg34[%c48_57, %c0_58] : memref<144x1152xf32, #tpu.memory_space<vmem>>, vector<8x1152xf32>
    tpu.vector_store %arg34[%c48_57, %c0_58], %51 {strides = array<i32>} : memref<144x1152xf32, #tpu.memory_space<vmem>>, vector<8x1152xf32>,
    %c0_59 = arith.constant 0 : index
    %c69 = arith.constant 69 : index
    %53 = vector.load %arg0[%c0_59, %c69] : memref<8x1280xf32, #tpu.memory_space<vmem>>, vector<8x1152xf32>
    %c56_60 = arith.constant 56 : index
    %c0_61 = arith.constant 0 : index
    %54 = vector.load %arg34[%c56_60, %c0_61] : memref<144x1152xf32, #tpu.memory_space<vmem>>, vector<8x1152xf32>
    tpu.vector_store %arg34[%c56_60, %c0_61], %53 {strides = array<i32>} : memref<144x1152xf32, #tpu.memory_space<vmem>>, vector<8x1152xf32>,
    %c0_62 = arith.constant 0 : index
    %c70 = arith.constant 70 : index
    %55 = vector.load %arg0[%c0_62, %c70] : memref<8x1280xf32, #tpu.memory_space<vmem>>, vector<8x1152xf32>
    %c64_63 = arith.constant 64 : index
    %c0_64 = arith.constant 0 : index
    %56 = vector.load %arg34[%c64_63, %c0_64] : memref<144x1152xf32, #tpu.memory_space<vmem>>, vector<8x1152xf32>
    tpu.vector_store %arg34[%c64_63, %c0_64], %55 {strides = array<i32>} : memref<144x1152xf32, #tpu.memory_space<vmem>>, vector<8x1152xf32>,
    %c0_65 = arith.constant 0 : index
    %c0_66 = arith.constant 0 : index
    %57 = vector.load %arg34[%c0_65, %c0_66] : memref<144x1152xf32, #tpu.memory_space<vmem>>, vector<72x1152xf32>
    %cst_67 = arith.constant dense<0.000000e+00> : vector<16x1152xf32>
    %58 = tpu.matmul %36, %57, %cst_67 {dimension_numbers = #tpu.dot_dimension_numbers<[1], [0], [0], [1], [0, 0, 1, 1], [], []>} : vector<16x72xf32>, vector<72x1152xf32>, vector<16x1152xf32> -> vector<16x1152xf32>
    %59 = vector.extract_strided_slice %58 {offsets = [0, 0], sizes = [16, 1088], strides = [1, 1]} : vector<16x1152xf32> to vector<16x1088xf32>
    %60 = vector.extract_strided_slice %58 {offsets = [0, 1], sizes = [16, 1088], strides = [1, 1]} : vector<16x1152xf32> to vector<16x1088xf32>
    %61 = arith.maximumf %59, %60 : vector<16x1088xf32>
    %62 = vector.extract_strided_slice %58 {offsets = [0, 34], sizes = [16, 1088], strides = [1, 1]} : vector<16x1152xf32> to vector<16x1088xf32>
    %63 = vector.extract_strided_slice %58 {offsets = [0, 35], sizes = [16, 1088], strides = [1, 1]} : vector<16x1152xf32> to vector<16x1088xf32>
    %64 = arith.maximumf %62, %63 : vector<16x1088xf32>
    %65 = arith.maximumf %61, %64 : vector<16x1088xf32>
    %66 = vector.broadcast %37 : vector<16x1xf32> to vector<16x1088xf32>
    %67 = arith.addf %65, %66 : vector<16x1088xf32>
    %68 = tpu.iota {dimensions = array<i32: 0>} : vector<1088x512xi32>
    %69 = vector.broadcast %38 : vector<1x512xi32> to vector<1088x512xi32>
    %70 = arith.cmpi eq, %68, %69 : vector<1088x512xi32>
    %71 = arith.extui %70 : vector<1088x512xi1> to vector<1088x512xi32>
    %72 = arith.sitofp %71 : vector<1088x512xi32> to vector<1088x512xf32>
    %cst_68 = arith.constant dense<0.000000e+00> : vector<16x512xf32>
    %73 = tpu.matmul %67, %72, %cst_68 {dimension_numbers = #tpu.dot_dimension_numbers<[1], [0], [0], [1], [0, 0, 1, 1], [], []>} : vector<16x1088xf32>, vector<1088x512xf32>, vector<16x512xf32> -> vector<16x512xf32>
    %c0_69 = arith.constant 0 : index
    %c0_70 = arith.constant 0 : index
    %74 = vector.load %arg30[%c0_69, %c0_70] : memref<16x512xf32, #tpu.memory_space<vmem>>, vector<16x512xf32>
    tpu.vector_store %arg30[%c0_69, %c0_70], %73 {strides = array<i32>} : memref<16x512xf32, #tpu.memory_space<vmem>>, vector<16x512xf32>,
    %c0_71 = arith.constant 0 : index
    %c0_72 = arith.constant 0 : index
    %75 = vector.load %arg7[%c0_71, %c0_72] : memref<2x144xf32, #tpu.memory_space<vmem>>, vector<2x144xf32>
    %c0_73 = arith.constant 0 : index
    %c0_74 = arith.constant 0 : index
    %76 = vector.load %arg8[%c0_73, %c0_74] : memref<2x1xf32, #tpu.memory_space<vmem>>, vector<2x1xf32>
    %c0_75 = arith.constant 0 : index
    %c0_76 = arith.constant 0 : index
    %77 = vector.load %arg9[%c0_75, %c0_76] : memref<1x256xi32, #tpu.memory_space<vmem>>, vector<1x256xi32>
    %c0_77 = arith.constant 0 : index
    %c19 = arith.constant 19 : index
    %78 = vector.load %arg30[%c0_77, %c19] : memref<16x512xf32, #tpu.memory_space<vmem>>, vector<16x128xf32>
    %c0_78 = arith.constant 0 : index
    %c0_79 = arith.constant 0 : index
    %79 = vector.load %arg34[%c0_78, %c0_79] : memref<144x1152xf32, #tpu.memory_space<vmem>>, vector<16x128xf32>
    tpu.vector_store %arg34[%c0_78, %c0_79], %78 {strides = array<i32>} : memref<144x1152xf32, #tpu.memory_space<vmem>>, vector<16x128xf32>,
    %c0_80 = arith.constant 0 : index
    %c25 = arith.constant 25 : index
    %80 = vector.load %arg30[%c0_80, %c25] : memref<16x512xf32, #tpu.memory_space<vmem>>, vector<16x128xf32>
    %c16_81 = arith.constant 16 : index
    %c0_82 = arith.constant 0 : index
    %81 = vector.load %arg34[%c16_81, %c0_82] : memref<144x1152xf32, #tpu.memory_space<vmem>>, vector<16x128xf32>
    tpu.vector_store %arg34[%c16_81, %c0_82], %80 {strides = array<i32>} : memref<144x1152xf32, #tpu.memory_space<vmem>>, vector<16x128xf32>,
    %c0_83 = arith.constant 0 : index
    %c31 = arith.constant 31 : index
    %82 = vector.load %arg30[%c0_83, %c31] : memref<16x512xf32, #tpu.memory_space<vmem>>, vector<16x128xf32>
    %c32_84 = arith.constant 32 : index
    %c0_85 = arith.constant 0 : index
    %83 = vector.load %arg34[%c32_84, %c0_85] : memref<144x1152xf32, #tpu.memory_space<vmem>>, vector<16x128xf32>
    tpu.vector_store %arg34[%c32_84, %c0_85], %82 {strides = array<i32>} : memref<144x1152xf32, #tpu.memory_space<vmem>>, vector<16x128xf32>,
    %c0_86 = arith.constant 0 : index
    %c127 = arith.constant 127 : index
    %84 = vector.load %arg30[%c0_86, %c127] : memref<16x512xf32, #tpu.memory_space<vmem>>, vector<16x128xf32>
    %c48_87 = arith.constant 48 : index
    %c0_88 = arith.constant 0 : index
    %85 = vector.load %arg34[%c48_87, %c0_88] : memref<144x1152xf32, #tpu.memory_space<vmem>>, vector<16x128xf32>
    tpu.vector_store %arg34[%c48_87, %c0_88], %84 {strides = array<i32>} : memref<144x1152xf32, #tpu.memory_space<vmem>>, vector<16x128xf32>,
    %c0_89 = arith.constant 0 : index
    %c133 = arith.constant 133 : index
    %86 = vector.load %arg30[%c0_89, %c133] : memref<16x512xf32, #tpu.memory_space<vmem>>, vector<16x128xf32>
    %c64_90 = arith.constant 64 : index
    %c0_91 = arith.constant 0 : index
    %87 = vector.load %arg34[%c64_90, %c0_91] : memref<144x1152xf32, #tpu.memory_space<vmem>>, vector<16x128xf32>
    tpu.vector_store %arg34[%c64_90, %c0_91], %86 {strides = array<i32>} : memref<144x1152xf32, #tpu.memory_space<vmem>>, vector<16x128xf32>,
    %c0_92 = arith.constant 0 : index
    %c139 = arith.constant 139 : index
    %88 = vector.load %arg30[%c0_92, %c139] : memref<16x512xf32, #tpu.memory_space<vmem>>, vector<16x128xf32>
    %c80 = arith.constant 80 : index
    %c0_93 = arith.constant 0 : index
    %89 = vector.load %arg34[%c80, %c0_93] : memref<144x1152xf32, #tpu.memory_space<vmem>>, vector<16x128xf32>
    tpu.vector_store %arg34[%c80, %c0_93], %88 {strides = array<i32>} : memref<144x1152xf32, #tpu.memory_space<vmem>>, vector<16x128xf32>,
    %c0_94 = arith.constant 0 : index
    %c235 = arith.constant 235 : index
    %90 = vector.load %arg30[%c0_94, %c235] : memref<16x512xf32, #tpu.memory_space<vmem>>, vector<16x128xf32>
    %c96 = arith.constant 96 : index
    %c0_95 = arith.constant 0 : index
    %91 = vector.load %arg34[%c96, %c0_95] : memref<144x1152xf32, #tpu.memory_space<vmem>>, vector<16x128xf32>
    tpu.vector_store %arg34[%c96, %c0_95], %90 {strides = array<i32>} : memref<144x1152xf32, #tpu.memory_space<vmem>>, vector<16x128xf32>,
    %c0_96 = arith.constant 0 : index
    %c241 = arith.constant 241 : index
    %92 = vector.load %arg30[%c0_96, %c241] : memref<16x512xf32, #tpu.memory_space<vmem>>, vector<16x128xf32>
    %c112 = arith.constant 112 : index
    %c0_97 = arith.constant 0 : index
    %93 = vector.load %arg34[%c112, %c0_97] : memref<144x1152xf32, #tpu.memory_space<vmem>>, vector<16x128xf32>
    tpu.vector_store %arg34[%c112, %c0_97], %92 {strides = array<i32>} : memref<144x1152xf32, #tpu.memory_space<vmem>>, vector<16x128xf32>,
    %c0_98 = arith.constant 0 : index
    %c247 = arith.constant 247 : index
    %94 = vector.load %arg30[%c0_98, %c247] : memref<16x512xf32, #tpu.memory_space<vmem>>, vector<16x128xf32>
    %c128 = arith.constant 128 : index
    %c0_99 = arith.constant 0 : index
    %95 = vector.load %arg34[%c128, %c0_99] : memref<144x1152xf32, #tpu.memory_space<vmem>>, vector<16x128xf32>
    tpu.vector_store %arg34[%c128, %c0_99], %94 {strides = array<i32>} : memref<144x1152xf32, #tpu.memory_space<vmem>>, vector<16x128xf32>,
    %c0_100 = arith.constant 0 : index
    %c0_101 = arith.constant 0 : index
    %96 = vector.load %arg34[%c0_100, %c0_101] : memref<144x1152xf32, #tpu.memory_space<vmem>>, vector<144x128xf32>
    %cst_102 = arith.constant dense<0.000000e+00> : vector<2x128xf32>
    %97 = tpu.matmul %75, %96, %cst_102 {dimension_numbers = #tpu.dot_dimension_numbers<[1], [0], [0], [1], [0, 0, 1, 1], [], []>} : vector<2x144xf32>, vector<144x128xf32>, vector<2x128xf32> -> vector<2x128xf32>
    %98 = vector.extract_strided_slice %97 {offsets = [0, 0], sizes = [2, 72], strides = [1, 1]} : vector<2x128xf32> to vector<2x72xf32>
    %99 = vector.broadcast %76 : vector<2x1xf32> to vector<2x72xf32>
    %100 = arith.addf %98, %99 : vector<2x72xf32>
    %101 = tpu.iota {dimensions = array<i32: 0>} : vector<72x256xi32>
    %102 = vector.broadcast %77 : vector<1x256xi32> to vector<72x256xi32>
    %103 = arith.cmpi eq, %101, %102 : vector<72x256xi32>
    %104 = arith.extui %103 : vector<72x256xi1> to vector<72x256xi32>
    %105 = arith.sitofp %104 : vector<72x256xi32> to vector<72x256xf32>
    %cst_103 = arith.constant dense<0.000000e+00> : vector<2x256xf32>
    %106 = tpu.matmul %100, %105, %cst_103 {dimension_numbers = #tpu.dot_dimension_numbers<[1], [0], [0], [1], [0, 0, 1, 1], [], []>} : vector<2x72xf32>, vector<72x256xf32>, vector<2x256xf32> -> vector<2x256xf32>
    %107 = vector.extract_strided_slice %106 {offsets = [0, 0], sizes = [1, 256], strides = [1, 1]} : vector<2x256xf32> to vector<1x256xf32>
    %c2_104 = arith.constant 2 : index
    %c0_105 = arith.constant 0 : index
    %108 = vector.load %arg33[%c2_104, %c0_105] : memref<8x256xf32, #tpu.memory_space<vmem>>, vector<1x256xf32>
    tpu.vector_store %arg33[%c2_104, %c0_105], %107 {strides = array<i32>} : memref<8x256xf32, #tpu.memory_space<vmem>>, vector<1x256xf32>,
    %109 = vector.extract_strided_slice %106 {offsets = [1, 0], sizes = [1, 256], strides = [1, 1]} : vector<2x256xf32> to vector<1x256xf32>
    %c6 = arith.constant 6 : index
    %c0_106 = arith.constant 0 : index
    %110 = vector.load %arg33[%c6, %c0_106] : memref<8x256xf32, #tpu.memory_space<vmem>>, vector<1x256xf32>
    tpu.vector_store %arg33[%c6, %c0_106], %109 {strides = array<i32>} : memref<8x256xf32, #tpu.memory_space<vmem>>, vector<1x256xf32>,
    %c0_107 = arith.constant 0 : index
    %c0_108 = arith.constant 0 : index
    %111 = vector.load %arg10[%c0_107, %c0_108] : memref<16x144xf32, #tpu.memory_space<vmem>>, vector<16x144xf32>
    %c0_109 = arith.constant 0 : index
    %c0_110 = arith.constant 0 : index
    %112 = vector.load %arg11[%c0_109, %c0_110] : memref<16x1xf32, #tpu.memory_space<vmem>>, vector<16x1xf32>
    %c0_111 = arith.constant 0 : index
    %c0_112 = arith.constant 0 : index
    %113 = vector.load %arg12[%c0_111, %c0_112] : memref<1x256xi32, #tpu.memory_space<vmem>>, vector<1x256xi32>
    %c0_113 = arith.constant 0 : index
    %c0_114 = arith.constant 0 : index
    %114 = vector.load %arg30[%c0_113, %c0_114] : memref<16x512xf32, #tpu.memory_space<vmem>>, vector<16x384xf32>
    %c0_115 = arith.constant 0 : index
    %c0_116 = arith.constant 0 : index
    %115 = vector.load %arg34[%c0_115, %c0_116] : memref<144x1152xf32, #tpu.memory_space<vmem>>, vector<16x384xf32>
    tpu.vector_store %arg34[%c0_115, %c0_116], %114 {strides = array<i32>} : memref<144x1152xf32, #tpu.memory_space<vmem>>, vector<16x384xf32>,
    %c0_117 = arith.constant 0 : index
    %c1_118 = arith.constant 1 : index
    %116 = vector.load %arg30[%c0_117, %c1_118] : memref<16x512xf32, #tpu.memory_space<vmem>>, vector<16x384xf32>
    %c16_119 = arith.constant 16 : index
    %c0_120 = arith.constant 0 : index
    %117 = vector.load %arg34[%c16_119, %c0_120] : memref<144x1152xf32, #tpu.memory_space<vmem>>, vector<16x384xf32>
    tpu.vector_store %arg34[%c16_119, %c0_120], %116 {strides = array<i32>} : memref<144x1152xf32, #tpu.memory_space<vmem>>, vector<16x384xf32>,
    %c0_121 = arith.constant 0 : index
    %c2_122 = arith.constant 2 : index
    %118 = vector.load %arg30[%c0_121, %c2_122] : memref<16x512xf32, #tpu.memory_space<vmem>>, vector<16x384xf32>
    %c32_123 = arith.constant 32 : index
    %c0_124 = arith.constant 0 : index
    %119 = vector.load %arg34[%c32_123, %c0_124] : memref<144x1152xf32, #tpu.memory_space<vmem>>, vector<16x384xf32>
    tpu.vector_store %arg34[%c32_123, %c0_124], %118 {strides = array<i32>} : memref<144x1152xf32, #tpu.memory_space<vmem>>, vector<16x384xf32>,
    %c0_125 = arith.constant 0 : index
    %c18 = arith.constant 18 : index
    %120 = vector.load %arg30[%c0_125, %c18] : memref<16x512xf32, #tpu.memory_space<vmem>>, vector<16x384xf32>
    %c48_126 = arith.constant 48 : index
    %c0_127 = arith.constant 0 : index
    %121 = vector.load %arg34[%c48_126, %c0_127] : memref<144x1152xf32, #tpu.memory_space<vmem>>, vector<16x384xf32>
    tpu.vector_store %arg34[%c48_126, %c0_127], %120 {strides = array<i32>} : memref<144x1152xf32, #tpu.memory_space<vmem>>, vector<16x384xf32>,
    %c0_128 = arith.constant 0 : index
    %c19_129 = arith.constant 19 : index
    %122 = vector.load %arg30[%c0_128, %c19_129] : memref<16x512xf32, #tpu.memory_space<vmem>>, vector<16x384xf32>
    %c64_130 = arith.constant 64 : index
    %c0_131 = arith.constant 0 : index
    %123 = vector.load %arg34[%c64_130, %c0_131] : memref<144x1152xf32, #tpu.memory_space<vmem>>, vector<16x384xf32>
    tpu.vector_store %arg34[%c64_130, %c0_131], %122 {strides = array<i32>} : memref<144x1152xf32, #tpu.memory_space<vmem>>, vector<16x384xf32>,
    %c0_132 = arith.constant 0 : index
    %c20 = arith.constant 20 : index
    %124 = vector.load %arg30[%c0_132, %c20] : memref<16x512xf32, #tpu.memory_space<vmem>>, vector<16x384xf32>
    %c80_133 = arith.constant 80 : index
    %c0_134 = arith.constant 0 : index
    %125 = vector.load %arg34[%c80_133, %c0_134] : memref<144x1152xf32, #tpu.memory_space<vmem>>, vector<16x384xf32>
    tpu.vector_store %arg34[%c80_133, %c0_134], %124 {strides = array<i32>} : memref<144x1152xf32, #tpu.memory_space<vmem>>, vector<16x384xf32>,
    %c0_135 = arith.constant 0 : index
    %c36_136 = arith.constant 36 : index
    %126 = vector.load %arg30[%c0_135, %c36_136] : memref<16x512xf32, #tpu.memory_space<vmem>>, vector<16x384xf32>
    %c96_137 = arith.constant 96 : index
    %c0_138 = arith.constant 0 : index
    %127 = vector.load %arg34[%c96_137, %c0_138] : memref<144x1152xf32, #tpu.memory_space<vmem>>, vector<16x384xf32>
    tpu.vector_store %arg34[%c96_137, %c0_138], %126 {strides = array<i32>} : memref<144x1152xf32, #tpu.memory_space<vmem>>, vector<16x384xf32>,
    %c0_139 = arith.constant 0 : index
    %c37 = arith.constant 37 : index
    %128 = vector.load %arg30[%c0_139, %c37] : memref<16x512xf32, #tpu.memory_space<vmem>>, vector<16x384xf32>
    %c112_140 = arith.constant 112 : index
    %c0_141 = arith.constant 0 : index
    %129 = vector.load %arg34[%c112_140, %c0_141] : memref<144x1152xf32, #tpu.memory_space<vmem>>, vector<16x384xf32>
    tpu.vector_store %arg34[%c112_140, %c0_141], %128 {strides = array<i32>} : memref<144x1152xf32, #tpu.memory_space<vmem>>, vector<16x384xf32>,
    %c0_142 = arith.constant 0 : index
    %c38 = arith.constant 38 : index
    %130 = vector.load %arg30[%c0_142, %c38] : memref<16x512xf32, #tpu.memory_space<vmem>>, vector<16x384xf32>
    %c128_143 = arith.constant 128 : index
    %c0_144 = arith.constant 0 : index
    %131 = vector.load %arg34[%c128_143, %c0_144] : memref<144x1152xf32, #tpu.memory_space<vmem>>, vector<16x384xf32>
    tpu.vector_store %arg34[%c128_143, %c0_144], %130 {strides = array<i32>} : memref<144x1152xf32, #tpu.memory_space<vmem>>, vector<16x384xf32>,
    %c0_145 = arith.constant 0 : index
    %c0_146 = arith.constant 0 : index
    %132 = vector.load %arg34[%c0_145, %c0_146] : memref<144x1152xf32, #tpu.memory_space<vmem>>, vector<144x384xf32>
    %cst_147 = arith.constant dense<0.000000e+00> : vector<16x384xf32>
    %133 = tpu.matmul %111, %132, %cst_147 {dimension_numbers = #tpu.dot_dimension_numbers<[1], [0], [0], [1], [0, 0, 1, 1], [], []>} : vector<16x144xf32>, vector<144x384xf32>, vector<16x384xf32> -> vector<16x384xf32>
    %134 = vector.extract_strided_slice %133 {offsets = [0, 0], sizes = [16, 288], strides = [1, 1]} : vector<16x384xf32> to vector<16x288xf32>
    %135 = vector.extract_strided_slice %133 {offsets = [0, 1], sizes = [16, 288], strides = [1, 1]} : vector<16x384xf32> to vector<16x288xf32>
    %136 = arith.maximumf %134, %135 : vector<16x288xf32>
    %137 = vector.extract_strided_slice %133 {offsets = [0, 18], sizes = [16, 288], strides = [1, 1]} : vector<16x384xf32> to vector<16x288xf32>
    %138 = vector.extract_strided_slice %133 {offsets = [0, 19], sizes = [16, 288], strides = [1, 1]} : vector<16x384xf32> to vector<16x288xf32>
    %139 = arith.maximumf %137, %138 : vector<16x288xf32>
    %140 = arith.maximumf %136, %139 : vector<16x288xf32>
    %141 = vector.broadcast %112 : vector<16x1xf32> to vector<16x288xf32>
    %142 = arith.addf %140, %141 : vector<16x288xf32>
    %143 = tpu.iota {dimensions = array<i32: 0>} : vector<288x256xi32>
    %144 = vector.broadcast %113 : vector<1x256xi32> to vector<288x256xi32>
    %145 = arith.cmpi eq, %143, %144 : vector<288x256xi32>
    %146 = arith.extui %145 : vector<288x256xi1> to vector<288x256xi32>
    %147 = arith.sitofp %146 : vector<288x256xi32> to vector<288x256xf32>
    %cst_148 = arith.constant dense<0.000000e+00> : vector<16x256xf32>
    %148 = tpu.matmul %142, %147, %cst_148 {dimension_numbers = #tpu.dot_dimension_numbers<[1], [0], [0], [1], [0, 0, 1, 1], [], []>} : vector<16x288xf32>, vector<288x256xf32>, vector<16x256xf32> -> vector<16x256xf32>
    %c0_149 = arith.constant 0 : index
    %c0_150 = arith.constant 0 : index
    %149 = vector.load %arg31[%c0_149, %c0_150] : memref<16x256xf32, #tpu.memory_space<vmem>>, vector<16x256xf32>
    tpu.vector_store %arg31[%c0_149, %c0_150], %148 {strides = array<i32>} : memref<16x256xf32, #tpu.memory_space<vmem>>, vector<16x256xf32>,
    %c0_151 = arith.constant 0 : index
    %c0_152 = arith.constant 0 : index
    %150 = vector.load %arg13[%c0_151, %c0_152] : memref<2x144xf32, #tpu.memory_space<vmem>>, vector<2x144xf32>
    %c0_153 = arith.constant 0 : index
    %c0_154 = arith.constant 0 : index
    %151 = vector.load %arg14[%c0_153, %c0_154] : memref<2x1xf32, #tpu.memory_space<vmem>>, vector<2x1xf32>
    %c0_155 = arith.constant 0 : index
    %c0_156 = arith.constant 0 : index
    %152 = vector.load %arg15[%c0_155, %c0_156] : memref<1x256xi32, #tpu.memory_space<vmem>>, vector<1x256xi32>
    %c0_157 = arith.constant 0 : index
    %c11 = arith.constant 11 : index
    %153 = vector.load %arg31[%c0_157, %c11] : memref<16x256xf32, #tpu.memory_space<vmem>>, vector<16x128xf32>
    %c0_158 = arith.constant 0 : index
    %c0_159 = arith.constant 0 : index
    %154 = vector.load %arg34[%c0_158, %c0_159] : memref<144x1152xf32, #tpu.memory_space<vmem>>, vector<16x128xf32>
    tpu.vector_store %arg34[%c0_158, %c0_159], %153 {strides = array<i32>} : memref<144x1152xf32, #tpu.memory_space<vmem>>, vector<16x128xf32>,
    %c0_160 = arith.constant 0 : index
    %c13 = arith.constant 13 : index
    %155 = vector.load %arg31[%c0_160, %c13] : memref<16x256xf32, #tpu.memory_space<vmem>>, vector<16x128xf32>
    %c16_161 = arith.constant 16 : index
    %c0_162 = arith.constant 0 : index
    %156 = vector.load %arg34[%c16_161, %c0_162] : memref<144x1152xf32, #tpu.memory_space<vmem>>, vector<16x128xf32>
    tpu.vector_store %arg34[%c16_161, %c0_162], %155 {strides = array<i32>} : memref<144x1152xf32, #tpu.memory_space<vmem>>, vector<16x128xf32>,
    %c0_163 = arith.constant 0 : index
    %c15 = arith.constant 15 : index
    %157 = vector.load %arg31[%c0_163, %c15] : memref<16x256xf32, #tpu.memory_space<vmem>>, vector<16x128xf32>
    %c32_164 = arith.constant 32 : index
    %c0_165 = arith.constant 0 : index
    %158 = vector.load %arg34[%c32_164, %c0_165] : memref<144x1152xf32, #tpu.memory_space<vmem>>, vector<16x128xf32>
    tpu.vector_store %arg34[%c32_164, %c0_165], %157 {strides = array<i32>} : memref<144x1152xf32, #tpu.memory_space<vmem>>, vector<16x128xf32>,
    %c0_166 = arith.constant 0 : index
    %c31_167 = arith.constant 31 : index
    %159 = vector.load %arg31[%c0_166, %c31_167] : memref<16x256xf32, #tpu.memory_space<vmem>>, vector<16x128xf32>
    %c48_168 = arith.constant 48 : index
    %c0_169 = arith.constant 0 : index
    %160 = vector.load %arg34[%c48_168, %c0_169] : memref<144x1152xf32, #tpu.memory_space<vmem>>, vector<16x128xf32>
    tpu.vector_store %arg34[%c48_168, %c0_169], %159 {strides = array<i32>} : memref<144x1152xf32, #tpu.memory_space<vmem>>, vector<16x128xf32>,
    %c0_170 = arith.constant 0 : index
    %c33 = arith.constant 33 : index
    %161 = vector.load %arg31[%c0_170, %c33] : memref<16x256xf32, #tpu.memory_space<vmem>>, vector<16x128xf32>
    %c64_171 = arith.constant 64 : index
    %c0_172 = arith.constant 0 : index
    %162 = vector.load %arg34[%c64_171, %c0_172] : memref<144x1152xf32, #tpu.memory_space<vmem>>, vector<16x128xf32>
    tpu.vector_store %arg34[%c64_171, %c0_172], %161 {strides = array<i32>} : memref<144x1152xf32, #tpu.memory_space<vmem>>, vector<16x128xf32>,
    %c0_173 = arith.constant 0 : index
    %c35_174 = arith.constant 35 : index
    %163 = vector.load %arg31[%c0_173, %c35_174] : memref<16x256xf32, #tpu.memory_space<vmem>>, vector<16x128xf32>
    %c80_175 = arith.constant 80 : index
    %c0_176 = arith.constant 0 : index
    %164 = vector.load %arg34[%c80_175, %c0_176] : memref<144x1152xf32, #tpu.memory_space<vmem>>, vector<16x128xf32>
    tpu.vector_store %arg34[%c80_175, %c0_176], %163 {strides = array<i32>} : memref<144x1152xf32, #tpu.memory_space<vmem>>, vector<16x128xf32>,
    %c0_177 = arith.constant 0 : index
    %c51 = arith.constant 51 : index
    %165 = vector.load %arg31[%c0_177, %c51] : memref<16x256xf32, #tpu.memory_space<vmem>>, vector<16x128xf32>
    %c96_178 = arith.constant 96 : index
    %c0_179 = arith.constant 0 : index
    %166 = vector.load %arg34[%c96_178, %c0_179] : memref<144x1152xf32, #tpu.memory_space<vmem>>, vector<16x128xf32>
    tpu.vector_store %arg34[%c96_178, %c0_179], %165 {strides = array<i32>} : memref<144x1152xf32, #tpu.memory_space<vmem>>, vector<16x128xf32>,
    %c0_180 = arith.constant 0 : index
    %c53 = arith.constant 53 : index
    %167 = vector.load %arg31[%c0_180, %c53] : memref<16x256xf32, #tpu.memory_space<vmem>>, vector<16x128xf32>
    %c112_181 = arith.constant 112 : index
    %c0_182 = arith.constant 0 : index
    %168 = vector.load %arg34[%c112_181, %c0_182] : memref<144x1152xf32, #tpu.memory_space<vmem>>, vector<16x128xf32>
    tpu.vector_store %arg34[%c112_181, %c0_182], %167 {strides = array<i32>} : memref<144x1152xf32, #tpu.memory_space<vmem>>, vector<16x128xf32>,
    %c0_183 = arith.constant 0 : index
    %c55 = arith.constant 55 : index
    %169 = vector.load %arg31[%c0_183, %c55] : memref<16x256xf32, #tpu.memory_space<vmem>>, vector<16x128xf32>
    %c128_184 = arith.constant 128 : index
    %c0_185 = arith.constant 0 : index
    %170 = vector.load %arg34[%c128_184, %c0_185] : memref<144x1152xf32, #tpu.memory_space<vmem>>, vector<16x128xf32>
    tpu.vector_store %arg34[%c128_184, %c0_185], %169 {strides = array<i32>} : memref<144x1152xf32, #tpu.memory_space<vmem>>, vector<16x128xf32>,
    %c0_186 = arith.constant 0 : index
    %c0_187 = arith.constant 0 : index
    %171 = vector.load %arg34[%c0_186, %c0_187] : memref<144x1152xf32, #tpu.memory_space<vmem>>, vector<144x128xf32>
    %cst_188 = arith.constant dense<0.000000e+00> : vector<2x128xf32>
    %172 = tpu.matmul %150, %171, %cst_188 {dimension_numbers = #tpu.dot_dimension_numbers<[1], [0], [0], [1], [0, 0, 1, 1], [], []>} : vector<2x144xf32>, vector<144x128xf32>, vector<2x128xf32> -> vector<2x128xf32>
    %173 = vector.extract_strided_slice %172 {offsets = [0, 0], sizes = [2, 40], strides = [1, 1]} : vector<2x128xf32> to vector<2x40xf32>
    %174 = vector.broadcast %151 : vector<2x1xf32> to vector<2x40xf32>
    %175 = arith.addf %173, %174 : vector<2x40xf32>
    %176 = tpu.iota {dimensions = array<i32: 0>} : vector<40x256xi32>
    %177 = vector.broadcast %152 : vector<1x256xi32> to vector<40x256xi32>
    %178 = arith.cmpi eq, %176, %177 : vector<40x256xi32>
    %179 = arith.extui %178 : vector<40x256xi1> to vector<40x256xi32>
    %180 = arith.sitofp %179 : vector<40x256xi32> to vector<40x256xf32>
    %cst_189 = arith.constant dense<0.000000e+00> : vector<2x256xf32>
    %181 = tpu.matmul %175, %180, %cst_189 {dimension_numbers = #tpu.dot_dimension_numbers<[1], [0], [0], [1], [0, 0, 1, 1], [], []>} : vector<2x40xf32>, vector<40x256xf32>, vector<2x256xf32> -> vector<2x256xf32>
    %182 = vector.extract_strided_slice %181 {offsets = [0, 0], sizes = [1, 256], strides = [1, 1]} : vector<2x256xf32> to vector<1x256xf32>
    %c3 = arith.constant 3 : index
    %c0_190 = arith.constant 0 : index
    %183 = vector.load %arg33[%c3, %c0_190] : memref<8x256xf32, #tpu.memory_space<vmem>>, vector<1x256xf32>
    tpu.vector_store %arg33[%c3, %c0_190], %182 {strides = array<i32>} : memref<8x256xf32, #tpu.memory_space<vmem>>, vector<1x256xf32>,
    %184 = vector.extract_strided_slice %181 {offsets = [1, 0], sizes = [1, 256], strides = [1, 1]} : vector<2x256xf32> to vector<1x256xf32>
    %c7 = arith.constant 7 : index
    %c0_191 = arith.constant 0 : index
    %185 = vector.load %arg33[%c7, %c0_191] : memref<8x256xf32, #tpu.memory_space<vmem>>, vector<1x256xf32>
    tpu.vector_store %arg33[%c7, %c0_191], %184 {strides = array<i32>} : memref<8x256xf32, #tpu.memory_space<vmem>>, vector<1x256xf32>,
    %c0_192 = arith.constant 0 : index
    %c0_193 = arith.constant 0 : index
    %186 = vector.load %arg16[%c0_192, %c0_193] : memref<16x144xf32, #tpu.memory_space<vmem>>, vector<16x144xf32>
    %c0_194 = arith.constant 0 : index
    %c0_195 = arith.constant 0 : index
    %187 = vector.load %arg17[%c0_194, %c0_195] : memref<16x1xf32, #tpu.memory_space<vmem>>, vector<16x1xf32>
    %c0_196 = arith.constant 0 : index
    %c0_197 = arith.constant 0 : index
    %188 = vector.load %arg18[%c0_196, %c0_197] : memref<1x256xi32, #tpu.memory_space<vmem>>, vector<1x256xi32>
    %c0_198 = arith.constant 0 : index
    %c0_199 = arith.constant 0 : index
    %189 = vector.load %arg31[%c0_198, %c0_199] : memref<16x256xf32, #tpu.memory_space<vmem>>, vector<16x128xf32>
    %c0_200 = arith.constant 0 : index
    %c0_201 = arith.constant 0 : index
    %190 = vector.load %arg34[%c0_200, %c0_201] : memref<144x1152xf32, #tpu.memory_space<vmem>>, vector<16x128xf32>
    tpu.vector_store %arg34[%c0_200, %c0_201], %189 {strides = array<i32>} : memref<144x1152xf32, #tpu.memory_space<vmem>>, vector<16x128xf32>,
    %c0_202 = arith.constant 0 : index
    %c1_203 = arith.constant 1 : index
    %191 = vector.load %arg31[%c0_202, %c1_203] : memref<16x256xf32, #tpu.memory_space<vmem>>, vector<16x128xf32>
    %c16_204 = arith.constant 16 : index
    %c0_205 = arith.constant 0 : index
    %192 = vector.load %arg34[%c16_204, %c0_205] : memref<144x1152xf32, #tpu.memory_space<vmem>>, vector<16x128xf32>
    tpu.vector_store %arg34[%c16_204, %c0_205], %191 {strides = array<i32>} : memref<144x1152xf32, #tpu.memory_space<vmem>>, vector<16x128xf32>,
    %c0_206 = arith.constant 0 : index
    %c2_207 = arith.constant 2 : index
    %193 = vector.load %arg31[%c0_206, %c2_207] : memref<16x256xf32, #tpu.memory_space<vmem>>, vector<16x128xf32>
    %c32_208 = arith.constant 32 : index
    %c0_209 = arith.constant 0 : index
    %194 = vector.load %arg34[%c32_208, %c0_209] : memref<144x1152xf32, #tpu.memory_space<vmem>>, vector<16x128xf32>
    tpu.vector_store %arg34[%c32_208, %c0_209], %193 {strides = array<i32>} : memref<144x1152xf32, #tpu.memory_space<vmem>>, vector<16x128xf32>,
    %c0_210 = arith.constant 0 : index
    %c10 = arith.constant 10 : index
    %195 = vector.load %arg31[%c0_210, %c10] : memref<16x256xf32, #tpu.memory_space<vmem>>, vector<16x128xf32>
    %c48_211 = arith.constant 48 : index
    %c0_212 = arith.constant 0 : index
    %196 = vector.load %arg34[%c48_211, %c0_212] : memref<144x1152xf32, #tpu.memory_space<vmem>>, vector<16x128xf32>
    tpu.vector_store %arg34[%c48_211, %c0_212], %195 {strides = array<i32>} : memref<144x1152xf32, #tpu.memory_space<vmem>>, vector<16x128xf32>,
    %c0_213 = arith.constant 0 : index
    %c11_214 = arith.constant 11 : index
    %197 = vector.load %arg31[%c0_213, %c11_214] : memref<16x256xf32, #tpu.memory_space<vmem>>, vector<16x128xf32>
    %c64_215 = arith.constant 64 : index
    %c0_216 = arith.constant 0 : index
    %198 = vector.load %arg34[%c64_215, %c0_216] : memref<144x1152xf32, #tpu.memory_space<vmem>>, vector<16x128xf32>
    tpu.vector_store %arg34[%c64_215, %c0_216], %197 {strides = array<i32>} : memref<144x1152xf32, #tpu.memory_space<vmem>>, vector<16x128xf32>,
    %c0_217 = arith.constant 0 : index
    %c12 = arith.constant 12 : index
    %199 = vector.load %arg31[%c0_217, %c12] : memref<16x256xf32, #tpu.memory_space<vmem>>, vector<16x128xf32>
    %c80_218 = arith.constant 80 : index
    %c0_219 = arith.constant 0 : index
    %200 = vector.load %arg34[%c80_218, %c0_219] : memref<144x1152xf32, #tpu.memory_space<vmem>>, vector<16x128xf32>
    tpu.vector_store %arg34[%c80_218, %c0_219], %199 {strides = array<i32>} : memref<144x1152xf32, #tpu.memory_space<vmem>>, vector<16x128xf32>,
    %c0_220 = arith.constant 0 : index
    %c20_221 = arith.constant 20 : index
    %201 = vector.load %arg31[%c0_220, %c20_221] : memref<16x256xf32, #tpu.memory_space<vmem>>, vector<16x128xf32>
    %c96_222 = arith.constant 96 : index
    %c0_223 = arith.constant 0 : index
    %202 = vector.load %arg34[%c96_222, %c0_223] : memref<144x1152xf32, #tpu.memory_space<vmem>>, vector<16x128xf32>
    tpu.vector_store %arg34[%c96_222, %c0_223], %201 {strides = array<i32>} : memref<144x1152xf32, #tpu.memory_space<vmem>>, vector<16x128xf32>,
    %c0_224 = arith.constant 0 : index
    %c21 = arith.constant 21 : index
    %203 = vector.load %arg31[%c0_224, %c21] : memref<16x256xf32, #tpu.memory_space<vmem>>, vector<16x128xf32>
    %c112_225 = arith.constant 112 : index
    %c0_226 = arith.constant 0 : index
    %204 = vector.load %arg34[%c112_225, %c0_226] : memref<144x1152xf32, #tpu.memory_space<vmem>>, vector<16x128xf32>
    tpu.vector_store %arg34[%c112_225, %c0_226], %203 {strides = array<i32>} : memref<144x1152xf32, #tpu.memory_space<vmem>>, vector<16x128xf32>,
    %c0_227 = arith.constant 0 : index
    %c22 = arith.constant 22 : index
    %205 = vector.load %arg31[%c0_227, %c22] : memref<16x256xf32, #tpu.memory_space<vmem>>, vector<16x128xf32>
    %c128_228 = arith.constant 128 : index
    %c0_229 = arith.constant 0 : index
    %206 = vector.load %arg34[%c128_228, %c0_229] : memref<144x1152xf32, #tpu.memory_space<vmem>>, vector<16x128xf32>
    tpu.vector_store %arg34[%c128_228, %c0_229], %205 {strides = array<i32>} : memref<144x1152xf32, #tpu.memory_space<vmem>>, vector<16x128xf32>,
    %c0_230 = arith.constant 0 : index
    %c0_231 = arith.constant 0 : index
    %207 = vector.load %arg34[%c0_230, %c0_231] : memref<144x1152xf32, #tpu.memory_space<vmem>>, vector<144x128xf32>
    %cst_232 = arith.constant dense<0.000000e+00> : vector<16x128xf32>
    %208 = tpu.matmul %186, %207, %cst_232 {dimension_numbers = #tpu.dot_dimension_numbers<[1], [0], [0], [1], [0, 0, 1, 1], [], []>} : vector<16x144xf32>, vector<144x128xf32>, vector<16x128xf32> -> vector<16x128xf32>
    %209 = vector.extract_strided_slice %208 {offsets = [0, 0], sizes = [16, 80], strides = [1, 1]} : vector<16x128xf32> to vector<16x80xf32>
    %210 = vector.extract_strided_slice %208 {offsets = [0, 1], sizes = [16, 80], strides = [1, 1]} : vector<16x128xf32> to vector<16x80xf32>
    %211 = arith.maximumf %209, %210 : vector<16x80xf32>
    %212 = vector.extract_strided_slice %208 {offsets = [0, 10], sizes = [16, 80], strides = [1, 1]} : vector<16x128xf32> to vector<16x80xf32>
    %213 = vector.extract_strided_slice %208 {offsets = [0, 11], sizes = [16, 80], strides = [1, 1]} : vector<16x128xf32> to vector<16x80xf32>
    %214 = arith.maximumf %212, %213 : vector<16x80xf32>
    %215 = arith.maximumf %211, %214 : vector<16x80xf32>
    %216 = vector.broadcast %187 : vector<16x1xf32> to vector<16x80xf32>
    %217 = arith.addf %215, %216 : vector<16x80xf32>
    %218 = tpu.iota {dimensions = array<i32: 0>} : vector<80x256xi32>
    %219 = vector.broadcast %188 : vector<1x256xi32> to vector<80x256xi32>
    %220 = arith.cmpi eq, %218, %219 : vector<80x256xi32>
    %221 = arith.extui %220 : vector<80x256xi1> to vector<80x256xi32>
    %222 = arith.sitofp %221 : vector<80x256xi32> to vector<80x256xf32>
    %cst_233 = arith.constant dense<0.000000e+00> : vector<16x256xf32>
    %223 = tpu.matmul %217, %222, %cst_233 {dimension_numbers = #tpu.dot_dimension_numbers<[1], [0], [0], [1], [0, 0, 1, 1], [], []>} : vector<16x80xf32>, vector<80x256xf32>, vector<16x256xf32> -> vector<16x256xf32>
    %c0_234 = arith.constant 0 : index
    %c0_235 = arith.constant 0 : index
    %224 = vector.load %arg32[%c0_234, %c0_235] : memref<16x256xf32, #tpu.memory_space<vmem>>, vector<16x256xf32>
    tpu.vector_store %arg32[%c0_234, %c0_235], %223 {strides = array<i32>} : memref<16x256xf32, #tpu.memory_space<vmem>>, vector<16x256xf32>,
    %c0_236 = arith.constant 0 : index
    %c0_237 = arith.constant 0 : index
    %225 = vector.load %arg19[%c0_236, %c0_237] : memref<2x144xf32, #tpu.memory_space<vmem>>, vector<2x144xf32>
    %c0_238 = arith.constant 0 : index
    %c0_239 = arith.constant 0 : index
    %226 = vector.load %arg20[%c0_238, %c0_239] : memref<2x1xf32, #tpu.memory_space<vmem>>, vector<2x1xf32>
    %c0_240 = arith.constant 0 : index
    %c0_241 = arith.constant 0 : index
    %227 = vector.load %arg21[%c0_240, %c0_241] : memref<1x256xi32, #tpu.memory_space<vmem>>, vector<1x256xi32>
    %c0_242 = arith.constant 0 : index
    %c0_243 = arith.constant 0 : index
    %228 = vector.load %arg32[%c0_242, %c0_243] : memref<16x256xf32, #tpu.memory_space<vmem>>, vector<16x128xf32>
    %c0_244 = arith.constant 0 : index
    %c0_245 = arith.constant 0 : index
    %229 = vector.load %arg34[%c0_244, %c0_245] : memref<144x1152xf32, #tpu.memory_space<vmem>>, vector<16x128xf32>
    tpu.vector_store %arg34[%c0_244, %c0_245], %228 {strides = array<i32>} : memref<144x1152xf32, #tpu.memory_space<vmem>>, vector<16x128xf32>,
    %c0_246 = arith.constant 0 : index
    %c1_247 = arith.constant 1 : index
    %230 = vector.load %arg32[%c0_246, %c1_247] : memref<16x256xf32, #tpu.memory_space<vmem>>, vector<16x128xf32>
    %c16_248 = arith.constant 16 : index
    %c0_249 = arith.constant 0 : index
    %231 = vector.load %arg34[%c16_248, %c0_249] : memref<144x1152xf32, #tpu.memory_space<vmem>>, vector<16x128xf32>
    tpu.vector_store %arg34[%c16_248, %c0_249], %230 {strides = array<i32>} : memref<144x1152xf32, #tpu.memory_space<vmem>>, vector<16x128xf32>,
    %c0_250 = arith.constant 0 : index
    %c2_251 = arith.constant 2 : index
    %232 = vector.load %arg32[%c0_250, %c2_251] : memref<16x256xf32, #tpu.memory_space<vmem>>, vector<16x128xf32>
    %c32_252 = arith.constant 32 : index
    %c0_253 = arith.constant 0 : index
    %233 = vector.load %arg34[%c32_252, %c0_253] : memref<144x1152xf32, #tpu.memory_space<vmem>>, vector<16x128xf32>
    tpu.vector_store %arg34[%c32_252, %c0_253], %232 {strides = array<i32>} : memref<144x1152xf32, #tpu.memory_space<vmem>>, vector<16x128xf32>,
    %c0_254 = arith.constant 0 : index
    %c6_255 = arith.constant 6 : index
    %234 = vector.load %arg32[%c0_254, %c6_255] : memref<16x256xf32, #tpu.memory_space<vmem>>, vector<16x128xf32>
    %c48_256 = arith.constant 48 : index
    %c0_257 = arith.constant 0 : index
    %235 = vector.load %arg34[%c48_256, %c0_257] : memref<144x1152xf32, #tpu.memory_space<vmem>>, vector<16x128xf32>
    tpu.vector_store %arg34[%c48_256, %c0_257], %234 {strides = array<i32>} : memref<144x1152xf32, #tpu.memory_space<vmem>>, vector<16x128xf32>,
    %c0_258 = arith.constant 0 : index
    %c7_259 = arith.constant 7 : index
    %236 = vector.load %arg32[%c0_258, %c7_259] : memref<16x256xf32, #tpu.memory_space<vmem>>, vector<16x128xf32>
    %c64_260 = arith.constant 64 : index
    %c0_261 = arith.constant 0 : index
    %237 = vector.load %arg34[%c64_260, %c0_261] : memref<144x1152xf32, #tpu.memory_space<vmem>>, vector<16x128xf32>
    tpu.vector_store %arg34[%c64_260, %c0_261], %236 {strides = array<i32>} : memref<144x1152xf32, #tpu.memory_space<vmem>>, vector<16x128xf32>,
    %c0_262 = arith.constant 0 : index
    %c8_263 = arith.constant 8 : index
    %238 = vector.load %arg32[%c0_262, %c8_263] : memref<16x256xf32, #tpu.memory_space<vmem>>, vector<16x128xf32>
    %c80_264 = arith.constant 80 : index
    %c0_265 = arith.constant 0 : index
    %239 = vector.load %arg34[%c80_264, %c0_265] : memref<144x1152xf32, #tpu.memory_space<vmem>>, vector<16x128xf32>
    tpu.vector_store %arg34[%c80_264, %c0_265], %238 {strides = array<i32>} : memref<144x1152xf32, #tpu.memory_space<vmem>>, vector<16x128xf32>,
    %c0_266 = arith.constant 0 : index
    %c12_267 = arith.constant 12 : index
    %240 = vector.load %arg32[%c0_266, %c12_267] : memref<16x256xf32, #tpu.memory_space<vmem>>, vector<16x128xf32>
    %c96_268 = arith.constant 96 : index
    %c0_269 = arith.constant 0 : index
    %241 = vector.load %arg34[%c96_268, %c0_269] : memref<144x1152xf32, #tpu.memory_space<vmem>>, vector<16x128xf32>
    tpu.vector_store %arg34[%c96_268, %c0_269], %240 {strides = array<i32>} : memref<144x1152xf32, #tpu.memory_space<vmem>>, vector<16x128xf32>,
    %c0_270 = arith.constant 0 : index
    %c13_271 = arith.constant 13 : index
    %242 = vector.load %arg32[%c0_270, %c13_271] : memref<16x256xf32, #tpu.memory_space<vmem>>, vector<16x128xf32>
    %c112_272 = arith.constant 112 : index
    %c0_273 = arith.constant 0 : index
    %243 = vector.load %arg34[%c112_272, %c0_273] : memref<144x1152xf32, #tpu.memory_space<vmem>>, vector<16x128xf32>
    tpu.vector_store %arg34[%c112_272, %c0_273], %242 {strides = array<i32>} : memref<144x1152xf32, #tpu.memory_space<vmem>>, vector<16x128xf32>,
    %c0_274 = arith.constant 0 : index
    %c14 = arith.constant 14 : index
    %244 = vector.load %arg32[%c0_274, %c14] : memref<16x256xf32, #tpu.memory_space<vmem>>, vector<16x128xf32>
    %c128_275 = arith.constant 128 : index
    %c0_276 = arith.constant 0 : index
    %245 = vector.load %arg34[%c128_275, %c0_276] : memref<144x1152xf32, #tpu.memory_space<vmem>>, vector<16x128xf32>
    tpu.vector_store %arg34[%c128_275, %c0_276], %244 {strides = array<i32>} : memref<144x1152xf32, #tpu.memory_space<vmem>>, vector<16x128xf32>,
    %c0_277 = arith.constant 0 : index
    %c0_278 = arith.constant 0 : index
    %246 = vector.load %arg34[%c0_277, %c0_278] : memref<144x1152xf32, #tpu.memory_space<vmem>>, vector<144x128xf32>
    %cst_279 = arith.constant dense<0.000000e+00> : vector<2x128xf32>
    %247 = tpu.matmul %225, %246, %cst_279 {dimension_numbers = #tpu.dot_dimension_numbers<[1], [0], [0], [1], [0, 0, 1, 1], [], []>} : vector<2x144xf32>, vector<144x128xf32>, vector<2x128xf32> -> vector<2x128xf32>
    %248 = vector.extract_strided_slice %247 {offsets = [0, 0], sizes = [2, 24], strides = [1, 1]} : vector<2x128xf32> to vector<2x24xf32>
    %249 = vector.broadcast %226 : vector<2x1xf32> to vector<2x24xf32>
    %250 = arith.addf %248, %249 : vector<2x24xf32>
    %251 = tpu.iota {dimensions = array<i32: 0>} : vector<24x256xi32>
    %252 = vector.broadcast %227 : vector<1x256xi32> to vector<24x256xi32>
    %253 = arith.cmpi eq, %251, %252 : vector<24x256xi32>
    %254 = arith.extui %253 : vector<24x256xi1> to vector<24x256xi32>
    %255 = arith.sitofp %254 : vector<24x256xi32> to vector<24x256xf32>
    %cst_280 = arith.constant dense<0.000000e+00> : vector<2x256xf32>
    %256 = tpu.matmul %250, %255, %cst_280 {dimension_numbers = #tpu.dot_dimension_numbers<[1], [0], [0], [1], [0, 0, 1, 1], [], []>} : vector<2x24xf32>, vector<24x256xf32>, vector<2x256xf32> -> vector<2x256xf32>
    %257 = vector.extract_strided_slice %256 {offsets = [0, 0], sizes = [1, 256], strides = [1, 1]} : vector<2x256xf32> to vector<1x256xf32>
    %c0_281 = arith.constant 0 : index
    %c0_282 = arith.constant 0 : index
    %258 = vector.load %arg33[%c0_281, %c0_282] : memref<8x256xf32, #tpu.memory_space<vmem>>, vector<1x256xf32>
    tpu.vector_store %arg33[%c0_281, %c0_282], %257 {strides = array<i32>} : memref<8x256xf32, #tpu.memory_space<vmem>>, vector<1x256xf32>,
    %259 = vector.extract_strided_slice %256 {offsets = [1, 0], sizes = [1, 256], strides = [1, 1]} : vector<2x256xf32> to vector<1x256xf32>
    %c4 = arith.constant 4 : index
    %c0_283 = arith.constant 0 : index
    %260 = vector.load %arg33[%c4, %c0_283] : memref<8x256xf32, #tpu.memory_space<vmem>>, vector<1x256xf32>
    tpu.vector_store %arg33[%c4, %c0_283], %259 {strides = array<i32>} : memref<8x256xf32, #tpu.memory_space<vmem>>, vector<1x256xf32>,
    %c0_284 = arith.constant 0 : index
    %c0_285 = arith.constant 0 : index
    %261 = vector.load %arg22[%c0_284, %c0_285] : memref<2x72xf32, #tpu.memory_space<vmem>>, vector<2x72xf32>
    %c0_286 = arith.constant 0 : index
    %c0_287 = arith.constant 0 : index
    %262 = vector.load %arg23[%c0_286, %c0_287] : memref<2x1xf32, #tpu.memory_space<vmem>>, vector<2x1xf32>
    %c0_288 = arith.constant 0 : index
    %c0_289 = arith.constant 0 : index
    %263 = vector.load %arg24[%c0_288, %c0_289] : memref<1x16xi32, #tpu.memory_space<vmem>>, vector<1x16xi32>
    %c0_290 = arith.constant 0 : index
    %c0_291 = arith.constant 0 : index
    %264 = vector.load %arg33[%c0_290, %c0_291] : memref<8x256xf32, #tpu.memory_space<vmem>>, vector<8x128xf32>
    %c0_292 = arith.constant 0 : index
    %c0_293 = arith.constant 0 : index
    %265 = vector.load %arg34[%c0_292, %c0_293] : memref<144x1152xf32, #tpu.memory_space<vmem>>, vector<8x128xf32>
    tpu.vector_store %arg34[%c0_292, %c0_293], %264 {strides = array<i32>} : memref<144x1152xf32, #tpu.memory_space<vmem>>, vector<8x128xf32>,
    %c0_294 = arith.constant 0 : index
    %c1_295 = arith.constant 1 : index
    %266 = vector.load %arg33[%c0_294, %c1_295] : memref<8x256xf32, #tpu.memory_space<vmem>>, vector<8x128xf32>
    %c8_296 = arith.constant 8 : index
    %c0_297 = arith.constant 0 : index
    %267 = vector.load %arg34[%c8_296, %c0_297] : memref<144x1152xf32, #tpu.memory_space<vmem>>, vector<8x128xf32>
    tpu.vector_store %arg34[%c8_296, %c0_297], %266 {strides = array<i32>} : memref<144x1152xf32, #tpu.memory_space<vmem>>, vector<8x128xf32>,
    %c0_298 = arith.constant 0 : index
    %c2_299 = arith.constant 2 : index
    %268 = vector.load %arg33[%c0_298, %c2_299] : memref<8x256xf32, #tpu.memory_space<vmem>>, vector<8x128xf32>
    %c16_300 = arith.constant 16 : index
    %c0_301 = arith.constant 0 : index
    %269 = vector.load %arg34[%c16_300, %c0_301] : memref<144x1152xf32, #tpu.memory_space<vmem>>, vector<8x128xf32>
    tpu.vector_store %arg34[%c16_300, %c0_301], %268 {strides = array<i32>} : memref<144x1152xf32, #tpu.memory_space<vmem>>, vector<8x128xf32>,
    %c0_302 = arith.constant 0 : index
    %c6_303 = arith.constant 6 : index
    %270 = vector.load %arg33[%c0_302, %c6_303] : memref<8x256xf32, #tpu.memory_space<vmem>>, vector<8x128xf32>
    %c24_304 = arith.constant 24 : index
    %c0_305 = arith.constant 0 : index
    %271 = vector.load %arg34[%c24_304, %c0_305] : memref<144x1152xf32, #tpu.memory_space<vmem>>, vector<8x128xf32>
    tpu.vector_store %arg34[%c24_304, %c0_305], %270 {strides = array<i32>} : memref<144x1152xf32, #tpu.memory_space<vmem>>, vector<8x128xf32>,
    %c0_306 = arith.constant 0 : index
    %c7_307 = arith.constant 7 : index
    %272 = vector.load %arg33[%c0_306, %c7_307] : memref<8x256xf32, #tpu.memory_space<vmem>>, vector<8x128xf32>
    %c32_308 = arith.constant 32 : index
    %c0_309 = arith.constant 0 : index
    %273 = vector.load %arg34[%c32_308, %c0_309] : memref<144x1152xf32, #tpu.memory_space<vmem>>, vector<8x128xf32>
    tpu.vector_store %arg34[%c32_308, %c0_309], %272 {strides = array<i32>} : memref<144x1152xf32, #tpu.memory_space<vmem>>, vector<8x128xf32>,
    %c0_310 = arith.constant 0 : index
    %c8_311 = arith.constant 8 : index
    %274 = vector.load %arg33[%c0_310, %c8_311] : memref<8x256xf32, #tpu.memory_space<vmem>>, vector<8x128xf32>
    %c40_312 = arith.constant 40 : index
    %c0_313 = arith.constant 0 : index
    %275 = vector.load %arg34[%c40_312, %c0_313] : memref<144x1152xf32, #tpu.memory_space<vmem>>, vector<8x128xf32>
    tpu.vector_store %arg34[%c40_312, %c0_313], %274 {strides = array<i32>} : memref<144x1152xf32, #tpu.memory_space<vmem>>, vector<8x128xf32>,
    %c0_314 = arith.constant 0 : index
    %c12_315 = arith.constant 12 : index
    %276 = vector.load %arg33[%c0_314, %c12_315] : memref<8x256xf32, #tpu.memory_space<vmem>>, vector<8x128xf32>
    %c48_316 = arith.constant 48 : index
    %c0_317 = arith.constant 0 : index
    %277 = vector.load %arg34[%c48_316, %c0_317] : memref<144x1152xf32, #tpu.memory_space<vmem>>, vector<8x128xf32>
    tpu.vector_store %arg34[%c48_316, %c0_317], %276 {strides = array<i32>} : memref<144x1152xf32, #tpu.memory_space<vmem>>, vector<8x128xf32>,
    %c0_318 = arith.constant 0 : index
    %c13_319 = arith.constant 13 : index
    %278 = vector.load %arg33[%c0_318, %c13_319] : memref<8x256xf32, #tpu.memory_space<vmem>>, vector<8x128xf32>
    %c56_320 = arith.constant 56 : index
    %c0_321 = arith.constant 0 : index
    %279 = vector.load %arg34[%c56_320, %c0_321] : memref<144x1152xf32, #tpu.memory_space<vmem>>, vector<8x128xf32>
    tpu.vector_store %arg34[%c56_320, %c0_321], %278 {strides = array<i32>} : memref<144x1152xf32, #tpu.memory_space<vmem>>, vector<8x128xf32>,
    %c0_322 = arith.constant 0 : index
    %c14_323 = arith.constant 14 : index
    %280 = vector.load %arg33[%c0_322, %c14_323] : memref<8x256xf32, #tpu.memory_space<vmem>>, vector<8x128xf32>
    %c64_324 = arith.constant 64 : index
    %c0_325 = arith.constant 0 : index
    %281 = vector.load %arg34[%c64_324, %c0_325] : memref<144x1152xf32, #tpu.memory_space<vmem>>, vector<8x128xf32>
    tpu.vector_store %arg34[%c64_324, %c0_325], %280 {strides = array<i32>} : memref<144x1152xf32, #tpu.memory_space<vmem>>, vector<8x128xf32>,
    %c0_326 = arith.constant 0 : index
    %c0_327 = arith.constant 0 : index
    %282 = vector.load %arg34[%c0_326, %c0_327] : memref<144x1152xf32, #tpu.memory_space<vmem>>, vector<72x128xf32>
    %cst_328 = arith.constant dense<0.000000e+00> : vector<2x128xf32>
    %283 = tpu.matmul %261, %282, %cst_328 {dimension_numbers = #tpu.dot_dimension_numbers<[1], [0], [0], [1], [0, 0, 1, 1], [], []>} : vector<2x72xf32>, vector<72x128xf32>, vector<2x128xf32> -> vector<2x128xf32>
    %284 = vector.extract_strided_slice %283 {offsets = [0, 0], sizes = [2, 24], strides = [1, 1]} : vector<2x128xf32> to vector<2x24xf32>
    %285 = vector.broadcast %262 : vector<2x1xf32> to vector<2x24xf32>
    %286 = arith.addf %284, %285 : vector<2x24xf32>
    %287 = tpu.iota {dimensions = array<i32: 0>} : vector<24x16xi32>
    %288 = vector.broadcast %263 : vector<1x16xi32> to vector<24x16xi32>
    %289 = arith.cmpi eq, %287, %288 : vector<24x16xi32>
    %290 = arith.extui %289 : vector<24x16xi1> to vector<24x16xi32>
    %291 = arith.sitofp %290 : vector<24x16xi32> to vector<24x16xf32>
    %cst_329 = arith.constant dense<0.000000e+00> : vector<2x16xf32>
    %292 = tpu.matmul %286, %291, %cst_329 {dimension_numbers = #tpu.dot_dimension_numbers<[1], [0], [0], [1], [0, 0, 1, 1], [], []>} : vector<2x24xf32>, vector<24x16xf32>, vector<2x16xf32> -> vector<2x16xf32>
    %c0_330 = arith.constant 0 : index
    %c0_331 = arith.constant 0 : index
    %293 = vector.load %arg26[%c0_330, %c0_331] : memref<16x5xf32, #tpu.memory_space<vmem>>, vector<16x5xf32>
    %cst_332 = arith.constant dense<0.000000e+00> : vector<2x5xf32>
    %294 = tpu.matmul %292, %293, %cst_332 {dimension_numbers = #tpu.dot_dimension_numbers<[1], [0], [0], [1], [0, 0, 1, 1], [], []>} : vector<2x16xf32>, vector<16x5xf32>, vector<2x5xf32> -> vector<2x5xf32>
    %c0_333 = arith.constant 0 : index
    %c0_334 = arith.constant 0 : index
    %295 = vector.load %arg25[%c0_333, %c0_334] : memref<2x12xf32, #tpu.memory_space<vmem>>, vector<2x12xf32>
    %c0_335 = arith.constant 0 : index
    %c0_336 = arith.constant 0 : index
    %296 = vector.load %arg27[%c0_335, %c0_336] : memref<12x5xf32, #tpu.memory_space<vmem>>, vector<12x5xf32>
    %cst_337 = arith.constant dense<0.000000e+00> : vector<2x5xf32>
    %297 = tpu.matmul %295, %296, %cst_337 {dimension_numbers = #tpu.dot_dimension_numbers<[1], [0], [0], [1], [0, 0, 1, 1], [], []>} : vector<2x12xf32>, vector<12x5xf32>, vector<2x5xf32> -> vector<2x5xf32>
    %298 = arith.addf %294, %297 : vector<2x5xf32>
    %c0_338 = arith.constant 0 : index
    %c0_339 = arith.constant 0 : index
    %299 = vector.load %arg28[%c0_338, %c0_339] : memref<1x5xf32, #tpu.memory_space<vmem>>, vector<1x5xf32>
    %300 = vector.broadcast %299 : vector<1x5xf32> to vector<2x5xf32>
    %301 = arith.addf %298, %300 : vector<2x5xf32>
    %c0_340 = arith.constant 0 : index
    %c0_341 = arith.constant 0 : index
    %302 = vector.load %arg29[%c0_340, %c0_341] : memref<2x5xf32, #tpu.memory_space<vmem>>, vector<2x5xf32>
    tpu.vector_store %arg29[%c0_340, %c0_341], %301 {strides = array<i32>} : memref<2x5xf32, #tpu.memory_space<vmem>>, vector<2x5xf32>,
    return
  }
}

</mosaic_0001>

<bundles_post_ra>
// kernel: cnn_tc_forward.1
= control target key start
LH: loop header
LB: loop body
LE: loop exit
PB: predicated region body
PF: predicated region fallthrough
CT: control target
= control target key end

     0   :  { %s9491_s6 = smov 1   ;;  %s9492_s10 = smov 2   ;;  %s13943_s0 = inlined_call_operand.smem [shape: u32[30], index: -1, kind: input, shape index: {}] }
   0x1   :  { %s9571_s5 = sld [smem:[%s13943_s0]]   ;;  %s9493_s14 = smov 3  }
   0x2   :  { %s9576_s9 = sld [smem:[%s13943_s0 + %s9491_s6]]   ;;  %s9494_s18 = smov 4  }
   0x3   :  { %s9581_s13 = sld [smem:[%s13943_s0 + %s9492_s10]]   ;;  %s9495_s22 = smov 5  }
   0x4   :  { %s9586_s17 = sld [smem:[%s13943_s0 + %s9493_s14]]   ;;  %s9496_s26 = smov 6  }
   0x5   :  { %s9591_s21 = sld [smem:[%s13943_s0 + %s9494_s18]]   ;;  %s9497_s30 = smov 7  }
   0x6   :  { %s9596_s25 = sld [smem:[%s13943_s0 + %s9495_s22]]   ;;  %s9498_s4 = smov 8  }
   0x7   :  { %s9601_s29 = sld [smem:[%s13943_s0 + %s9496_s26]]   ;;  %s9499_s10 = smov 9  }
   0x8   :  { %s9606_s3 = sld [smem:[%s13943_s0 + %s9497_s30]]   ;;  %s9500_s15 = smov 10  }
   0x9   :  { %s9611_s8 = sld [smem:[%s13943_s0 + %s9498_s4]]   ;;  %s9501_s20 = smov 11  }
   0xa   :  { %s9616_s14 = sld [smem:[%s13943_s0 + %s9499_s10]]   ;;  %s9502_s26 = smov 12  }
   0xb   :  { %s9621_s19 = sld [smem:[%s13943_s0 + %s9500_s15]]   ;;  %s9503_s1 = smov 13  }
   0xc   :  { %s9626_s24 = sld [smem:[%s13943_s0 + %s9501_s20]]   ;;  %s9504_s7 = smov 14  }
   0xd   :  { %s9631_s30 = sld [smem:[%s13943_s0 + %s9502_s26]]   ;;  %s9505_s15 = smov 15  }
   0xe   :  { %s9636_s6 = sld [smem:[%s13943_s0 + %s9503_s1]]   ;;  %s9506_s22 = smov 16  }
   0xf   :  { %s9641_s12 = sld [smem:[%s13943_s0 + %s9504_s7]]   ;;  %s9507_s28 = smov 17  }
  0x10   :  { %s9646_s20 = sld [smem:[%s13943_s0 + %s9505_s15]]   ;;  %s9508_s7 = smov 18  }
  0x11   :  { %s9651_s27 = sld [smem:[%s13943_s0 + %s9506_s22]]   ;;  %s9509_s15 = smov 19  }
  0x12   :  { %s9656_s4 = sld [smem:[%s13943_s0 + %s9507_s28]]   ;;  %s9510_s22 = smov 20  }
  0x13   :  { %s9511_s28 = smov 21  }
  0x15   :  { %14278 = sst [smem:[#allocation10_spill]] %s9641_s12 }
  0x16   :  { %14279 = sst [smem:[#allocation11_spill]] %s9646_s20 }
  0x17   :  { %14280 = sst [smem:[#allocation12_spill]] %s9651_s27 }
  0x18   :  { %14281 = sst [smem:[#allocation13_spill]] %s9656_s4 }
  0x19   :  { %s9661_s12 = sld [smem:[%s13943_s0 + %s9508_s7]]   ;;  %s9512_s7 = smov 22  }
  0x1a   :  { %s9666_s20 = sld [smem:[%s13943_s0 + %s9509_s15]]   ;;  %s9513_s15 = smov 23  }
  0x1b   :  { %s9671_s27 = sld [smem:[%s13943_s0 + %s9510_s22]]   ;;  %s9514_s22 = smov 24  }
  0x1c   :  { %s9676_s4 = sld [smem:[%s13943_s0 + %s9511_s28]]   ;;  %s9515_s28 = smov 25  }
  0x1f   :  { %14282 = sst [smem:[#allocation14_spill]] %s9661_s12 }
  0x20   :  { %14283 = sst [smem:[#allocation15_spill]] %s9666_s20 }
  0x21   :  { %14284 = sst [smem:[#allocation16_spill]] %s9671_s27 }
  0x22   :  { %14285 = sst [smem:[#allocation17_spill]] %s9676_s4 }
  0x23   :  { %s9681_s12 = sld [smem:[%s13943_s0 + %s9512_s7]]   ;;  %s9516_s7 = smov 26  }
  0x24   :  { %s9686_s20 = sld [smem:[%s13943_s0 + %s9513_s15]]   ;;  %s9517_s15 = smov 27  }
  0x25   :  { %s9691_s27 = sld [smem:[%s13943_s0 + %s9514_s22]]   ;;  %s9518_s22 = smov 28  }
  0x26   :  { %s9696_s4 = sld [smem:[%s13943_s0 + %s9515_s28]]   ;;  %s9519_s28 = smov 29  }
  0x29   :  { %14286 = sst [smem:[#allocation18_spill]] %s9681_s12 }
  0x2a   :  { %14287 = sst [smem:[#allocation19_spill]] %s9686_s20 }
  0x2b   :  { %14288 = sst [smem:[#allocation20_spill]] %s9691_s27 }
  0x2c   :  { %14289 = sst [smem:[#allocation21_spill]] %s9696_s4 }
  0x2d   :  { %s9701_s12 = sld [smem:[%s13943_s0 + %s9516_s7]]  }
  0x2e   :  { %s9706_s20 = sld [smem:[%s13943_s0 + %s9517_s15]]  }
  0x2f   :  { %s9711_s27 = sld [smem:[%s13943_s0 + %s9518_s22]]  }
  0x30   :  { %s9716_s4 = sld [smem:[%s13943_s0 + %s9519_s28]]  }
  0x31   :  { %v9719_v0 = vld [vmem:[%s9571_s5 + $0x40] sm:$0xff]  ;;  %v9722_v1 = vld [vmem:[%s9571_s5 + $0x48] sm:$0xff]  ;;  %v9730_v4 = vld [vmem:[%s9571_s5 + $0x30] sm:$0xff]  ;;  %s9520_s0 = smov 9   ;;  %s9521_s7 = smov 37  }
  0x32   :  { %v222_v2 = vld [vmem:[%s9571_s5 + $0x28] sm:$0xff]  ;;  %v9727_v3 = vpack.i.bf16 %v9722_v1, %v9719_v0  ;;  %s9522_s10 = smov 115  }
  0x33   :  { %v9733_v5 = vpack.i.bf16 %v9730_v4, %v222_v2 }
  0x34   :  { %8695 = vrot.lane.b32.xlu0 %v9727_v3, %s9520_s0  ;;  %8705 = vrot.lane.b32.xlu1 %v9727_v3, %s9521_s7 }
  0x35   :  { %8715 = vrot.lane.b32.xlu2 %v9733_v5, %s9522_s10 }
  0x36   :  { %64 = vsyncpa [#allocation8], 0  ;;  %s9523_s11 = smov 23   ;;  %s9524_s15 = smov 101   ;;  %v9743_v6 = vld [vmem:[%s9571_s5 + $0x38] sm:$0xff]  ;;  %v184_v7 = vld [vmem:[%s9571_s5 + $0x20] sm:$0xff] }
  0x37   :  { %v8719_v8 = vpack.i.bf16 %v222_v2, %v184_v7  ;;  %v146_v9 = vld [vmem:[%s9571_s5 + $0x8] sm:$0xff]  ;;  %v147_v10 = vld [vmem:[%s9571_s5 + $0x10] sm:$0xff]  ;;  %s9525_s16 = smov 1   ;;  %s9526_s18 = smov 65   ;;  %v9528_v12 = vmov 0   ;;  %v183_v13 = vld [vmem:[%s9571_s5 + $0x18] sm:$0xff]  ;;  %v9796_v23 = vpack.i.bf16 %v9743_v6, %v9730_v4  ;;  %v8900_v54 = vpack.i.bf16 %v9719_v0, %v9743_v6 }
  0x38   :  { %v8729_v11 = vpack.i.bf16 %v147_v10, %v146_v9  ;;  %s9527_s22 = smov 79   ;;  %8764 = vset.pattern.permute.xlu1 %v9528_v12  ;;  %8920 = vset.pattern.permute.xlu0 %v9528_v12  ;;  %s9529_s23 = smov 93   ;;  %v9758_v14 = vld [vmem:[%s9571_s5] sm:$0xff]  ;;  %v8770_v18 = vpack.i.bf16 %v183_v13, %v147_v10  ;;  %v8825_v19 = vpack.i.bf16 %v184_v7, %v183_v13  ;;  %vm290_vm0 = vcmask 72704  }
  0x39   :  { %9171 = vset.pattern.permute.xlu2 %v9528_v12  ;;  %v8739_v15 = vpack.i.bf16 %v9758_v14, %v9758_v14  ;;  %v8744_v16 = vpack.i.bf16 %v146_v9, %v9758_v14  ;;  %s9530_s26 = smov 58   ;;  %s9531_s28 = smov 59   ;;  %v124_v17 = vld [vmem:[%s9581_s13] sm:$0x3]  ;;  %vm271_vm1 = vcmask 187392   ;;  %vm252_vm2 = vcmask 302080  }
  0x3a   :  { %s9532_s1 = smov 60   ;;  %s9533_s2 = smov 92   ;;  %vm233_vm3 = vcmask 826368   ;;  %vm13966_vm4 = vcmask 941056   ;;  %vm195_vm5 = vcmask 7168   ;;  %vm176_vm6 = vcmask 531456  }
  0x3b   :  { %s9536_s13 = smov 127   ;;  %vm157_vm7 = vcmask 646144   ;;  %vm13967_vm8 = vcmask 760832   ;;  %vm13977_vm9 = vcmask 588800  }
  0x3c   :  { %8700 = vrot.lane.b32.xlu0 %v9727_v3, %s9523_s11  ;;  %8710 = vrot.lane.b32.xlu1 %v9733_v5, %s9524_s15 }
  0x3d   :  { %284 = vrot.lane.b32.xlu2 %v9743_v6, %s9520_s0 }
  0x44   :  { %265 = vrot.lane.b32.xlu1 %v9743_v6, %s9523_s11  ;;  %8720 = vrot.lane.b32.xlu0 %v8719_v8, %s9525_s16  ;;  %s9535_s11 = smov 126  }
  0x45   :  { %8725 = vrot.lane.b32.xlu2 %v8729_v11, %s9526_s18 }
  0x4c   :  { %246 = vrot.lane.b32.xlu0 %v9743_v6, %s9521_s7  ;;  %8730 = vrot.lane.b32.xlu1 %v8729_v11, %s9527_s22  ;;  %s9534_s7 = smov 94  }
  0x4d   :  { %227 = vrot.lane.b32.xlu2 %v184_v7, %s9524_s15  ;;  %s9545_s15 = smov 91  }
  0x54   :  { %208 = vrot.lane.b32.xlu1 %v184_v7, %s9522_s10  ;;  %8735 = vrot.lane.b32.xlu0 %v8729_v11, %s9529_s23 }
  0x55   :  { %189 = vrot.lane.b32.xlu2 %v183_v13, %s9525_s16  ;;  %v123_v13 = vld [vmem:[%s9576_s9] sm:$0x3]  ;;  %s9539_s9 = smov 21  }
  0x5c   :  { %151 = vrot.lane.b32.xlu1 %v9758_v14, %s9527_s22  ;;  %170 = vrot.lane.b32.xlu0 %v9758_v14, %s9526_s18  ;;  %s14781_s18 = sld [smem:[#allocation10_spill]]  ;;  %s9554_s22 = smov 116  }
  0x5d   :  { %8740 = vrot.lane.b32.xlu2 %v8739_v15, %s9529_s23 }
  0x64   :  { %8745 = vrot.lane.b32.xlu0 %v8744_v16, %s9530_s26  ;;  %8750 = vrot.lane.b32.xlu1 %v8744_v16, %s9531_s28 }
  0x65   :  { %8755 = vrot.lane.b32.xlu2 %v8744_v16, %s9532_s1 }
  0x6c   :  { %8760 = vrot.lane.b32.xlu0 %v8744_v16, %s9533_s2  ;;  %361 = vperm.xlu1 %8764, %v124_v17  }
  0x6d   :  { %8766 = vrot.lane.b32.xlu2 %v8729_v11, %s9529_s23 }
  0x74   :  { %8771 = vrot.lane.b32.xlu0 %v8770_v18, %s9530_s26  ;;  %8776 = vrot.lane.b32.xlu1 %v8719_v8, %s9530_s26 }
  0x75   :  { %8781 = vrot.lane.b32.xlu2 %v8744_v16, %s9534_s7 }
  0x7c   :  { %8786 = vrot.lane.b32.xlu0 %v8770_v18, %s9531_s28  ;;  %8791 = vrot.lane.b32.xlu1 %v8719_v8, %s9531_s28 }
  0x7d   :  { %8796 = vrot.lane.b32.xlu2 %v8744_v16, %s9535_s11 }
  0x84   :  { %8801 = vrot.lane.b32.xlu0 %v8770_v18, %s9532_s1  ;;  %8806 = vrot.lane.b32.xlu1 %v8719_v8, %s9532_s1 }
  0x85   :  { %8811 = vrot.lane.b32.xlu2 %v8744_v16, %s9536_s13 }
  0x8c   :  { %8816 = vrot.lane.b32.xlu0 %v8770_v18, %s9533_s2  ;;  %8821 = vrot.lane.b32.xlu1 %v8719_v8, %s9533_s2 }
  0x8d   :  { %8826 = vrot.lane.b32.xlu2 %v8825_v19, %s9529_s23  ;;  %v13953_v19 = vmov 1.0  }
  0x8f   :  { %v9784_v20 = vpop.permute.xlu2 %8715 }
  0x90   :  { %v8718_v41 = vunpack.i.h.bf16 %v9784_v20  ;;  %v8717_v42 = vunpack.i.l.bf16 %v9784_v20 }
  0x92   :  { %v216_v52 = vsel %vm13966_vm4, %v8717_v42, %v8718_v41 }
  0x94   :  { %8831 = vrot.lane.b32.xlu0 %v8770_v18, %s9534_s7  ;;  %8836 = vrot.lane.b32.xlu1 %v8719_v8, %s9534_s7 }
  0x95   :  { %8841 = vrot.lane.b32.xlu2 %v8770_v18, %s9535_s11 }
  0x97   :  { %v285_v21 = vpop.permute.xlu2 %284 }
  0x9c   :  { %8846 = vrot.lane.b32.xlu0 %v8719_v8, %s9535_s11  ;;  %8851 = vrot.lane.b32.xlu1 %v8770_v18, %s9536_s13 }
  0x9d   :  { %8856 = vrot.lane.b32.xlu2 %v8719_v8, %s9536_s13 }
  0x9f   :  { %v9792_v22 = vpop.permute.xlu2 %8725 }
  0xa0   :  { %v8728_v44 = vunpack.i.h.bf16 %v9792_v22  ;;  %v8727_v45 = vunpack.i.l.bf16 %v9792_v22 }
  0xa2   :  { %v178_v56 = vsel %vm176_vm6, %v8727_v45, %v8728_v44 }
  0xa4   :  { %8861 = vrot.lane.b32.xlu0 %v9733_v5, %s9529_s23  ;;  %8866 = vrot.lane.b32.xlu1 %v9796_v23, %s9530_s26  ;;  %v9861_v5 = vld [vmem:[%s9586_s17] sm:$0x3]  ;;  %s9540_s17 = smov 15  }
  0xa5   :  { %8871 = vrot.lane.b32.xlu2 %v9727_v3, %s9530_s26  ;;  %v9867_v9 = vperm.slane %v9861_v5, 0  ;;  %s9556_s26 = smov 118  }
  0xa6   :  { %v8696_v24 = vpop.permute.xlu0 %8695  ;;  %v9804_v25 = vpop.permute.xlu1 %8705 }
  0xa7   :  { %v8698_v26 = vunpack.i.h.bf16 %v8696_v24  ;;  %v8697_v27 = vunpack.i.l.bf16 %v8696_v24  ;;  %v228_v28 = vpop.permute.xlu2 %227  ;;  %v8708_v33 = vunpack.i.h.bf16 %v9804_v25  ;;  %v8707_v34 = vunpack.i.l.bf16 %v9804_v25 }
  0xa9   :  { %v291_v29 = vsel %vm290_vm0, %v285_v21, %v8697_v27  ;;  %v292_v30 = vsel %vm290_vm0, %v8697_v27, %v8698_v26  ;;  %v254_v43 = vsel %vm252_vm2, %v8707_v34, %v8708_v33 }
  0xaa   :  { %326 = vmatpush.msra.mxu0 %v291_v29  ;;  %346 = vmatpush.msra.mxu1 %v292_v30 }
  0xac   :  { %8876 = vrot.lane.b32.xlu0 %v9796_v23, %s9531_s28  ;;  %8881 = vrot.lane.b32.xlu1 %v9727_v3, %s9531_s28  ;;  %s9557_s28 = smov 106  }
  0xad   :  { %8886 = vrot.lane.b32.xlu2 %v9796_v23, %s9532_s1 }
  0xae   :  { %v8701_v31 = vpop.permute.xlu0 %8700  ;;  %v8711_v32 = vpop.permute.xlu1 %8710 }
  0xaf   :  { %v8703_v35 = vunpack.i.h.bf16 %v8701_v31  ;;  %v8702_v36 = vunpack.i.l.bf16 %v8701_v31  ;;  %v9816_v37 = vpop.permute.xlu2 %189  ;;  %v8713_v38 = vunpack.i.h.bf16 %v8711_v32  ;;  %v8712_v39 = vunpack.i.l.bf16 %v8711_v32 }
  0xb1   :  { %v273_v40 = vsel %vm271_vm1, %v8702_v36, %v8703_v35  ;;  %v235_v46 = vsel %vm233_vm3, %v8712_v39, %v8713_v38  ;;  %v234_v63 = vsel %vm233_vm3, %v228_v28, %v8712_v39  ;;  %vm1131_vm3 = vcmask 474112  }
  0xb2   :  { %347 = vmatpush.msra.mxu1 %v273_v40 }
  0xb4   :  { %348 = vmatpush.msra.mxu1 %v254_v43  ;;  %8891 = vrot.lane.b32.xlu0 %v9727_v3, %s9532_s1  ;;  %v13946_v3 = vlaneseq  ;;  %s14783_s1 = sld [smem:[#allocation11_spill]] }
  0xb5   :  { %8896 = vrot.lane.b32.xlu1 %v9796_v23, %s9533_s2  ;;  %923 = vrot.lane.b32.xlu2 %v9719_v0, %s9533_s2 }
  0xb6   :  { %v266_v47 = vpop.permute.xlu1 %265  ;;  %349 = vmatpush.msra.mxu1 %v235_v46  ;;  %v8721_v48 = vpop.permute.xlu0 %8720  ;;  %v9854_v4 = vshrl.u32 %v13946_v3, 7 }
  0xb7   :  { %v8723_v49 = vunpack.i.h.bf16 %v8721_v48  ;;  %v8722_v50 = vunpack.i.l.bf16 %v8721_v48  ;;  %v272_v51 = vsel %vm271_vm1, %v266_v47, %v8702_v36  ;;  %v9833_v53 = vpop.permute.xlu2 %8740 }
  0xb8   :  { %327 = vmatpush.msra.mxu0 %v272_v51  ;;  %350 = vmatpush.msra.mxu1 %v216_v52  ;;  %14290 = vst [vmem:[#allocation22_spill] sm:$0xff] %v9854_v4  ;;  %v9864_v8 = vadd.s32 120, %v9854_v4  ;;  %v9874_v15 = vadd.s32 112, %v9854_v4  ;;  %v9883_v20 = vadd.s32 104, %v9854_v4  ;;  %v9886_v21 = vadd.s32 96, %v9854_v4 }
  0xb9   :  { %v197_v55 = vsel %vm195_vm5, %v8722_v50, %v8723_v49  ;;  %v196_v16 = vsel %vm195_vm5, %v9816_v37, %v8722_v50  ;;  %v9902_v25 = vadd.s32 88, %v9854_v4  ;;  %v8742_v26 = vunpack.i.l.bf16 %v9833_v53 }
  0xba   :  { %351 = vmatpush.msra.mxu1 %v197_v55  ;;  %14291 = vst [vmem:[#allocation23_spill] sm:$0xff] %v9864_v8  ;;  %vm416_vm10 = vcmp.eq.s32.totalorder %v9864_v8, %v9867_v9  ;;  %vm414_vm11 = vcmp.eq.s32.totalorder %v9874_v15, %v9867_v9  ;;  %vm412_vm12 = vcmp.eq.s32.totalorder %v9883_v20, %v9867_v9  ;;  %v9912_v27 = vadd.s32 80, %v9854_v4 }
  0xbb   :  { %14292 = vst [vmem:[#allocation24_spill] sm:$0xff] %v9874_v15  ;;  %7184 = vmatpush.msk.msra.mxu2 %vm416_vm10, %v13953_v19  ;;  %vm410_vm13 = vcmp.eq.s32.totalorder %v9886_v21, %v9867_v9  ;;  %v9915_v28 = vadd.s32 72, %v9854_v4  ;;  %vm408_vm14 = vcmp.eq.s32.totalorder %v9902_v25, %v9867_v9  ;;  %v9920_v29 = vadd.s32 64, %v9854_v4 }
  0xbc   :  { %352 = vmatpush.msra.mxu1 %v178_v56  ;;  %8901 = vrot.lane.b32.xlu0 %v8900_v54, %s9529_s23  ;;  %14293 = vst [vmem:[#allocation25_spill] sm:$0xff] %v9883_v20  ;;  %vm406_vm15 = vcmp.eq.s32.totalorder %v9912_v27, %v9867_v9  ;;  %v9945_v36 = vadd.s32 56, %v9854_v4  ;;  %v9962_v41 = vadd.s32 48, %v9854_v4  ;;  %v9970_v43 = vadd.s32 40, %v9854_v4 }
  0xbd   :  { %8906 = vrot.lane.b32.xlu1 %v9796_v23, %s9534_s7  ;;  %788 = vrot.lane.b32.xlu2 %v9719_v0, %s9534_s7  ;;  %14294 = vst [vmem:[#allocation26_spill] sm:$0xff] %v9886_v21  ;;  %vm404_vm1 = vcmp.eq.s32.totalorder %v9915_v28, %v9867_v9  ;;  %v9973_v44 = vadd.s32 32, %v9854_v4  ;;  %v8743_v47 = vunpack.i.h.bf16 %v9833_v53  ;;  %v9995_v51 = vadd.s32 24, %v9854_v4 }
  0xbe   :  { %v247_v57 = vpop.permute.xlu0 %246  ;;  %v8731_v58 = vpop.permute.xlu1 %8730  ;;  %7185 = vmatpush.msk.msra.mxu2 %vm414_vm11, %v13953_v19  ;;  %14295 = vst [vmem:[#allocation27_spill] sm:$0xff] %v9902_v25  ;;  %vm400_vm10 = vcmp.eq.s32.totalorder %v9945_v36, %v9867_v9  ;;  %vm398_vm11 = vcmp.eq.s32.totalorder %v9962_v41, %v9867_v9  ;;  %v10001_v55 = vadd.s32 16, %v9854_v4  ;;  %v10004_v53 = vadd.s32 128, %v9854_v4 }
  0xbf   :  { %v8733_v59 = vunpack.i.h.bf16 %v8731_v58  ;;  %v8732_v60 = vunpack.i.l.bf16 %v8731_v58  ;;  %v253_v61 = vsel %vm252_vm2, %v247_v57, %v8707_v34  ;;  %v9847_v62 = vpop.permute.xlu2 %8755  ;;  %14296 = vst [vmem:[#allocation28_spill] sm:$0xff] %v9912_v27  ;;  %vm402_vm2 = vcmp.eq.s32.totalorder %v9920_v29, %v9867_v9 }
  0xc0   :  { %328 = vmatpush.msra.mxu0 %v253_v61  ;;  %7186 = vmatpush.msk.msra.mxu2 %vm412_vm12, %v13953_v19  ;;  %14297 = vst [vmem:[#allocation29_spill] sm:$0xff] %v9915_v28  ;;  %v8758_v32 = vunpack.i.h.bf16 %v9847_v62  ;;  %v8757_v33 = vunpack.i.l.bf16 %v9847_v62  ;;  %vm396_vm12 = vcmp.eq.s32.totalorder %v9970_v43, %v9867_v9  ;;  %v10009_v56 = vperm.slane %v9861_v5, 1 }
  0xc1   :  { %v159_v2 = vsel %vm157_vm7, %v8732_v60, %v8733_v59  ;;  %14298 = vst [vmem:[#allocation30_spill] sm:$0xff] %v9920_v29  ;;  %v10018_v58 = vadd.s32 8, %v9854_v4 }
  0xc2   :  { %329 = vmatpush.msra.mxu0 %v234_v63  ;;  %353 = vmatpush.msra.mxu1 %v159_v2  ;;  %14299 = vst [vmem:[#allocation31_spill] sm:$0xff] %v9945_v36 }
  0xc3   :  { %7187 = vmatpush.msk.msra.mxu2 %vm410_vm13, %v13953_v19  ;;  %14300 = vst [vmem:[#allocation32_spill] sm:$0xff] %v9962_v41  ;;  %vm394_vm13 = vcmp.eq.s32.totalorder %v9973_v44, %v9867_v9 }
  0xc4   :  { %8911 = vrot.lane.b32.xlu0 %v9796_v23, %s9535_s11  ;;  %14301 = vst [vmem:[#allocation33_spill] sm:$0xff] %v9970_v43 }
  0xc5   :  { %720 = vrot.lane.b32.xlu1 %v9719_v0, %s9535_s11  ;;  %8916 = vrot.lane.b32.xlu2 %v9796_v23, %s9536_s13  ;;  %14302 = vst [vmem:[#allocation34_spill] sm:$0xff] %v9973_v44 }
  0xc6   :  { %v209_v6 = vpop.permute.xlu1 %208  ;;  %v8736_v7 = vpop.permute.xlu0 %8735  ;;  %7188 = vmatpush.msk.msra.mxu2 %vm408_vm14, %v13953_v19  ;;  %vm927_vm14 = vcmask 752640   ;;  %14303 = vst [vmem:[#allocation35_spill] sm:$0xff] %v9995_v51 }
  0xc7   :  { %v8738_v10 = vunpack.i.h.bf16 %v8736_v7  ;;  %v8737_v11 = vunpack.i.l.bf16 %v8736_v7  ;;  %v215_v12 = vsel %vm13966_vm4, %v209_v6, %v8717_v42  ;;  %v9879_v18 = vpop.permute.xlu2 %8766  ;;  %14304 = vst [vmem:[#allocation36_spill] sm:$0xff] %v10001_v55 }
  0xc8   :  { %330 = vmatpush.msra.mxu0 %v215_v12  ;;  %7189 = vmatpush.msk.msra.mxu2 %vm406_vm15, %v13953_v19  ;;  %v8768_v48 = vunpack.i.l.bf16 %v9879_v18  ;;  %14305 = vst [vmem:[#allocation37_spill] sm:$0xff] %v10004_v53  ;;  %vm392_vm15 = vcmp.eq.s32.totalorder %v9995_v51, %v9867_v9 }
  0xc9   :  { %v140_v17 = vsel %vm13967_vm8, %v8737_v11, %v8738_v10  ;;  %v139_v31 = vsel %vm13967_vm8, %v8742_v26, %v8737_v11  ;;  %14306 = vst [vmem:[#allocation38_spill] sm:$0xff] %v10018_v58 }
  0xca   :  { %331 = vmatpush.msra.mxu0 %v196_v16  ;;  %354 = vmatpush.msra.mxu1 %v140_v17  ;;  %v860_v59 = vsel %vm13967_vm8, %v8743_v47, %v8768_v48 }
  0xcb   :  { %7149 = vmatmul.msk.f32.vlgmr.msra.gmra.mxu1 %vm13977_vm9, %v123_v13  ;;  %7190 = vmatpush.msk.msra.mxu2 %vm404_vm1, %v13953_v19  ;;  %vm390_vm1 = vcmp.eq.s32.totalorder %v10001_v55, %v9867_v9 }
  0xcc   :  { %652 = vrot.lane.b32.xlu0 %v9719_v0, %s9536_s13 }
  0xcd   :  { %925 = vrot.lane.b32.xlu1 %v9722_v1, %s9533_s2  ;;  %858 = vrot.lane.b32.xlu2 %v9722_v1, %s9529_s23 }
  0xce   :  { %v152_v23 = vpop.permute.xlu1 %151  ;;  %v171_v24 = vpop.permute.xlu0 %170  ;;  %7191 = vmatpush.msk.msra.mxu2 %vm402_vm2, %v13953_v19  ;;  %vm419_vm2 = vcmp.eq.s32.totalorder %v10004_v53, %v10009_v56 }
  0xcf   :  { %v177_v0 = vsel %vm176_vm6, %v171_v24, %v8727_v45  ;;  %v158_v30 = vsel %vm157_vm7, %v152_v23, %v8732_v60  ;;  %v9923_v22 = vpop.permute.xlu2 %8781  ;;  %vm1063_vm6 = vcmask 482304   ;;  %vm995_vm7 = vcmask 490496  }
  0xd0   :  { %332 = vmatpush.msra.mxu0 %v177_v0  ;;  %7192 = vmatpush.msk.msra.mxu2 %vm400_vm10, %v13953_v19  ;;  %v996_v45 = vsel %vm995_vm7, %v8757_v33, %v8758_v32  ;;  %vm388_vm10 = vcmp.eq.s32.totalorder %v10018_v58, %v9867_v9  ;;  %v8784_v10 = vunpack.i.h.bf16 %v9923_v22  ;;  %v8783_v11 = vunpack.i.l.bf16 %v9923_v22 }
  0xd2   :  { %333 = vmatpush.msra.mxu0 %v158_v30  ;;  %7193 = vmatpush.msk.msra.mxu2 %vm398_vm11, %v13953_v19  ;;  %vm386_vm11 = vcmp.eq.s32.totalorder %v9854_v4, %v9867_v9 }
  0xd4   :  { %334 = vmatpush.msra.mxu0 %v139_v31  ;;  %790 = vrot.lane.b32.xlu0 %v9722_v1, %s9534_s7 }
  0xd5   :  { %7148 = vmatmul.msk.f32.vlgmr.msra.gmra.mxu0 %vm13977_vm9, %v123_v13  ;;  %722 = vrot.lane.b32.xlu1 %v9722_v1, %s9535_s11 }
  0xd6   :  { %v9940_v34 = vpop.permute.xlu0 %8745  ;;  %v9942_v35 = vpop.permute.xlu1 %8750  ;;  %654 = vrot.lane.b32.xlu2 %v9722_v1, %s9536_s13  ;;  %7194 = vmatpush.msk.msra.mxu2 %vm396_vm12, %v13953_v19  ;;  %vm792_vm12 = vcmask 769024  }
  0xd7   :  { %v8748_v37 = vunpack.i.h.bf16 %v9940_v34  ;;  %v8747_v38 = vunpack.i.l.bf16 %v9940_v34  ;;  %v8753_v39 = vunpack.i.h.bf16 %v9942_v35  ;;  %v8752_v40 = vunpack.i.l.bf16 %v9942_v35  ;;  %v9980_v46 = vpop.permute.xlu2 %8796  ;;  %7218 = vmatpush.msk.msrb.mxu0 %vm419_vm2, %v13953_v19 }
  0xd8   :  { %7195 = vmatpush.msk.msra.mxu2 %vm394_vm13, %v13953_v19  ;;  %v8799_v16 = vunpack.i.h.bf16 %v9980_v46  ;;  %v8798_v17 = vunpack.i.l.bf16 %v9980_v46  ;;  %vm13989_vm13 = vcmask 1031168   ;;  %v793_v33 = vsel %vm792_vm12, %v8783_v11, %v8784_v10 }
  0xd9   :  { %v1132_v1 = vsel %vm1131_vm3, %v8747_v38, %v8748_v37  ;;  %v1064_v42 = vsel %vm1063_vm6, %v8752_v40, %v8753_v39  ;;  %vm417_vm2 = vcmp.eq.s32.totalorder %v9864_v8, %v10009_v56 }
  0xda   :  { %1253 = vmatpush.msrb.mxu1 %v1132_v1  ;;  %7196 = vmatpush.msk.msra.mxu2 %vm392_vm15, %v13953_v19  ;;  %v725_v34 = vsel %vm13989_vm13, %v8798_v17, %v8799_v16  ;;  %vm14276_vm15 = vcmask 1039360  }
  0xdc   :  { %1254 = vmatpush.msrb.mxu1 %v1064_v42  ;;  %7197 = vmatpush.msk.msra.mxu2 %vm390_vm1, %v13953_v19  ;;  %vm418_vm1 = vcmp.eq.s32.totalorder %v10004_v53, %v9867_v9 }
  0xdd   :  { %7200 = vmatpush.msk.msra.mxu3 %vm418_vm1, %v13953_v19  ;;  %vm411_vm1 = vcmp.eq.s32.totalorder %v9886_v21, %v10009_v56 }
  0xde   :  { %v9990_v49 = vpop.permute.xlu0 %8760  ;;  %1255 = vmatpush.msrb.mxu1 %v996_v45  ;;  %v9992_v50 = vpop.permute.xlu1 %361  ;;  %7198 = vmatpush.msk.msra.mxu2 %vm388_vm10, %v13953_v19  ;;  %vm415_vm10 = vcmp.eq.s32.totalorder %v9874_v15, %v10009_v56 }
  0xdf   :  { %v8763_v52 = vunpack.i.h.bf16 %v9990_v49  ;;  %v8762_v54 = vunpack.i.l.bf16 %v9990_v49  ;;  %v10031_v60 = vpop.permute.xlu2 %8811  ;;  %7202 = vmatpush.msk.msrb.mxu3 %vm417_vm2, %v13953_v19  ;;  %vm409_vm2 = vcmp.eq.s32.totalorder %v9902_v25, %v10009_v56 }
  0xe0   :  { %7199 = vmatpush.msk.msra.mxu2 %vm386_vm11, %v13953_v19  ;;  %v8813_v35 = vunpack.i.l.bf16 %v10031_v60  ;;  %vm413_vm11 = vcmp.eq.s32.totalorder %v9883_v20, %v10009_v56 }
  0xe1   :  { %v928_v57 = vsel %vm927_vm14, %v8762_v54, %v8763_v52  ;;  %7203 = vmatpush.msk.msrb.mxu3 %vm415_vm10, %v13953_v19  ;;  %vm407_vm10 = vcmp.eq.s32.totalorder %v9912_v27, %v10009_v56 }
  0xe2   :  { %1256 = vmatpush.msrb.mxu1 %v928_v57 }
  0xe3   :  { %7204 = vmatpush.msk.msrb.mxu3 %vm413_vm11, %v13953_v19  ;;  %vm405_vm11 = vcmp.eq.s32.totalorder %v9915_v28, %v10009_v56 }
  0xe4   :  { %1257 = vmatpush.msrb.mxu1 %v860_v59 }
  0xe5   :  { %7205 = vmatpush.msk.msrb.mxu3 %vm411_vm1, %v13953_v19  ;;  %vm403_vm1 = vcmp.eq.s32.totalorder %v9920_v29, %v10009_v56 }
  0xe6   :  { %v8772_v61 = vpop.permute.xlu0 %8771  ;;  %v10034_v63 = vpop.permute.xlu1 %8776  ;;  %1258 = vmatpush.msrb.mxu1 %v793_v33 }
  0xe7   :  { %v8774_v2 = vunpack.i.h.bf16 %v8772_v61  ;;  %v8773_v5 = vunpack.i.l.bf16 %v8772_v61  ;;  %v10045_v26 = vpop.permute.xlu2 %8826  ;;  %v8778_v0 = vunpack.i.l.bf16 %v10034_v63  ;;  %v8779_v1 = vunpack.i.h.bf16 %v10034_v63  ;;  %7206 = vmatpush.msk.msrb.mxu3 %vm409_vm2, %v13953_v19 }
  0xe8   :  { %1259 = vmatpush.msrb.mxu1 %v725_v34  ;;  %vm401_vm2 = vcmp.eq.s32.totalorder %v9945_v36, %v10009_v56 }
  0xe9   :  { %v1133_v6 = vsel %vm1131_vm3, %v8748_v37, %v8773_v5  ;;  %v1134_v7 = vsel %vm1131_vm3, %v8773_v5, %v8774_v2  ;;  %v8814_v37 = vunpack.i.h.bf16 %v10031_v60  ;;  %v10061_v38 = vsel %vm1131_vm3, %v8774_v2, %v8778_v0  ;;  %7207 = vmatpush.msk.msrb.mxu3 %vm407_vm10, %v13953_v19 }
  0xea   :  { %1276 = vmatpush.msra.mxu0 %v1133_v6  ;;  %1299 = vmatpush.msrb.mxu2 %v1134_v7  ;;  %v1136_v2 = vsel %vm1131_vm3, %v8778_v0, %v8779_v1  ;;  %v13960_v5 = vunpack.i.l.bf16 %v10045_v26  ;;  %v13961_v60 = vunpack.i.h.bf16 %v10045_v26  ;;  %vm399_vm10 = vcmp.eq.s32.totalorder %v9962_v41, %v10009_v56 }
  0xeb   :  { %v657_v59 = vsel %vm14276_vm15, %v8813_v35, %v8814_v37  ;;  %7208 = vmatpush.msk.msrb.mxu3 %vm405_vm11, %v13953_v19  ;;  %vm397_vm11 = vcmp.eq.s32.totalorder %v9970_v43, %v10009_v56 }
  0xec   :  { %1260 = vmatpush.msrb.mxu1 %v657_v59 }
  0xed   :  { %7209 = vmatpush.msk.msrb.mxu3 %vm403_vm1, %v13953_v19  ;;  %vm395_vm1 = vcmp.eq.s32.totalorder %v9973_v44, %v10009_v56 }
  0xee   :  { %v8787_v12 = vpop.permute.xlu0 %8786  ;;  %v10041_v13 = vpop.permute.xlu1 %8791  ;;  %1261 = vmatpush.msrb.mxu1 %v9758_v14 }
  0xef   :  { %v8789_v23 = vunpack.i.h.bf16 %v8787_v12  ;;  %v8788_v24 = vunpack.i.l.bf16 %v8787_v12  ;;  %v10069_v54 = vpop.permute.xlu2 %8841  ;;  %v8793_v61 = vunpack.i.l.bf16 %v10041_v13  ;;  %v8794_v62 = vunpack.i.h.bf16 %v10041_v13  ;;  %7210 = vmatpush.msk.msrb.mxu3 %vm401_vm2, %v13953_v19 }
  0xf0   :  { %1345 = vmatpush.msra.mxu1 %v1136_v2  ;;  %v13951_v46 = vunpack.i.h.bf16 %v10069_v54  ;;  %vm393_vm2 = vcmp.eq.s32.totalorder %v9995_v51, %v10009_v56 }
  0xf1   :  { %v1065_v30 = vsel %vm1063_vm6, %v8753_v39, %v8788_v24  ;;  %v1066_v31 = vsel %vm1063_vm6, %v8788_v24, %v8789_v23  ;;  %v10086_v11 = vsel %vm1063_vm6, %v8789_v23, %v8793_v61  ;;  %v1068_v24 = vsel %vm1063_vm6, %v8793_v61, %v8794_v62  ;;  %7211 = vmatpush.msk.msrb.mxu3 %vm399_vm10, %v13953_v19 }
  0xf2   :  { %1277 = vmatpush.msra.mxu0 %v1065_v30  ;;  %1300 = vmatpush.msrb.mxu2 %v1066_v31  ;;  %vm391_vm10 = vcmp.eq.s32.totalorder %v10001_v55, %v10009_v56 }
  0xf3   :  { %1346 = vmatpush.msra.mxu1 %v1068_v24  ;;  %7212 = vmatpush.msk.msrb.mxu3 %vm397_vm11, %v13953_v19  ;;  %vm389_vm11 = vcmp.eq.s32.totalorder %v10018_v58, %v10009_v56 }
  0xf5   :  { %7213 = vmatpush.msk.msrb.mxu3 %vm395_vm1, %v13953_v19  ;;  %vm387_vm1 = vcmp.eq.s32.totalorder %v9854_v4, %v10009_v56 }
  0xf6   :  { %v8802_v39 = vpop.permute.xlu0 %8801  ;;  %v10063_v40 = vpop.permute.xlu1 %8806 }
  0xf7   :  { %v8804_v42 = vunpack.i.h.bf16 %v8802_v39  ;;  %v8803_v45 = vunpack.i.l.bf16 %v8802_v39  ;;  %v8808_v31 = vunpack.i.l.bf16 %v10063_v40  ;;  %v10102_v33 = vpop.permute.xlu2 %8856  ;;  %v13965_v49 = vunpack.i.h.bf16 %v10063_v40  ;;  %7214 = vmatpush.msk.msrb.mxu3 %vm393_vm2, %v13953_v19 }
  0xf8   :  { %vm488_vm2 = vcmask 64512  }
  0xf9   :  { %v997_v47 = vsel %vm995_vm7, %v8758_v32, %v8803_v45  ;;  %v998_v57 = vsel %vm995_vm7, %v8803_v45, %v8804_v42  ;;  %v8769_v32 = vunpack.i.h.bf16 %v9879_v18  ;;  %v10113_v39 = vsel %vm995_vm7, %v8804_v42, %v8808_v31  ;;  %7215 = vmatpush.msk.msrb.mxu3 %vm391_vm10, %v13953_v19 }
  0xfa   :  { %1278 = vmatpush.msra.mxu0 %v997_v47  ;;  %1301 = vmatpush.msrb.mxu2 %v998_v57  ;;  %v1000_v42 = vsel %vm995_vm7, %v8808_v31, %v13965_v49  ;;  %v10185_v31 = vld [vmem:[%s9591_s21] sm:$0xff] }
  0xfb   :  { %v862_v14 = vsel %vm13967_vm8, %v8769_v32, %v13960_v5  ;;  %v861_v23 = vsel %vm13967_vm8, %v8768_v48, %v8769_v32  ;;  %1347 = vmatpush.msra.mxu1 %v1000_v42  ;;  %7216 = vmatpush.msk.msrb.mxu3 %vm389_vm11, %v13953_v19 }
  0xfc   :  { %7220 = vmatmul.msk.f32.vlgmr.msrb.gmra.mxu1 %vm13977_vm9, %v10185_v31 }
  0xfd   :  { %7217 = vmatpush.msk.msrb.mxu3 %vm387_vm1, %v13953_v19  ;;  %v600_v19 = vld [vmem:[%s9571_s5 + $0x10] sm:$0xff] }
  0xfe   :  { %v8817_v6 = vpop.permute.xlu0 %8816  ;;  %v10083_v7 = vpop.permute.xlu1 %8821 }
  0xff   :  { %v8819_v12 = vunpack.i.h.bf16 %v8817_v6  ;;  %v8818_v17 = vunpack.i.l.bf16 %v8817_v6  ;;  %v13964_v34 = vunpack.i.h.bf16 %v10083_v7  ;;  %v8823_v35 = vunpack.i.l.bf16 %v10083_v7 }
 0x101   :  { %v929_v0 = vsel %vm927_vm14, %v8763_v52, %v8818_v17  ;;  %v930_v30 = vsel %vm927_vm14, %v8818_v17, %v8819_v12  ;;  %v8843_v52 = vunpack.i.l.bf16 %v10069_v54  ;;  %v932_v9 = vsel %vm927_vm14, %v8823_v35, %v13964_v34 }
 0x102   :  { %1279 = vmatpush.msra.mxu0 %v929_v0  ;;  %1302 = vmatpush.msrb.mxu2 %v930_v30  ;;  %v10149_v61 = vsel %vm927_vm14, %v8819_v12, %v8823_v35  ;;  %v13947_v35 = vunpack.i.h.bf16 %v10102_v33 }
 0x103   :  { %v726_v57 = vsel %vm13989_vm13, %v8799_v16, %v8843_v52  ;;  %1348 = vmatpush.msra.mxu1 %v932_v9  ;;  %v727_v12 = vsel %vm13989_vm13, %v8843_v52, %v13951_v46 }
 0x104   :  { %1303 = vmatpush.msrb.mxu2 %v862_v14  ;;  %1280 = vmatpush.msra.mxu0 %v861_v23 }
 0x106   :  { %v10108_v18 = vpop.permute.xlu0 %8831  ;;  %v10110_v48 = vpop.permute.xlu1 %8836 }
 0x107   :  { %v8833_v45 = vunpack.i.l.bf16 %v10108_v18  ;;  %v13957_v22 = vunpack.i.h.bf16 %v10108_v18  ;;  %v13958_v0 = vunpack.i.l.bf16 %v10110_v48 }
 0x109   :  { %v794_v47 = vsel %vm792_vm12, %v8784_v10, %v8833_v45  ;;  %v10141_v10 = vpop.permute.xlu2 %8871  ;;  %v795_v32 = vsel %vm792_vm12, %v8833_v45, %v13957_v22 }
 0x10a   :  { %1281 = vmatpush.msra.mxu0 %v794_v47  ;;  %1304 = vmatpush.msrb.mxu2 %v795_v32  ;;  %v13949_v47 = vunpack.i.l.bf16 %v10102_v33  ;;  %v13952_v3 = vunpack.i.l.bf16 %v10141_v10 }
 0x10c   :  { %1282 = vmatpush.msra.mxu0 %v726_v57  ;;  %1305 = vmatpush.msrb.mxu2 %v727_v12 }
 0x10e   :  { %v10143_v16 = vpop.permute.xlu0 %8846  ;;  %v10145_v59 = vpop.permute.xlu1 %8851 }
 0x10f   :  { %v8853_v2 = vunpack.i.l.bf16 %v10145_v59  ;;  %v13950_v30 = vunpack.i.h.bf16 %v10143_v16  ;;  %v13948_v52 = vunpack.i.h.bf16 %v10145_v59  ;;  %v13955_v45 = vunpack.i.l.bf16 %v10143_v16 }
 0x111   :  { %v658_v6 = vsel %vm14276_vm15, %v8814_v37, %v8853_v2  ;;  %v13956_v37 = vunpack.i.h.bf16 %v10110_v48  ;;  %v10181_v23 = vpop.permute.xlu2 %8886  ;;  %v659_v9 = vsel %vm14276_vm15, %v8853_v2, %v13948_v52  ;;  %v729_v32 = vsel %vm13989_vm13, %v13955_v45, %v13950_v30 }
 0x112   :  { %1283 = vmatpush.msra.mxu0 %v658_v6  ;;  %1306 = vmatpush.msrb.mxu2 %v659_v9  ;;  %v661_v2 = vsel %vm14276_vm15, %v13949_v47, %v13947_v35 }
 0x113   :  { %v797_v42 = vsel %vm792_vm12, %v13958_v0, %v13956_v37 }
 0x114   :  { %1307 = vmatpush.msrb.mxu2 %v600_v19 }
 0x116   :  { %v10174_v17 = vpop.permute.xlu0 %8861  ;;  %v10176_v24 = vpop.permute.xlu1 %8866 }
 0x117   :  { %v13959_v14 = vunpack.i.l.bf16 %v10174_v17 }
 0x119   :  { %v864_v57 = vsel %vm13967_vm8, %v13961_v60, %v13959_v14  ;;  %v10240_v9 = vpop.permute.xlu2 %923 }
 0x11a   :  { %1349 = vmatpush.msra.mxu1 %v864_v57  ;;  %v10234_v57 = vld [vmem:[%s9591_s21 + $0x8] sm:$0xff]  ;;  %s9541_s21 = smov 123  }
 0x11b   :  { %7221 = vmatmul.msk.f32.gmra.mxu1 %vm13977_vm9, %v10234_v57 }
 0x11c   :  { %1350 = vmatpush.msra.mxu1 %v797_v42  ;;  %v602_v42 = vld [vmem:[%s9571_s5 + $0x20] sm:$0xff] }
 0x11e   :  { %v10227_v6 = vpop.permute.xlu0 %8876  ;;  %v10229_v12 = vpop.permute.xlu1 %8881  ;;  %1351 = vmatpush.msra.mxu1 %v729_v32  ;;  %v8874_v32 = vunpack.i.h.bf16 %v10141_v10 }
 0x11f   :  { %v8884_v30 = vunpack.i.h.bf16 %v10229_v12  ;;  %v8878_v34 = vunpack.i.l.bf16 %v10227_v6 }
 0x120   :  { %1352 = vmatpush.msra.mxu1 %v661_v2  ;;  %v1140_v52 = vsel %vm1131_vm3, %v13952_v3, %v8874_v32 }
 0x121   :  { %v10267_v47 = vpop.permute.xlu2 %788 }
 0x122   :  { %1353 = vmatpush.msra.mxu1 %v602_v42  ;;  %v599_v42 = vld [vmem:[%s9571_s5 + $0x8] sm:$0xff] }
 0x123   :  { %7228 = vmatmul.msk.f32.vlgmr.msra.gmra.mxu1 %vm13977_vm9, %v10185_v31  ;;  %1284 = vmatpush.msra.mxu0 %v599_v42 }
 0x124   :  { %1437 = vmatpush.msrb.mxu1 %v1140_v52  ;;  %v13963_v52 = vunpack.i.l.bf16 %v10229_v12 }
 0x126   :  { %v10251_v2 = vpop.permute.xlu0 %8891  ;;  %v1072_v42 = vsel %vm1063_vm6, %v13963_v52, %v8884_v30 }
 0x127   :  { %v10253_v35 = vpop.permute.xlu1 %8896  ;;  %v8894_v3 = vunpack.i.h.bf16 %v10251_v2  ;;  %v13962_v56 = vunpack.i.l.bf16 %v10251_v2  ;;  %1438 = vmatpush.msrb.mxu1 %v1072_v42 }
 0x129   :  { %v1004_v45 = vsel %vm995_vm7, %v13962_v56, %v8894_v3  ;;  %v10286_v37 = vpop.permute.xlu2 %8916 }
 0x12a   :  { %1439 = vmatpush.msrb.mxu1 %v1004_v45  ;;  %v8868_v45 = vunpack.i.l.bf16 %v10176_v24 }
 0x12b   :  { %7229 = vmatmul.msk.f32.gmra.mxu1 %vm13977_vm9, %v10234_v57 }
 0x12e   :  { %v10270_v46 = vpop.permute.xlu0 %8901 }
 0x12f   :  { %v10272_v32 = vpop.permute.xlu1 %8906  ;;  %v8904_v14 = vunpack.i.h.bf16 %v10270_v46 }
 0x131   :  { %v859_v5 = vpop.permute.xlu2 %858 }
 0x132   :  { %v868_v3 = vsel %vm13967_vm8, %v8904_v14, %v859_v5  ;;  %v1137_v5 = vsel %vm1131_vm3, %v8779_v1, %v8868_v45  ;;  %v14308_v1 = vunpack.i.h.bf16 %v10083_v7  ;;  %v14311_v7 = vunpack.i.l.bf16 %v10174_v17 }
 0x136   :  { %v10288_v22 = vpop.permute.xlu0 %8911 }
 0x137   :  { %v10290_v0 = vpop.permute.xlu1 %720 }
 0x13e   :  { %v10293_v60 = vpop.permute.xlu0 %652 }
 0x13f   :  { %v926_v30 = vpop.permute.xlu1 %925 }
 0x140   :  { %v936_v42 = vsel %vm927_vm14, %v10240_v9, %v926_v30  ;;  %v8888_v30 = vunpack.i.l.bf16 %v10181_v23 }
 0x141   :  { %1440 = vmatpush.msrb.mxu1 %v936_v42  ;;  %v8898_v42 = vunpack.i.l.bf16 %v10253_v35 }
 0x143   :  { %1441 = vmatpush.msrb.mxu1 %v868_v3  ;;  %v933_v13 = vsel %vm927_vm14, %v14308_v1, %v8898_v42  ;;  %v14313_v1 = vunpack.i.h.bf16 %v10108_v18  ;;  %v14315_v18 = vunpack.i.l.bf16 %v10143_v16 }
 0x146   :  { %v791_v19 = vpop.permute.xlu0 %790 }
 0x147   :  { %v801_v56 = vsel %vm792_vm12, %v10267_v47, %v791_v19 }
 0x148   :  { %v356_v52 = vpop.f32.mrf.mxu1  ;;  %1442 = vmatpush.msrb.mxu1 %v801_v56  ;;  %v1069_v56 = vsel %vm1063_vm6, %v8794_v62, %v8878_v34 }
 0x149   :  { %v365_v49 = vadd.f32 %v9992_v50, %v356_v52  ;;  %v8864_v52 = vunpack.i.h.bf16 %v10174_v17 }
 0x14b   :  { %7201 = vmatmul.msk.f32.vlgmr.msra.gmra.mxu3 %vm488_vm2, %v365_v49  ;;  %7219 = vmatmul.msk.f32.vlgmr.msrb.gmra.mxu0 %vm488_vm2, %v365_v49  ;;  %v14307_v49 = vunpack.i.h.bf16 %v10063_v40  ;;  %v14309_v40 = vunpack.i.h.bf16 %v10045_v26  ;;  %v865_v19 = vsel %vm13967_vm8, %v14311_v7, %v8864_v52  ;;  %v14317_v7 = vunpack.i.h.bf16 %v10143_v16 }
 0x14c   :  { %1322 = vmatpush.msra.mxu3 %v10061_v38  ;;  %1368 = vmatpush.msrb.mxu0 %v1137_v5  ;;  %v8908_v38 = vunpack.i.l.bf16 %v10272_v32  ;;  %v723_v5 = vpop.permute.xlu1 %722  ;;  %v14320_v16 = vunpack.i.h.bf16 %v10102_v33 }
 0x14d   :  { %v1001_v63 = vsel %vm995_vm7, %v14307_v49, %v8888_v30  ;;  %v8879_v49 = vunpack.i.h.bf16 %v10227_v6 }
 0x14e   :  { %1323 = vmatpush.msra.mxu3 %v10086_v11  ;;  %1369 = vmatpush.msrb.mxu0 %v1069_v56  ;;  %v8913_v11 = vunpack.i.l.bf16 %v10288_v22  ;;  %v8869_v56 = vunpack.i.h.bf16 %v10176_v24  ;;  %v8889_v24 = vunpack.i.h.bf16 %v10181_v23 }
 0x150   :  { %1324 = vmatpush.msra.mxu3 %v10113_v39  ;;  %1370 = vmatpush.msrb.mxu0 %v1001_v63  ;;  %v14310_v39 = vunpack.i.l.bf16 %v10045_v26  ;;  %v8918_v63 = vunpack.i.l.bf16 %v10286_v37  ;;  %v14312_v26 = vunpack.i.l.bf16 %v10110_v48  ;;  %v1138_v6 = vsel %vm1131_vm3, %v8868_v45, %v8869_v56 }
 0x151   :  { %v730_v23 = vsel %vm13989_vm13, %v14317_v7, %v8913_v11 }
 0x152   :  { %1325 = vmatpush.msra.mxu3 %v10149_v61  ;;  %1371 = vmatpush.msrb.mxu0 %v933_v13  ;;  %v336_v62 = vpop.f32.mrf.mxu0  ;;  %v863_v3 = vsel %vm13967_vm8, %v14310_v39, %v14309_v40  ;;  %v796_v13 = vsel %vm792_vm12, %v14313_v1, %v14312_v26  ;;  %v14314_v40 = vunpack.i.h.bf16 %v10110_v48  ;;  %v655_v39 = vpop.permute.xlu2 %654  ;;  %v662_v1 = vsel %vm14276_vm15, %v14320_v16, %v8918_v63 }
 0x153   :  { %7222 = vmatmul.msk.f32.vlgmr.msra.gmra.mxu0 %vm13977_vm9, %v10185_v31  ;;  %v364_v61 = vadd.f32 %v9992_v50, %v336_v62  ;;  %v733_v62 = vsel %vm13989_vm13, %v10290_v0, %v723_v5  ;;  %v665_v45 = vsel %vm14276_vm15, %v10293_v60, %v655_v39  ;;  %v14318_v5 = vunpack.i.l.bf16 %v10102_v33  ;;  %v606_v39 = vld [vmem:[%s9571_s5 + $0x40] sm:$0xff] }
 0x154   :  { %1326 = vmatpush.msra.mxu3 %v863_v3  ;;  %1372 = vmatpush.msrb.mxu0 %v865_v19  ;;  %v798_v50 = vsel %vm792_vm12, %v14314_v40, %v8908_v38  ;;  %v14316_v3 = vunpack.i.h.bf16 %v10069_v54  ;;  %v8899_v19 = vunpack.i.h.bf16 %v10253_v35  ;;  %v14319_v54 = vunpack.i.h.bf16 %v10145_v59  ;;  %v603_v40 = vld [vmem:[%s9571_s5 + $0x28] sm:$0xff] }
 0x155   :  { %508 = vmatmul.f32.vlgmr.msra.gmra.mxu2 %v364_v61  ;;  %548 = vmatmul.f32.vlgmr.msrb.gmra.mxu3 %v364_v61  ;;  %v1070_v61 = vsel %vm1063_vm6, %v8878_v34, %v8879_v49  ;;  %v8903_v35 = vunpack.i.l.bf16 %v10270_v46  ;;  %v1002_v34 = vsel %vm995_vm7, %v8888_v30, %v8889_v24  ;;  %v8909_v33 = vunpack.i.h.bf16 %v10272_v32 }
 0x156   :  { %1327 = vmatpush.msra.mxu3 %v796_v13  ;;  %1373 = vmatpush.msrb.mxu0 %v798_v50  ;;  %v728_v48 = vsel %vm13989_vm13, %v14316_v3, %v14315_v18  ;;  %v660_v26 = vsel %vm14276_vm15, %v14319_v54, %v14318_v5  ;;  %v601_v13 = vld [vmem:[%s9571_s5 + $0x18] sm:$0xff]  ;;  %v934_v50 = vsel %vm927_vm14, %v8898_v42, %v8899_v19  ;;  %v8914_v59 = vunpack.i.h.bf16 %v10288_v22 }
 0x157   :  { %1391 = vmatpush.msra.mxu2 %v1138_v6  ;;  %1443 = vmatpush.msrb.mxu1 %v733_v62  ;;  %v14321_v6 = vunpack.i.l.bf16 %v10141_v10  ;;  %v8919_v30 = vunpack.i.h.bf16 %v10286_v37  ;;  %v866_v22 = vsel %vm13967_vm8, %v8864_v52, %v8903_v35  ;;  %v14322_v10 = vunpack.i.l.bf16 %v10229_v12  ;;  %v604_v52 = vld [vmem:[%s9571_s5 + $0x30] sm:$0xff] }
 0x158   :  { %1328 = vmatpush.msra.mxu3 %v728_v48  ;;  %1374 = vmatpush.msrb.mxu0 %v730_v23  ;;  %v799_v42 = vsel %vm792_vm12, %v8908_v38, %v8909_v33  ;;  %v14323_v37 = vunpack.i.l.bf16 %v10251_v2  ;;  %v731_v18 = vsel %vm13989_vm13, %v8913_v11, %v8914_v59  ;;  %v935_v17 = vsel %vm927_vm14, %v8899_v19, %v10240_v9  ;;  %v605_v38 = vld [vmem:[%s9571_s5 + $0x38] sm:$0xff]  ;;  %s9538_s5 = smov 117  }
 0x159   :  { %1392 = vmatpush.msra.mxu2 %v1070_v61  ;;  %1444 = vmatpush.msrb.mxu1 %v665_v45  ;;  %v1139_v62 = vsel %vm1131_vm3, %v8869_v56, %v14321_v6  ;;  %v1071_v32 = vsel %vm1063_vm6, %v8879_v49, %v14322_v10  ;;  %v663_v12 = vsel %vm14276_vm15, %v8918_v63, %v8919_v30  ;;  %v4291_v45 = vld [vmem:[%s9606_s3] sm:$0xf]  ;;  %vm13968_vm3 = vcmask 1040384   ;;  %s9544_s3 = smov 109  }
 0x15a   :  { %1329 = vmatpush.msra.mxu3 %v660_v26  ;;  %1375 = vmatpush.msrb.mxu0 %v662_v1  ;;  %v1003_v56 = vsel %vm995_vm7, %v8889_v24, %v14323_v37  ;;  %v867_v2 = vsel %vm13967_vm8, %v8903_v35, %v8904_v14  ;;  %v800_v9 = vsel %vm792_vm12, %v8909_v33, %v10267_v47  ;;  %v14324_v26 = vlaneseq }
 0x15b   :  { %1393 = vmatpush.msra.mxu2 %v1002_v34  ;;  %7223 = vmatmul.msk.f32.gmra.mxu0 %vm13977_vm9, %v10234_v57  ;;  %v732_v46 = vsel %vm13989_vm13, %v8914_v59, %v10290_v0  ;;  %v664_v14 = vsel %vm14276_vm15, %v8919_v30, %v10293_v60  ;;  %v14325_v16 = vmov 0  ;;  %v595_v30 = vld [vmem:[%s9596_s25] sm:$0xff] }
 0x15c   :  { %1330 = vmatpush.msra.mxu3 %v601_v13  ;;  %1376 = vmatpush.msrb.mxu0 %v603_v40  ;;  %vm10463_vm6 = vcmp.lt.s32.totalorder %v14324_v26, 256 }
 0x15d   :  { %1394 = vmatpush.msra.mxu2 %v934_v50  ;;  %7226 = vmatmul.msk.f32.vlgmr.msra.gmra.mxu3 %vm13977_vm9, %v10185_v31  ;;  %v14326_v16 = vsel %vm10463_vm6, 4294967295, %v14325_v16 }
 0x15e   :  { %1414 = vmatpush.msrb.mxu3 %v1139_v62  ;;  %7224 = vmatmul.msk.f32.vlgmr.msrb.gmra.mxu2 %vm13977_vm9, %v10185_v31  ;;  %14327 = vst [vmem:[#allocation39_spill] sm:$0xff] %v14326_v16  ;;  %v10756_v16 = vadd.s32 496, %v9854_v4 }
 0x15f   :  { %1395 = vmatpush.msra.mxu2 %v866_v22  ;;  %1445 = vmatpush.msrb.mxu1 %v606_v39 }
 0x160   :  { %1415 = vmatpush.msrb.mxu3 %v1071_v32  ;;  %7236 = vmatmul.msk.f32.vlgmr.msrb.gmra.mxu1 %vm13977_vm9, %v10185_v31 }
 0x161   :  { %1396 = vmatpush.msra.mxu2 %v799_v42 }
 0x162   :  { %1416 = vmatpush.msrb.mxu3 %v1003_v56 }
 0x163   :  { %1397 = vmatpush.msra.mxu2 %v731_v18  ;;  %7230 = vmatmul.msk.f32.vlgmr.msrb.gmra.mxu0 %vm13977_vm9, %v10185_v31 }
 0x164   :  { %1417 = vmatpush.msrb.mxu3 %v935_v17 }
 0x165   :  { %1398 = vmatpush.msra.mxu2 %v663_v12  ;;  %7227 = vmatmul.msk.f32.gmra.mxu3 %vm13977_vm9, %v10234_v57 }
 0x166   :  { %1418 = vmatpush.msrb.mxu3 %v867_v2  ;;  %7225 = vmatmul.msk.f32.gmra.mxu2 %vm13977_vm9, %v10234_v57 }
 0x167   :  { %1399 = vmatpush.msra.mxu2 %v604_v52 }
 0x168   :  { %1419 = vmatpush.msrb.mxu3 %v800_v9  ;;  %7237 = vmatmul.msk.f32.gmra.mxu1 %vm13977_vm9, %v10234_v57 }
 0x16a   :  { %1420 = vmatpush.msrb.mxu3 %v732_v46 }
 0x16b   :  { %7231 = vmatmul.msk.f32.gmra.mxu0 %vm13977_vm9, %v10234_v57 }
 0x16c   :  { %1421 = vmatpush.msrb.mxu3 %v664_v14 }
 0x16e   :  { %1422 = vmatpush.msrb.mxu3 %v605_v38  ;;  %7232 = vmatmul.msk.f32.vlgmr.msra.gmra.mxu2 %vm13977_vm9, %v10185_v31 }
 0x16f   :  { %7234 = vmatmul.msk.f32.vlgmr.msrb.gmra.mxu3 %vm13977_vm9, %v10185_v31 }
 0x176   :  { %7233 = vmatmul.msk.f32.gmra.mxu2 %vm13977_vm9, %v10234_v57 }
 0x177   :  { %7235 = vmatmul.msk.f32.gmra.mxu3 %vm13977_vm9, %v10234_v57 }
 0x179   :  { %v1263_v60 = vpop.f32.mrf.mxu1 }
 0x17a   :  { %1471 = vrot.lane.b32.xlu1 %v1263_v60, %s9536_s13 }
 0x198   :  { %v10438_v0 = vpop.f32.mrf.mxu1 }
 0x199   :  { %1489 = vrot.lane.b32.xlu0 %v10438_v0, %s9536_s13 }
 0x1a0   :  { %v10442_v47 = vpop.f32.mrf.mxu1 }
 0x1a1   :  { %1479 = vrot.lane.b32.xlu0 %v10442_v47, %s9536_s13 }
 0x1a8   :  { %v10446_v31 = vpop.f32.mrf.mxu1 }
 0x1a9   :  { %1497 = vrot.lane.b32.xlu2 %v10446_v31, %s9536_s13 }
 0x1c8   :  { %v569_v57 = vpop.f32.mrf.mxu0 }
 0x1ce   :  { %v529_v11 = vpop.f32.mrf.mxu3 }
 0x1d0   :  { %v1286_v49 = vpop.f32.mrf.mxu0 }
 0x1d1   :  { %1473 = vrot.lane.b32.xlu0 %v1286_v49, %s9536_s13 }
 0x1d8   :  { %v509_v63 = vpop.f32.mrf.mxu2  ;;  %v549_v24 = vpop.f32.mrf.mxu3 }
 0x1d9   :  { %v530_v3 = vadd.f32 %v529_v11, %v509_v63  ;;  %v570_v48 = vadd.f32 %v569_v57, %v549_v24  ;;  %v10451_v7 = vpop.f32.mrf.mxu0  ;;  %v596_v11 = vld [vmem:[%s9596_s25 + $0x8] sm:$0xff]  ;;  %s9542_s25 = smov 97  }
 0x1da   :  { %1491 = vrot.lane.b32.xlu2 %v10451_v7, %s9536_s13 }
 0x1db   :  { %585 = vst [vmem:[#allocation1] sm:$0xff] %v530_v3  ;;  %v574_v23 = vrot.slane %v570_v48, 7 }
 0x1dc   :  { %586 = vst [vmem:[#allocation1 + $0x9] sm:$0xff] %v570_v48 }
 0x1dd   :  { %v576_v54 = vsel %vm13968_vm3, %v530_v3, %v574_v23  ;;  %v10485_v50 = vpop.f32.mrf.mxu1 }
 0x1de   :  { %583 = vst.msk [vmem:[#allocation5 + $0x1] ss:$8 sm:$0x3] %vm10463_vm6, %v576_v54 }
 0x1e0   :  { %v10456_v61 = vpop.f32.mrf.mxu3 }
 0x1e1   :  { %v1309_v19 = vpop.f32.mrf.mxu2  ;;  %v10471_v1 = vpop.f32.mrf.mxu0 }
 0x1e2   :  { %1477 = vrot.lane.b32.xlu2 %v10456_v61, %s9536_s13  ;;  %1475 = vrot.lane.b32.xlu1 %v1309_v19, %s9536_s13 }
 0x1e3   :  { %v588_v5 = vld [vmem:[#allocation1 + $0x1] ss:$9 sm:$0xff] }
 0x1e4   :  { %4518 = vst [vmem:[#allocation1] ss:$4 sm:$0xff] %v4291_v45 }
 0x1e5   :  { %591 = vst.msk [vmem:[#allocation5 + $0x5] ss:$8 sm:$0x3] %vm10463_vm6, %v588_v5  ;;  %v10496_v62 = vpop.f32.mrf.mxu1 }
 0x1e8   :  { %v10473_v40 = vpop.f32.mrf.mxu3 }
 0x1e9   :  { %v1312_v13 = vpop.f32.mrf.mxu2  ;;  %v1381_v33 = vpop.f32.mrf.mxu0 }
 0x1ea   :  { %1481 = vrot.lane.b32.xlu1 %v10471_v1, %s9536_s13  ;;  %1493 = vrot.lane.b32.xlu0 %v1312_v13, %s9536_s13 }
 0x1ec   :  { %v1472_v32 = vpop.permute.xlu1 %1471 }
 0x1f1   :  { %v1401_v35 = vpop.f32.mrf.mxu2 }
 0x1f2   :  { %v10478_v34 = vpop.f32.mrf.mxu3  ;;  %1495 = vrot.lane.b32.xlu1 %v10473_v40, %s9536_s13  ;;  %1483 = vrot.lane.b32.xlu2 %v1401_v35, %s9536_s13 }
 0x1f3   :  { %1485 = vrot.lane.b32.xlu0 %v10478_v34, %s9536_s13 }
 0x1f9   :  { %v10487_v59 = vpop.f32.mrf.mxu2 }
 0x1fa   :  { %1487 = vrot.lane.b32.xlu1 %v10485_v50, %s9536_s13  ;;  %1499 = vrot.lane.b32.xlu2 %v1381_v33, %s9536_s13  ;;  %v10494_v6 = vpop.f32.mrf.mxu3 }
 0x1fb   :  { %1501 = vrot.lane.b32.xlu0 %v10487_v59, %s9536_s13 }
 0x202   :  { %1503 = vrot.lane.b32.xlu1 %v10494_v6, %s9536_s13  ;;  %1505 = vrot.lane.b32.xlu2 %v10496_v62, %s9536_s13 }
 0x203   :  { %1667 = vperm.xlu0 %8920, %v595_v30   ;;  %v10503_v10 = vpop.permute.xlu2 %1497 }
 0x20b   :  { %v1490_v39 = vpop.permute.xlu0 %1489 }
 0x213   :  { %v1480_v22 = vpop.permute.xlu0 %1479 }
 0x234   :  { %v1492_v18 = vpop.permute.xlu2 %1491 }
 0x235   :  { %v1515_v17 = vsel %vm14276_vm15, %v1490_v39, %v1492_v18 }
 0x236   :  { %v10512_v12 = vmax.f32 %v10438_v0, %v1515_v17  ;;  %v10592_v17 = vadd.s32 368, %v9854_v4 }
 0x23c   :  { %v1478_v2 = vpop.permute.xlu2 %1477 }
 0x243   :  { %v1474_v42 = vpop.permute.xlu0 %1473 }
 0x244   :  { %v1507_v37 = vsel %vm14276_vm15, %v1472_v32, %v1474_v42 }
 0x245   :  { %v10506_v56 = vmax.f32 %v1263_v60, %v1507_v37  ;;  %v10569_v37 = vld [vmem:[%s9601_s29] sm:$0xf] }
 0x247   :  { %1577 = vrot.lane.b32.xlu1 %v10506_v56, %s9534_s7 }
 0x24c   :  { %v1484_v24 = vpop.permute.xlu2 %1483 }
 0x24f   :  { %1595 = vrot.lane.b32.xlu1 %v10512_v12, %s9534_s7 }
 0x254   :  { %v1476_v52 = vpop.permute.xlu1 %1475  ;;  %v10552_v54 = vpop.permute.xlu2 %1499 }
 0x255   :  { %v1508_v9 = vsel %vm14276_vm15, %v1474_v42, %v1476_v52  ;;  %v1509_v46 = vsel %vm14276_vm15, %v1476_v52, %v1478_v2  ;;  %v10598_v52 = vadd.s32 360, %v9854_v4 }
 0x256   :  { %v10518_v14 = vmax.f32 %v1309_v19, %v1509_v46  ;;  %v10520_v38 = vmax.f32 %v1286_v49, %v1508_v9  ;;  %v1510_v49 = vsel %vm14276_vm15, %v1478_v2, %v1480_v22  ;;  %v10595_v2 = vadd.s32 232, %v9854_v4 }
 0x257   :  { %14332 = vst [vmem:[#allocation44_spill] sm:$0xff] %v10598_v52  ;;  %v10607_v9 = vadd.s32 224, %v9854_v4  ;;  %v14334_v46 = vmov 1.0  }
 0x258   :  { %1581 = vrot.lane.b32.xlu1 %v10518_v14, %s9534_s7  ;;  %1579 = vrot.lane.b32.xlu0 %v10520_v38, %s9534_s7  ;;  %14331 = vst [vmem:[#allocation43_spill] sm:$0xff] %v10595_v2 }
 0x259   :  { %14333 = vst [vmem:[#allocation45_spill] sm:$0xff] %v10607_v9 }
 0x25c   :  { %v1482_v60 = vpop.permute.xlu1 %1481  ;;  %v1494_v0 = vpop.permute.xlu0 %1493 }
 0x25d   :  { %v1516_v57 = vsel %vm14276_vm15, %v1492_v18, %v1494_v0  ;;  %v1511_v26 = vsel %vm14276_vm15, %v1480_v22, %v1482_v60  ;;  %v10576_v22 = vadd.s32 248, %v9854_v4  ;;  %v10579_v18 = vperm.slane %v10569_v37, 0 }
 0x25e   :  { %v10529_v63 = vmax.f32 %v10451_v7, %v1516_v57  ;;  %v10542_v7 = vmax.f32 %v10456_v61, %v1510_v49  ;;  %v10561_v30 = vmax.f32 %v10442_v47, %v1511_v26  ;;  %v10582_v47 = vadd.s32 376, %v9854_v4 }
 0x25f   :  { %14329 = vst [vmem:[#allocation41_spill] sm:$0xff] %v10576_v22  ;;  %vm1940_vm7 = vcmp.eq.s32.totalorder %v10576_v22, %v10579_v18  ;;  %vm2000_vm1 = vcmp.eq.s32.totalorder %v10592_v17, %v10579_v18  ;;  %vm1932_vm2 = vcmp.eq.s32.totalorder %v10595_v2, %v10579_v18  ;;  %vm1996_vm4 = vcmp.eq.s32.totalorder %v10598_v52, %v10579_v18 }
 0x260   :  { %1597 = vrot.lane.b32.xlu2 %v10529_v63, %s9534_s7  ;;  %1672 = vperm.xlu0 %8920, %v596_v11   ;;  %vm2004_vm10 = vcmp.eq.s32.totalorder %v10582_v47, %v10579_v18  ;;  %v10623_v11 = vadd.s32 216, %v9854_v4  ;;  %vm1864_vm3 = vcmp.eq.s32.totalorder %v9886_v21, %v10579_v18 }
 0x261   :  { %7798 = vmatpush.msk.msrb.mxu2 %vm1940_vm7, %v14334_v46  ;;  %7814 = vmatpush.msk.msra.mxu3 %vm2004_vm10, %v14334_v46  ;;  %vm1876_vm7 = vcmp.eq.s32.totalorder %v9864_v8, %v10579_v18  ;;  %vm1928_vm10 = vcmp.eq.s32.totalorder %v10607_v9, %v10579_v18 }
 0x262   :  { %14336 = vst [vmem:[#allocation47_spill] sm:$0xff] %v10623_v11  ;;  %7782 = vmatpush.msk.msra.mxu0 %vm1876_vm7, %v14334_v46  ;;  %vm1868_vm7 = vcmp.eq.s32.totalorder %v9883_v20, %v10579_v18 }
 0x263   :  { %7815 = vmatpush.msk.msra.mxu3 %vm2000_vm1, %v14334_v46  ;;  %vm1872_vm1 = vcmp.eq.s32.totalorder %v9874_v15, %v10579_v18 }
 0x264   :  { %v1496_v3 = vpop.permute.xlu1 %1495  ;;  %7783 = vmatpush.msk.msra.mxu0 %vm1872_vm1, %v14334_v46 }
 0x265   :  { %v10534_v48 = vpop.permute.xlu0 %1485  ;;  %v1517_v23 = vsel %vm14276_vm15, %v1494_v0, %v1496_v3  ;;  %v10616_v0 = vpop.permute.xlu2 %1505  ;;  %7816 = vmatpush.msk.msra.mxu3 %vm1996_vm4, %v14334_v46 }
 0x266   :  { %v1513_v45 = vsel %vm14276_vm15, %v1484_v24, %v10534_v48  ;;  %v10539_v19 = vmax.f32 %v1312_v13, %v1517_v23  ;;  %v1512_v13 = vsel %vm14276_vm15, %v1482_v60, %v1484_v24  ;;  %v10614_v60 = vadd.s32 352, %v9854_v4  ;;  %7784 = vmatpush.msk.msra.mxu0 %vm1868_vm7, %v14334_v46 }
 0x267   :  { %v10544_v5 = vmax.f32 %v1401_v35, %v1513_v45  ;;  %v10564_v32 = vmax.f32 %v10471_v1, %v1512_v13  ;;  %v10585_v1 = vadd.s32 240, %v9854_v4  ;;  %v10636_v23 = vadd.s32 344, %v9854_v4 }
 0x268   :  { %1599 = vrot.lane.b32.xlu1 %v10539_v19, %s9534_s7  ;;  %1583 = vrot.lane.b32.xlu2 %v10542_v7, %s9534_s7  ;;  %14335 = vst [vmem:[#allocation46_spill] sm:$0xff] %v10614_v60  ;;  %vm1856_vm7 = vcmp.eq.s32.totalorder %v9912_v27, %v10579_v18 }
 0x269   :  { %1589 = vrot.lane.b32.xlu0 %v10544_v5, %s9534_s7  ;;  %14330 = vst [vmem:[#allocation42_spill] sm:$0xff] %v10585_v1  ;;  %vm1936_vm11 = vcmp.eq.s32.totalorder %v10585_v1, %v10579_v18  ;;  %vm1988_vm4 = vcmp.eq.s32.totalorder %v10636_v23, %v10579_v18  ;;  %7785 = vmatpush.msk.msra.mxu0 %vm1864_vm3, %v14334_v46 }
 0x26a   :  { %7799 = vmatpush.msk.msrb.mxu2 %vm1936_vm11, %v14334_v46  ;;  %14338 = vst [vmem:[#allocation49_spill] sm:$0xff] %v10636_v23  ;;  %vm1992_vm11 = vcmp.eq.s32.totalorder %v10614_v60, %v10579_v18  ;;  %v10856_v23 = vadd.s32 136, %v9854_v4  ;;  %v10859_v60 = vadd.s32 464, %v9854_v4 }
 0x26b   :  { %7817 = vmatpush.msk.msra.mxu3 %vm1992_vm11, %v14334_v46 }
 0x26c   :  { %v10556_v39 = vpop.permute.xlu1 %1487  ;;  %7800 = vmatpush.msk.msrb.mxu2 %vm1932_vm2, %v14334_v46  ;;  %vm1924_vm2 = vcmp.eq.s32.totalorder %v10623_v11, %v10579_v18  ;;  %14365 = vst [vmem:[#allocation76_spill] sm:$0xff] %v10856_v23 }
 0x26d   :  { %v1502_v61 = vpop.permute.xlu0 %1501  ;;  %v1514_v13 = vsel %vm14276_vm15, %v10534_v48, %v10556_v39  ;;  %7818 = vmatpush.msk.msra.mxu3 %vm1988_vm4, %v14334_v46  ;;  %v10698_v48 = vadd.s32 320, %v9854_v4  ;;  %14366 = vst [vmem:[#allocation77_spill] sm:$0xff] %v10859_v60 }
 0x26e   :  { %v1520_v35 = vsel %vm14276_vm15, %v10552_v54, %v1502_v61  ;;  %7801 = vmatpush.msk.msrb.mxu2 %vm1928_vm10, %v14334_v46 }
 0x26f   :  { %v10566_v42 = vmax.f32 %v1381_v33, %v1520_v35  ;;  %v1518_v33 = vsel %vm14276_vm15, %v1496_v3, %v10503_v10  ;;  %v10686_v35 = vadd.s32 192, %v9854_v4  ;;  %14346 = vst [vmem:[#allocation57_spill] sm:$0xff] %v10698_v48  ;;  %vm1976_vm3 = vcmp.eq.s32.totalorder %v10698_v48, %v10579_v18 }
 0x270   :  { %1585 = vrot.lane.b32.xlu1 %v10561_v30, %s9534_s7  ;;  %1587 = vrot.lane.b32.xlu2 %v10564_v32, %s9534_s7  ;;  %v10631_v3 = vmax.f32 %v10473_v40, %v1518_v33  ;;  %v10648_v40 = vadd.s32 208, %v9854_v4  ;;  %v10701_v33 = vadd.s32 184, %v9854_v4  ;;  %v10800_v48 = vadd.s32 152, %v9854_v4 }
 0x271   :  { %14328 = vst [vmem:[#allocation40_spill] sm:$0xff] %v10566_v42  ;;  %1605 = vrot.lane.b32.xlu0 %v10566_v42, %s9534_s7  ;;  %7802 = vmatpush.msk.msrb.mxu2 %vm1924_vm2, %v14334_v46  ;;  %vm1912_vm2 = vcmp.eq.s32.totalorder %v10686_v35, %v10579_v18 }
 0x272   :  { %14337 = vst [vmem:[#allocation48_spill] sm:$0xff] %v10631_v3  ;;  %vm1920_vm8 = vcmp.eq.s32.totalorder %v10648_v40, %v10579_v18  ;;  %vm1908_vm4 = vcmp.eq.s32.totalorder %v10701_v33, %v10579_v18 }
 0x273   :  { %14341 = vst [vmem:[#allocation52_spill] sm:$0xff] %v10648_v40  ;;  %7803 = vmatpush.msk.msrb.mxu2 %vm1920_vm8, %v14334_v46  ;;  %vm1860_vm8 = vcmp.eq.s32.totalorder %v9902_v25, %v10579_v18 }
 0x274   :  { %v1504_v57 = vpop.permute.xlu1 %1503  ;;  %14345 = vst [vmem:[#allocation56_spill] sm:$0xff] %v10686_v35  ;;  %7786 = vmatpush.msk.msra.mxu0 %vm1860_vm8, %v14334_v46  ;;  %vm2064_vm8 = vcmp.eq.s32.totalorder %v10756_v16, %v10579_v18 }
 0x275   :  { %v1521_v24 = vsel %vm14276_vm15, %v1502_v61, %v1504_v57  ;;  %v1522_v49 = vsel %vm14276_vm15, %v1504_v57, %v10616_v0  ;;  %v10683_v61 = vadd.s32 328, %v9854_v4  ;;  %14347 = vst [vmem:[#allocation58_spill] sm:$0xff] %v10701_v33  ;;  %v10705_v57 = vmax.f32 %v10485_v50, %v10556_v39 }
 0x276   :  { %v10639_v45 = vmax.f32 %v10487_v59, %v1521_v24  ;;  %v10642_v26 = vmax.f32 %v10494_v6, %v1522_v49  ;;  %v10655_v59 = vadd.s32 336, %v9854_v4  ;;  %v10666_v6 = vadd.s32 200, %v9854_v4  ;;  %7787 = vmatpush.msk.msra.mxu0 %vm1856_vm7, %v14334_v46  ;;  %14359 = vst [vmem:[#allocation70_spill] sm:$0xff] %v10800_v48 }
 0x277   :  { %14344 = vst [vmem:[#allocation55_spill] sm:$0xff] %v10683_v61  ;;  %v10708_v24 = vmax.f32 %v10478_v34, %v1514_v13  ;;  %vm1980_vm1 = vcmp.eq.s32.totalorder %v10683_v61, %v10579_v18  ;;  %v10718_v49 = vadd.s32 312, %v9854_v4  ;;  %v10721_v50 = vadd.s32 176, %v9854_v4 }
 0x278   :  { %14339 = vst [vmem:[#allocation50_spill] sm:$0xff] %v10639_v45  ;;  %1601 = vrot.lane.b32.xlu2 %v10631_v3, %s9534_s7  ;;  %1607 = vrot.lane.b32.xlu1 %v10639_v45, %s9534_s7  ;;  %vm1984_vm10 = vcmp.eq.s32.totalorder %v10655_v59, %v10579_v18  ;;  %vm1916_vm11 = vcmp.eq.s32.totalorder %v10666_v6, %v10579_v18  ;;  %v10730_v39 = vadd.s32 504, %v9854_v4  ;;  %v10751_v13 = vadd.s32 296, %v9854_v4 }
 0x279   :  { %14340 = vst [vmem:[#allocation51_spill] sm:$0xff] %v10642_v26  ;;  %1609 = vrot.lane.b32.xlu0 %v10642_v26, %s9534_s7  ;;  %7819 = vmatpush.msk.msra.mxu3 %vm1984_vm10, %v14334_v46  ;;  %v1519_v34 = vsel %vm14276_vm15, %v10503_v10, %v10552_v54  ;;  %v10741_v10 = vadd.s32 304, %v9854_v4  ;;  %v10744_v54 = vadd.s32 168, %v9854_v4  ;;  %v10770_v61 = vadd.s32 160, %v9854_v4 }
 0x27a   :  { %14342 = vst [vmem:[#allocation53_spill] sm:$0xff] %v10655_v59  ;;  %7804 = vmatpush.msk.msrb.mxu2 %vm1916_vm11, %v14334_v46  ;;  %vm2068_vm10 = vcmp.eq.s32.totalorder %v10730_v39, %v10579_v18  ;;  %v10759_v26 = vmax.f32 %v10446_v31, %v1519_v34  ;;  %vm1972_vm11 = vcmp.eq.s32.totalorder %v10718_v49, %v10579_v18  ;;  %v10784_v31 = vadd.s32 288, %v9854_v4 }
 0x27b   :  { %14343 = vst [vmem:[#allocation54_spill] sm:$0xff] %v10666_v6  ;;  %7820 = vmatpush.msk.msra.mxu3 %vm1980_vm1, %v14334_v46  ;;  %vm1904_vm1 = vcmp.eq.s32.totalorder %v10721_v50, %v10579_v18  ;;  %7830 = vmatpush.msk.msra.mxu1 %vm2068_vm10, %v14334_v46  ;;  %v10789_v34 = vadd.s32 488, %v9854_v4  ;;  %vm1964_vm7 = vcmp.eq.s32.totalorder %v10751_v13, %v10579_v18  ;;  %v10831_v59 = vadd.s32 472, %v9854_v4 }
 0x27c   :  { %14348 = vst [vmem:[#allocation59_spill] sm:$0xff] %v10705_v57  ;;  %7805 = vmatpush.msk.msrb.mxu2 %vm1912_vm2, %v14334_v46  ;;  %vm1852_vm2 = vcmp.eq.s32.totalorder %v9915_v28, %v10579_v18  ;;  %vm1848_vm10 = vcmp.eq.s32.totalorder %v9920_v29, %v10579_v18  ;;  %vm1896_vm9 = vcmp.eq.s32.totalorder %v10770_v61, %v10579_v18  ;;  %v10917_v3 = vadd.s32 752, %v9854_v4 }
 0x27d   :  { %14349 = vst [vmem:[#allocation60_spill] sm:$0xff] %v10708_v24  ;;  %7821 = vmatpush.msk.msra.mxu3 %vm1976_vm3, %v14334_v46  ;;  %vm1968_vm3 = vcmp.eq.s32.totalorder %v10741_v10, %v10579_v18  ;;  %7831 = vmatpush.msk.msra.mxu1 %vm2064_vm8, %v14334_v46  ;;  %vm2060_vm8 = vcmp.eq.s32.totalorder %v10789_v34, %v10579_v18 }
 0x27e   :  { %14350 = vst [vmem:[#allocation61_spill] sm:$0xff] %v10718_v49  ;;  %7806 = vmatpush.msk.msrb.mxu2 %vm1908_vm4, %v14334_v46  ;;  %vm1900_vm4 = vcmp.eq.s32.totalorder %v10744_v54, %v10579_v18  ;;  %7788 = vmatpush.msk.msra.mxu0 %vm1852_vm2, %v14334_v46  ;;  %v10824_v49 = vadd.s32 280, %v9854_v4  ;;  %v10921_v45 = vmax.f32 %v10496_v62, %v10616_v0  ;;  %v10951_v62 = vadd.s32 880, %v9854_v4 }
 0x27f   :  { %14351 = vst [vmem:[#allocation62_spill] sm:$0xff] %v10721_v50  ;;  %7822 = vmatpush.msk.msra.mxu3 %vm1972_vm11, %v14334_v46  ;;  %7832 = vmatpush.msk.msra.mxu1 %vm2060_vm8, %v14334_v46  ;;  %vm1960_vm11 = vcmp.eq.s32.totalorder %v10784_v31, %v10579_v18  ;;  %v10954_v0 = vadd.s32 744, %v9854_v4 }
 0x280   :  { %1591 = vrot.lane.b32.xlu2 %v10708_v24, %s9534_s7  ;;  %1593 = vrot.lane.b32.xlu1 %v10705_v57, %s9534_s7  ;;  %14352 = vst [vmem:[#allocation63_spill] sm:$0xff] %v10741_v10  ;;  %v10804_v57 = vadd.s32 480, %v9854_v4  ;;  %v10827_v24 = vadd.s32 144, %v9854_v4  ;;  %v10853_v10 = vadd.s32 272, %v9854_v4  ;;  %vm1956_vm8 = vcmp.eq.s32.totalorder %v10824_v49, %v10579_v18 }
 0x281   :  { %14353 = vst [vmem:[#allocation64_spill] sm:$0xff] %v10744_v54  ;;  %7807 = vmatpush.msk.msrb.mxu2 %vm1904_vm1, %v14334_v46  ;;  %7823 = vmatpush.msk.msra.mxu3 %vm1968_vm3, %v14334_v46  ;;  %vm1844_vm1 = vcmp.eq.s32.totalorder %v9945_v36, %v10579_v18  ;;  %vm1892_vm3 = vcmp.eq.s32.totalorder %v10800_v48, %v10579_v18 }
 0x282   :  { %14354 = vst [vmem:[#allocation65_spill] sm:$0xff] %v10751_v13  ;;  %vm2056_vm2 = vcmp.eq.s32.totalorder %v10804_v57, %v10579_v18  ;;  %7789 = vmatpush.msk.msra.mxu0 %vm1848_vm10, %v14334_v46  ;;  %vm2052_vm10 = vcmp.eq.s32.totalorder %v10831_v59, %v10579_v18  ;;  %vm1888_vm13 = vcmp.eq.s32.totalorder %v10827_v24, %v10579_v18  ;;  %v10879_v13 = vadd.s32 264, %v9854_v4 }
 0x283   :  { %14355 = vst [vmem:[#allocation66_spill] sm:$0xff] %v10759_v26  ;;  %7808 = vmatpush.msk.msrb.mxu2 %vm1900_vm4, %v14334_v46  ;;  %7824 = vmatpush.msk.msra.mxu3 %vm1964_vm7, %v14334_v46  ;;  %vm1840_vm4 = vcmp.eq.s32.totalorder %v9962_v41, %v10579_v18  ;;  %vm2048_vm7 = vcmp.eq.s32.totalorder %v10859_v60, %v10579_v18  ;;  %v11114_v60 = vadd.s32 600, %v9854_v4 }
 0x284   :  { %14356 = vst [vmem:[#allocation67_spill] sm:$0xff] %v10770_v61  ;;  %7790 = vmatpush.msk.msra.mxu0 %vm1844_vm1, %v14334_v46  ;;  %7833 = vmatpush.msk.msra.mxu1 %vm2056_vm2, %v14334_v46  ;;  %vm1952_vm1 = vcmp.eq.s32.totalorder %v10853_v10, %v10579_v18  ;;  %vm1884_vm2 = vcmp.eq.s32.totalorder %v10856_v23, %v10579_v18 }
 0x285   :  { %14357 = vst [vmem:[#allocation68_spill] sm:$0xff] %v10784_v31  ;;  %7809 = vmatpush.msk.msrb.mxu2 %vm1896_vm9, %v14334_v46  ;;  %7825 = vmatpush.msk.msra.mxu3 %vm1960_vm11, %v14334_v46  ;;  %vm1836_vm9 = vcmp.eq.s32.totalorder %v9970_v43, %v10579_v18  ;;  %v10900_v31 = vadd.s32 256, %v9854_v4  ;;  %vm1832_vm11 = vcmp.eq.s32.totalorder %v9973_v44, %v10579_v18 }
 0x286   :  { %14358 = vst [vmem:[#allocation69_spill] sm:$0xff] %v10789_v34  ;;  %7791 = vmatpush.msk.msra.mxu0 %vm1840_vm4, %v14334_v46  ;;  %7834 = vmatpush.msk.msra.mxu1 %vm2052_vm10, %v14334_v46  ;;  %vm1828_vm10 = vcmp.eq.s32.totalorder %v9995_v51, %v10579_v18 }
 0x287   :  { %14360 = vst [vmem:[#allocation71_spill] sm:$0xff] %v10804_v57  ;;  %7810 = vmatpush.msk.msrb.mxu2 %vm1892_vm3, %v14334_v46  ;;  %v10904_v57 = vadd.s32 456, %v9854_v4  ;;  %7826 = vmatpush.msk.msra.mxu3 %vm1956_vm8, %v14334_v46  ;;  %vm1948_vm3 = vcmp.eq.s32.totalorder %v10879_v13, %v10579_v18  ;;  %vm1944_vm8 = vcmp.eq.s32.totalorder %v10900_v31, %v10579_v18 }
 0x288   :  { %14361 = vst [vmem:[#allocation72_spill] sm:$0xff] %v10824_v49  ;;  %1603 = vrot.lane.b32.xlu2 %v10759_v26, %s9534_s7  ;;  %v10914_v26 = vadd.s32 888, %v9854_v4  ;;  %7792 = vmatpush.msk.msra.mxu0 %vm1836_vm9, %v14334_v46  ;;  %v10936_v49 = vadd.s32 448, %v9854_v4 }
 0x289   :  { %14362 = vst [vmem:[#allocation73_spill] sm:$0xff] %v10827_v24  ;;  %7811 = vmatpush.msk.msrb.mxu2 %vm1888_vm13, %v14334_v46  ;;  %vm1880_vm13 = vcmp.eq.s32.totalorder %v10004_v53, %v10579_v18  ;;  %7835 = vmatpush.msk.msra.mxu1 %vm2048_vm7, %v14334_v46  ;;  %vm2044_vm9 = vcmp.eq.s32.totalorder %v10904_v57, %v10579_v18 }
 0x28a   :  { %14363 = vst [vmem:[#allocation74_spill] sm:$0xff] %v10831_v59  ;;  %v10890_v59 = vadd.s32 760, %v9854_v4  ;;  %7827 = vmatpush.msk.msra.mxu3 %vm1952_vm1, %v14334_v46  ;;  %7793 = vmatpush.msk.msra.mxu0 %vm1832_vm11, %v14334_v46  ;;  %vm2260_vm7 = vcmp.eq.s32.totalorder %v10914_v26, %v10579_v18  ;;  %vm2192_vm1 = vcmp.eq.s32.totalorder %v10917_v3, %v10579_v18 }
 0x28b   :  { %14364 = vst [vmem:[#allocation75_spill] sm:$0xff] %v10853_v10  ;;  %7812 = vmatpush.msk.msrb.mxu2 %vm1884_vm2, %v14334_v46  ;;  %v10967_v10 = vadd.s32 440, %v9854_v4  ;;  %vm1824_vm2 = vcmp.eq.s32.totalorder %v10001_v55, %v10579_v18  ;;  %vm2040_vm11 = vcmp.eq.s32.totalorder %v10936_v49, %v10579_v18  ;;  %7836 = vmatpush.msk.msra.mxu1 %vm2044_vm9, %v14334_v46 }
 0x28c   :  { %14367 = vst [vmem:[#allocation78_spill] sm:$0xff] %v10879_v13  ;;  %vm2196_vm4 = vcmp.eq.s32.totalorder %v10890_v59, %v10579_v18  ;;  %7828 = vmatpush.msk.msra.mxu3 %vm1948_vm3, %v14334_v46  ;;  %7794 = vmatpush.msk.msra.mxu0 %vm1828_vm10, %v14334_v46  ;;  %vm2256_vm3 = vcmp.eq.s32.totalorder %v10951_v62, %v10579_v18  ;;  %v11000_v13 = vadd.s32 728, %v9854_v4 }
 0x28d   :  { %14368 = vst [vmem:[#allocation79_spill] sm:$0xff] %v10890_v59  ;;  %7813 = vmatpush.msk.msrb.mxu2 %vm1880_vm13, %v14334_v46  ;;  %vm2188_vm13 = vcmp.eq.s32.totalorder %v10954_v0, %v10579_v18  ;;  %vm2036_vm10 = vcmp.eq.s32.totalorder %v10967_v10, %v10579_v18  ;;  %7837 = vmatpush.msk.msra.mxu1 %vm2040_vm11, %v14334_v46 }
 0x28e   :  { %14369 = vst [vmem:[#allocation80_spill] sm:$0xff] %v10900_v31  ;;  %v10979_v31 = vadd.s32 872, %v9854_v4  ;;  %7829 = vmatpush.msk.msra.mxu3 %vm1944_vm8, %v14334_v46  ;;  %7795 = vmatpush.msk.msra.mxu0 %vm1824_vm2, %v14334_v46  ;;  %vm2180_vm2 = vcmp.eq.s32.totalorder %v11000_v13, %v10579_v18 }
 0x28f   :  { %14370 = vst [vmem:[#allocation81_spill] sm:$0xff] %v10904_v57  ;;  %7862 = vmatpush.msk.msra.mxu2 %vm2196_vm4, %v14334_v46  ;;  %vm1820_vm4 = vcmp.eq.s32.totalorder %v10018_v58, %v10579_v18  ;;  %7838 = vmatpush.msk.msra.mxu1 %vm2036_vm10, %v14334_v46  ;;  %v11063_v57 = vadd.s32 424, %v9854_v4  ;;  %v11429_v58 = vadd.s32 1072, %v9854_v4 }
 0x290   :  { %14371 = vst [vmem:[#allocation82_spill] sm:$0xff] %v10914_v26  ;;  %1611 = vrot.lane.b32.xlu2 %v10921_v45, %s9534_s7  ;;  %v10997_v26 = vadd.s32 864, %v9854_v4  ;;  %7878 = vmatpush.msk.msrb.mxu3 %vm2260_vm7, %v14334_v46  ;;  %vm2252_vm8 = vcmp.eq.s32.totalorder %v10979_v31, %v10579_v18  ;;  %vm1816_vm7 = vcmp.eq.s32.totalorder %v9854_v4, %v10579_v18  ;;  %s14794_s7 = sld [smem:[#allocation15_spill]] }
 0x291   :  { %14372 = vst [vmem:[#allocation83_spill] sm:$0xff] %v10917_v3  ;;  %7863 = vmatpush.msk.msra.mxu2 %vm2192_vm1, %v14334_v46  ;;  %7796 = vmatpush.msk.msra.mxu0 %vm1820_vm4, %v14334_v46  ;;  %v11404_v3 = vadd.s32 896, %v9854_v4 }
 0x292   :  { %14373 = vst [vmem:[#allocation84_spill] sm:$0xff] %v10921_v45  ;;  %v10982_v45 = vadd.s32 736, %v9854_v4  ;;  %7879 = vmatpush.msk.msrb.mxu3 %vm2256_vm3, %v14334_v46  ;;  %vm2248_vm1 = vcmp.eq.s32.totalorder %v10997_v26, %v10579_v18 }
 0x293   :  { %14374 = vst [vmem:[#allocation85_spill] sm:$0xff] %v10936_v49  ;;  %v11018_v49 = vadd.s32 856, %v9854_v4  ;;  %7864 = vmatpush.msk.msra.mxu2 %vm2188_vm13, %v14334_v46  ;;  %7797 = vmatpush.msk.msra.mxu0 %vm1816_vm7, %v14334_v46 }
 0x294   :  { %14375 = vst [vmem:[#allocation86_spill] sm:$0xff] %v10951_v62  ;;  %v11009_v62 = vadd.s32 632, %v9854_v4  ;;  %vm2184_vm9 = vcmp.eq.s32.totalorder %v10982_v45, %v10579_v18  ;;  %7880 = vmatpush.msk.msrb.mxu3 %vm2252_vm8, %v14334_v46 }
 0x295   :  { %14376 = vst [vmem:[#allocation87_spill] sm:$0xff] %v10954_v0  ;;  %7865 = vmatpush.msk.msra.mxu2 %vm2184_vm9, %v14334_v46  ;;  %vm2244_vm3 = vcmp.eq.s32.totalorder %v11018_v49, %v10579_v18  ;;  %v11066_v0 = vadd.s32 616, %v9854_v4 }
 0x296   :  { %14377 = vst [vmem:[#allocation88_spill] sm:$0xff] %v10967_v10  ;;  %vm2132_vm11 = vcmp.eq.s32.totalorder %v11009_v62, %v10579_v18  ;;  %7881 = vmatpush.msk.msrb.mxu3 %vm2248_vm1, %v14334_v46  ;;  %v11046_v10 = vadd.s32 432, %v9854_v4  ;;  %vm2028_vm1 = vcmp.eq.s32.totalorder %v11063_v57, %v10579_v18 }
 0x297   :  { %14378 = vst [vmem:[#allocation89_spill] sm:$0xff] %v10979_v31  ;;  %v11038_v31 = vadd.s32 720, %v9854_v4  ;;  %7866 = vmatpush.msk.msra.mxu2 %vm2180_vm2, %v14334_v46  ;;  %7846 = vmatpush.msk.msrb.mxu0 %vm2132_vm11, %v14334_v46  ;;  %vm2124_vm2 = vcmp.eq.s32.totalorder %v11066_v0, %v10579_v18 }
 0x298   :  { %14379 = vst [vmem:[#allocation90_spill] sm:$0xff] %v10982_v45  ;;  %v11052_v45 = vadd.s32 712, %v9854_v4  ;;  %7882 = vmatpush.msk.msrb.mxu3 %vm2244_vm3, %v14334_v46  ;;  %vm2032_vm10 = vcmp.eq.s32.totalorder %v11046_v10, %v10579_v18 }
 0x299   :  { %14380 = vst [vmem:[#allocation91_spill] sm:$0xff] %v10997_v26  ;;  %v11041_v26 = vadd.s32 848, %v9854_v4  ;;  %vm2176_vm13 = vcmp.eq.s32.totalorder %v11038_v31, %v10579_v18  ;;  %7839 = vmatpush.msk.msra.mxu1 %vm2032_vm10, %v14334_v46 }
 0x29a   :  { %14381 = vst [vmem:[#allocation92_spill] sm:$0xff] %v11000_v13  ;;  %v11049_v13 = vadd.s32 624, %v9854_v4  ;;  %7867 = vmatpush.msk.msra.mxu2 %vm2176_vm13, %v14334_v46  ;;  %vm2172_vm9 = vcmp.eq.s32.totalorder %v11052_v45, %v10579_v18 }
 0x29b   :  { %14382 = vst [vmem:[#allocation93_spill] sm:$0xff] %v11009_v62  ;;  %vm2240_vm4 = vcmp.eq.s32.totalorder %v11041_v26, %v10579_v18  ;;  %7840 = vmatpush.msk.msra.mxu1 %vm2028_vm1, %v14334_v46  ;;  %v11415_v62 = vperm.slane %v10569_v37, 1 }
 0x29c   :  { %14383 = vst [vmem:[#allocation94_spill] sm:$0xff] %v11018_v49  ;;  %v11055_v49 = vadd.s32 840, %v9854_v4  ;;  %vm2128_vm8 = vcmp.eq.s32.totalorder %v11049_v13, %v10579_v18  ;;  %7883 = vmatpush.msk.msrb.mxu3 %vm2240_vm4, %v14334_v46  ;;  %7868 = vmatpush.msk.msra.mxu2 %vm2172_vm9, %v14334_v46 }
 0x29d   :  { %14384 = vst [vmem:[#allocation95_spill] sm:$0xff] %v11038_v31  ;;  %7847 = vmatpush.msk.msrb.mxu0 %vm2128_vm8, %v14334_v46  ;;  %v11098_v31 = vadd.s32 608, %v9854_v4 }
 0x29e   :  { %14385 = vst [vmem:[#allocation96_spill] sm:$0xff] %v11041_v26  ;;  %v11077_v26 = vadd.s32 704, %v9854_v4  ;;  %vm2236_vm7 = vcmp.eq.s32.totalorder %v11055_v49, %v10579_v18 }
 0x29f   :  { %14386 = vst [vmem:[#allocation97_spill] sm:$0xff] %v11046_v10  ;;  %v11088_v10 = vadd.s32 832, %v9854_v4  ;;  %7848 = vmatpush.msk.msrb.mxu0 %vm2124_vm2, %v14334_v46  ;;  %7884 = vmatpush.msk.msrb.mxu3 %vm2236_vm7, %v14334_v46  ;;  %vm2120_vm4 = vcmp.eq.s32.totalorder %v11098_v31, %v10579_v18  ;;  %vm2116_vm7 = vcmp.eq.s32.totalorder %v11114_v60, %v10579_v18 }
 0x2a0   :  { %14387 = vst [vmem:[#allocation98_spill] sm:$0xff] %v11049_v13  ;;  %vm2168_vm11 = vcmp.eq.s32.totalorder %v11077_v26, %v10579_v18 }
 0x2a1   :  { %14388 = vst [vmem:[#allocation99_spill] sm:$0xff] %v11052_v45  ;;  %v11095_v45 = vadd.s32 416, %v9854_v4  ;;  %vm2232_vm3 = vcmp.eq.s32.totalorder %v11088_v10, %v10579_v18  ;;  %7869 = vmatpush.msk.msra.mxu2 %vm2168_vm11, %v14334_v46  ;;  %7849 = vmatpush.msk.msrb.mxu0 %vm2120_vm4, %v14334_v46 }
 0x2a2   :  { %14389 = vst [vmem:[#allocation100_spill] sm:$0xff] %v11055_v49  ;;  %7885 = vmatpush.msk.msrb.mxu3 %vm2232_vm3, %v14334_v46  ;;  %v11141_v49 = vadd.s32 816, %v9854_v4 }
 0x2a3   :  { %14390 = vst [vmem:[#allocation101_spill] sm:$0xff] %v11063_v57  ;;  %v11101_v57 = vadd.s32 696, %v9854_v4  ;;  %vm2024_vm13 = vcmp.eq.s32.totalorder %v11095_v45, %v10579_v18  ;;  %7850 = vmatpush.msk.msrb.mxu0 %vm2116_vm7, %v14334_v46 }
 0x2a4   :  { %14391 = vst [vmem:[#allocation102_spill] sm:$0xff] %v11066_v0  ;;  %v11108_v0 = vadd.s32 824, %v9854_v4  ;;  %7841 = vmatpush.msk.msra.mxu1 %vm2024_vm13, %v14334_v46  ;;  %vm2224_vm2 = vcmp.eq.s32.totalorder %v11141_v49, %v10579_v18 }
 0x2a5   :  { %14392 = vst [vmem:[#allocation103_spill] sm:$0xff] %v11077_v26  ;;  %v11111_v26 = vadd.s32 408, %v9854_v4  ;;  %vm2164_vm10 = vcmp.eq.s32.totalorder %v11101_v57, %v10579_v18 }
 0x2a6   :  { %14393 = vst [vmem:[#allocation104_spill] sm:$0xff] %v11088_v10  ;;  %vm2228_vm8 = vcmp.eq.s32.totalorder %v11108_v0, %v10579_v18  ;;  %v11136_v10 = vadd.s32 688, %v9854_v4  ;;  %7870 = vmatpush.msk.msra.mxu2 %vm2164_vm10, %v14334_v46 }
 0x2a7   :  { %14394 = vst [vmem:[#allocation105_spill] sm:$0xff] %v11095_v45  ;;  %vm2020_vm9 = vcmp.eq.s32.totalorder %v11111_v26, %v10579_v18  ;;  %v11157_v45 = vadd.s32 808, %v9854_v4  ;;  %7886 = vmatpush.msk.msrb.mxu3 %vm2228_vm8, %v14334_v46 }
 0x2a8   :  { %14395 = vst [vmem:[#allocation106_spill] sm:$0xff] %v11098_v31  ;;  %7842 = vmatpush.msk.msra.mxu1 %vm2020_vm9, %v14334_v46  ;;  %vm2160_vm1 = vcmp.eq.s32.totalorder %v11136_v10, %v10579_v18 }
 0x2a9   :  { %14396 = vst [vmem:[#allocation107_spill] sm:$0xff] %v11101_v57  ;;  %v11144_v57 = vadd.s32 400, %v9854_v4  ;;  %7871 = vmatpush.msk.msra.mxu2 %vm2160_vm1, %v14334_v46  ;;  %vm2220_vm4 = vcmp.eq.s32.totalorder %v11157_v45, %v10579_v18  ;;  %7887 = vmatpush.msk.msrb.mxu3 %vm2224_vm2, %v14334_v46 }
 0x2aa   :  { %14397 = vst [vmem:[#allocation108_spill] sm:$0xff] %v11108_v0  ;;  %v11147_v0 = vadd.s32 592, %v9854_v4 }
 0x2ab   :  { %14398 = vst [vmem:[#allocation109_spill] sm:$0xff] %v11111_v26  ;;  %v11154_v26 = vadd.s32 680, %v9854_v4  ;;  %vm2016_vm11 = vcmp.eq.s32.totalorder %v11144_v57, %v10579_v18  ;;  %7888 = vmatpush.msk.msrb.mxu3 %vm2220_vm4, %v14334_v46 }
 0x2ac   :  { %14399 = vst [vmem:[#allocation110_spill] sm:$0xff] %v11114_v60  ;;  %v11160_v60 = vadd.s32 392, %v9854_v4  ;;  %vm2112_vm3 = vcmp.eq.s32.totalorder %v11147_v0, %v10579_v18  ;;  %7843 = vmatpush.msk.msra.mxu1 %vm2016_vm11, %v14334_v46 }
 0x2ad   :  { %14400 = vst [vmem:[#allocation111_spill] sm:$0xff] %v11136_v10  ;;  %v11171_v10 = vadd.s32 584, %v9854_v4  ;;  %7851 = vmatpush.msk.msrb.mxu0 %vm2112_vm3, %v14334_v46  ;;  %vm2156_vm13 = vcmp.eq.s32.totalorder %v11154_v26, %v10579_v18 }
 0x2ae   :  { %14401 = vst [vmem:[#allocation112_spill] sm:$0xff] %v11141_v49  ;;  %vm2012_vm10 = vcmp.eq.s32.totalorder %v11160_v60, %v10579_v18  ;;  %v11182_v49 = vadd.s32 672, %v9854_v4  ;;  %7872 = vmatpush.msk.msra.mxu2 %vm2156_vm13, %v14334_v46 }
 0x2af   :  { %14402 = vst [vmem:[#allocation113_spill] sm:$0xff] %v11144_v57  ;;  %vm2108_vm8 = vcmp.eq.s32.totalorder %v11171_v10, %v10579_v18  ;;  %v11189_v57 = vadd.s32 800, %v9854_v4  ;;  %7844 = vmatpush.msk.msra.mxu1 %vm2012_vm10, %v14334_v46 }
 0x2b0   :  { %14403 = vst [vmem:[#allocation114_spill] sm:$0xff] %v11147_v0  ;;  %7852 = vmatpush.msk.msrb.mxu0 %vm2108_vm8, %v14334_v46  ;;  %vm2152_vm9 = vcmp.eq.s32.totalorder %v11182_v49, %v10579_v18  ;;  %v11208_v0 = vadd.s32 1016, %v9854_v4 }
 0x2b1   :  { %14404 = vst [vmem:[#allocation115_spill] sm:$0xff] %v11154_v26  ;;  %v11192_v26 = vadd.s32 384, %v9854_v4  ;;  %7873 = vmatpush.msk.msra.mxu2 %vm2152_vm9, %v14334_v46  ;;  %vm2216_vm7 = vcmp.eq.s32.totalorder %v11189_v57, %v10579_v18 }
 0x2b2   :  { %14405 = vst [vmem:[#allocation116_spill] sm:$0xff] %v11157_v45  ;;  %v11195_v45 = vadd.s32 576, %v9854_v4  ;;  %vm2324_vm13 = vcmp.eq.s32.totalorder %v11208_v0, %v10579_v18  ;;  %7889 = vmatpush.msk.msrb.mxu3 %vm2216_vm7, %v14334_v46 }
 0x2b3   :  { %14406 = vst [vmem:[#allocation117_spill] sm:$0xff] %v11160_v60  ;;  %v11202_v60 = vadd.s32 664, %v9854_v4  ;;  %vm2008_vm1 = vcmp.eq.s32.totalorder %v11192_v26, %v10579_v18 }
 0x2b4   :  { %14407 = vst [vmem:[#allocation118_spill] sm:$0xff] %v11171_v10  ;;  %v11205_v10 = vadd.s32 792, %v9854_v4  ;;  %vm2104_vm2 = vcmp.eq.s32.totalorder %v11195_v45, %v10579_v18  ;;  %7845 = vmatpush.msk.msra.mxu1 %vm2008_vm1, %v14334_v46 }
 0x2b5   :  { %14408 = vst [vmem:[#allocation119_spill] sm:$0xff] %v11182_v49  ;;  %v11219_v49 = vadd.s32 568, %v9854_v4  ;;  %7853 = vmatpush.msk.msrb.mxu0 %vm2104_vm2, %v14334_v46  ;;  %vm2148_vm11 = vcmp.eq.s32.totalorder %v11202_v60, %v10579_v18 }
 0x2b6   :  { %14409 = vst [vmem:[#allocation120_spill] sm:$0xff] %v11189_v57  ;;  %vm2212_vm3 = vcmp.eq.s32.totalorder %v11205_v10, %v10579_v18  ;;  %v11230_v57 = vadd.s32 656, %v9854_v4  ;;  %7874 = vmatpush.msk.msra.mxu2 %vm2148_vm11, %v14334_v46  ;;  %7894 = vmatpush.msk.msrb.mxu1 %vm2324_vm13, %v14334_v46 }
 0x2b7   :  { %14410 = vst [vmem:[#allocation121_spill] sm:$0xff] %v11192_v26  ;;  %vm2100_vm4 = vcmp.eq.s32.totalorder %v11219_v49, %v10579_v18  ;;  %v11237_v26 = vadd.s32 784, %v9854_v4  ;;  %7890 = vmatpush.msk.msrb.mxu3 %vm2212_vm3, %v14334_v46 }
 0x2b8   :  { %14411 = vst [vmem:[#allocation122_spill] sm:$0xff] %v11195_v45  ;;  %7854 = vmatpush.msk.msrb.mxu0 %vm2100_vm4, %v14334_v46  ;;  %vm2144_vm10 = vcmp.eq.s32.totalorder %v11230_v57, %v10579_v18  ;;  %v11256_v45 = vadd.s32 1000, %v9854_v4 }
 0x2b9   :  { %14412 = vst [vmem:[#allocation123_spill] sm:$0xff] %v11202_v60  ;;  %v11240_v60 = vadd.s32 1008, %v9854_v4  ;;  %7875 = vmatpush.msk.msra.mxu2 %vm2144_vm10, %v14334_v46  ;;  %vm2208_vm8 = vcmp.eq.s32.totalorder %v11237_v26, %v10579_v18 }
 0x2ba   :  { %14413 = vst [vmem:[#allocation124_spill] sm:$0xff] %v11205_v10  ;;  %v11243_v10 = vadd.s32 560, %v9854_v4  ;;  %vm2316_vm11 = vcmp.eq.s32.totalorder %v11256_v45, %v10579_v18  ;;  %7891 = vmatpush.msk.msrb.mxu3 %vm2208_vm8, %v14334_v46 }
 0x2bb   :  { %14414 = vst [vmem:[#allocation125_spill] sm:$0xff] %v11208_v0  ;;  %v11250_v0 = vadd.s32 648, %v9854_v4  ;;  %vm2320_vm9 = vcmp.eq.s32.totalorder %v11240_v60, %v10579_v18 }
 0x2bc   :  { %14415 = vst [vmem:[#allocation126_spill] sm:$0xff] %v11219_v49  ;;  %v11253_v49 = vadd.s32 776, %v9854_v4  ;;  %vm2096_vm7 = vcmp.eq.s32.totalorder %v11243_v10, %v10579_v18  ;;  %7895 = vmatpush.msk.msrb.mxu1 %vm2320_vm9, %v14334_v46 }
 0x2bd   :  { %14416 = vst [vmem:[#allocation127_spill] sm:$0xff] %v11230_v57  ;;  %v11267_v57 = vadd.s32 552, %v9854_v4  ;;  %7855 = vmatpush.msk.msrb.mxu0 %vm2096_vm7, %v14334_v46  ;;  %vm2140_vm1 = vcmp.eq.s32.totalorder %v11250_v0, %v10579_v18 }
 0x2be   :  { %14417 = vst [vmem:[#allocation128_spill] sm:$0xff] %v11237_v26  ;;  %vm2204_vm2 = vcmp.eq.s32.totalorder %v11253_v49, %v10579_v18  ;;  %v11278_v26 = vadd.s32 640, %v9854_v4  ;;  %7876 = vmatpush.msk.msra.mxu2 %vm2140_vm1, %v14334_v46  ;;  %7896 = vmatpush.msk.msrb.mxu1 %vm2316_vm11, %v14334_v46 }
 0x2bf   :  { %14418 = vst [vmem:[#allocation129_spill] sm:$0xff] %v11240_v60  ;;  %vm2092_vm3 = vcmp.eq.s32.totalorder %v11267_v57, %v10579_v18  ;;  %v11285_v60 = vadd.s32 768, %v9854_v4  ;;  %7892 = vmatpush.msk.msrb.mxu3 %vm2204_vm2, %v14334_v46 }
 0x2c0   :  { %14419 = vst [vmem:[#allocation130_spill] sm:$0xff] %v11243_v10  ;;  %7856 = vmatpush.msk.msrb.mxu0 %vm2092_vm3, %v14334_v46  ;;  %vm2136_vm13 = vcmp.eq.s32.totalorder %v11278_v26, %v10579_v18  ;;  %v11384_v10 = vpop.permute.xlu0 %1667 }
 0x2c1   :  { %14420 = vst [vmem:[#allocation131_spill] sm:$0xff] %v11250_v0  ;;  %v11288_v0 = vadd.s32 992, %v9854_v4  ;;  %7877 = vmatpush.msk.msra.mxu2 %vm2136_vm13, %v14334_v46  ;;  %vm2200_vm4 = vcmp.eq.s32.totalorder %v11285_v60, %v10579_v18 }
 0x2c2   :  { %14421 = vst [vmem:[#allocation132_spill] sm:$0xff] %v11253_v49  ;;  %v11291_v49 = vadd.s32 544, %v9854_v4  ;;  %7893 = vmatpush.msk.msrb.mxu3 %vm2200_vm4, %v14334_v46 }
 0x2c3   :  { %14422 = vst [vmem:[#allocation133_spill] sm:$0xff] %v11256_v45  ;;  %vm2312_vm10 = vcmp.eq.s32.totalorder %v11288_v0, %v10579_v18  ;;  %v11306_v45 = vadd.s32 984, %v9854_v4 }
 0x2c4   :  { %14423 = vst [vmem:[#allocation134_spill] sm:$0xff] %v11267_v57  ;;  %vm2088_vm8 = vcmp.eq.s32.totalorder %v11291_v49, %v10579_v18  ;;  %7897 = vmatpush.msk.msrb.mxu1 %vm2312_vm10, %v14334_v46  ;;  %v11358_v57 = vpop.permute.xlu2 %1597 }
 0x2c5   :  { %14424 = vst [vmem:[#allocation135_spill] sm:$0xff] %v11278_v26  ;;  %7857 = vmatpush.msk.msrb.mxu0 %vm2088_vm8, %v14334_v46  ;;  %v11311_v26 = vadd.s32 536, %v9854_v4  ;;  %vm2308_vm9 = vcmp.eq.s32.totalorder %v11306_v45, %v10579_v18 }
 0x2c6   :  { %14425 = vst [vmem:[#allocation136_spill] sm:$0xff] %v11285_v60  ;;  %v11317_v60 = vadd.s32 976, %v9854_v4  ;;  %7898 = vmatpush.msk.msrb.mxu1 %vm2308_vm9, %v14334_v46 }
 0x2c7   :  { %14426 = vst [vmem:[#allocation137_spill] sm:$0xff] %v11288_v0  ;;  %vm2084_vm7 = vcmp.eq.s32.totalorder %v11311_v26, %v10579_v18  ;;  %v11323_v0 = vadd.s32 528, %v9854_v4 }
 0x2c8   :  { %14427 = vst [vmem:[#allocation138_spill] sm:$0xff] %v11291_v49  ;;  %7858 = vmatpush.msk.msrb.mxu0 %vm2084_vm7, %v14334_v46  ;;  %vm2304_vm1 = vcmp.eq.s32.totalorder %v11317_v60, %v10579_v18  ;;  %v11329_v49 = vadd.s32 968, %v9854_v4 }
 0x2c9   :  { %14428 = vst [vmem:[#allocation139_spill] sm:$0xff] %v11306_v45  ;;  %7899 = vmatpush.msk.msrb.mxu1 %vm2304_vm1, %v14334_v46  ;;  %vm2080_vm2 = vcmp.eq.s32.totalorder %v11323_v0, %v10579_v18  ;;  %v11335_v45 = vadd.s32 520, %v9854_v4 }
 0x2ca   :  { %14429 = vst [vmem:[#allocation140_spill] sm:$0xff] %v11311_v26  ;;  %7859 = vmatpush.msk.msrb.mxu0 %vm2080_vm2, %v14334_v46  ;;  %vm2300_vm11 = vcmp.eq.s32.totalorder %v11329_v49, %v10579_v18  ;;  %v11341_v26 = vadd.s32 960, %v9854_v4  ;;  %v1580_v59 = vpop.permute.xlu0 %1579 }
 0x2cb   :  { %14430 = vst [vmem:[#allocation141_spill] sm:$0xff] %v11317_v60  ;;  %7900 = vmatpush.msk.msrb.mxu1 %vm2300_vm11, %v14334_v46  ;;  %vm2076_vm3 = vcmp.eq.s32.totalorder %v11335_v45, %v10579_v18  ;;  %v11347_v60 = vadd.s32 512, %v9854_v4 }
 0x2cc   :  { %14431 = vst [vmem:[#allocation142_spill] sm:$0xff] %v11323_v0  ;;  %7860 = vmatpush.msk.msrb.mxu0 %vm2076_vm3, %v14334_v46  ;;  %vm2296_vm13 = vcmp.eq.s32.totalorder %v11341_v26, %v10579_v18  ;;  %v11353_v0 = vadd.s32 952, %v9854_v4  ;;  %v11387_v31 = vpop.permute.xlu2 %1583  ;;  %vm2264_vm3 = vcmp.eq.s32.totalorder %v11404_v3, %v10579_v18 }
 0x2cd   :  { %14432 = vst [vmem:[#allocation143_spill] sm:$0xff] %v11329_v49  ;;  %v1578_v49 = vpop.permute.xlu1 %1577  ;;  %7901 = vmatpush.msk.msrb.mxu1 %vm2296_vm13, %v14334_v46  ;;  %vm2072_vm4 = vcmp.eq.s32.totalorder %v11347_v60, %v10579_v18  ;;  %vm1877_vm13 = vcmp.eq.s32.totalorder %v9864_v8, %v11415_v62 }
 0x2ce   :  { %14433 = vst [vmem:[#allocation144_spill] sm:$0xff] %v11335_v45  ;;  %7861 = vmatpush.msk.msrb.mxu0 %vm2072_vm4, %v14334_v46  ;;  %vm2292_vm10 = vcmp.eq.s32.totalorder %v11353_v0, %v10579_v18  ;;  %v11364_v45 = vadd.s32 944, %v9854_v4  ;;  %v1613_v53 = vsel %vm792_vm12, %v1578_v49, %v1580_v59  ;;  %vm1941_vm4 = vcmp.eq.s32.totalorder %v10576_v22, %v11415_v62 }
 0x2cf   :  { %14434 = vst [vmem:[#allocation145_spill] sm:$0xff] %v11341_v26  ;;  %7902 = vmatpush.msk.msrb.mxu1 %vm2292_vm10, %v14334_v46  ;;  %v11370_v26 = vadd.s32 936, %v9854_v4  ;;  %v1647_v34 = vmax.f32 %v10506_v56, %v1613_v53  ;;  %v11445_v53 = vadd.s32 1064, %v9854_v4 }
 0x2d0   :  { %14435 = vst [vmem:[#allocation146_spill] sm:$0xff] %v11347_v60  ;;  %vm2288_vm8 = vcmp.eq.s32.totalorder %v11364_v45, %v10579_v18  ;;  %v11376_v60 = vadd.s32 928, %v9854_v4 }
 0x2d1   :  { %14436 = vst [vmem:[#allocation147_spill] sm:$0xff] %v11353_v0  ;;  %7903 = vmatpush.msk.msrb.mxu1 %vm2288_vm8, %v14334_v46  ;;  %vm2284_vm9 = vcmp.eq.s32.totalorder %v11370_v26, %v10579_v18  ;;  %v11382_v0 = vadd.s32 920, %v9854_v4  ;;  %v11432_v37 = vadd.f32 %v11384_v10, %v1647_v34  ;;  %vm1873_vm8 = vcmp.eq.s32.totalorder %v9874_v15, %v11415_v62 }
 0x2d2   :  { %14437 = vst [vmem:[#allocation148_spill] sm:$0xff] %v11364_v45  ;;  %vm2280_vm7 = vcmp.eq.s32.totalorder %v11376_v60, %v10579_v18 }
 0x2d3   :  { %14438 = vst [vmem:[#allocation149_spill] sm:$0xff] %v11370_v26  ;;  %7904 = vmatpush.msk.msrb.mxu1 %vm2284_vm9, %v14334_v46  ;;  %vm2276_vm1 = vcmp.eq.s32.totalorder %v11382_v0, %v10579_v18  ;;  %v11392_v26 = vadd.s32 912, %v9854_v4  ;;  %3471 = vmatmul.f32.vlgmr.msra.gmra.mxu0 %v11432_v37  ;;  %vm1937_vm9 = vcmp.eq.s32.totalorder %v10585_v1, %v11415_v62 }
 0x2d4   :  { %14439 = vst [vmem:[#allocation150_spill] sm:$0xff] %v11376_v60  ;;  %v11399_v60 = vadd.s32 904, %v9854_v4  ;;  %v11409_v13 = vpop.permute.xlu2 %1587 }
 0x2d5   :  { %14440 = vst [vmem:[#allocation151_spill] sm:$0xff] %v11382_v0  ;;  %v1596_v45 = vpop.permute.xlu1 %1595  ;;  %7905 = vmatpush.msk.msrb.mxu1 %vm2280_vm7, %v14334_v46  ;;  %vm2272_vm2 = vcmp.eq.s32.totalorder %v11392_v26, %v10579_v18  ;;  %vm2352_vm7 = vcmp.eq.s32.totalorder %v11429_v58, %v10579_v18 }
 0x2d6   :  { %14441 = vst [vmem:[#allocation152_spill] sm:$0xff] %v11392_v26  ;;  %vm2268_vm11 = vcmp.eq.s32.totalorder %v11399_v60, %v10579_v18  ;;  %v1621_v56 = vsel %vm792_vm12, %v1596_v45, %v11358_v57  ;;  %v11484_v45 = vadd.s32 1048, %v9854_v4 }
 0x2d7   :  { %7906 = vmatpush.msk.msrb.mxu1 %vm2276_vm1, %v14334_v46  ;;  %14442 = vst [vmem:[#allocation153_spill] sm:$0xff] %v11399_v60  ;;  %vm1869_vm1 = vcmp.eq.s32.totalorder %v9883_v20, %v11415_v62 }
 0x2d8   :  { %14443 = vst [vmem:[#allocation154_spill] sm:$0xff] %v11404_v3  ;;  %v11421_v3 = vadd.s32 1080, %v9854_v4 }
 0x2d9   :  { %7907 = vmatpush.msk.msrb.mxu1 %vm2272_vm2, %v14334_v46  ;;  %14446 = vst [vmem:[#allocation157_spill] sm:$0xff] %v11429_v58  ;;  %vm1933_vm2 = vcmp.eq.s32.totalorder %v10595_v2, %v11415_v62 }
 0x2da   :  { %14444 = vst [vmem:[#allocation155_spill] sm:$0xff] %v11421_v3  ;;  %vm2356_vm10 = vcmp.eq.s32.totalorder %v11421_v3, %v10579_v18 }
 0x2db   :  { %7908 = vmatpush.msk.msrb.mxu1 %vm2268_vm11, %v14334_v46  ;;  %14447 = vst [vmem:[#allocation158_spill] sm:$0xff] %v11432_v37  ;;  %7910 = vmatpush.msk.msra.mxu0 %vm2356_vm10, %v14334_v46  ;;  %vm2348_vm11 = vcmp.eq.s32.totalorder %v11445_v53, %v10579_v18  ;;  %vm1925_vm10 = vcmp.eq.s32.totalorder %v10623_v11, %v11415_v62 }
 0x2dc   :  { %14449 = vst [vmem:[#allocation160_spill] sm:$0xff] %v11445_v53 }
 0x2dd   :  { %v1582_v0 = vpop.permute.xlu1 %1581  ;;  %7909 = vmatpush.msk.msrb.mxu1 %vm2264_vm3, %v14334_v46  ;;  %vm1865_vm3 = vcmp.eq.s32.totalorder %v9886_v21, %v11415_v62  ;;  %7911 = vmatpush.msk.msra.mxu0 %vm2352_vm7, %v14334_v46  ;;  %14451 = vst [vmem:[#allocation162_spill] sm:$0xff] %v11484_v45  ;;  %vm1921_vm7 = vcmp.eq.s32.totalorder %v10648_v40, %v11415_v62 }
 0x2de   :  { %v1615_v26 = vsel %vm792_vm12, %v1582_v0, %v11387_v31  ;;  %v1614_v42 = vsel %vm792_vm12, %v1580_v59, %v1582_v0 }
 0x2df   :  { %v1649_v60 = vmax.f32 %v10518_v14, %v1615_v26  ;;  %v1648_v52 = vmax.f32 %v10520_v38, %v1614_v42  ;;  %v11459_v38 = vpop.permute.xlu0 %1672  ;;  %v11466_v42 = vpop.permute.xlu2 %1601  ;;  %7912 = vmatpush.msk.msra.mxu0 %vm2348_vm11, %v14334_v46  ;;  %vm1917_vm11 = vcmp.eq.s32.totalorder %v10666_v6, %v11415_v62 }
 0x2e1   :  { %v11426_v23 = vadd.f32 %v11384_v10, %v1649_v60  ;;  %v11435_v14 = vadd.f32 %v11384_v10, %v1648_v52  ;;  %v11473_v52 = vadd.s32 1056, %v9854_v4  ;;  %v1656_v60 = vmax.f32 %v10512_v12, %v1621_v56 }
 0x2e2   :  { %v11499_v12 = vadd.s32 1040, %v9854_v4 }
 0x2e3   :  { %14445 = vst [vmem:[#allocation156_spill] sm:$0xff] %v11426_v23  ;;  %3517 = vmatmul.f32.vlgmr.msra.gmra.mxu3 %v11426_v23  ;;  %3494 = vmatmul.f32.vlgmr.msrb.gmra.mxu2 %v11435_v14  ;;  %v11487_v26 = vadd.f32 %v11459_v38, %v1656_v60 }
 0x2e4   :  { %14448 = vst [vmem:[#allocation159_spill] sm:$0xff] %v11435_v14  ;;  %7920 = vmatpush.msk.msrb.mxu2 %vm1877_vm13, %v14334_v46  ;;  %7936 = vmatpush.msk.msra.mxu3 %vm1941_vm4, %v14334_v46  ;;  %vm1929_vm13 = vcmp.eq.s32.totalorder %v10607_v9, %v11415_v62  ;;  %vm1861_vm4 = vcmp.eq.s32.totalorder %v9902_v25, %v11415_v62  ;;  %v14485_v9 = vld [vmem:[#allocation87_spill] sm:$0xff] }
 0x2e5   :  { %14450 = vst [vmem:[#allocation161_spill] sm:$0xff] %v11473_v52  ;;  %3474 = vmatmul.f32.gmra.mxu0 %v11487_v26  ;;  %v1600_v59 = vpop.permute.xlu1 %1599 }
 0x2e6   :  { %7921 = vmatpush.msk.msrb.mxu2 %vm1873_vm8, %v14334_v46  ;;  %7937 = vmatpush.msk.msra.mxu3 %vm1937_vm9, %v14334_v46  ;;  %14452 = vst [vmem:[#allocation163_spill] sm:$0xff] %v11487_v26  ;;  %vm2344_vm8 = vcmp.eq.s32.totalorder %v11473_v52, %v10579_v18  ;;  %vm1857_vm9 = vcmp.eq.s32.totalorder %v9912_v27, %v11415_v62 }
 0x2e7   :  { %14453 = vst [vmem:[#allocation164_spill] sm:$0xff] %v11499_v12  ;;  %v1622_v49 = vsel %vm792_vm12, %v11358_v57, %v1600_v59  ;;  %v1623_v34 = vsel %vm792_vm12, %v1600_v59, %v11466_v42  ;;  %v1590_v0 = vpop.permute.xlu0 %1589  ;;  %7913 = vmatpush.msk.msra.mxu0 %vm2344_vm8, %v14334_v46  ;;  %v11526_v57 = vadd.s32 1032, %v9854_v4  ;;  %v11539_v59 = vpop.permute.xlu2 %1591  ;;  %vm1909_vm8 = vcmp.eq.s32.totalorder %v10701_v33, %v11415_v62 }
 0x2e8   :  { %7922 = vmatpush.msk.msrb.mxu2 %vm1869_vm1, %v14334_v46  ;;  %7938 = vmatpush.msk.msra.mxu3 %vm1933_vm2, %v14334_v46  ;;  %vm2340_vm1 = vcmp.eq.s32.totalorder %v11484_v45, %v10579_v18  ;;  %vm1853_vm2 = vcmp.eq.s32.totalorder %v9915_v28, %v11415_v62  ;;  %v1657_v56 = vmax.f32 %v10529_v63, %v1622_v49  ;;  %v11544_v49 = vadd.s32 1024, %v9854_v4 }
 0x2e9   :  { %v1658_v60 = vmax.f32 %v10539_v19, %v1623_v34  ;;  %14454 = vst [vmem:[#allocation165_spill] sm:$0xff] %v11526_v57  ;;  %7914 = vmatpush.msk.msra.mxu0 %vm2340_vm1, %v14334_v46  ;;  %v1618_v34 = vsel %vm792_vm12, %v11409_v13, %v1590_v0  ;;  %vm1905_vm1 = vcmp.eq.s32.totalorder %v10721_v50, %v11415_v62 }
 0x2ea   :  { %7923 = vmatpush.msk.msrb.mxu2 %vm1865_vm3, %v14334_v46  ;;  %7939 = vmatpush.msk.msra.mxu3 %vm1929_vm13, %v14334_v46  ;;  %vm2336_vm3 = vcmp.eq.s32.totalorder %v11499_v12, %v10579_v18  ;;  %vm1849_vm13 = vcmp.eq.s32.totalorder %v9920_v29, %v11415_v62  ;;  %v11534_v63 = vadd.f32 %v11459_v38, %v1657_v56 }
 0x2eb   :  { %v11537_v19 = vadd.f32 %v11459_v38, %v1658_v60  ;;  %14456 = vst [vmem:[#allocation167_spill] sm:$0xff] %v11544_v49  ;;  %7915 = vmatpush.msk.msra.mxu0 %vm2336_vm3, %v14334_v46  ;;  %v1619_v56 = vsel %vm792_vm12, %v1590_v0, %v11539_v59  ;;  %v1652_v0 = vmax.f32 %v10564_v32, %v1618_v34 }
 0x2ec   :  { %7924 = vmatpush.msk.msrb.mxu2 %vm1861_vm4, %v14334_v46  ;;  %7940 = vmatpush.msk.msra.mxu3 %vm1925_vm10, %v14334_v46  ;;  %vm1913_vm4 = vcmp.eq.s32.totalorder %v10686_v35, %v11415_v62  ;;  %14455 = vst [vmem:[#allocation166_spill] sm:$0xff] %v11534_v63  ;;  %vm1845_vm10 = vcmp.eq.s32.totalorder %v9945_v36, %v11415_v62 }
 0x2ed   :  { %3497 = vmatmul.f32.gmra.mxu2 %v11534_v63  ;;  %3520 = vmatmul.f32.gmra.mxu3 %v11537_v19  ;;  %v1586_v60 = vpop.permute.xlu1 %1585  ;;  %vm1901_vm3 = vcmp.eq.s32.totalorder %v10744_v54, %v11415_v62  ;;  %v1653_v40 = vmax.f32 %v10544_v5, %v1619_v56  ;;  %v14466_v54 = vld [vmem:[#allocation66_spill] sm:$0xff] }
 0x2ee   :  { %7925 = vmatpush.msk.msrb.mxu2 %vm1857_vm9, %v14334_v46  ;;  %7941 = vmatpush.msk.msra.mxu3 %vm1921_vm7, %v14334_v46  ;;  %vm2332_vm9 = vcmp.eq.s32.totalorder %v11526_v57, %v10579_v18  ;;  %vm1841_vm7 = vcmp.eq.s32.totalorder %v9962_v41, %v11415_v62  ;;  %v1616_v33 = vsel %vm792_vm12, %v11387_v31, %v1586_v60 }
 0x2ef   :  { %v1617_v35 = vsel %vm792_vm12, %v1586_v60, %v11409_v13  ;;  %v1606_v6 = vpop.permute.xlu0 %1605  ;;  %7916 = vmatpush.msk.msra.mxu0 %vm2332_vm9, %v14334_v46  ;;  %v1650_v11 = vmax.f32 %v10542_v7, %v1616_v33  ;;  %vm2005_vm9 = vcmp.eq.s32.totalorder %v10582_v47, %v11415_v62  ;;  %v14460_v33 = vld [vmem:[#allocation76_spill] sm:$0xff] }
 0x2f0   :  { %7926 = vmatpush.msk.msrb.mxu2 %vm1853_vm2, %v14334_v46  ;;  %7942 = vmatpush.msk.msra.mxu3 %vm1917_vm11, %v14334_v46  ;;  %vm1837_vm2 = vcmp.eq.s32.totalorder %v9970_v43, %v11415_v62  ;;  %vm2328_vm11 = vcmp.eq.s32.totalorder %v11544_v49, %v10579_v18  ;;  %v1651_v32 = vmax.f32 %v10561_v30, %v1617_v35  ;;  %v14459_v35 = vld [vmem:[#allocation38_spill] sm:$0xff]  ;;  %v14461_v60 = vld [vmem:[#allocation44_spill] sm:$0xff] }
 0x2f1   :  { %7917 = vmatpush.msk.msra.mxu0 %vm2328_vm11, %v14334_v46  ;;  %v11597_v5 = vadd.f32 %v11384_v10, %v1650_v11  ;;  %v11616_v30 = vadd.f32 %v11384_v10, %v1652_v0  ;;  %v11619_v18 = vadd.f32 %v11384_v10, %v1653_v40  ;;  %v1604_v11 = vpop.permute.xlu2 %1603  ;;  %vm2001_vm11 = vcmp.eq.s32.totalorder %v10592_v17, %v11415_v62  ;;  %v14463_v0 = vld [vmem:[#allocation40_spill] sm:$0xff] }
 0x2f2   :  { %7927 = vmatpush.msk.msrb.mxu2 %vm1849_vm13, %v14334_v46  ;;  %7943 = vmatpush.msk.msra.mxu3 %vm1913_vm4, %v14334_v46  ;;  %vm1833_vm13 = vcmp.eq.s32.totalorder %v9973_v44, %v11415_v62  ;;  %v11600_v7 = vadd.f32 %v11384_v10, %v1651_v32  ;;  %vm1897_vm4 = vcmp.eq.s32.totalorder %v10770_v61, %v11415_v62 }
 0x2f3   :  { %14458 = vst [vmem:[#allocation169_spill] sm:$0xff] %v11616_v30  ;;  %3540 = vmatmul.f32.vlgmr.msra.gmra.mxu1 %v11597_v5  ;;  %v1624_v13 = vsel %vm792_vm12, %v11466_v42, %v1604_v11  ;;  %v1625_v31 = vsel %vm792_vm12, %v1604_v11, %v1606_v6  ;;  %v14464_v11 = vld [vmem:[#allocation50_spill] sm:$0xff] }
 0x2f4   :  { %7928 = vmatpush.msk.msrb.mxu2 %vm1845_vm10, %v14334_v46  ;;  %7944 = vmatpush.msk.msra.mxu3 %vm1909_vm8, %v14334_v46  ;;  %14457 = vst [vmem:[#allocation168_spill] sm:$0xff] %v11600_v7  ;;  %vm1829_vm10 = vcmp.eq.s32.totalorder %v9995_v51, %v11415_v62  ;;  %vm1893_vm8 = vcmp.eq.s32.totalorder %v10800_v48, %v11415_v62  ;;  %v14465_v48 = vld [vmem:[#allocation48_spill] sm:$0xff] }
 0x2f5   :  { %3563 = vmatmul.f32.vlgmr.msrb.gmra.mxu0 %v11600_v7  ;;  %3586 = vmatmul.f32.vlgmr.msra.gmra.mxu2 %v11616_v30  ;;  %v1608_v40 = vpop.permute.xlu1 %1607  ;;  %v1659_v61 = vmax.f32 %v14465_v48, %v1624_v13  ;;  %v1660_v50 = vmax.f32 %v14466_v54, %v1625_v31  ;;  %v14468_v48 = vld [vmem:[#allocation46_spill] sm:$0xff]  ;;  %v14469_v54 = vld [vmem:[#allocation71_spill] sm:$0xff]  ;;  %v14470_v13 = vld [vmem:[#allocation93_spill] sm:$0xff] }
 0x2f6   :  { %7929 = vmatpush.msk.msrb.mxu2 %vm1841_vm7, %v14334_v46  ;;  %7945 = vmatpush.msk.msra.mxu3 %vm1905_vm1, %v14334_v46  ;;  %vm2069_vm7 = vcmp.eq.s32.totalorder %v10730_v39, %v11415_v62  ;;  %vm1825_vm1 = vcmp.eq.s32.totalorder %v10001_v55, %v11415_v62  ;;  %v1626_v34 = vsel %vm792_vm12, %v1606_v6, %v1608_v40  ;;  %v14462_v6 = vld [vmem:[#allocation69_spill] sm:$0xff]  ;;  %v14471_v31 = vld [vmem:[#allocation79_spill] sm:$0xff] }
 0x2f7   :  { %3609 = vmatmul.f32.vlgmr.msrb.gmra.mxu3 %v11619_v18  ;;  %v11653_v56 = vpop.permute.xlu0 %1609  ;;  %7952 = vmatpush.msk.msra.mxu1 %vm2005_vm9, %v14334_v46  ;;  %v1661_v32 = vmax.f32 %v14463_v0, %v1626_v34  ;;  %vm1817_vm9 = vcmp.eq.s32.totalorder %v9854_v4, %v11415_v62  ;;  %v14467_v34 = vld [vmem:[#allocation37_spill] sm:$0xff] }
 0x2f8   :  { %7930 = vmatpush.msk.msrb.mxu2 %vm1837_vm2, %v14334_v46  ;;  %7946 = vmatpush.msk.msra.mxu3 %vm1901_vm3, %v14334_v46  ;;  %vm1889_vm2 = vcmp.eq.s32.totalorder %v10827_v24, %v11415_v62  ;;  %vm2065_vm3 = vcmp.eq.s32.totalorder %v10756_v16, %v11415_v62  ;;  %v1627_v42 = vsel %vm792_vm12, %v1608_v40, %v11653_v56  ;;  %v14480_v24 = vld [vmem:[#allocation53_spill] sm:$0xff] }
 0x2f9   :  { %7968 = vmatpush.msk.msrb.mxu0 %vm2069_vm7, %v14334_v46  ;;  %v1662_v40 = vmax.f32 %v14464_v11, %v1627_v42  ;;  %7953 = vmatpush.msk.msra.mxu1 %vm2001_vm11, %v14334_v46  ;;  %vm1881_vm7 = vcmp.eq.s32.totalorder %v14467_v34, %v11415_v62  ;;  %vm2133_vm11 = vcmp.eq.s32.totalorder %v14470_v13, %v11415_v62 }
 0x2fa   :  { %7931 = vmatpush.msk.msrb.mxu2 %vm1833_vm13, %v14334_v46  ;;  %7947 = vmatpush.msk.msra.mxu3 %vm1897_vm4, %v14334_v46  ;;  %vm1821_vm13 = vcmp.eq.s32.totalorder %v14459_v35, %v11415_v62  ;;  %vm1885_vm4 = vcmp.eq.s32.totalorder %v14460_v33, %v11415_v62  ;;  %v11718_v42 = vadd.f32 %v11459_v38, %v1661_v32  ;;  %v14479_v33 = vld [vmem:[#allocation83_spill] sm:$0xff] }
 0x2fb   :  { %7969 = vmatpush.msk.msrb.mxu0 %vm2065_vm3, %v14334_v46  ;;  %vm2197_vm3 = vcmp.eq.s32.totalorder %v14471_v31, %v11415_v62  ;;  %v11721_v0 = vadd.f32 %v11459_v38, %v1662_v40  ;;  %v11729_v11 = vadd.f32 %v11459_v38, %v1659_v61  ;;  %v11732_v34 = vadd.f32 %v11459_v38, %v1660_v50  ;;  %v14476_v40 = vld [vmem:[#allocation49_spill] sm:$0xff]  ;;  %v14477_v31 = vld [vmem:[#allocation74_spill] sm:$0xff] }
 0x2fc   :  { %7932 = vmatpush.msk.msrb.mxu2 %vm1829_vm10, %v14334_v46  ;;  %7948 = vmatpush.msk.msra.mxu3 %vm1893_vm8, %v14334_v46  ;;  %vm1997_vm10 = vcmp.eq.s32.totalorder %v14461_v60, %v11415_v62  ;;  %vm2061_vm8 = vcmp.eq.s32.totalorder %v14462_v6, %v11415_v62  ;;  %14472 = vst [vmem:[#allocation44_spill] sm:$0xff] %v11718_v42  ;;  %v14478_v50 = vld [vmem:[#allocation98_spill] sm:$0xff] }
 0x2fd   :  { %7954 = vmatpush.msk.msra.mxu1 %vm1997_vm10, %v14334_v46  ;;  %7970 = vmatpush.msk.msrb.mxu0 %vm2061_vm8, %v14334_v46  ;;  %14473 = vst [vmem:[#allocation69_spill] sm:$0xff] %v11721_v0  ;;  %v1594_v32 = vpop.permute.xlu1 %1593  ;;  %vm2129_vm10 = vcmp.eq.s32.totalorder %v14478_v50, %v11415_v62  ;;  %vm2193_vm8 = vcmp.eq.s32.totalorder %v14479_v33, %v11415_v62  ;;  %v14483_v50 = vld [vmem:[#allocation60_spill] sm:$0xff]  ;;  %v14484_v33 = vld [vmem:[#allocation59_spill] sm:$0xff] }
 0x2fe   :  { %7933 = vmatpush.msk.msrb.mxu2 %vm1825_vm1, %v14334_v46  ;;  %7949 = vmatpush.msk.msra.mxu3 %vm1889_vm2, %v14334_v46  ;;  %vm1993_vm1 = vcmp.eq.s32.totalorder %v14468_v48, %v11415_v62  ;;  %vm2057_vm2 = vcmp.eq.s32.totalorder %v14469_v54, %v11415_v62  ;;  %14474 = vst [vmem:[#allocation40_spill] sm:$0xff] %v11729_v11 }
 0x2ff   :  { %14475 = vst [vmem:[#allocation50_spill] sm:$0xff] %v11732_v34  ;;  %7955 = vmatpush.msk.msra.mxu1 %vm1993_vm1, %v14334_v46  ;;  %7971 = vmatpush.msk.msrb.mxu0 %vm2057_vm2, %v14334_v46  ;;  %v1620_v61 = vsel %vm792_vm12, %v11539_v59, %v1594_v32  ;;  %v14482_v59 = vld [vmem:[#allocation102_spill] sm:$0xff]  ;;  %v1655_v48 = vmax.f32 %v14484_v33, %v1594_v32  ;;  %v14490_v32 = vld [vmem:[#allocation57_spill] sm:$0xff] }
 0x300   :  { %7934 = vmatpush.msk.msrb.mxu2 %vm1821_vm13, %v14334_v46  ;;  %7950 = vmatpush.msk.msra.mxu3 %vm1885_vm4, %v14334_v46  ;;  %vm1989_vm13 = vcmp.eq.s32.totalorder %v14476_v40, %v11415_v62  ;;  %vm2053_vm4 = vcmp.eq.s32.totalorder %v14477_v31, %v11415_v62  ;;  %v14481_v40 = vld [vmem:[#allocation77_spill] sm:$0xff]  ;;  %vm2125_vm1 = vcmp.eq.s32.totalorder %v14482_v59, %v11415_v62  ;;  %v14489_v33 = vld [vmem:[#allocation90_spill] sm:$0xff] }
 0x301   :  { %3543 = vmatmul.f32.gmra.mxu1 %v11729_v11  ;;  %3566 = vmatmul.f32.gmra.mxu0 %v11732_v34  ;;  %v1654_v13 = vmax.f32 %v14483_v50, %v1620_v61  ;;  %vm2189_vm2 = vcmp.eq.s32.totalorder %v14485_v9, %v11415_v62  ;;  %v14487_v59 = vld [vmem:[#allocation81_spill] sm:$0xff]  ;;  %v14488_v61 = vld [vmem:[#allocation106_spill] sm:$0xff] }
 0x302   :  { %7935 = vmatpush.msk.msrb.mxu2 %vm1817_vm9, %v14334_v46  ;;  %7951 = vmatpush.msk.msra.mxu3 %vm1881_vm7, %v14334_v46  ;;  %vm1985_vm9 = vcmp.eq.s32.totalorder %v14480_v24, %v11415_v62  ;;  %vm2049_vm7 = vcmp.eq.s32.totalorder %v14481_v40, %v11415_v62  ;;  %v14486_v24 = vld [vmem:[#allocation55_spill] sm:$0xff]  ;;  %v14491_v50 = vld [vmem:[#allocation85_spill] sm:$0xff]  ;;  %v14492_v9 = vld [vmem:[#allocation110_spill] sm:$0xff] }
 0x303   :  { %3589 = vmatmul.f32.gmra.mxu2 %v11718_v42  ;;  %3612 = vmatmul.f32.gmra.mxu3 %v11721_v0  ;;  %v14499_v0 = vld [vmem:[#allocation97_spill] sm:$0xff] }
 0x304   :  { %7984 = vmatpush.msk.msra.mxu2 %vm2133_vm11, %v14334_v46  ;;  %8000 = vmatpush.msk.msrb.mxu3 %vm2197_vm3, %v14334_v46  ;;  %vm1981_vm11 = vcmp.eq.s32.totalorder %v14486_v24, %v11415_v62  ;;  %vm2045_vm3 = vcmp.eq.s32.totalorder %v14487_v59, %v11415_v62  ;;  %v11785_v24 = vadd.f32 %v11384_v10, %v1654_v13  ;;  %v14496_v13 = vld [vmem:[#allocation114_spill] sm:$0xff] }
 0x305   :  { %7956 = vmatpush.msk.msra.mxu1 %vm1989_vm13, %v14334_v46  ;;  %7972 = vmatpush.msk.msrb.mxu0 %vm2053_vm4, %v14334_v46  ;;  %vm2121_vm13 = vcmp.eq.s32.totalorder %v14488_v61, %v11415_v62  ;;  %vm2185_vm4 = vcmp.eq.s32.totalorder %v14489_v33, %v11415_v62  ;;  %v11788_v61 = vadd.f32 %v11384_v10, %v1655_v48  ;;  %v14493_v33 = vld [vmem:[#allocation92_spill] sm:$0xff]  ;;  %v14494_v10 = vld [vmem:[#allocation61_spill] sm:$0xff] }
 0x306   :  { %7985 = vmatpush.msk.msra.mxu2 %vm2129_vm10, %v14334_v46  ;;  %8001 = vmatpush.msk.msrb.mxu3 %vm2193_vm8, %v14334_v46  ;;  %vm1977_vm10 = vcmp.eq.s32.totalorder %v14490_v32, %v11415_v62  ;;  %vm2041_vm8 = vcmp.eq.s32.totalorder %v14491_v50, %v11415_v62  ;;  %v1612_v32 = vpop.permute.xlu2 %1611  ;;  %v14495_v48 = vld [vmem:[#allocation88_spill] sm:$0xff] }
 0x307   :  { %7957 = vmatpush.msk.msra.mxu1 %vm1985_vm9, %v14334_v46  ;;  %7973 = vmatpush.msk.msrb.mxu0 %vm2049_vm7, %v14334_v46  ;;  %vm2117_vm9 = vcmp.eq.s32.totalorder %v14492_v9, %v11415_v62  ;;  %vm2181_vm7 = vcmp.eq.s32.totalorder %v14493_v33, %v11415_v62  ;;  %v14497_v33 = vld [vmem:[#allocation95_spill] sm:$0xff]  ;;  %v1628_v9 = vsel %vm792_vm12, %v11653_v56, %v1612_v32  ;;  %v14502_v56 = vld [vmem:[#allocation65_spill] sm:$0xff] }
 0x308   :  { %7986 = vmatpush.msk.msra.mxu2 %vm2125_vm1, %v14334_v46  ;;  %8002 = vmatpush.msk.msrb.mxu3 %vm2189_vm2, %v14334_v46  ;;  %vm3448_vm1 = vcmask 523264   ;;  %vm1973_vm2 = vcmp.eq.s32.totalorder %v14494_v10, %v11415_v62  ;;  %v14498_v10 = vld [vmem:[#allocation63_spill] sm:$0xff] }
 0x309   :  { %7958 = vmatpush.msk.msra.mxu1 %vm1981_vm11, %v14334_v46  ;;  %7974 = vmatpush.msk.msrb.mxu0 %vm2045_vm3, %v14334_v46  ;;  %vm2037_vm11 = vcmp.eq.s32.totalorder %v14495_v48, %v11415_v62  ;;  %vm2113_vm3 = vcmp.eq.s32.totalorder %v14496_v13, %v11415_v62  ;;  %v14500_v13 = vld [vmem:[#allocation118_spill] sm:$0xff]  ;;  %v14506_v48 = vld [vmem:[#allocation51_spill] sm:$0xff] }
 0x30a   :  { %7987 = vmatpush.msk.msra.mxu2 %vm2121_vm13, %v14334_v46  ;;  %8003 = vmatpush.msk.msrb.mxu3 %vm2185_vm4, %v14334_v46  ;;  %vm2177_vm13 = vcmp.eq.s32.totalorder %v14497_v33, %v11415_v62  ;;  %vm1969_vm4 = vcmp.eq.s32.totalorder %v14498_v10, %v11415_v62  ;;  %v14501_v33 = vld [vmem:[#allocation99_spill] sm:$0xff]  ;;  %v14504_v10 = vld [vmem:[#allocation122_spill] sm:$0xff] }
 0x30b   :  { %7959 = vmatpush.msk.msra.mxu1 %vm1977_vm10, %v14334_v46  ;;  %7975 = vmatpush.msk.msrb.mxu0 %vm2041_vm8, %v14334_v46  ;;  %vm2033_vm10 = vcmp.eq.s32.totalorder %v14499_v0, %v11415_v62  ;;  %vm2109_vm8 = vcmp.eq.s32.totalorder %v14500_v13, %v11415_v62  ;;  %vm2173_vm12 = vcmp.eq.s32.totalorder %v14501_v33, %v11415_v62  ;;  %v14505_v0 = vld [vmem:[#allocation84_spill] sm:$0xff]  ;;  %v14507_v33 = vld [vmem:[#allocation103_spill] sm:$0xff] }
 0x30c   :  { %7988 = vmatpush.msk.msra.mxu2 %vm2117_vm9, %v14334_v46  ;;  %8004 = vmatpush.msk.msrb.mxu3 %vm2181_vm7, %v14334_v46  ;;  %vm1965_vm9 = vcmp.eq.s32.totalorder %v14502_v56, %v11415_v62  ;;  %v1663_v13 = vmax.f32 %v14506_v48, %v1628_v9  ;;  %v14508_v56 = vld [vmem:[#allocation68_spill] sm:$0xff]  ;;  %v14510_v9 = vld [vmem:[#allocation126_spill] sm:$0xff] }
 0x30d   :  { %3632 = vmatmul.f32.vlgmr.msrb.gmra.mxu1 %v11785_v24  ;;  %7918 = vmatmul.msk.f32.vlgmr.msra.gmra.mxu0 %vm3448_vm1, %v11788_v61 }
 0x30e   :  { %3678 = vmatmul.f32.vlgmr.msrb.gmra.mxu2 %v11432_v37  ;;  %3701 = vmatmul.f32.vlgmr.msra.gmra.mxu3 %v11435_v14  ;;  %v14503_v14 = vld [vmem:[#allocation101_spill] sm:$0xff]  ;;  %v1664_v37 = vmax.f32 %v14505_v0, %v1612_v32  ;;  %v14511_v0 = vld [vmem:[#allocation107_spill] sm:$0xff]  ;;  %v11857_v48 = vadd.f32 %v11459_v38, %v1663_v13 }
 0x30f   :  { %7960 = vmatpush.msk.msra.mxu1 %vm1973_vm2, %v14334_v46  ;;  %7976 = vmatpush.msk.msrb.mxu0 %vm2037_vm11, %v14334_v46  ;;  %vm2029_vm7 = vcmp.eq.s32.totalorder %v14503_v14, %v11415_v62  ;;  %vm2105_vm2 = vcmp.eq.s32.totalorder %v14504_v10, %v11415_v62  ;;  %vm2169_vm11 = vcmp.eq.s32.totalorder %v14507_v33, %v11415_v62  ;;  %v14509_v10 = vld [vmem:[#allocation105_spill] sm:$0xff]  ;;  %v14516_v13 = vld [vmem:[#allocation75_spill] sm:$0xff] }
 0x310   :  { %7989 = vmatpush.msk.msra.mxu2 %vm2113_vm3, %v14334_v46  ;;  %8005 = vmatpush.msk.msrb.mxu3 %vm2177_vm13, %v14334_v46  ;;  %vm1961_vm3 = vcmp.eq.s32.totalorder %v14508_v56, %v11415_v62  ;;  %vm2025_vm13 = vcmp.eq.s32.totalorder %v14509_v10, %v11415_v62  ;;  %v11854_v32 = vadd.f32 %v11459_v38, %v1664_v37  ;;  %v14513_v33 = vld [vmem:[#allocation109_spill] sm:$0xff]  ;;  %v14514_v37 = vld [vmem:[#allocation130_spill] sm:$0xff]  ;;  %v14515_v38 = vld [vmem:[#allocation111_spill] sm:$0xff] }
 0x311   :  { %7961 = vmatpush.msk.msra.mxu1 %vm1969_vm4, %v14334_v46  ;;  %7977 = vmatpush.msk.msrb.mxu0 %vm2033_vm10, %v14334_v46  ;;  %vm2101_vm4 = vcmp.eq.s32.totalorder %v14510_v9, %v11415_v62  ;;  %vm2165_vm10 = vcmp.eq.s32.totalorder %v14511_v0, %v11415_v62  ;;  %v14512_v0 = vld [vmem:[#allocation72_spill] sm:$0xff]  ;;  %v14518_v9 = vld [vmem:[#allocation134_spill] sm:$0xff] }
 0x312   :  { %7990 = vmatpush.msk.msra.mxu2 %vm2109_vm8, %v14334_v46  ;;  %8006 = vmatpush.msk.msrb.mxu3 %vm2173_vm12, %v14334_v46  ;;  %vm1957_vm8 = vcmp.eq.s32.totalorder %v14512_v0, %v11415_v62  ;;  %vm2021_vm12 = vcmp.eq.s32.totalorder %v14513_v33, %v11415_v62  ;;  %v14517_v0 = vld [vmem:[#allocation113_spill] sm:$0xff]  ;;  %v14526_v56 = vld [vmem:[#allocation140_spill] sm:$0xff] }
 0x313   :  { %7962 = vmatpush.msk.msra.mxu1 %vm1965_vm9, %v14334_v46  ;;  %7978 = vmatpush.msk.msrb.mxu0 %vm2029_vm7, %v14334_v46  ;;  %vm2097_vm9 = vcmp.eq.s32.totalorder %v14514_v37, %v11415_v62  ;;  %vm2161_vm7 = vcmp.eq.s32.totalorder %v14515_v38, %v11415_v62  ;;  %v14519_v37 = vld [vmem:[#allocation115_spill] sm:$0xff]  ;;  %v14520_v38 = vld [vmem:[#allocation78_spill] sm:$0xff] }
 0x314   :  { %7991 = vmatpush.msk.msra.mxu2 %vm2105_vm2, %v14334_v46  ;;  %8007 = vmatpush.msk.msrb.mxu3 %vm2169_vm11, %v14334_v46  ;;  %vm1953_vm2 = vcmp.eq.s32.totalorder %v14516_v13, %v11415_v62  ;;  %vm2017_vm11 = vcmp.eq.s32.totalorder %v14517_v0, %v11415_v62  ;;  %v14522_v13 = vld [vmem:[#allocation138_spill] sm:$0xff] }
 0x315   :  { %7963 = vmatpush.msk.msra.mxu1 %vm1961_vm3, %v14334_v46  ;;  %7979 = vmatpush.msk.msrb.mxu0 %vm2025_vm13, %v14334_v46  ;;  %vm2093_vm3 = vcmp.eq.s32.totalorder %v14518_v9, %v11415_v62  ;;  %vm2157_vm13 = vcmp.eq.s32.totalorder %v14519_v37, %v11415_v62  ;;  %v14523_v9 = vld [vmem:[#allocation119_spill] sm:$0xff]  ;;  %v14524_v37 = vld [vmem:[#allocation80_spill] sm:$0xff] }
 0x316   :  { %7992 = vmatpush.msk.msra.mxu2 %vm2101_vm4, %v14334_v46  ;;  %8008 = vmatpush.msk.msrb.mxu3 %vm2165_vm10, %v14334_v46  ;;  %vm1949_vm4 = vcmp.eq.s32.totalorder %v14520_v38, %v11415_v62  ;;  %v14525_v38 = vld [vmem:[#allocation121_spill] sm:$0xff] }
 0x317   :  { %3635 = vmatmul.f32.gmra.mxu1 %v11857_v48  ;;  %7919 = vmatmul.msk.f32.gmra.mxu0 %vm3448_vm1, %v11854_v32 }
 0x318   :  { %3681 = vmatmul.f32.gmra.mxu2 %v11487_v26  ;;  %3704 = vmatmul.f32.gmra.mxu3 %v11534_v63  ;;  %v14521_v63 = vld [vmem:[#allocation117_spill] sm:$0xff] }
 0x319   :  { %7964 = vmatpush.msk.msra.mxu1 %vm1957_vm8, %v14334_v46  ;;  %7980 = vmatpush.msk.msrb.mxu0 %vm2021_vm12, %v14334_v46  ;;  %vm2013_vm10 = vcmp.eq.s32.totalorder %v14521_v63, %v11415_v62  ;;  %vm2089_vm8 = vcmp.eq.s32.totalorder %v14522_v13, %v11415_v62  ;;  %vm2153_vm12 = vcmp.eq.s32.totalorder %v14523_v9, %v11415_v62  ;;  %v14527_v13 = vld [vmem:[#allocation123_spill] sm:$0xff]  ;;  %v14528_v9 = vld [vmem:[#allocation82_spill] sm:$0xff] }
 0x31a   :  { %7993 = vmatpush.msk.msra.mxu2 %vm2097_vm9, %v14334_v46  ;;  %8009 = vmatpush.msk.msrb.mxu3 %vm2161_vm7, %v14334_v46  ;;  %vm1945_vm9 = vcmp.eq.s32.totalorder %v14524_v37, %v11415_v62  ;;  %vm2009_vm7 = vcmp.eq.s32.totalorder %v14525_v38, %v11415_v62  ;;  %v14529_v37 = vld [vmem:[#allocation125_spill] sm:$0xff]  ;;  %v14534_v38 = vld [vmem:[#allocation144_spill] sm:$0xff] }
 0x31b   :  { %7965 = vmatpush.msk.msra.mxu1 %vm1953_vm2, %v14334_v46  ;;  %7981 = vmatpush.msk.msrb.mxu0 %vm2017_vm11, %v14334_v46  ;;  %vm2085_vm2 = vcmp.eq.s32.totalorder %v14526_v56, %v11415_v62  ;;  %vm2149_vm11 = vcmp.eq.s32.totalorder %v14527_v13, %v11415_v62  ;;  %v14530_v13 = vld [vmem:[#allocation142_spill] sm:$0xff]  ;;  %v14531_v56 = vld [vmem:[#allocation127_spill] sm:$0xff] }
 0x31c   :  { %7994 = vmatpush.msk.msra.mxu2 %vm2093_vm3, %v14334_v46  ;;  %8010 = vmatpush.msk.msrb.mxu3 %vm2157_vm13, %v14334_v46  ;;  %vm2261_vm3 = vcmp.eq.s32.totalorder %v14528_v9, %v11415_v62  ;;  %vm2325_vm13 = vcmp.eq.s32.totalorder %v14529_v37, %v11415_v62  ;;  %v14532_v9 = vld [vmem:[#allocation86_spill] sm:$0xff]  ;;  %v14533_v37 = vld [vmem:[#allocation129_spill] sm:$0xff] }
 0x31d   :  { %7966 = vmatpush.msk.msra.mxu1 %vm1949_vm4, %v14334_v46  ;;  %7982 = vmatpush.msk.msrb.mxu0 %vm2013_vm10, %v14334_v46  ;;  %vm2081_vm4 = vcmp.eq.s32.totalorder %v14530_v13, %v11415_v62  ;;  %vm2145_vm10 = vcmp.eq.s32.totalorder %v14531_v56, %v11415_v62  ;;  %v14535_v13 = vld [vmem:[#allocation131_spill] sm:$0xff]  ;;  %v14536_v56 = vld [vmem:[#allocation89_spill] sm:$0xff] }
 0x31e   :  { %7995 = vmatpush.msk.msra.mxu2 %vm2089_vm8, %v14334_v46  ;;  %8011 = vmatpush.msk.msrb.mxu3 %vm2153_vm12, %v14334_v46  ;;  %vm2257_vm8 = vcmp.eq.s32.totalorder %v14532_v9, %v11415_v62  ;;  %vm2321_vm12 = vcmp.eq.s32.totalorder %v14533_v37, %v11415_v62  ;;  %v14537_v9 = vld [vmem:[#allocation133_spill] sm:$0xff]  ;;  %v11943_v37 = vld [vmem:[%s9601_s29] sm:$0xf]  ;;  %s9543_s29 = smov 103  }
 0x31f   :  { %7967 = vmatpush.msk.msra.mxu1 %vm1945_vm9, %v14334_v46  ;;  %7983 = vmatpush.msk.msrb.mxu0 %vm2009_vm7, %v14334_v46  ;;  %vm2077_vm9 = vcmp.eq.s32.totalorder %v14534_v38, %v11415_v62  ;;  %vm2141_vm7 = vcmp.eq.s32.totalorder %v14535_v13, %v11415_v62  ;;  %14538 = vst [vmem:[#allocation48_spill] sm:$0xff] %v11943_v37  ;;  %v14539_v13 = vld [vmem:[#allocation146_spill] sm:$0xff]  ;;  %v14540_v38 = vld [vmem:[#allocation135_spill] sm:$0xff] }
 0x320   :  { %7996 = vmatpush.msk.msra.mxu2 %vm2085_vm2, %v14334_v46  ;;  %8012 = vmatpush.msk.msrb.mxu3 %vm2149_vm11, %v14334_v46  ;;  %vm2253_vm2 = vcmp.eq.s32.totalorder %v14536_v56, %v11415_v62  ;;  %vm2317_vm11 = vcmp.eq.s32.totalorder %v14537_v9, %v11415_v62  ;;  %v14541_v56 = vld [vmem:[#allocation91_spill] sm:$0xff] }
 0x321   :  { %8016 = vmatpush.msk.msrb.mxu1 %vm2261_vm3, %v14334_v46  ;;  %8032 = vmatpush.msk.msra.mxu0 %vm2325_vm13, %v14334_v46  ;;  %vm2073_vm3 = vcmp.eq.s32.totalorder %v14539_v13, %v11415_v62  ;;  %vm2137_vm13 = vcmp.eq.s32.totalorder %v14540_v38, %v11415_v62  ;;  %v14543_v38 = vld [vmem:[#allocation94_spill] sm:$0xff] }
 0x322   :  { %3724 = vmatmul.f32.vlgmr.msra.gmra.mxu1 %v11426_v23  ;;  %3747 = vmatmul.f32.vlgmr.msrb.gmra.mxu0 %v11597_v5  ;;  %v11946_v23 = vperm.slane %v11943_v37, 2  ;;  %v14542_v37 = vld [vmem:[#allocation137_spill] sm:$0xff] }
 0x323   :  { %7997 = vmatpush.msk.msra.mxu2 %vm2081_vm4, %v14334_v46  ;;  %8013 = vmatpush.msk.msrb.mxu3 %vm2145_vm10, %v14334_v46  ;;  %vm2249_vm4 = vcmp.eq.s32.totalorder %v14541_v56, %v11415_v62  ;;  %vm2313_vm10 = vcmp.eq.s32.totalorder %v14542_v37, %v11415_v62  ;;  %v14544_v56 = vld [vmem:[#allocation139_spill] sm:$0xff] }
 0x324   :  { %8017 = vmatpush.msk.msrb.mxu1 %vm2257_vm8, %v14334_v46  ;;  %8033 = vmatpush.msk.msra.mxu0 %vm2321_vm12, %v14334_v46  ;;  %vm2357_vm8 = vcmp.eq.s32.totalorder %v11421_v3, %v11415_v62  ;;  %vm1878_vm12 = vcmp.eq.s32.totalorder %v9864_v8, %v11946_v23  ;;  %v14545_v8 = vld [vmem:[#allocation96_spill] sm:$0xff] }
 0x325   :  { %7998 = vmatpush.msk.msra.mxu2 %vm2077_vm9, %v14334_v46  ;;  %8014 = vmatpush.msk.msrb.mxu3 %vm2141_vm7, %v14334_v46  ;;  %vm2245_vm9 = vcmp.eq.s32.totalorder %v14543_v38, %v11415_v62  ;;  %vm2309_vm7 = vcmp.eq.s32.totalorder %v14544_v56, %v11415_v62  ;;  %v14546_v38 = vld [vmem:[#allocation141_spill] sm:$0xff] }
 0x326   :  { %8018 = vmatpush.msk.msrb.mxu1 %vm2253_vm2, %v14334_v46  ;;  %8034 = vmatpush.msk.msra.mxu0 %vm2317_vm11, %v14334_v46  ;;  %vm2353_vm2 = vcmp.eq.s32.totalorder %v11429_v58, %v11415_v62  ;;  %vm1874_vm11 = vcmp.eq.s32.totalorder %v9874_v15, %v11946_v23  ;;  %v14547_v15 = vld [vmem:[#allocation100_spill] sm:$0xff] }
 0x327   :  { %7999 = vmatpush.msk.msra.mxu2 %vm2073_vm3, %v14334_v46  ;;  %8015 = vmatpush.msk.msrb.mxu3 %vm2137_vm13, %v14334_v46  ;;  %vm2241_vm3 = vcmp.eq.s32.totalorder %v14545_v8, %v11415_v62  ;;  %vm2305_vm13 = vcmp.eq.s32.totalorder %v14546_v38, %v11415_v62 }
 0x328   :  { %8019 = vmatpush.msk.msrb.mxu1 %vm2249_vm4, %v14334_v46  ;;  %8035 = vmatpush.msk.msra.mxu0 %vm2313_vm10, %v14334_v46  ;;  %vm2349_vm4 = vcmp.eq.s32.totalorder %v11445_v53, %v11415_v62  ;;  %vm1870_vm10 = vcmp.eq.s32.totalorder %v9883_v20, %v11946_v23  ;;  %v14549_v20 = vld [vmem:[#allocation104_spill] sm:$0xff] }
 0x329   :  { %3770 = vmatmul.f32.vlgmr.msra.gmra.mxu2 %v11600_v7  ;;  %3793 = vmatmul.f32.vlgmr.msrb.gmra.mxu3 %v11616_v30  ;;  %v14548_v30 = vld [vmem:[#allocation143_spill] sm:$0xff] }
 0x32a   :  { %8048 = vmatpush.msk.msrb.mxu2 %vm2357_vm8, %v14334_v46  ;;  %8058 = vmatpush.msk.msra.mxu3 %vm1878_vm12, %v14334_v46  ;;  %vm2237_vm8 = vcmp.eq.s32.totalorder %v14547_v15, %v11415_v62  ;;  %vm2301_vm12 = vcmp.eq.s32.totalorder %v14548_v30, %v11415_v62  ;;  %v14550_v15 = vld [vmem:[#allocation145_spill] sm:$0xff] }
 0x32b   :  { %8020 = vmatpush.msk.msrb.mxu1 %vm2245_vm9, %v14334_v46  ;;  %8036 = vmatpush.msk.msra.mxu0 %vm2309_vm7, %v14334_v46  ;;  %vm2345_vm9 = vcmp.eq.s32.totalorder %v11473_v52, %v11415_v62  ;;  %vm1866_vm7 = vcmp.eq.s32.totalorder %v9886_v21, %v11946_v23  ;;  %v14551_v21 = vld [vmem:[#allocation108_spill] sm:$0xff] }
 0x32c   :  { %3727 = vmatmul.f32.gmra.mxu1 %v11537_v19  ;;  %3750 = vmatmul.f32.gmra.mxu0 %v11729_v11 }
 0x32d   :  { %8049 = vmatpush.msk.msrb.mxu2 %vm2353_vm2, %v14334_v46  ;;  %8059 = vmatpush.msk.msra.mxu3 %vm1874_vm11, %v14334_v46  ;;  %vm2233_vm2 = vcmp.eq.s32.totalorder %v14549_v20, %v11415_v62  ;;  %vm2297_vm11 = vcmp.eq.s32.totalorder %v14550_v15, %v11415_v62  ;;  %v14552_v20 = vld [vmem:[#allocation147_spill] sm:$0xff] }
 0x32e   :  { %8021 = vmatpush.msk.msrb.mxu1 %vm2241_vm3, %v14334_v46  ;;  %8037 = vmatpush.msk.msra.mxu0 %vm2305_vm13, %v14334_v46  ;;  %vm2341_vm3 = vcmp.eq.s32.totalorder %v11484_v45, %v11415_v62  ;;  %vm1862_vm13 = vcmp.eq.s32.totalorder %v9902_v25, %v11946_v23  ;;  %v14553_v25 = vld [vmem:[#allocation112_spill] sm:$0xff] }
 0x32f   :  { %8050 = vmatpush.msk.msrb.mxu2 %vm2349_vm4, %v14334_v46  ;;  %8060 = vmatpush.msk.msra.mxu3 %vm1870_vm10, %v14334_v46  ;;  %vm2229_vm4 = vcmp.eq.s32.totalorder %v14551_v21, %v11415_v62  ;;  %vm2293_vm10 = vcmp.eq.s32.totalorder %v14552_v20, %v11415_v62  ;;  %v14554_v21 = vld [vmem:[#allocation148_spill] sm:$0xff] }
 0x330   :  { %8022 = vmatpush.msk.msrb.mxu1 %vm2237_vm8, %v14334_v46  ;;  %8038 = vmatpush.msk.msra.mxu0 %vm2301_vm12, %v14334_v46  ;;  %vm2337_vm8 = vcmp.eq.s32.totalorder %v11499_v12, %v11415_v62  ;;  %vm1858_vm12 = vcmp.eq.s32.totalorder %v9912_v27, %v11946_v23  ;;  %v14555_v27 = vld [vmem:[#allocation116_spill] sm:$0xff] }
 0x331   :  { %8051 = vmatpush.msk.msrb.mxu2 %vm2345_vm9, %v14334_v46  ;;  %8061 = vmatpush.msk.msra.mxu3 %vm1866_vm7, %v14334_v46  ;;  %vm2225_vm9 = vcmp.eq.s32.totalorder %v14553_v25, %v11415_v62  ;;  %vm2289_vm7 = vcmp.eq.s32.totalorder %v14554_v21, %v11415_v62 }
 0x332   :  { %8023 = vmatpush.msk.msrb.mxu1 %vm2233_vm2, %v14334_v46  ;;  %8039 = vmatpush.msk.msra.mxu0 %vm2297_vm11, %v14334_v46  ;;  %vm2333_vm2 = vcmp.eq.s32.totalorder %v11526_v57, %v11415_v62  ;;  %vm1854_vm11 = vcmp.eq.s32.totalorder %v9915_v28, %v11946_v23  ;;  %v14557_v28 = vld [vmem:[#allocation120_spill] sm:$0xff] }
 0x333   :  { %3773 = vmatmul.f32.gmra.mxu2 %v11732_v34  ;;  %3796 = vmatmul.f32.gmra.mxu3 %v11718_v42  ;;  %v14556_v42 = vld [vmem:[#allocation149_spill] sm:$0xff] }
 0x334   :  { %8052 = vmatpush.msk.msrb.mxu2 %vm2341_vm3, %v14334_v46  ;;  %8062 = vmatpush.msk.msra.mxu3 %vm1862_vm13, %v14334_v46  ;;  %vm2221_vm3 = vcmp.eq.s32.totalorder %v14555_v27, %v11415_v62  ;;  %vm2285_vm13 = vcmp.eq.s32.totalorder %v14556_v42, %v11415_v62  ;;  %v14558_v27 = vld [vmem:[#allocation150_spill] sm:$0xff] }
 0x335   :  { %8024 = vmatpush.msk.msrb.mxu1 %vm2229_vm4, %v14334_v46  ;;  %8040 = vmatpush.msk.msra.mxu0 %vm2293_vm10, %v14334_v46  ;;  %vm2329_vm4 = vcmp.eq.s32.totalorder %v11544_v49, %v11415_v62  ;;  %vm1850_vm10 = vcmp.eq.s32.totalorder %v9920_v29, %v11946_v23  ;;  %v14559_v29 = vld [vmem:[#allocation124_spill] sm:$0xff] }
 0x336   :  { %8053 = vmatpush.msk.msrb.mxu2 %vm2337_vm8, %v14334_v46  ;;  %8063 = vmatpush.msk.msra.mxu3 %vm1858_vm12, %v14334_v46  ;;  %vm2217_vm8 = vcmp.eq.s32.totalorder %v14557_v28, %v11415_v62  ;;  %vm2281_vm12 = vcmp.eq.s32.totalorder %v14558_v27, %v11415_v62  ;;  %v14560_v28 = vld [vmem:[#allocation151_spill] sm:$0xff] }
 0x337   :  { %8025 = vmatpush.msk.msrb.mxu1 %vm2225_vm9, %v14334_v46  ;;  %8041 = vmatpush.msk.msra.mxu0 %vm2289_vm7, %v14334_v46  ;;  %vm2070_vm9 = vcmp.eq.s32.totalorder %v10730_v39, %v11946_v23  ;;  %vm1846_vm7 = vcmp.eq.s32.totalorder %v9945_v36, %v11946_v23  ;;  %v14561_v36 = vld [vmem:[#allocation128_spill] sm:$0xff] }
 0x338   :  { %8054 = vmatpush.msk.msrb.mxu2 %vm2333_vm2, %v14334_v46  ;;  %8064 = vmatpush.msk.msra.mxu3 %vm1854_vm11, %v14334_v46  ;;  %vm2213_vm2 = vcmp.eq.s32.totalorder %v14559_v29, %v11415_v62  ;;  %vm2277_vm11 = vcmp.eq.s32.totalorder %v14560_v28, %v11415_v62  ;;  %v14562_v29 = vld [vmem:[#allocation152_spill] sm:$0xff] }
 0x339   :  { %8026 = vmatpush.msk.msrb.mxu1 %vm2221_vm3, %v14334_v46  ;;  %8042 = vmatpush.msk.msra.mxu0 %vm2285_vm13, %v14334_v46  ;;  %vm2066_vm3 = vcmp.eq.s32.totalorder %v10756_v16, %v11946_v23  ;;  %vm1842_vm13 = vcmp.eq.s32.totalorder %v9962_v41, %v11946_v23  ;;  %v14563_v41 = vld [vmem:[#allocation132_spill] sm:$0xff] }
 0x33a   :  { %8055 = vmatpush.msk.msrb.mxu2 %vm2329_vm4, %v14334_v46  ;;  %8065 = vmatpush.msk.msra.mxu3 %vm1850_vm10, %v14334_v46  ;;  %vm2209_vm4 = vcmp.eq.s32.totalorder %v14561_v36, %v11415_v62  ;;  %vm2273_vm10 = vcmp.eq.s32.totalorder %v14562_v29, %v11415_v62  ;;  %v14564_v36 = vld [vmem:[#allocation153_spill] sm:$0xff] }
 0x33b   :  { %8027 = vmatpush.msk.msrb.mxu1 %vm2217_vm8, %v14334_v46  ;;  %8043 = vmatpush.msk.msra.mxu0 %vm2281_vm12, %v14334_v46  ;;  %vm2062_vm8 = vcmp.eq.s32.totalorder %v14462_v6, %v11946_v23  ;;  %vm1838_vm12 = vcmp.eq.s32.totalorder %v9970_v43, %v11946_v23  ;;  %v14565_v43 = vld [vmem:[#allocation136_spill] sm:$0xff] }
 0x33c   :  { %8106 = vmatpush.msk.msra.mxu2 %vm2070_vm9, %v14334_v46  ;;  %8066 = vmatpush.msk.msra.mxu3 %vm1846_vm7, %v14334_v46  ;;  %vm2205_vm9 = vcmp.eq.s32.totalorder %v14563_v41, %v11415_v62  ;;  %vm2269_vm7 = vcmp.eq.s32.totalorder %v14564_v36, %v11415_v62  ;;  %v14566_v41 = vld [vmem:[#allocation154_spill] sm:$0xff] }
 0x33d   :  { %8056 = vmatmul.msk.f32.vlgmr.msrb.gmra.mxu2 %vm3448_vm1, %v11788_v61  ;;  %8028 = vmatpush.msk.msrb.mxu1 %vm2213_vm2, %v14334_v46  ;;  %vm2058_vm2 = vcmp.eq.s32.totalorder %v14469_v54, %v11946_v23 }
 0x33e   :  { %8044 = vmatpush.msk.msra.mxu0 %vm2277_vm11, %v14334_v46  ;;  %8107 = vmatpush.msk.msra.mxu2 %vm2066_vm3, %v14334_v46  ;;  %vm1834_vm11 = vcmp.eq.s32.totalorder %v9973_v44, %v11946_v23  ;;  %vm2201_vm3 = vcmp.eq.s32.totalorder %v14565_v43, %v11415_v62  ;;  %v14572_v44 = vld [vmem:[#allocation158_spill] sm:$0xff] }
 0x33f   :  { %8067 = vmatpush.msk.msra.mxu3 %vm1842_vm13, %v14334_v46  ;;  %8029 = vmatpush.msk.msrb.mxu1 %vm2209_vm4, %v14334_v46  ;;  %vm2265_vm13 = vcmp.eq.s32.totalorder %v14566_v41, %v11415_v62  ;;  %vm2054_vm4 = vcmp.eq.s32.totalorder %v14477_v31, %v11946_v23  ;;  %v14567_v62 = vld [vmem:[#allocation45_spill] sm:$0xff] }
 0x340   :  { %8045 = vmatpush.msk.msra.mxu0 %vm2273_vm10, %v14334_v46  ;;  %8108 = vmatpush.msk.msra.mxu2 %vm2062_vm8, %v14334_v46  ;;  %vm1830_vm10 = vcmp.eq.s32.totalorder %v9995_v51, %v11946_v23  ;;  %vm1942_vm8 = vcmp.eq.s32.totalorder %v10576_v22, %v11946_v23  ;;  %v14571_v51 = vld [vmem:[#allocation47_spill] sm:$0xff] }
 0x341   :  { %8068 = vmatpush.msk.msra.mxu3 %vm1838_vm12, %v14334_v46  ;;  %8030 = vmatpush.msk.msrb.mxu1 %vm2205_vm9, %v14334_v46  ;;  %vm2006_vm12 = vcmp.eq.s32.totalorder %v10582_v47, %v11946_v23  ;;  %vm2050_vm9 = vcmp.eq.s32.totalorder %v14481_v40, %v11946_v23 }
 0x342   :  { %8046 = vmatpush.msk.msra.mxu0 %vm2269_vm7, %v14334_v46  ;;  %8109 = vmatpush.msk.msra.mxu2 %vm2058_vm2, %v14334_v46  ;;  %vm1826_vm7 = vcmp.eq.s32.totalorder %v10001_v55, %v11946_v23  ;;  %vm1938_vm2 = vcmp.eq.s32.totalorder %v10585_v1, %v11946_v23  ;;  %v14569_v55 = vld [vmem:[#allocation88_spill] sm:$0xff] }
 0x343   :  { %8069 = vmatpush.msk.msra.mxu3 %vm1834_vm11, %v14334_v46  ;;  %8031 = vmatpush.msk.msrb.mxu1 %vm2201_vm3, %v14334_v46  ;;  %vm2002_vm11 = vcmp.eq.s32.totalorder %v10592_v17, %v11946_v23  ;;  %vm2046_vm3 = vcmp.eq.s32.totalorder %v14487_v59, %v11946_v23 }
 0x344   :  { %8047 = vmatpush.msk.msra.mxu0 %vm2265_vm13, %v14334_v46  ;;  %8110 = vmatpush.msk.msra.mxu2 %vm2054_vm4, %v14334_v46  ;;  %vm1822_vm13 = vcmp.eq.s32.totalorder %v14459_v35, %v11946_v23  ;;  %vm1934_vm4 = vcmp.eq.s32.totalorder %v10595_v2, %v11946_v23  ;;  %v14568_v35 = vld [vmem:[#allocation46_spill] sm:$0xff]  ;;  %v14577_v2 = vld [vmem:[#allocation52_spill] sm:$0xff] }
 0x345   :  { %3816 = vmatmul.f32.vlgmr.msrb.gmra.mxu1 %v11619_v18  ;;  %3839 = vmatmul.f32.vlgmr.msra.gmra.mxu0 %v11785_v24 }
 0x346   :  { %8057 = vmatmul.msk.f32.gmra.mxu2 %vm3448_vm1, %v11854_v32  ;;  %8070 = vmatpush.msk.msra.mxu3 %vm1830_vm10, %v14334_v46  ;;  %vm1998_vm10 = vcmp.eq.s32.totalorder %v14461_v60, %v11946_v23 }
 0x347   :  { %8074 = vmatpush.msk.msra.mxu1 %vm1942_vm8, %v14334_v46  ;;  %8090 = vmatpush.msk.msrb.mxu0 %vm2006_vm12, %v14334_v46  ;;  %vm2042_vm8 = vcmp.eq.s32.totalorder %v14491_v50, %v11946_v23  ;;  %vm1818_vm12 = vcmp.eq.s32.totalorder %v9854_v4, %v11946_v23  ;;  %v14570_v4 = vld [vmem:[#allocation93_spill] sm:$0xff]  ;;  %v14576_v50 = vld [vmem:[#allocation98_spill] sm:$0xff] }
 0x348   :  { %8111 = vmatpush.msk.msra.mxu2 %vm2050_vm9, %v14334_v46  ;;  %8071 = vmatpush.msk.msra.mxu3 %vm1826_vm7, %v14334_v46  ;;  %vm1930_vm9 = vcmp.eq.s32.totalorder %v14567_v62, %v11946_v23  ;;  %vm1994_vm7 = vcmp.eq.s32.totalorder %v14568_v35, %v11946_v23  ;;  %v14574_v62 = vld [vmem:[#allocation97_spill] sm:$0xff] }
 0x349   :  { %8075 = vmatpush.msk.msra.mxu1 %vm1938_vm2, %v14334_v46  ;;  %8091 = vmatpush.msk.msrb.mxu0 %vm2002_vm11, %v14334_v46  ;;  %vm2038_vm2 = vcmp.eq.s32.totalorder %v14569_v55, %v11946_v23  ;;  %vm2134_vm11 = vcmp.eq.s32.totalorder %v14570_v4, %v11946_v23  ;;  %v14573_v55 = vld [vmem:[#allocation49_spill] sm:$0xff] }
 0x34a   :  { %8112 = vmatpush.msk.msra.mxu2 %vm2046_vm3, %v14334_v46  ;;  %8072 = vmatpush.msk.msra.mxu3 %vm1822_vm13, %v14334_v46  ;;  %vm1926_vm3 = vcmp.eq.s32.totalorder %v14571_v51, %v11946_v23  ;;  %vm1990_vm13 = vcmp.eq.s32.totalorder %v14573_v55, %v11946_v23  ;;  %v14575_v4 = vld [vmem:[#allocation69_spill] sm:$0xff] }
 0x34b   :  { %8076 = vmatpush.msk.msra.mxu1 %vm1934_vm4, %v14334_v46  ;;  %8092 = vmatpush.msk.msrb.mxu0 %vm1998_vm10, %v14334_v46  ;;  %vm2034_vm4 = vcmp.eq.s32.totalorder %v14574_v62, %v11946_v23  ;;  %vm2130_vm10 = vcmp.eq.s32.totalorder %v14576_v50, %v11946_v23  ;;  %v14580_v50 = vld [vmem:[#allocation54_spill] sm:$0xff] }
 0x34c   :  { %8113 = vmatpush.msk.msra.mxu2 %vm2042_vm8, %v14334_v46  ;;  %8073 = vmatpush.msk.msra.mxu3 %vm1818_vm12, %v14334_v46  ;;  %vm1922_vm8 = vcmp.eq.s32.totalorder %v14577_v2, %v11946_v23  ;;  %v14581_v2 = vld [vmem:[#allocation55_spill] sm:$0xff] }
 0x34d   :  { %8077 = vmatpush.msk.msra.mxu1 %vm1930_vm9, %v14334_v46  ;;  %8093 = vmatpush.msk.msrb.mxu0 %vm1994_vm7, %v14334_v46  ;;  %vm2030_vm9 = vcmp.eq.s32.totalorder %v14503_v14, %v11946_v23  ;;  %v14582_v14 = vld [vmem:[#allocation106_spill] sm:$0xff] }
 0x34e   :  { %3885 = vmatmul.f32.vlgmr.msra.gmra.mxu3 %v14572_v44  ;;  %8114 = vmatpush.msk.msra.mxu2 %vm2038_vm2, %v14334_v46  ;;  %v14578_v44 = vld [vmem:[#allocation53_spill] sm:$0xff]  ;;  %vm1918_vm2 = vcmp.eq.s32.totalorder %v14580_v50, %v11946_v23 }
 0x34f   :  { %8122 = vmatpush.msk.msrb.mxu3 %vm2134_vm11, %v14334_v46  ;;  %3819 = vmatmul.f32.gmra.mxu1 %v14575_v4  ;;  %vm1986_vm12 = vcmp.eq.s32.totalorder %v14578_v44, %v11946_v23  ;;  %v14579_v4 = vld [vmem:[#allocation102_spill] sm:$0xff]  ;;  %vm1982_vm11 = vcmp.eq.s32.totalorder %v14581_v2, %v11946_v23  ;;  %v14584_v50 = vld [vmem:[#allocation57_spill] sm:$0xff] }
 0x350   :  { %3842 = vmatmul.f32.gmra.mxu0 %v11857_v48  ;;  %8078 = vmatpush.msk.msra.mxu1 %vm1926_vm3, %v14334_v46  ;;  %vm2126_vm7 = vcmp.eq.s32.totalorder %v14579_v4, %v11946_v23  ;;  %vm2026_vm3 = vcmp.eq.s32.totalorder %v14509_v10, %v11946_v23  ;;  %v14583_v4 = vld [vmem:[#allocation56_spill] sm:$0xff]  ;;  %v14585_v10 = vld [vmem:[#allocation110_spill] sm:$0xff] }
 0x351   :  { %8094 = vmatpush.msk.msrb.mxu0 %vm1990_vm13, %v14334_v46  ;;  %8115 = vmatpush.msk.msra.mxu2 %vm2034_vm4, %v14334_v46  ;;  %vm2122_vm13 = vcmp.eq.s32.totalorder %v14582_v14, %v11946_v23  ;;  %vm1914_vm4 = vcmp.eq.s32.totalorder %v14583_v4, %v11946_v23  ;;  %v14586_v14 = vld [vmem:[#allocation58_spill] sm:$0xff]  ;;  %v14587_v4 = vld [vmem:[#allocation61_spill] sm:$0xff] }
 0x352   :  { %8123 = vmatpush.msk.msrb.mxu3 %vm2130_vm10, %v14334_v46  ;;  %8079 = vmatpush.msk.msra.mxu1 %vm1922_vm8, %v14334_v46  ;;  %vm1978_vm10 = vcmp.eq.s32.totalorder %v14584_v50, %v11946_v23  ;;  %vm2022_vm8 = vcmp.eq.s32.totalorder %v14513_v33, %v11946_v23  ;;  %v14588_v33 = vld [vmem:[#allocation114_spill] sm:$0xff] }
 0x353   :  { %8095 = vmatpush.msk.msrb.mxu0 %vm1986_vm12, %v14334_v46  ;;  %8116 = vmatpush.msk.msra.mxu2 %vm2030_vm9, %v14334_v46  ;;  %vm2118_vm12 = vcmp.eq.s32.totalorder %v14585_v10, %v11946_v23  ;;  %vm1910_vm9 = vcmp.eq.s32.totalorder %v14586_v14, %v11946_v23  ;;  %v14589_v10 = vld [vmem:[#allocation62_spill] sm:$0xff]  ;;  %v14590_v14 = vld [vmem:[#allocation63_spill] sm:$0xff] }
 0x354   :  { %8124 = vmatpush.msk.msrb.mxu3 %vm2126_vm7, %v14334_v46  ;;  %8080 = vmatpush.msk.msra.mxu1 %vm1918_vm2, %v14334_v46  ;;  %vm1974_vm7 = vcmp.eq.s32.totalorder %v14587_v4, %v11946_v23  ;;  %vm2018_vm2 = vcmp.eq.s32.totalorder %v14517_v0, %v11946_v23  ;;  %v14594_v0 = vld [vmem:[#allocation121_spill] sm:$0xff] }
 0x355   :  { %8096 = vmatpush.msk.msrb.mxu0 %vm1982_vm11, %v14334_v46  ;;  %8117 = vmatpush.msk.msra.mxu2 %vm2026_vm3, %v14334_v46  ;;  %vm2114_vm11 = vcmp.eq.s32.totalorder %v14588_v33, %v11946_v23  ;;  %vm1906_vm3 = vcmp.eq.s32.totalorder %v14589_v10, %v11946_v23  ;;  %v14592_v33 = vld [vmem:[#allocation64_spill] sm:$0xff]  ;;  %v14593_v10 = vld [vmem:[#allocation65_spill] sm:$0xff] }
 0x356   :  { %8125 = vmatpush.msk.msrb.mxu3 %vm2122_vm13, %v14334_v46  ;;  %8081 = vmatpush.msk.msra.mxu1 %vm1914_vm4, %v14334_v46  ;;  %vm1970_vm13 = vcmp.eq.s32.totalorder %v14590_v14, %v11946_v23  ;;  %vm2014_vm4 = vcmp.eq.s32.totalorder %v14521_v63, %v11946_v23  ;;  %v14595_v63 = vld [vmem:[#allocation122_spill] sm:$0xff] }
 0x357   :  { %8097 = vmatpush.msk.msrb.mxu0 %vm1978_vm10, %v14334_v46  ;;  %3888 = vmatmul.f32.gmra.mxu3 %v11487_v26  ;;  %v14591_v26 = vld [vmem:[#allocation118_spill] sm:$0xff] }
 0x358   :  { %8118 = vmatpush.msk.msra.mxu2 %vm2022_vm8, %v14334_v46  ;;  %8126 = vmatpush.msk.msrb.mxu3 %vm2118_vm12, %v14334_v46  ;;  %vm2110_vm10 = vcmp.eq.s32.totalorder %v14591_v26, %v11946_v23  ;;  %vm1902_vm8 = vcmp.eq.s32.totalorder %v14592_v33, %v11946_v23  ;;  %vm1966_vm12 = vcmp.eq.s32.totalorder %v14593_v10, %v11946_v23  ;;  %v14596_v26 = vld [vmem:[#allocation67_spill] sm:$0xff]  ;;  %v14597_v33 = vld [vmem:[#allocation68_spill] sm:$0xff]  ;;  %v14598_v10 = vld [vmem:[#allocation126_spill] sm:$0xff] }
 0x359   :  { %8082 = vmatpush.msk.msra.mxu1 %vm1910_vm9, %v14334_v46  ;;  %8098 = vmatpush.msk.msrb.mxu0 %vm1974_vm7, %v14334_v46  ;;  %vm2010_vm9 = vcmp.eq.s32.totalorder %v14594_v0, %v11946_v23  ;;  %vm2106_vm7 = vcmp.eq.s32.totalorder %v14595_v63, %v11946_v23  ;;  %v14599_v63 = vld [vmem:[#allocation125_spill] sm:$0xff]  ;;  %v14600_v0 = vld [vmem:[#allocation70_spill] sm:$0xff] }
 0x35a   :  { %8119 = vmatpush.msk.msra.mxu2 %vm2018_vm2, %v14334_v46  ;;  %8127 = vmatpush.msk.msrb.mxu3 %vm2114_vm11, %v14334_v46  ;;  %vm1898_vm2 = vcmp.eq.s32.totalorder %v14596_v26, %v11946_v23  ;;  %vm1962_vm11 = vcmp.eq.s32.totalorder %v14597_v33, %v11946_v23  ;;  %v14601_v26 = vld [vmem:[#allocation72_spill] sm:$0xff]  ;;  %v14602_v33 = vld [vmem:[#allocation130_spill] sm:$0xff] }
 0x35b   :  { %8083 = vmatpush.msk.msra.mxu1 %vm1906_vm3, %v14334_v46  ;;  %8099 = vmatpush.msk.msrb.mxu0 %vm1970_vm13, %v14334_v46  ;;  %vm2102_vm3 = vcmp.eq.s32.totalorder %v14598_v10, %v11946_v23  ;;  %vm2326_vm13 = vcmp.eq.s32.totalorder %v14599_v63, %v11946_v23  ;;  %v14603_v10 = vld [vmem:[#allocation129_spill] sm:$0xff] }
 0x35c   :  { %8120 = vmatpush.msk.msra.mxu2 %vm2014_vm4, %v14334_v46  ;;  %8128 = vmatpush.msk.msrb.mxu3 %vm2110_vm10, %v14334_v46  ;;  %vm1894_vm4 = vcmp.eq.s32.totalorder %v14600_v0, %v11946_v23  ;;  %vm1958_vm10 = vcmp.eq.s32.totalorder %v14601_v26, %v11946_v23  ;;  %v14604_v63 = vld [vmem:[#allocation73_spill] sm:$0xff]  ;;  %v14605_v0 = vld [vmem:[#allocation75_spill] sm:$0xff]  ;;  %v14606_v26 = vld [vmem:[#allocation134_spill] sm:$0xff] }
 0x35d   :  { %8084 = vmatpush.msk.msra.mxu1 %vm1902_vm8, %v14334_v46  ;;  %8100 = vmatpush.msk.msrb.mxu0 %vm1966_vm12, %v14334_v46  ;;  %vm2098_vm8 = vcmp.eq.s32.totalorder %v14602_v33, %v11946_v23  ;;  %vm2322_vm12 = vcmp.eq.s32.totalorder %v14603_v10, %v11946_v23  ;;  %v14607_v33 = vld [vmem:[#allocation76_spill] sm:$0xff]  ;;  %v14609_v10 = vld [vmem:[#allocation138_spill] sm:$0xff] }
 0x35e   :  { %8121 = vmatpush.msk.msra.mxu2 %vm2010_vm9, %v14334_v46  ;;  %8129 = vmatpush.msk.msrb.mxu3 %vm2106_vm7, %v14334_v46  ;;  %vm1890_vm9 = vcmp.eq.s32.totalorder %v14604_v63, %v11946_v23  ;;  %vm1954_vm7 = vcmp.eq.s32.totalorder %v14605_v0, %v11946_v23  ;;  %v14608_v63 = vld [vmem:[#allocation78_spill] sm:$0xff] }
 0x35f   :  { %8085 = vmatpush.msk.msra.mxu1 %vm1898_vm2, %v14334_v46  ;;  %8101 = vmatpush.msk.msrb.mxu0 %vm1962_vm11, %v14334_v46  ;;  %vm2094_vm2 = vcmp.eq.s32.totalorder %v14606_v26, %v11946_v23  ;;  %vm2318_vm11 = vcmp.eq.s32.totalorder %v14537_v9, %v11946_v23  ;;  %v14610_v26 = vld [vmem:[#allocation37_spill] sm:$0xff]  ;;  %v14616_v9 = vld [vmem:[#allocation142_spill] sm:$0xff] }
 0x360   :  { %3954 = vmatmul.f32.vlgmr.msra.gmra.mxu2 %v11597_v5  ;;  %8130 = vmatpush.msk.msrb.mxu3 %vm2102_vm3, %v14334_v46  ;;  %vm1886_vm3 = vcmp.eq.s32.totalorder %v14607_v33, %v11946_v23  ;;  %v14611_v33 = vld [vmem:[#allocation80_spill] sm:$0xff] }
 0x361   :  { %8170 = vmatpush.msk.msrb.mxu2 %vm2326_vm13, %v14334_v46  ;;  %8086 = vmatpush.msk.msra.mxu1 %vm1894_vm4, %v14334_v46  ;;  %vm1950_vm13 = vcmp.eq.s32.totalorder %v14608_v63, %v11946_v23  ;;  %vm2090_vm4 = vcmp.eq.s32.totalorder %v14609_v10, %v11946_v23  ;;  %v14612_v10 = vld [vmem:[#allocation140_spill] sm:$0xff] }
 0x362   :  { %8102 = vmatpush.msk.msrb.mxu0 %vm1958_vm10, %v14334_v46  ;;  %8131 = vmatpush.msk.msrb.mxu3 %vm2098_vm8, %v14334_v46  ;;  %vm2314_vm10 = vcmp.eq.s32.totalorder %v14542_v37, %v11946_v23  ;;  %vm1882_vm8 = vcmp.eq.s32.totalorder %v14610_v26, %v11946_v23  ;;  %v14613_v26 = vld [vmem:[#allocation79_spill] sm:$0xff]  ;;  %v14614_v37 = vld [vmem:[#allocation82_spill] sm:$0xff] }
 0x363   :  { %8171 = vmatpush.msk.msrb.mxu2 %vm2322_vm12, %v14334_v46  ;;  %8087 = vmatpush.msk.msra.mxu1 %vm1890_vm9, %v14334_v46  ;;  %vm1946_vm12 = vcmp.eq.s32.totalorder %v14611_v33, %v11946_v23  ;;  %vm2310_vm9 = vcmp.eq.s32.totalorder %v14544_v56, %v11946_v23  ;;  %v14615_v56 = vld [vmem:[#allocation159_spill] sm:$0xff] }
 0x364   :  { %8103 = vmatpush.msk.msrb.mxu0 %vm1954_vm7, %v14334_v46  ;;  %8132 = vmatpush.msk.msrb.mxu3 %vm2094_vm2, %v14334_v46  ;;  %vm2086_vm7 = vcmp.eq.s32.totalorder %v14612_v10, %v11946_v23  ;;  %vm2198_vm2 = vcmp.eq.s32.totalorder %v14613_v26, %v11946_v23  ;;  %v14617_v10 = vld [vmem:[#allocation156_spill] sm:$0xff]  ;;  %v14619_v26 = vld [vmem:[#allocation86_spill] sm:$0xff] }
 0x365   :  { %8172 = vmatpush.msk.msrb.mxu2 %vm2318_vm11, %v14334_v46  ;;  %8088 = vmatpush.msk.msra.mxu1 %vm1886_vm3, %v14334_v46  ;;  %vm2262_vm11 = vcmp.eq.s32.totalorder %v14614_v37, %v11946_v23  ;;  %vm2306_vm3 = vcmp.eq.s32.totalorder %v14546_v38, %v11946_v23 }
 0x366   :  { %8104 = vmatpush.msk.msrb.mxu0 %vm1950_vm13, %v14334_v46  ;;  %8133 = vmatpush.msk.msrb.mxu3 %vm2090_vm4, %v14334_v46  ;;  %vm2082_vm13 = vcmp.eq.s32.totalorder %v14616_v9, %v11946_v23  ;;  %v14621_v9 = vld [vmem:[#allocation87_spill] sm:$0xff] }
 0x367   :  { %8173 = vmatpush.msk.msrb.mxu2 %vm2314_vm10, %v14334_v46  ;;  %8089 = vmatpush.msk.msra.mxu1 %vm1882_vm8, %v14334_v46  ;;  %vm2258_vm10 = vcmp.eq.s32.totalorder %v14619_v26, %v11946_v23  ;;  %vm2302_vm8 = vcmp.eq.s32.totalorder %v14548_v30, %v11946_v23 }
 0x368   :  { %8105 = vmatpush.msk.msrb.mxu0 %vm1946_vm12, %v14334_v46  ;;  %3957 = vmatmul.f32.gmra.mxu2 %v11729_v11  ;;  %v14618_v11 = vld [vmem:[#allocation83_spill] sm:$0xff] }
 0x369   :  { %8174 = vmatpush.msk.msrb.mxu2 %vm2310_vm9, %v14334_v46  ;;  %3908 = vmatmul.f32.vlgmr.msra.gmra.mxu1 %v14615_v56  ;;  %vm2194_vm4 = vcmp.eq.s32.totalorder %v14618_v11, %v11946_v23  ;;  %v14620_v56 = vld [vmem:[#allocation144_spill] sm:$0xff]  ;;  %vm2190_vm9 = vcmp.eq.s32.totalorder %v14621_v9, %v11946_v23  ;;  %v14622_v11 = vld [vmem:[#allocation89_spill] sm:$0xff]  ;;  %v14624_v9 = vld [vmem:[#allocation91_spill] sm:$0xff] }
 0x36a   :  { %3931 = vmatmul.f32.vlgmr.msrb.gmra.mxu0 %v14617_v10  ;;  %8134 = vmatpush.msk.msrb.mxu3 %vm2086_vm7, %v14334_v46  ;;  %vm2078_vm12 = vcmp.eq.s32.totalorder %v14620_v56, %v11946_v23  ;;  %vm2254_vm7 = vcmp.eq.s32.totalorder %v14622_v11, %v11946_v23  ;;  %v14623_v56 = vld [vmem:[#allocation90_spill] sm:$0xff] }
 0x36b   :  { %8138 = vmatpush.msk.msrb.mxu1 %vm2198_vm2, %v14334_v46  ;;  %8154 = vmatpush.msk.msra.mxu0 %vm2262_vm11, %v14334_v46  ;;  %vm2298_vm2 = vcmp.eq.s32.totalorder %v14550_v15, %v11946_v23  ;;  %vm2074_vm11 = vcmp.eq.s32.totalorder %v14539_v13, %v11946_v23  ;;  %v14625_v13 = vld [vmem:[#allocation92_spill] sm:$0xff] }
 0x36c   :  { %8175 = vmatpush.msk.msrb.mxu2 %vm2306_vm3, %v14334_v46  ;;  %8135 = vmatpush.msk.msrb.mxu3 %vm2082_vm13, %v14334_v46  ;;  %vm2186_vm3 = vcmp.eq.s32.totalorder %v14623_v56, %v11946_v23  ;;  %vm2250_vm13 = vcmp.eq.s32.totalorder %v14624_v9, %v11946_v23  ;;  %v14628_v56 = vld [vmem:[#allocation95_spill] sm:$0xff] }
 0x36d   :  { %8139 = vmatpush.msk.msrb.mxu1 %vm2194_vm4, %v14334_v46  ;;  %8155 = vmatpush.msk.msra.mxu0 %vm2258_vm10, %v14334_v46  ;;  %vm2294_vm4 = vcmp.eq.s32.totalorder %v14552_v20, %v11946_v23  ;;  %vm2358_vm10 = vcmp.eq.s32.totalorder %v11421_v3, %v11946_v23  ;;  %v14626_v20 = vld [vmem:[#allocation94_spill] sm:$0xff] }
 0x36e   :  { %8176 = vmatpush.msk.msrb.mxu2 %vm2302_vm8, %v14334_v46  ;;  %8136 = vmatpush.msk.msrb.mxu3 %vm2078_vm12, %v14334_v46  ;;  %vm2182_vm8 = vcmp.eq.s32.totalorder %v14625_v13, %v11946_v23  ;;  %vm2246_vm12 = vcmp.eq.s32.totalorder %v14626_v20, %v11946_v23  ;;  %v14627_v3 = vld [vmem:[#allocation166_spill] sm:$0xff] }
 0x36f   :  { %8140 = vmatpush.msk.msrb.mxu1 %vm2190_vm9, %v14334_v46  ;;  %8156 = vmatpush.msk.msra.mxu0 %vm2254_vm7, %v14334_v46  ;;  %vm2290_vm9 = vcmp.eq.s32.totalorder %v14554_v21, %v11946_v23  ;;  %vm2354_vm7 = vcmp.eq.s32.totalorder %v11429_v58, %v11946_v23  ;;  %v14629_v58 = vld [vmem:[#allocation99_spill] sm:$0xff] }
 0x370   :  { %8177 = vmatpush.msk.msrb.mxu2 %vm2298_vm2, %v14334_v46  ;;  %8137 = vmatpush.msk.msrb.mxu3 %vm2074_vm11, %v14334_v46  ;;  %vm2178_vm2 = vcmp.eq.s32.totalorder %v14628_v56, %v11946_v23  ;;  %vm2242_vm11 = vcmp.eq.s32.totalorder %v14545_v8, %v11946_v23 }
 0x371   :  { %8141 = vmatpush.msk.msrb.mxu1 %vm2186_vm3, %v14334_v46  ;;  %8157 = vmatpush.msk.msra.mxu0 %vm2250_vm13, %v14334_v46  ;;  %vm2286_vm3 = vcmp.eq.s32.totalorder %v14556_v42, %v11946_v23  ;;  %vm2350_vm13 = vcmp.eq.s32.totalorder %v11445_v53, %v11946_v23  ;;  %v14631_v53 = vld [vmem:[#allocation103_spill] sm:$0xff] }
 0x372   :  { %3977 = vmatmul.f32.vlgmr.msrb.gmra.mxu3 %v11600_v7  ;;  %8178 = vmatpush.msk.msrb.mxu2 %vm2294_vm4, %v14334_v46  ;;  %vm2174_vm4 = vcmp.eq.s32.totalorder %v14629_v58, %v11946_v23  ;;  %v14630_v7 = vld [vmem:[#allocation100_spill] sm:$0xff] }
 0x373   :  { %8186 = vmatpush.msk.msra.mxu3 %vm2358_vm10, %v14334_v46  ;;  %3911 = vmatmul.f32.gmra.mxu1 %v14627_v3  ;;  %vm2238_vm10 = vcmp.eq.s32.totalorder %v14630_v7, %v11946_v23  ;;  %v14632_v58 = vld [vmem:[#allocation104_spill] sm:$0xff] }
 0x374   :  { %3934 = vmatmul.f32.gmra.mxu0 %v11537_v19  ;;  %8142 = vmatpush.msk.msrb.mxu1 %vm2182_vm8, %v14334_v46  ;;  %vm2282_vm8 = vcmp.eq.s32.totalorder %v14558_v27, %v11946_v23 }
 0x375   :  { %8158 = vmatpush.msk.msra.mxu0 %vm2246_vm12, %v14334_v46  ;;  %8179 = vmatpush.msk.msrb.mxu2 %vm2290_vm9, %v14334_v46  ;;  %vm2346_vm12 = vcmp.eq.s32.totalorder %v11473_v52, %v11946_v23  ;;  %vm2170_vm9 = vcmp.eq.s32.totalorder %v14631_v53, %v11946_v23  ;;  %v14633_v52 = vld [vmem:[#allocation107_spill] sm:$0xff]  ;;  %v14634_v53 = vld [vmem:[#allocation108_spill] sm:$0xff] }
 0x376   :  { %8187 = vmatpush.msk.msra.mxu3 %vm2354_vm7, %v14334_v46  ;;  %8143 = vmatpush.msk.msrb.mxu1 %vm2178_vm2, %v14334_v46  ;;  %vm2234_vm7 = vcmp.eq.s32.totalorder %v14632_v58, %v11946_v23  ;;  %vm2278_vm2 = vcmp.eq.s32.totalorder %v14560_v28, %v11946_v23 }
 0x377   :  { %8159 = vmatpush.msk.msra.mxu0 %vm2242_vm11, %v14334_v46  ;;  %8180 = vmatpush.msk.msrb.mxu2 %vm2286_vm3, %v14334_v46  ;;  %vm2342_vm11 = vcmp.eq.s32.totalorder %v11484_v45, %v11946_v23  ;;  %vm2166_vm3 = vcmp.eq.s32.totalorder %v14633_v52, %v11946_v23  ;;  %v14635_v45 = vld [vmem:[#allocation111_spill] sm:$0xff] }
 0x378   :  { %8188 = vmatpush.msk.msra.mxu3 %vm2350_vm13, %v14334_v46  ;;  %8144 = vmatpush.msk.msrb.mxu1 %vm2174_vm4, %v14334_v46  ;;  %vm2230_vm13 = vcmp.eq.s32.totalorder %v14634_v53, %v11946_v23  ;;  %vm2274_vm4 = vcmp.eq.s32.totalorder %v14562_v29, %v11946_v23  ;;  %v14638_v29 = vld [vmem:[#allocation116_spill] sm:$0xff] }
 0x379   :  { %8160 = vmatpush.msk.msra.mxu0 %vm2238_vm10, %v14334_v46  ;;  %8181 = vmatpush.msk.msrb.mxu2 %vm2282_vm8, %v14334_v46  ;;  %vm2338_vm10 = vcmp.eq.s32.totalorder %v11499_v12, %v11946_v23  ;;  %vm2162_vm8 = vcmp.eq.s32.totalorder %v14635_v45, %v11946_v23  ;;  %v14636_v12 = vld [vmem:[#allocation48_spill] sm:$0xff]  ;;  %v14637_v45 = vld [vmem:[#allocation115_spill] sm:$0xff] }
 0x37a   :  { %8189 = vmatpush.msk.msra.mxu3 %vm2346_vm12, %v14334_v46  ;;  %8145 = vmatpush.msk.msrb.mxu1 %vm2170_vm9, %v14334_v46  ;;  %vm2226_vm12 = vcmp.eq.s32.totalorder %v14553_v25, %v11946_v23  ;;  %vm2270_vm9 = vcmp.eq.s32.totalorder %v14564_v36, %v11946_v23 }
 0x37b   :  { %8161 = vmatpush.msk.msra.mxu0 %vm2234_vm7, %v14334_v46  ;;  %3980 = vmatmul.f32.gmra.mxu3 %v11732_v34  ;;  %vm2334_vm7 = vcmp.eq.s32.totalorder %v11526_v57, %v11946_v23  ;;  %v12447_v34 = vperm.slane %v14636_v12, 3  ;;  %v14639_v12 = vld [vmem:[#allocation119_spill] sm:$0xff]  ;;  %v14640_v57 = vld [vmem:[#allocation120_spill] sm:$0xff] }
 0x37c   :  { %8182 = vmatpush.msk.msrb.mxu2 %vm2278_vm2, %v14334_v46  ;;  %8190 = vmatpush.msk.msra.mxu3 %vm2342_vm11, %v14334_v46  ;;  %vm2158_vm2 = vcmp.eq.s32.totalorder %v14637_v45, %v11946_v23  ;;  %vm2222_vm11 = vcmp.eq.s32.totalorder %v14638_v29, %v11946_v23 }
 0x37d   :  { %8146 = vmatpush.msk.msrb.mxu1 %vm2166_vm3, %v14334_v46  ;;  %8162 = vmatpush.msk.msra.mxu0 %vm2230_vm13, %v14334_v46  ;;  %vm2266_vm3 = vcmp.eq.s32.totalorder %v14566_v41, %v11946_v23  ;;  %vm2330_vm13 = vcmp.eq.s32.totalorder %v11544_v49, %v11946_v23  ;;  %v14641_v49 = vld [vmem:[#allocation123_spill] sm:$0xff] }
 0x37e   :  { %8183 = vmatpush.msk.msrb.mxu2 %vm2274_vm4, %v14334_v46  ;;  %8191 = vmatpush.msk.msra.mxu3 %vm2338_vm10, %v14334_v46  ;;  %vm2154_vm4 = vcmp.eq.s32.totalorder %v14639_v12, %v11946_v23  ;;  %vm2218_vm10 = vcmp.eq.s32.totalorder %v14640_v57, %v11946_v23  ;;  %v14642_v12 = vld [vmem:[#allocation124_spill] sm:$0xff] }
 0x37f   :  { %8147 = vmatpush.msk.msrb.mxu1 %vm2162_vm8, %v14334_v46  ;;  %8163 = vmatpush.msk.msra.mxu0 %vm2226_vm12, %v14334_v46  ;;  %vm2071_vm8 = vcmp.eq.s32.totalorder %v10730_v39, %v12447_v34  ;;  %vm2007_vm12 = vcmp.eq.s32.totalorder %v10582_v47, %v12447_v34  ;;  %v14643_v47 = vld [vmem:[#allocation127_spill] sm:$0xff]  ;;  %v14644_v39 = vld [vmem:[#allocation128_spill] sm:$0xff] }
 0x380   :  { %8184 = vmatpush.msk.msrb.mxu2 %vm2270_vm9, %v14334_v46  ;;  %8192 = vmatpush.msk.msra.mxu3 %vm2334_vm7, %v14334_v46  ;;  %vm2150_vm9 = vcmp.eq.s32.totalorder %v14641_v49, %v11946_v23  ;;  %vm2214_vm7 = vcmp.eq.s32.totalorder %v14642_v12, %v11946_v23 }
 0x381   :  { %8148 = vmatpush.msk.msrb.mxu1 %vm2158_vm2, %v14334_v46  ;;  %8164 = vmatpush.msk.msra.mxu0 %vm2222_vm11, %v14334_v46  ;;  %vm2003_vm2 = vcmp.eq.s32.totalorder %v10592_v17, %v12447_v34  ;;  %vm2067_vm11 = vcmp.eq.s32.totalorder %v10756_v16, %v12447_v34  ;;  %v14645_v16 = vld [vmem:[#allocation131_spill] sm:$0xff]  ;;  %v14646_v17 = vld [vmem:[#allocation132_spill] sm:$0xff] }
 0x382   :  { %8185 = vmatpush.msk.msrb.mxu2 %vm2266_vm3, %v14334_v46  ;;  %8193 = vmatpush.msk.msra.mxu3 %vm2330_vm13, %v14334_v46  ;;  %vm2146_vm3 = vcmp.eq.s32.totalorder %v14643_v47, %v11946_v23  ;;  %vm2210_vm13 = vcmp.eq.s32.totalorder %v14644_v39, %v11946_v23 }
 0x383   :  { %8149 = vmatpush.msk.msrb.mxu1 %vm2154_vm4, %v14334_v46  ;;  %8165 = vmatpush.msk.msra.mxu0 %vm2218_vm10, %v14334_v46  ;;  %vm1999_vm4 = vcmp.eq.s32.totalorder %v14461_v60, %v12447_v34  ;;  %vm2063_vm10 = vcmp.eq.s32.totalorder %v14462_v6, %v12447_v34  ;;  %v14647_v60 = vld [vmem:[#allocation135_spill] sm:$0xff] }
 0x384   :  { %4046 = vmatmul.f32.vlgmr.msrb.gmra.mxu2 %v11785_v24  ;;  %8244 = vmatpush.msk.msrb.mxu3 %vm2071_vm8, %v14334_v46  ;;  %vm2142_vm8 = vcmp.eq.s32.totalorder %v14645_v16, %v11946_v23  ;;  %v14652_v6 = vld [vmem:[#allocation43_spill] sm:$0xff] }
 0x385   :  { %8228 = vmatpush.msk.msra.mxu2 %vm2007_vm12, %v14334_v46  ;;  %8194 = vmatmul.msk.f32.vlgmr.msra.gmra.mxu3 %vm3448_vm1, %v11788_v61  ;;  %vm2206_vm12 = vcmp.eq.s32.totalorder %v14646_v17, %v11946_v23 }
 0x386   :  { %8150 = vmatpush.msk.msrb.mxu1 %vm2150_vm9, %v14334_v46  ;;  %8166 = vmatpush.msk.msra.mxu0 %vm2214_vm7, %v14334_v46  ;;  %vm1995_vm9 = vcmp.eq.s32.totalorder %v14568_v35, %v12447_v34  ;;  %vm2059_vm7 = vcmp.eq.s32.totalorder %v14469_v54, %v12447_v34  ;;  %v14649_v35 = vld [vmem:[#allocation169_spill] sm:$0xff]  ;;  %v14654_v54 = vld [vmem:[#allocation26_spill] sm:$0xff] }
 0x387   :  { %8229 = vmatpush.msk.msra.mxu2 %vm2003_vm2, %v14334_v46  ;;  %8245 = vmatpush.msk.msrb.mxu3 %vm2067_vm11, %v14334_v46  ;;  %vm2138_vm2 = vcmp.eq.s32.totalorder %v14647_v60, %v11946_v23  ;;  %vm2202_vm11 = vcmp.eq.s32.totalorder %v14565_v43, %v11946_v23  ;;  %v14648_v23 = vld [vmem:[#allocation23_spill] sm:$0xff] }
 0x388   :  { %8151 = vmatpush.msk.msrb.mxu1 %vm2146_vm3, %v14334_v46  ;;  %8167 = vmatpush.msk.msra.mxu0 %vm2210_vm13, %v14334_v46  ;;  %vm2055_vm3 = vcmp.eq.s32.totalorder %v14477_v31, %v12447_v34  ;;  %vm1991_vm13 = vcmp.eq.s32.totalorder %v14573_v55, %v12447_v34  ;;  %v14650_v55 = vld [vmem:[#allocation24_spill] sm:$0xff]  ;;  %v14655_v31 = vld [vmem:[#allocation45_spill] sm:$0xff] }
 0x389   :  { %8230 = vmatpush.msk.msra.mxu2 %vm1999_vm4, %v14334_v46  ;;  %8246 = vmatpush.msk.msrb.mxu3 %vm2063_vm10, %v14334_v46  ;;  %vm1879_vm4 = vcmp.eq.s32.totalorder %v14648_v23, %v12447_v34  ;;  %vm1943_vm10 = vcmp.eq.s32.totalorder %v10576_v22, %v12447_v34  ;;  %v14685_v22 = vld [vmem:[#allocation70_spill] sm:$0xff] }
 0x38a   :  { %8152 = vmatpush.msk.msrb.mxu1 %vm2142_vm8, %v14334_v46  ;;  %8168 = vmatpush.msk.msra.mxu0 %vm2206_vm12, %v14334_v46  ;;  %vm1987_vm8 = vcmp.eq.s32.totalorder %v14578_v44, %v12447_v34  ;;  %vm2051_vm12 = vcmp.eq.s32.totalorder %v14481_v40, %v12447_v34  ;;  %v14651_v44 = vld [vmem:[#allocation25_spill] sm:$0xff]  ;;  %v14656_v40 = vld [vmem:[#allocation88_spill] sm:$0xff] }
 0x38b   :  { %8231 = vmatpush.msk.msra.mxu2 %vm1995_vm9, %v14334_v46  ;;  %8247 = vmatpush.msk.msrb.mxu3 %vm2059_vm7, %v14334_v46  ;;  %vm1875_vm9 = vcmp.eq.s32.totalorder %v14650_v55, %v12447_v34  ;;  %vm1939_vm7 = vcmp.eq.s32.totalorder %v10585_v1, %v12447_v34  ;;  %v12635_v1 = vpop.f32.mrf.mxu2  ;;  %v14698_v55 = vld [vmem:[#allocation79_spill] sm:$0xff] }
 0x38c   :  { %8153 = vmatpush.msk.msrb.mxu1 %vm2138_vm2, %v14334_v46  ;;  %8169 = vmatpush.msk.msra.mxu0 %vm2202_vm11, %v14334_v46  ;;  %vm1983_vm2 = vcmp.eq.s32.totalorder %v14581_v2, %v12447_v34  ;;  %vm2047_vm11 = vcmp.eq.s32.totalorder %v14487_v59, %v12447_v34  ;;  %v14653_v2 = vld [vmem:[#allocation85_spill] sm:$0xff]  ;;  %v14657_v59 = vld [vmem:[#allocation27_spill] sm:$0xff] }
 0x38d   :  { %4049 = vmatmul.f32.gmra.mxu2 %v11857_v48  ;;  %8248 = vmatpush.msk.msrb.mxu3 %vm2055_vm3, %v14334_v46  ;;  %vm1871_vm3 = vcmp.eq.s32.totalorder %v14651_v44, %v12447_v34  ;;  %v14697_v44 = vld [vmem:[#allocation93_spill] sm:$0xff] }
 0x38e   :  { %8232 = vmatpush.msk.msra.mxu2 %vm1991_vm13, %v14334_v46  ;;  %4000 = vmatmul.f32.vlgmr.msrb.gmra.mxu1 %v14649_v35  ;;  %vm1935_vm13 = vcmp.eq.s32.totalorder %v14652_v6, %v12447_v34  ;;  %v14669_v6 = vld [vmem:[#allocation56_spill] sm:$0xff] }
 0x38f   :  { %4023 = vmatmul.f32.vlgmr.msra.gmra.mxu0 %v11619_v18  ;;  %8195 = vmatmul.msk.f32.gmra.mxu3 %vm3448_vm1, %v11854_v32 }
 0x390   :  { %8196 = vmatpush.msk.msra.mxu1 %vm1879_vm4, %v14334_v46  ;;  %8212 = vmatpush.msk.msrb.mxu0 %vm1943_vm10, %v14334_v46  ;;  %vm1979_vm4 = vcmp.eq.s32.totalorder %v14584_v50, %v12447_v34  ;;  %vm2043_vm10 = vcmp.eq.s32.totalorder %v14653_v2, %v12447_v34  ;;  %v14659_v50 = vld [vmem:[#allocation69_spill] sm:$0xff]  ;;  %v14660_v2 = vld [vmem:[#allocation28_spill] sm:$0xff] }
 0x391   :  { %8233 = vmatpush.msk.msra.mxu2 %vm1987_vm8, %v14334_v46  ;;  %8249 = vmatpush.msk.msrb.mxu3 %vm2051_vm12, %v14334_v46  ;;  %vm1867_vm8 = vcmp.eq.s32.totalorder %v14654_v54, %v12447_v34  ;;  %vm1931_vm12 = vcmp.eq.s32.totalorder %v14655_v31, %v12447_v34  ;;  %v14665_v31 = vld [vmem:[#allocation54_spill] sm:$0xff]  ;;  %v14687_v54 = vld [vmem:[#allocation36_spill] sm:$0xff] }
 0x392   :  { %8197 = vmatpush.msk.msra.mxu1 %vm1875_vm9, %v14334_v46  ;;  %8213 = vmatpush.msk.msrb.mxu0 %vm1939_vm7, %v14334_v46  ;;  %vm1975_vm9 = vcmp.eq.s32.totalorder %v14587_v4, %v12447_v34  ;;  %vm2039_vm7 = vcmp.eq.s32.totalorder %v14656_v40, %v12447_v34  ;;  %v14658_v4 = vld [vmem:[#allocation44_spill] sm:$0xff] }
 0x393   :  { %8234 = vmatpush.msk.msra.mxu2 %vm1983_vm2, %v14334_v46  ;;  %8250 = vmatpush.msk.msrb.mxu3 %vm2047_vm11, %v14334_v46  ;;  %vm1863_vm2 = vcmp.eq.s32.totalorder %v14657_v59, %v12447_v34  ;;  %vm1927_vm11 = vcmp.eq.s32.totalorder %v14571_v51, %v12447_v34  ;;  %v14661_v40 = vld [vmem:[#allocation52_spill] sm:$0xff]  ;;  %v14662_v51 = vld [vmem:[#allocation65_spill] sm:$0xff]  ;;  %v14682_v59 = vld [vmem:[#allocation67_spill] sm:$0xff] }
 0x394   :  { %8198 = vmatpush.msk.msra.mxu1 %vm1871_vm3, %v14334_v46  ;;  %8214 = vmatpush.msk.msrb.mxu0 %vm1935_vm13, %v14334_v46  ;;  %vm1971_vm3 = vcmp.eq.s32.totalorder %v14590_v14, %v12447_v34  ;;  %vm2035_vm13 = vcmp.eq.s32.totalorder %v14574_v62, %v12447_v34  ;;  %v14663_v14 = vld [vmem:[#allocation101_spill] sm:$0xff] }
 0x395   :  { %8235 = vmatpush.msk.msra.mxu2 %vm1979_vm4, %v14334_v46  ;;  %8251 = vmatpush.msk.msrb.mxu3 %vm2043_vm10, %v14334_v46  ;;  %vm1859_vm4 = vcmp.eq.s32.totalorder %v14660_v2, %v12447_v34  ;;  %vm1923_vm10 = vcmp.eq.s32.totalorder %v14661_v40, %v12447_v34  ;;  %v14664_v62 = vld [vmem:[#allocation29_spill] sm:$0xff]  ;;  %v14666_v40 = vld [vmem:[#allocation68_spill] sm:$0xff]  ;;  %v12649_v2 = vpop.f32.mrf.mxu3 }
 0x396   :  { %8199 = vmatpush.msk.msra.mxu1 %vm1867_vm8, %v14334_v46  ;;  %8215 = vmatpush.msk.msrb.mxu0 %vm1931_vm12, %v14334_v46  ;;  %vm1967_vm8 = vcmp.eq.s32.totalorder %v14662_v51, %v12447_v34  ;;  %vm2031_vm12 = vcmp.eq.s32.totalorder %v14663_v14, %v12447_v34  ;;  %v14667_v51 = vld [vmem:[#allocation105_spill] sm:$0xff]  ;;  %v14668_v14 = vld [vmem:[#allocation30_spill] sm:$0xff] }
 0x397   :  { %8236 = vmatpush.msk.msra.mxu2 %vm1975_vm9, %v14334_v46  ;;  %8252 = vmatpush.msk.msrb.mxu3 %vm2039_vm7, %v14334_v46  ;;  %vm1855_vm9 = vcmp.eq.s32.totalorder %v14664_v62, %v12447_v34  ;;  %vm1919_vm7 = vcmp.eq.s32.totalorder %v14665_v31, %v12447_v34  ;;  %v12621_v31 = vpop.f32.mrf.mxu0  ;;  %v14672_v62 = vld [vmem:[#allocation31_spill] sm:$0xff] }
 0x398   :  { %4003 = vmatmul.f32.gmra.mxu1 %v14658_v4  ;;  %4026 = vmatmul.f32.gmra.mxu0 %v14659_v50 }
 0x399   :  { %8200 = vmatpush.msk.msra.mxu1 %vm1863_vm2, %v14334_v46  ;;  %8216 = vmatpush.msk.msrb.mxu0 %vm1927_vm11, %v14334_v46  ;;  %vm1963_vm2 = vcmp.eq.s32.totalorder %v14666_v40, %v12447_v34  ;;  %vm2027_vm11 = vcmp.eq.s32.totalorder %v14667_v51, %v12447_v34  ;;  %v14670_v40 = vld [vmem:[#allocation72_spill] sm:$0xff]  ;;  %v14671_v51 = vld [vmem:[#allocation109_spill] sm:$0xff] }
 0x39a   :  { %8237 = vmatpush.msk.msra.mxu2 %vm1971_vm3, %v14334_v46  ;;  %8253 = vmatpush.msk.msrb.mxu3 %vm2035_vm13, %v14334_v46  ;;  %vm1851_vm3 = vcmp.eq.s32.totalorder %v14668_v14, %v12447_v34  ;;  %vm1915_vm13 = vcmp.eq.s32.totalorder %v14669_v6, %v12447_v34  ;;  %v14673_v6 = vld [vmem:[#allocation58_spill] sm:$0xff] }
 0x39b   :  { %8201 = vmatpush.msk.msra.mxu1 %vm1859_vm4, %v14334_v46  ;;  %8217 = vmatpush.msk.msrb.mxu0 %vm1923_vm10, %v14334_v46  ;;  %vm1959_vm4 = vcmp.eq.s32.totalorder %v14670_v40, %v12447_v34  ;;  %vm2023_vm10 = vcmp.eq.s32.totalorder %v14671_v51, %v12447_v34  ;;  %v14674_v51 = vld [vmem:[#allocation113_spill] sm:$0xff]  ;;  %v14675_v40 = vld [vmem:[#allocation32_spill] sm:$0xff] }
 0x39c   :  { %8238 = vmatpush.msk.msra.mxu2 %vm1967_vm8, %v14334_v46  ;;  %8254 = vmatpush.msk.msrb.mxu3 %vm2031_vm12, %v14334_v46  ;;  %vm1847_vm8 = vcmp.eq.s32.totalorder %v14672_v62, %v12447_v34  ;;  %vm1911_vm12 = vcmp.eq.s32.totalorder %v14673_v6, %v12447_v34  ;;  %v14676_v6 = vld [vmem:[#allocation62_spill] sm:$0xff] }
 0x39d   :  { %8202 = vmatpush.msk.msra.mxu1 %vm1855_vm9, %v14334_v46  ;;  %8218 = vmatpush.msk.msrb.mxu0 %vm1919_vm7, %v14334_v46  ;;  %vm1955_vm9 = vcmp.eq.s32.totalorder %v14605_v0, %v12447_v34  ;;  %vm2019_vm7 = vcmp.eq.s32.totalorder %v14674_v51, %v12447_v34  ;;  %v14677_v51 = vld [vmem:[#allocation117_spill] sm:$0xff] }
 0x39e   :  { %8239 = vmatpush.msk.msra.mxu2 %vm1963_vm2, %v14334_v46  ;;  %8255 = vmatpush.msk.msrb.mxu3 %vm2027_vm11, %v14334_v46  ;;  %vm1843_vm2 = vcmp.eq.s32.totalorder %v14675_v40, %v12447_v34  ;;  %vm1907_vm11 = vcmp.eq.s32.totalorder %v14676_v6, %v12447_v34  ;;  %v14678_v0 = vld [vmem:[#allocation33_spill] sm:$0xff]  ;;  %v14679_v6 = vld [vmem:[#allocation64_spill] sm:$0xff] }
 0x39f   :  { %8203 = vmatpush.msk.msra.mxu1 %vm1851_vm3, %v14334_v46  ;;  %8219 = vmatpush.msk.msrb.mxu0 %vm1915_vm13, %v14334_v46  ;;  %vm1951_vm3 = vcmp.eq.s32.totalorder %v14608_v63, %v12447_v34  ;;  %vm2015_vm13 = vcmp.eq.s32.totalorder %v14677_v51, %v12447_v34  ;;  %v14680_v63 = vld [vmem:[#allocation121_spill] sm:$0xff]  ;;  %v14681_v51 = vld [vmem:[#allocation34_spill] sm:$0xff] }
 0x3a0   :  { %8240 = vmatpush.msk.msra.mxu2 %vm1959_vm4, %v14334_v46  ;;  %8256 = vmatpush.msk.msrb.mxu3 %vm2023_vm10, %v14334_v46  ;;  %vm1839_vm4 = vcmp.eq.s32.totalorder %v14678_v0, %v12447_v34  ;;  %vm1903_vm10 = vcmp.eq.s32.totalorder %v14679_v6, %v12447_v34  ;;  %v12683_v6 = vpop.f32.mrf.mxu0 }
 0x3a1   :  { %8204 = vmatpush.msk.msra.mxu1 %vm1847_vm8, %v14334_v46  ;;  %8220 = vmatpush.msk.msrb.mxu0 %vm1911_vm12, %v14334_v46  ;;  %vm1947_vm8 = vcmp.eq.s32.totalorder %v14611_v33, %v12447_v34  ;;  %vm2011_vm12 = vcmp.eq.s32.totalorder %v14680_v63, %v12447_v34  ;;  %v14683_v63 = vld [vmem:[#allocation125_spill] sm:$0xff]  ;;  %v12685_v33 = vpop.f32.mrf.mxu2 }
 0x3a2   :  { %8241 = vmatpush.msk.msra.mxu2 %vm1955_vm9, %v14334_v46  ;;  %8257 = vmatpush.msk.msrb.mxu3 %vm2019_vm7, %v14334_v46  ;;  %vm1835_vm9 = vcmp.eq.s32.totalorder %v14681_v51, %v12447_v34  ;;  %vm1899_vm7 = vcmp.eq.s32.totalorder %v14682_v59, %v12447_v34  ;;  %v14684_v59 = vld [vmem:[#allocation35_spill] sm:$0xff] }
 0x3a3   :  { %8205 = vmatpush.msk.msra.mxu1 %vm1843_vm2, %v14334_v46  ;;  %8221 = vmatpush.msk.msrb.mxu0 %vm1907_vm11, %v14334_v46  ;;  %vm2263_vm2 = vcmp.eq.s32.totalorder %v14614_v37, %v12447_v34  ;;  %vm2327_vm11 = vcmp.eq.s32.totalorder %v14683_v63, %v12447_v34  ;;  %v14686_v37 = vld [vmem:[#allocation129_spill] sm:$0xff]  ;;  %v12699_v63 = vpop.f32.mrf.mxu3 }
 0x3a4   :  { %8242 = vmatpush.msk.msra.mxu2 %vm1951_vm3, %v14334_v46  ;;  %8258 = vmatpush.msk.msrb.mxu3 %vm2015_vm13, %v14334_v46  ;;  %vm1831_vm3 = vcmp.eq.s32.totalorder %v14684_v59, %v12447_v34  ;;  %vm1895_vm13 = vcmp.eq.s32.totalorder %v14685_v22, %v12447_v34  ;;  %v14688_v22 = vld [vmem:[#allocation73_spill] sm:$0xff] }
 0x3a5   :  { %8206 = vmatpush.msk.msra.mxu1 %vm1839_vm4, %v14334_v46  ;;  %8222 = vmatpush.msk.msrb.mxu0 %vm1903_vm10, %v14334_v46  ;;  %vm2259_vm4 = vcmp.eq.s32.totalorder %v14619_v26, %v12447_v34  ;;  %vm2323_vm10 = vcmp.eq.s32.totalorder %v14686_v37, %v12447_v34  ;;  %v14689_v26 = vld [vmem:[#allocation133_spill] sm:$0xff]  ;;  %v12725_v37 = vpop.f32.mrf.mxu1 }
 0x3a6   :  { %8243 = vmatpush.msk.msra.mxu2 %vm1947_vm8, %v14334_v46  ;;  %8259 = vmatpush.msk.msrb.mxu3 %vm2011_vm12, %v14334_v46  ;;  %vm1827_vm8 = vcmp.eq.s32.totalorder %v14687_v54, %v12447_v34  ;;  %vm1891_vm12 = vcmp.eq.s32.totalorder %v14688_v22, %v12447_v34  ;;  %v14696_v22 = vld [vmem:[#allocation40_spill] sm:$0xff] }
 0x3a7   :  { %8207 = vmatpush.msk.msra.mxu1 %vm1835_vm9, %v14334_v46  ;;  %8223 = vmatpush.msk.msrb.mxu0 %vm1899_vm7, %v14334_v46  ;;  %vm2255_vm9 = vcmp.eq.s32.totalorder %v14622_v11, %v12447_v34  ;;  %vm2319_vm7 = vcmp.eq.s32.totalorder %v14689_v26, %v12447_v34  ;;  %v14692_v11 = vld [vmem:[#allocation137_spill] sm:$0xff]  ;;  %v14693_v26 = vld [vmem:[#allocation22_spill] sm:$0xff] }
 0x3a8   :  { %4138 = vmatmul.f32.vlgmr.msra.gmra.mxu2 %v14617_v10  ;;  %4161 = vmatmul.f32.vlgmr.msrb.gmra.mxu3 %v11597_v5  ;;  %v14690_v5 = vld [vmem:[#allocation38_spill] sm:$0xff]  ;;  %v14691_v10 = vld [vmem:[#allocation76_spill] sm:$0xff] }
 0x3a9   :  { %8292 = vmatpush.msk.msrb.mxu2 %vm2263_vm2, %v14334_v46  ;;  %8308 = vmatpush.msk.msra.mxu3 %vm2327_vm11, %v14334_v46  ;;  %vm1823_vm2 = vcmp.eq.s32.totalorder %v14690_v5, %v12447_v34  ;;  %vm1887_vm11 = vcmp.eq.s32.totalorder %v14691_v10, %v12447_v34  ;;  %v14694_v10 = vld [vmem:[#allocation37_spill] sm:$0xff] }
 0x3aa   :  { %8208 = vmatpush.msk.msra.mxu1 %vm1831_vm3, %v14334_v46  ;;  %8224 = vmatpush.msk.msrb.mxu0 %vm1895_vm13, %v14334_v46  ;;  %vm2251_vm3 = vcmp.eq.s32.totalorder %v14624_v9, %v12447_v34  ;;  %vm2315_vm13 = vcmp.eq.s32.totalorder %v14692_v11, %v12447_v34  ;;  %v12735_v9 = vpop.f32.mrf.mxu0  ;;  %v14695_v11 = vld [vmem:[#allocation139_spill] sm:$0xff] }
 0x3ab   :  { %8293 = vmatpush.msk.msrb.mxu2 %vm2259_vm4, %v14334_v46  ;;  %8309 = vmatpush.msk.msra.mxu3 %vm2323_vm10, %v14334_v46  ;;  %vm1819_vm4 = vcmp.eq.s32.totalorder %v14693_v26, %v12447_v34  ;;  %vm1883_vm10 = vcmp.eq.s32.totalorder %v14694_v10, %v12447_v34  ;;  %v12745_v10 = vpop.f32.mrf.mxu2 }
 0x3ac   :  { %8209 = vmatpush.msk.msra.mxu1 %vm1827_vm8, %v14334_v46  ;;  %8225 = vmatpush.msk.msrb.mxu0 %vm1891_vm12, %v14334_v46  ;;  %vm2247_vm8 = vcmp.eq.s32.totalorder %v14626_v20, %v12447_v34  ;;  %vm2311_vm12 = vcmp.eq.s32.totalorder %v14695_v11, %v12447_v34  ;;  %v12759_v20 = vpop.f32.mrf.mxu3  ;;  %v14706_v11 = vld [vmem:[#allocation90_spill] sm:$0xff] }
 0x3ad   :  { %8294 = vmatpush.msk.msrb.mxu2 %vm2255_vm9, %v14334_v46  ;;  %8310 = vmatpush.msk.msra.mxu3 %vm2319_vm7, %v14334_v46  ;;  %vm2135_vm9 = vcmp.eq.s32.totalorder %v14697_v44, %v12447_v34  ;;  %vm2199_vm7 = vcmp.eq.s32.totalorder %v14698_v55, %v12447_v34  ;;  %v14701_v44 = vld [vmem:[#allocation98_spill] sm:$0xff]  ;;  %v14702_v55 = vld [vmem:[#allocation83_spill] sm:$0xff] }
 0x3ae   :  { %8210 = vmatpush.msk.msra.mxu1 %vm1823_vm2, %v14334_v46  ;;  %8226 = vmatpush.msk.msrb.mxu0 %vm1887_vm11, %v14334_v46  ;;  %vm2243_vm2 = vcmp.eq.s32.totalorder %v14545_v8, %v12447_v34  ;;  %vm2307_vm11 = vcmp.eq.s32.totalorder %v14546_v38, %v12447_v34  ;;  %v14703_v8 = vld [vmem:[#allocation102_spill] sm:$0xff]  ;;  %v14704_v38 = vld [vmem:[#allocation87_spill] sm:$0xff] }
 0x3af   :  { %8295 = vmatpush.msk.msrb.mxu2 %vm2251_vm3, %v14334_v46  ;;  %8311 = vmatpush.msk.msra.mxu3 %vm2315_vm13, %v14334_v46  ;;  %vm2131_vm3 = vcmp.eq.s32.totalorder %v14701_v44, %v12447_v34  ;;  %vm2195_vm13 = vcmp.eq.s32.totalorder %v14702_v55, %v12447_v34  ;;  %v14710_v44 = vld [vmem:[#allocation114_spill] sm:$0xff] }
 0x3b0   :  { %8211 = vmatpush.msk.msra.mxu1 %vm1819_vm4, %v14334_v46  ;;  %8227 = vmatpush.msk.msrb.mxu0 %vm1883_vm10, %v14334_v46  ;;  %vm2239_vm4 = vcmp.eq.s32.totalorder %v14630_v7, %v12447_v34  ;;  %vm2303_vm10 = vcmp.eq.s32.totalorder %v14548_v30, %v12447_v34  ;;  %v12785_v7 = vpop.f32.mrf.mxu1  ;;  %v14705_v30 = vld [vmem:[#allocation106_spill] sm:$0xff] }
 0x3b1   :  { %4141 = vmatmul.f32.gmra.mxu2 %v11537_v19  ;;  %4164 = vmatmul.f32.gmra.mxu3 %v14696_v22  ;;  %v14699_v19 = vld [vmem:[#allocation158_spill] sm:$0xff]  ;;  %v14700_v22 = vld [vmem:[#allocation159_spill] sm:$0xff] }
 0x3b2   :  { %8296 = vmatpush.msk.msrb.mxu2 %vm2247_vm8, %v14334_v46  ;;  %8312 = vmatpush.msk.msra.mxu3 %vm2311_vm12, %v14334_v46  ;;  %vm2127_vm8 = vcmp.eq.s32.totalorder %v14703_v8, %v12447_v34  ;;  %vm2191_vm12 = vcmp.eq.s32.totalorder %v14704_v38, %v12447_v34 }
 0x3b3   :  { %4092 = vmatmul.f32.vlgmr.msra.gmra.mxu1 %v14699_v19  ;;  %4115 = vmatmul.f32.vlgmr.msrb.gmra.mxu0 %v14700_v22  ;;  %v14708_v19 = vld [vmem:[#allocation110_spill] sm:$0xff]  ;;  %v14709_v22 = vld [vmem:[#allocation163_spill] sm:$0xff] }
 0x3b4   :  { %8260 = vmatpush.msk.msrb.mxu1 %vm2135_vm9, %v14334_v46  ;;  %8276 = vmatpush.msk.msra.mxu0 %vm2199_vm7, %v14334_v46  ;;  %vm2235_vm9 = vcmp.eq.s32.totalorder %v14632_v58, %v12447_v34  ;;  %vm2299_vm7 = vcmp.eq.s32.totalorder %v14550_v15, %v12447_v34  ;;  %v14707_v15 = vld [vmem:[#allocation147_spill] sm:$0xff]  ;;  %v12799_v58 = vpop.f32.mrf.mxu0 }
 0x3b5   :  { %8297 = vmatpush.msk.msrb.mxu2 %vm2243_vm2, %v14334_v46  ;;  %8313 = vmatpush.msk.msra.mxu3 %vm2307_vm11, %v14334_v46  ;;  %vm2123_vm2 = vcmp.eq.s32.totalorder %v14705_v30, %v12447_v34  ;;  %vm2187_vm11 = vcmp.eq.s32.totalorder %v14706_v11, %v12447_v34  ;;  %v14727_v30 = vld [vmem:[#allocation168_spill] sm:$0xff] }
 0x3b6   :  { %8261 = vmatpush.msk.msrb.mxu1 %vm2131_vm3, %v14334_v46  ;;  %8277 = vmatpush.msk.msra.mxu0 %vm2195_vm13, %v14334_v46  ;;  %vm2231_vm3 = vcmp.eq.s32.totalorder %v14634_v53, %v12447_v34  ;;  %vm2295_vm13 = vcmp.eq.s32.totalorder %v14707_v15, %v12447_v34  ;;  %v12809_v53 = vpop.f32.mrf.mxu2 }
 0x3b7   :  { %8298 = vmatpush.msk.msrb.mxu2 %vm2239_vm4, %v14334_v46  ;;  %8314 = vmatpush.msk.msra.mxu3 %vm2303_vm10, %v14334_v46  ;;  %vm2119_vm4 = vcmp.eq.s32.totalorder %v14708_v19, %v12447_v34  ;;  %vm2183_vm10 = vcmp.eq.s32.totalorder %v14625_v13, %v12447_v34  ;;  %v12823_v13 = vpop.f32.mrf.mxu3  ;;  %v14729_v19 = vld [vmem:[#allocation160_spill] sm:$0xff] }
 0x3b8   :  { %8262 = vmatpush.msk.msrb.mxu1 %vm2127_vm8, %v14334_v46  ;;  %8278 = vmatpush.msk.msra.mxu0 %vm2191_vm12, %v14334_v46  ;;  %vm2227_vm8 = vcmp.eq.s32.totalorder %v14553_v25, %v12447_v34  ;;  %vm2291_vm12 = vcmp.eq.s32.totalorder %v14554_v21, %v12447_v34  ;;  %v14711_v21 = vld [vmem:[#allocation118_spill] sm:$0xff]  ;;  %v14712_v25 = vld [vmem:[#allocation99_spill] sm:$0xff] }
 0x3b9   :  { %8299 = vmatpush.msk.msrb.mxu2 %vm2235_vm9, %v14334_v46  ;;  %8315 = vmatpush.msk.msra.mxu3 %vm2299_vm7, %v14334_v46  ;;  %vm2115_vm9 = vcmp.eq.s32.totalorder %v14710_v44, %v12447_v34  ;;  %vm2179_vm7 = vcmp.eq.s32.totalorder %v14628_v56, %v12447_v34  ;;  %v14717_v56 = vld [vmem:[#allocation130_spill] sm:$0xff]  ;;  %v14733_v44 = vld [vmem:[#allocation164_spill] sm:$0xff] }
 0x3ba   :  { %8263 = vmatpush.msk.msrb.mxu1 %vm2123_vm2, %v14334_v46  ;;  %8279 = vmatpush.msk.msra.mxu0 %vm2187_vm11, %v14334_v46  ;;  %vm2223_vm2 = vcmp.eq.s32.totalorder %v14638_v29, %v12447_v34  ;;  %vm2287_vm11 = vcmp.eq.s32.totalorder %v14556_v42, %v12447_v34  ;;  %v14713_v29 = vld [vmem:[#allocation122_spill] sm:$0xff]  ;;  %v12849_v42 = vpop.f32.mrf.mxu1 }
 0x3bb   :  { %8300 = vmatpush.msk.msrb.mxu2 %vm2231_vm3, %v14334_v46  ;;  %8316 = vmatpush.msk.msra.mxu3 %vm2295_vm13, %v14334_v46  ;;  %vm2111_vm3 = vcmp.eq.s32.totalorder %v14711_v21, %v12447_v34  ;;  %vm2175_vm13 = vcmp.eq.s32.totalorder %v14712_v25, %v12447_v34  ;;  %v14734_v25 = vld [vmem:[#allocation165_spill] sm:$0xff] }
 0x3bc   :  { %4095 = vmatmul.f32.gmra.mxu1 %v14709_v22  ;;  %4118 = vmatmul.f32.gmra.mxu0 %v14627_v3  ;;  %v14714_v3 = vld [vmem:[#allocation103_spill] sm:$0xff]  ;;  %v14732_v22 = vld [vmem:[#allocation50_spill] sm:$0xff] }
 0x3bd   :  { %8264 = vmatpush.msk.msrb.mxu1 %vm2119_vm4, %v14334_v46  ;;  %8280 = vmatpush.msk.msra.mxu0 %vm2183_vm10, %v14334_v46  ;;  %vm2219_vm4 = vcmp.eq.s32.totalorder %v14640_v57, %v12447_v34  ;;  %vm2283_vm10 = vcmp.eq.s32.totalorder %v14558_v27, %v12447_v34  ;;  %v14715_v27 = vld [vmem:[#allocation126_spill] sm:$0xff]  ;;  %v12863_v57 = vpop.f32.mrf.mxu0 }
 0x3be   :  { %8301 = vmatpush.msk.msrb.mxu2 %vm2227_vm8, %v14334_v46  ;;  %8317 = vmatpush.msk.msra.mxu3 %vm2291_vm12, %v14334_v46  ;;  %vm2107_vm8 = vcmp.eq.s32.totalorder %v14713_v29, %v12447_v34  ;;  %vm2171_vm12 = vcmp.eq.s32.totalorder %v14714_v3, %v12447_v34 }
 0x3bf   :  { %8265 = vmatpush.msk.msrb.mxu1 %vm2115_vm9, %v14334_v46  ;;  %8281 = vmatpush.msk.msra.mxu0 %vm2179_vm7, %v14334_v46  ;;  %vm2215_vm9 = vcmp.eq.s32.totalorder %v14642_v12, %v12447_v34  ;;  %vm2279_vm7 = vcmp.eq.s32.totalorder %v14560_v28, %v12447_v34  ;;  %v14716_v28 = vld [vmem:[#allocation152_spill] sm:$0xff]  ;;  %v12877_v12 = vpop.f32.mrf.mxu2  ;;  %v12891_v55 = vpop.f32.mrf.mxu3 }
 0x3c0   :  { %8302 = vmatpush.msk.msrb.mxu2 %vm2223_vm2, %v14334_v46  ;;  %8318 = vmatpush.msk.msra.mxu3 %vm2287_vm11, %v14334_v46  ;;  %vm2103_vm2 = vcmp.eq.s32.totalorder %v14715_v27, %v12447_v34  ;;  %vm2167_vm11 = vcmp.eq.s32.totalorder %v14633_v52, %v12447_v34  ;;  %v14718_v52 = vld [vmem:[#allocation111_spill] sm:$0xff] }
 0x3c1   :  { %8266 = vmatpush.msk.msrb.mxu1 %vm2111_vm3, %v14334_v46  ;;  %8282 = vmatpush.msk.msra.mxu0 %vm2175_vm13, %v14334_v46  ;;  %vm2211_vm3 = vcmp.eq.s32.totalorder %v14644_v39, %v12447_v34  ;;  %vm2275_vm13 = vcmp.eq.s32.totalorder %v14716_v28, %v12447_v34  ;;  %v14719_v39 = vld [vmem:[#allocation134_spill] sm:$0xff]  ;;  %v14735_v27 = vld [vmem:[#allocation167_spill] sm:$0xff] }
 0x3c2   :  { %8303 = vmatpush.msk.msrb.mxu2 %vm2219_vm4, %v14334_v46  ;;  %8319 = vmatpush.msk.msra.mxu3 %vm2283_vm10, %v14334_v46  ;;  %vm2099_vm4 = vcmp.eq.s32.totalorder %v14717_v56, %v12447_v34  ;;  %vm2163_vm10 = vcmp.eq.s32.totalorder %v14718_v52, %v12447_v34 }
 0x3c3   :  { %8267 = vmatpush.msk.msrb.mxu1 %vm2107_vm8, %v14334_v46  ;;  %8283 = vmatpush.msk.msra.mxu0 %vm2171_vm12, %v14334_v46  ;;  %vm2207_vm8 = vcmp.eq.s32.totalorder %v14646_v17, %v12447_v34  ;;  %vm2271_vm12 = vcmp.eq.s32.totalorder %v14564_v36, %v12447_v34  ;;  %v14720_v36 = vld [vmem:[#allocation138_spill] sm:$0xff] }
 0x3c4   :  { %8304 = vmatpush.msk.msrb.mxu2 %vm2215_vm9, %v14334_v46  ;;  %8320 = vmatpush.msk.msra.mxu3 %vm2279_vm7, %v14334_v46  ;;  %vm2095_vm9 = vcmp.eq.s32.totalorder %v14719_v39, %v12447_v34  ;;  %vm2159_vm7 = vcmp.eq.s32.totalorder %v14637_v45, %v12447_v34  ;;  %v14721_v45 = vld [vmem:[#allocation119_spill] sm:$0xff]  ;;  %v14723_v17 = vld [vmem:[#allocation142_spill] sm:$0xff] }
 0x3c5   :  { %8268 = vmatpush.msk.msrb.mxu1 %vm2103_vm2, %v14334_v46  ;;  %8284 = vmatpush.msk.msra.mxu0 %vm2167_vm11, %v14334_v46  ;;  %vm2203_vm2 = vcmp.eq.s32.totalorder %v14565_v43, %v12447_v34  ;;  %vm2267_vm11 = vcmp.eq.s32.totalorder %v14566_v41, %v12447_v34  ;;  %v14722_v41 = vld [vmem:[#allocation140_spill] sm:$0xff]  ;;  %v12913_v43 = vpop.f32.mrf.mxu1  ;;  %v12923_v8 = vpop.f32.mrf.mxu0 }
 0x3c6   :  { %8305 = vmatpush.msk.msrb.mxu2 %vm2211_vm3, %v14334_v46  ;;  %8321 = vmatpush.msk.msra.mxu3 %vm2275_vm13, %v14334_v46  ;;  %vm2091_vm3 = vcmp.eq.s32.totalorder %v14720_v36, %v12447_v34  ;;  %vm2155_vm13 = vcmp.eq.s32.totalorder %v14721_v45, %v12447_v34 }
 0x3c7   :  { %8269 = vmatpush.msk.msrb.mxu1 %vm2099_vm4, %v14334_v46  ;;  %8285 = vmatpush.msk.msra.mxu0 %vm2163_vm10, %v14334_v46  ;;  %vm2087_vm4 = vcmp.eq.s32.totalorder %v14722_v41, %v12447_v34  ;;  %vm2151_vm10 = vcmp.eq.s32.totalorder %v14641_v49, %v12447_v34  ;;  %v14724_v49 = vld [vmem:[#allocation144_spill] sm:$0xff] }
 0x3c8   :  { %8306 = vmatpush.msk.msrb.mxu2 %vm2207_vm8, %v14334_v46  ;;  %8322 = vmatpush.msk.msra.mxu3 %vm2271_vm12, %v14334_v46  ;;  %vm2083_vm8 = vcmp.eq.s32.totalorder %v14723_v17, %v12447_v34  ;;  %vm2147_vm12 = vcmp.eq.s32.totalorder %v14643_v47, %v12447_v34  ;;  %v3705_v47 = vpop.f32.mrf.mxu3 }
 0x3c9   :  { %8270 = vmatpush.msk.msrb.mxu1 %vm2095_vm9, %v14334_v46  ;;  %8286 = vmatpush.msk.msra.mxu0 %vm2159_vm7, %v14334_v46  ;;  %vm2079_vm9 = vcmp.eq.s32.totalorder %v14724_v49, %v12447_v34  ;;  %vm2143_vm7 = vcmp.eq.s32.totalorder %v14645_v16, %v12447_v34  ;;  %v14726_v16 = vld [vmem:[#allocation155_spill] sm:$0xff] }
 0x3ca   :  { %8307 = vmatpush.msk.msrb.mxu2 %vm2203_vm2, %v14334_v46  ;;  %8323 = vmatpush.msk.msra.mxu3 %vm2267_vm11, %v14334_v46  ;;  %vm2139_vm11 = vcmp.eq.s32.totalorder %v14647_v60, %v12447_v34  ;;  %v14728_v60 = vld [vmem:[#allocation157_spill] sm:$0xff] }
 0x3cb   :  { %8271 = vmatpush.msk.msrb.mxu1 %vm2091_vm3, %v14334_v46  ;;  %8287 = vmatpush.msk.msra.mxu0 %vm2155_vm13, %v14334_v46  ;;  %vm2359_vm3 = vcmp.eq.s32.totalorder %v14726_v16, %v12447_v34  ;;  %vm2355_vm13 = vcmp.eq.s32.totalorder %v14728_v60, %v12447_v34 }
 0x3cc   :  { %4230 = vmatmul.f32.vlgmr.msrb.gmra.mxu2 %v11619_v18  ;;  %4253 = vmatmul.f32.vlgmr.msra.gmra.mxu3 %v11785_v24  ;;  %v3682_v18 = vpop.f32.mrf.mxu2  ;;  %v14725_v24 = vld [vmem:[#allocation146_spill] sm:$0xff] }
 0x3cd   :  { %8272 = vmatpush.msk.msrb.mxu1 %vm2087_vm4, %v14334_v46  ;;  %8288 = vmatpush.msk.msra.mxu0 %vm2151_vm10, %v14334_v46  ;;  %vm2075_vm2 = vcmp.eq.s32.totalorder %v14725_v24, %v12447_v34  ;;  %v3725_v38 = vpop.f32.mrf.mxu1  ;;  %v3748_v11 = vpop.f32.mrf.mxu0  ;;  %vm2351_vm4 = vcmp.eq.s32.totalorder %v14729_v19, %v12447_v34  ;;  %v3703_v24 = vadd.f32 %v12891_v55, %v12877_v12 }
 0x3cf   :  { %8273 = vmatpush.msk.msrb.mxu1 %vm2083_vm8, %v14334_v46  ;;  %8289 = vmatpush.msk.msra.mxu0 %vm2147_vm12, %v14334_v46  ;;  %vm2339_vm12 = vcmp.eq.s32.totalorder %v14733_v44, %v12447_v34  ;;  %v3706_v44 = vadd.f32 %v3705_v47, %v3682_v18 }
 0x3d1   :  { %8274 = vmatpush.msk.msrb.mxu1 %vm2079_vm9, %v14334_v46  ;;  %8290 = vmatpush.msk.msra.mxu0 %vm2143_vm7, %v14334_v46  ;;  %vm2335_vm9 = vcmp.eq.s32.totalorder %v14734_v25, %v12447_v34  ;;  %vm2331_vm7 = vcmp.eq.s32.totalorder %v14735_v27, %v12447_v34 }
 0x3d3   :  { %8275 = vmatpush.msk.msrb.mxu1 %vm2075_vm2, %v14334_v46  ;;  %8291 = vmatpush.msk.msra.mxu0 %vm2139_vm11, %v14334_v46  ;;  %vm4447_vm2 = vcmask 171008   ;;  %vm4424_vm11 = vcmask 957440  }
 0x3d4   :  { %4233 = vmatmul.f32.gmra.mxu2 %v14659_v50  ;;  %4256 = vmatmul.f32.gmra.mxu3 %v11857_v48  ;;  %v3771_v15 = vpop.f32.mrf.mxu2  ;;  %v3794_v50 = vpop.f32.mrf.mxu3  ;;  %v14730_v48 = vld [vmem:[#allocation161_spill] sm:$0xff] }
 0x3d5   :  { %4184 = vmatmul.f32.vlgmr.msrb.gmra.mxu1 %v14727_v30  ;;  %4207 = vmatmul.f32.vlgmr.msra.gmra.mxu0 %v14649_v35  ;;  %vm2347_vm10 = vcmp.eq.s32.totalorder %v14730_v48, %v12447_v34  ;;  %v14731_v35 = vld [vmem:[#allocation162_spill] sm:$0xff]  ;;  %v3728_v21 = vpop.f32.mrf.mxu1  ;;  %v3751_v29 = vpop.f32.mrf.mxu0 }
 0x3d6   :  { %8324 = vmatpush.msk.msra.mxu1 %vm2359_vm3, %v14334_v46  ;;  %vm2343_vm8 = vcmp.eq.s32.totalorder %v14731_v35, %v12447_v34  ;;  %v3729_v25 = vadd.f32 %v3728_v21, %v3706_v44  ;;  %vm4401_vm3 = vcmask 1006592  }
 0x3d8   :  { %8325 = vmatpush.msk.msra.mxu1 %vm2355_vm13, %v14334_v46  ;;  %v3752_v0 = vadd.f32 %v3751_v29, %v3729_v25 }
 0x3da   :  { %8326 = vmatpush.msk.msra.mxu1 %vm2351_vm4, %v14334_v46 }
 0x3dc   :  { %8327 = vmatpush.msk.msra.mxu1 %vm2347_vm10, %v14334_v46  ;;  %v3774_v3 = vpop.f32.mrf.mxu2  ;;  %v3797_v28 = vpop.f32.mrf.mxu3 }
 0x3dd   :  { %4187 = vmatmul.f32.gmra.mxu1 %v14732_v22  ;;  %4210 = vmatmul.f32.gmra.mxu0 %v14658_v4  ;;  %v3817_v4 = vpop.f32.mrf.mxu1  ;;  %v3840_v56 = vpop.f32.mrf.mxu0 }
 0x3de   :  { %8328 = vmatpush.msk.msra.mxu1 %vm2343_vm8, %v14334_v46  ;;  %vm4356_vm8 = vcmask 793600  }
 0x3e0   :  { %8329 = vmatpush.msk.msra.mxu1 %vm2339_vm12, %v14334_v46 }
 0x3e2   :  { %8330 = vmatpush.msk.msra.mxu1 %vm2335_vm9, %v14334_v46 }
 0x3e4   :  { %8331 = vmatpush.msk.msra.mxu1 %vm2331_vm7, %v14334_v46  ;;  %v3863_v52 = vpop.f32.mrf.mxu2  ;;  %v3886_v39 = vpop.f32.mrf.mxu3 }
 0x3e5   :  { %8332 = vmatmul.msk.f32.vlgmr.msra.gmra.mxu1 %vm3448_vm1, %v11788_v61  ;;  %v3820_v36 = vpop.f32.mrf.mxu1  ;;  %v3843_v45 = vpop.f32.mrf.mxu0  ;;  %v3726_v61 = vadd.f32 %v3725_v38, %v3703_v24  ;;  %v3496_v38 = vadd.f32 %v12635_v1, %v12621_v31 }
 0x3e7   :  { %v3749_v19 = vadd.f32 %v3748_v11, %v3726_v61  ;;  %v3499_v11 = vadd.f32 %v12685_v33, %v12683_v6 }
 0x3e9   :  { %v3772_v35 = vadd.f32 %v3771_v15, %v3749_v19  ;;  %v3775_v15 = vadd.f32 %v3774_v3, %v3752_v0 }
 0x3eb   :  { %v3795_v26 = vadd.f32 %v3794_v50, %v3772_v35  ;;  %v3798_v29 = vadd.f32 %v3797_v28, %v3775_v15 }
 0x3ec   :  { %v12975_v41 = vpop.f32.mrf.mxu2  ;;  %v3889_v34 = vpop.f32.mrf.mxu3 }
 0x3ed   :  { %8333 = vmatmul.msk.f32.gmra.mxu1 %vm3448_vm1, %v11854_v32  ;;  %v3909_v17 = vpop.f32.mrf.mxu1  ;;  %v3932_v49 = vpop.f32.mrf.mxu0  ;;  %v3818_v54 = vadd.f32 %v3817_v4, %v3795_v26  ;;  %v3519_v26 = vadd.f32 %v12649_v2, %v3496_v38  ;;  %v3821_v6 = vadd.f32 %v3820_v36, %v3798_v29  ;;  %vm4470_vm1 = vcmask 121856  }
 0x3ee   :  { %v3910_v60 = vadd.f32 %v3909_v17, %v3886_v39 }
 0x3ef   :  { %v3841_v47 = vadd.f32 %v3840_v56, %v3818_v54  ;;  %v3542_v33 = vadd.f32 %v12725_v37, %v3519_v26 }
 0x3f0   :  { %v3933_v22 = vadd.f32 %v3932_v49, %v3910_v60 }
 0x3f1   :  { %v3565_v3 = vadd.f32 %v12735_v9, %v3542_v33 }
 0x3f3   :  { %v3588_v56 = vadd.f32 %v12745_v10, %v3565_v3 }
 0x3f4   :  { %v3955_v16 = vpop.f32.mrf.mxu2 }
 0x3f5   :  { %v3978_v30 = vpop.f32.mrf.mxu3  ;;  %v3912_v48 = vpop.f32.mrf.mxu1  ;;  %v3956_v5 = vadd.f32 %v3955_v16, %v3933_v22 }
 0x3f6   :  { %v3935_v32 = vpop.f32.mrf.mxu0  ;;  %v3913_v59 = vadd.f32 %v3912_v48, %v3889_v34 }
 0x3f7   :  { %v3979_v51 = vadd.f32 %v3978_v30, %v3956_v5  ;;  %v3522_v5 = vadd.f32 %v12699_v63, %v3499_v11  ;;  %v3611_v30 = vadd.f32 %v12759_v20, %v3588_v56 }
 0x3f8   :  { %v3936_v21 = vadd.f32 %v3935_v32, %v3913_v59 }
 0x3f9   :  { %v3545_v0 = vadd.f32 %v12785_v7, %v3522_v5  ;;  %v3844_v7 = vadd.f32 %v3843_v45, %v3821_v6  ;;  %v3634_v10 = vadd.f32 %v12849_v42, %v3611_v30 }
 0x3fb   :  { %v3568_v37 = vadd.f32 %v12799_v58, %v3545_v0  ;;  %v12999_v24 = vadd.f32 %v12975_v41, %v3844_v7  ;;  %v13010_v45 = vadd.f32 %v12863_v57, %v3634_v10  ;;  %v4292_v57 = vld [vmem:[%s9611_s8] sm:$0x3]  ;;  %s9546_s8 = smov 108  }
 0x3fc   :  { %v3958_v27 = vpop.f32.mrf.mxu2 }
 0x3fd   :  { %v3959_v34 = vadd.f32 %v3958_v27, %v3936_v21 }
 0x3fe   :  { %v3981_v23 = vpop.f32.mrf.mxu3 }
 0x3ff   :  { %v3982_v54 = vadd.f32 %v3981_v23, %v3959_v34 }
 0x407   :  { %v4047_v17 = vpop.f32.mrf.mxu2 }
 0x408   :  { %v4070_v4 = vpop.f32.mrf.mxu3 }
 0x40b   :  { %v4001_v12 = vpop.f32.mrf.mxu1 }
 0x40c   :  { %v4002_v55 = vadd.f32 %v4001_v12, %v3979_v51  ;;  %v4024_v18 = vpop.f32.mrf.mxu0  ;;  %v12985_v51 = vadd.f32 %v3863_v52, %v3841_v47  ;;  %v3591_v52 = vadd.f32 %v12809_v53, %v3568_v37 }
 0x40e   :  { %v4025_v39 = vadd.f32 %v4024_v18, %v4002_v55  ;;  %v3614_v9 = vadd.f32 %v12823_v13, %v3591_v52  ;;  %v13017_v20 = vpack.i.bf16 %v12985_v51, %v13010_v45 }
 0x410   :  { %v4048_v50 = vadd.f32 %v4047_v17, %v4025_v39  ;;  %v4050_v23 = vpop.f32.mrf.mxu2  ;;  %v3637_v53 = vadd.f32 %v12913_v43, %v3614_v9 }
 0x412   :  { %v12987_v1 = vadd.f32 %v4070_v4, %v4048_v50  ;;  %v4073_v49 = vpop.f32.mrf.mxu3  ;;  %v13013_v41 = vadd.f32 %v12923_v8, %v3637_v53 }
 0x414   :  { %v8931_v31 = vpack.i.bf16 %v12987_v1, %v12985_v51  ;;  %v13021_v13 = vpack.i.bf16 %v12999_v24, %v13013_v41 }
 0x415   :  { %v4004_v59 = vpop.f32.mrf.mxu1  ;;  %v4027_v63 = vpop.f32.mrf.mxu0 }
 0x416   :  { %v4005_v2 = vadd.f32 %v4004_v59, %v3982_v54  ;;  %8932 = vrot.lane.b32.xlu2 %v8931_v31, %s9538_s5  ;;  %8927 = vrot.lane.b32.xlu0 %v8931_v31, %s9539_s9 }
 0x417   :  { %8922 = vrot.lane.b32.xlu1 %v8931_v31, %s9540_s17 }
 0x418   :  { %v4028_v28 = vadd.f32 %v4027_v63, %v4005_v2 }
 0x41a   :  { %v4051_v36 = vadd.f32 %v4050_v23, %v4028_v28 }
 0x41c   :  { %v13001_v16 = vadd.f32 %v4073_v49, %v4051_v36 }
 0x41e   :  { %v8946_v58 = vpack.i.bf16 %v13001_v16, %v12999_v24  ;;  %v9071_v27 = vpack.i.bf16 %v12987_v1, %v13001_v16 }
 0x41f   :  { %8937 = vrot.lane.b32.xlu1 %v8931_v31, %s9541_s21 }
 0x420   :  { %8947 = vrot.lane.b32.xlu2 %v8946_v58, %s9539_s9  ;;  %8942 = vrot.lane.b32.xlu0 %v8946_v58, %s9540_s17  ;;  %s14797_s9 = sld [smem:[#allocation14_spill]] }
 0x421   :  { %s14798_s17 = sld [smem:[#allocation16_spill]] }
 0x427   :  { %8962 = vrot.lane.b32.xlu1 %v8946_v58, %s9538_s5 }
 0x428   :  { %8957 = vrot.lane.b32.xlu0 %v13017_v20, %s9525_s16  ;;  %8952 = vrot.lane.b32.xlu2 %v13021_v13, %s9525_s16  ;;  %s9548_s16 = smov 110  }
 0x42b   :  { %v4139_v8 = vpop.f32.mrf.mxu2  ;;  %v4162_v19 = vpop.f32.mrf.mxu3 }
 0x42f   :  { %8967 = vrot.lane.b32.xlu1 %v13021_v13, %s9542_s25 }
 0x430   :  { %8987 = vrot.lane.b32.xlu0 %v8946_v58, %s9541_s21  ;;  %8972 = vrot.lane.b32.xlu2 %v13017_v20, %s9542_s25  ;;  %v4093_v42 = vpop.f32.mrf.mxu1  ;;  %v4116_v43 = vpop.f32.mrf.mxu0  ;;  %s9558_s21 = smov 120  }
 0x431   :  { %v4117_v60 = vadd.f32 %v4116_v43, %v4093_v42 }
 0x433   :  { %v4140_v48 = vadd.f32 %v4139_v8, %v4117_v60 }
 0x434   :  { %v4142_v32 = vpop.f32.mrf.mxu2  ;;  %v4165_v12 = vpop.f32.mrf.mxu3 }
 0x435   :  { %v4163_v44 = vadd.f32 %v4162_v19, %v4140_v48 }
 0x437   :  { %8977 = vrot.lane.b32.xlu1 %v13021_v13, %s9543_s29 }
 0x438   :  { %8992 = vrot.lane.b32.xlu0 %v8946_v58, %s9520_s0  ;;  %8982 = vrot.lane.b32.xlu2 %v8931_v31, %s9520_s0  ;;  %s9547_s0 = smov 90  }
 0x439   :  { %v4096_v61 = vpop.f32.mrf.mxu1  ;;  %v4119_v35 = vpop.f32.mrf.mxu0 }
 0x43a   :  { %v4120_v38 = vadd.f32 %v4119_v35, %v4096_v61 }
 0x43c   :  { %v4143_v47 = vadd.f32 %v4142_v32, %v4120_v38  ;;  %v4293_v38 = vld [vmem:[%s9616_s14] sm:$0x3]  ;;  %s9549_s14 = smov 77  }
 0x43e   :  { %v4166_v17 = vadd.f32 %v4165_v12, %v4143_v47 }
 0x43f   :  { %9002 = vrot.lane.b32.xlu1 %v13021_v13, %s9544_s3 }
 0x440   :  { %8997 = vrot.lane.b32.xlu0 %v13017_v20, %s9543_s29  ;;  %9007 = vrot.lane.b32.xlu2 %v13017_v20, %s9544_s3  ;;  %s9560_s29 = smov 122  }
 0x447   :  { %9012 = vrot.lane.b32.xlu1 %v13021_v13, %s9545_s15 }
 0x448   :  { %4567 = vperm.xlu0 %8920, %v4292_v57   ;;  %9022 = vrot.lane.b32.xlu2 %v13021_v13, %s9533_s2 }
 0x44f   :  { %9027 = vrot.lane.b32.xlu1 %v13017_v20, %s9533_s2  ;;  %v4231_v18 = vpop.f32.mrf.mxu2  ;;  %v4254_v39 = vpop.f32.mrf.mxu3 }
 0x450   :  { %9017 = vrot.lane.b32.xlu0 %v13017_v20, %s9545_s15  ;;  %9037 = vrot.lane.b32.xlu2 %v13017_v20, %s9546_s8 }
 0x452   :  { %v4185_v22 = vpop.f32.mrf.mxu1  ;;  %v4208_v55 = vpop.f32.mrf.mxu0 }
 0x453   :  { %v4186_v25 = vadd.f32 %v4185_v22, %v4163_v44 }
 0x455   :  { %v4209_v11 = vadd.f32 %v4208_v55, %v4186_v25 }
 0x457   :  { %9042 = vrot.lane.b32.xlu1 %v13021_v13, %s9544_s3  ;;  %v4232_v21 = vadd.f32 %v4231_v18, %v4209_v11  ;;  %v4234_v0 = vpop.f32.mrf.mxu2  ;;  %v4257_v54 = vpop.f32.mrf.mxu3 }
 0x458   :  { %9032 = vrot.lane.b32.xlu0 %v13021_v13, %s9546_s8  ;;  %9072 = vrot.lane.b32.xlu2 %v9071_v27, %s9547_s0 }
 0x459   :  { %v4255_v50 = vadd.f32 %v4254_v39, %v4232_v21 }
 0x45a   :  { %v4188_v15 = vpop.f32.mrf.mxu1  ;;  %v4211_v34 = vpop.f32.mrf.mxu0 }
 0x45b   :  { %v4189_v5 = vadd.f32 %v4188_v15, %v4166_v17  ;;  %v13110_v15 = vperm.slane %v4293_v38, 1 }
 0x45d   :  { %v4212_v33 = vadd.f32 %v4211_v34, %v4189_v5  ;;  %vm4590_vm13 = vcmp.eq.s32.totalorder %v14668_v14, %v13110_v15  ;;  %vm4588_vm4 = vcmp.eq.s32.totalorder %v14672_v62, %v13110_v15  ;;  %vm4586_vm10 = vcmp.eq.s32.totalorder %v14675_v40, %v13110_v15 }
 0x45e   :  { %8363 = vmatpush.msk.msrb.mxu1 %vm4590_vm13, %v14334_v46 }
 0x45f   :  { %9052 = vrot.lane.b32.xlu1 %v13017_v20, %s9544_s3  ;;  %v4235_v6 = vadd.f32 %v4234_v0, %v4212_v33 }
 0x460   :  { %9047 = vrot.lane.b32.xlu0 %v13021_v13, %s9547_s0  ;;  %8364 = vmatpush.msk.msrb.mxu1 %vm4588_vm4, %v14334_v46 }
 0x461   :  { %v4258_v59 = vadd.f32 %v4257_v54, %v4235_v6 }
 0x462   :  { %v4277_v26 = vpop.f32.mrf.mxu1  ;;  %8365 = vmatpush.msk.msrb.mxu1 %vm4586_vm10, %v14334_v46 }
 0x463   :  { %v13062_v29 = vadd.f32 %v4277_v26, %v4255_v50 }
 0x465   :  { %v9081_v4 = vpack.i.bf16 %v13062_v29, %v12987_v1 }
 0x467   :  { %9082 = vrot.lane.b32.xlu2 %v9081_v4, %s9533_s2  ;;  %9062 = vrot.lane.b32.xlu1 %v13021_v13, %s9548_s16 }
 0x468   :  { %9057 = vrot.lane.b32.xlu0 %v13017_v20, %s9547_s0 }
 0x46a   :  { %v4280_v31 = vpop.f32.mrf.mxu1 }
 0x46b   :  { %v4281_v63 = vadd.f32 %v4280_v31, %v4258_v59 }
 0x46d   :  { %v9101_v3 = vpack.i.bf16 %v4281_v63, %v13001_v16 }
 0x46f   :  { %9092 = vrot.lane.b32.xlu2 %v9081_v4, %s9544_s3  ;;  %9077 = vrot.lane.b32.xlu1 %v9081_v4, %s9545_s15 }
 0x470   :  { %9067 = vrot.lane.b32.xlu0 %v13017_v20, %s9548_s16  ;;  %v8933_v2 = vpop.permute.xlu2 %8932 }
 0x471   :  { %v8935_v44 = vunpack.i.h.bf16 %v8933_v2  ;;  %v8934_v32 = vunpack.i.l.bf16 %v8933_v2 }
 0x473   :  { %v4425_v12 = vsel %vm4424_vm11, %v8934_v32, %v8935_v44  ;;  %v14741_v32 = vld [vmem:[#allocation22_spill] sm:$0xff] }
 0x477   :  { %9102 = vrot.lane.b32.xlu2 %v9101_v3, %s9545_s15  ;;  %9097 = vrot.lane.b32.xlu1 %v9081_v4, %s9548_s16  ;;  %s14805_s15 = sld [smem:[#allocation17_spill]] }
 0x478   :  { %9087 = vrot.lane.b32.xlu0 %v9081_v4, %s9546_s8 }
 0x47a   :  { %v8948_v37 = vpop.permute.xlu2 %8947 }
 0x47b   :  { %v8950_v53 = vunpack.i.h.bf16 %v8948_v37 }
 0x47f   :  { %9117 = vrot.lane.b32.xlu2 %v13017_v20, %s9535_s11  ;;  %9127 = vrot.lane.b32.xlu1 %v9101_v3, %s9546_s8 }
 0x480   :  { %9107 = vrot.lane.b32.xlu0 %v9101_v3, %s9533_s2  ;;  %s14793_s2 = sld [smem:[#allocation12_spill]] }
 0x482   :  { %v13083_v7 = vpop.permute.xlu2 %8952 }
 0x483   :  { %v8955_v50 = vunpack.i.h.bf16 %v13083_v7  ;;  %v8954_v26 = vunpack.i.l.bf16 %v13083_v7 }
 0x485   :  { %v4380_v31 = vsel %vm195_vm5, %v8954_v26, %v8955_v50 }
 0x487   :  { %9137 = vrot.lane.b32.xlu2 %v9101_v3, %s9544_s3  ;;  %9132 = vrot.lane.b32.xlu1 %v13021_v13, %s9536_s13  ;;  %s9561_s3 = smov 114  }
 0x488   :  { %9112 = vrot.lane.b32.xlu0 %v13021_v13, %s9535_s11  ;;  %v8928_v28 = vpop.permute.xlu0 %8927  ;;  %v8949_v13 = vunpack.i.l.bf16 %v8948_v37  ;;  %v13131_v37 = vperm.slane %v4293_v38, 0 }
 0x489   :  { %v8923_v23 = vpop.permute.xlu1 %8922  ;;  %v8930_v57 = vunpack.i.h.bf16 %v8928_v28  ;;  %v8929_v43 = vunpack.i.l.bf16 %v8928_v28 }
 0x48a   :  { %v13090_v56 = vpop.permute.xlu2 %8972  ;;  %v8925_v30 = vunpack.i.h.bf16 %v8923_v23  ;;  %v8924_v9 = vunpack.i.l.bf16 %v8923_v23  ;;  %v4449_v60 = vsel %vm4447_vm2, %v8949_v13, %v8950_v53  ;;  %vm4589_vm9 = vcmp.eq.s32.totalorder %v14668_v14, %v13131_v37 }
 0x48b   :  { %v4448_v25 = vsel %vm4447_vm2, %v8929_v43, %v8930_v57  ;;  %v8975_v6 = vunpack.i.h.bf16 %v13090_v56  ;;  %v8974_v59 = vunpack.i.l.bf16 %v13090_v56  ;;  %8353 = vmatpush.msk.msrb.mxu3 %vm4589_vm9, %v14334_v46  ;;  %vm4522_vm2 = vcmask 130048   ;;  %v4520_v57 = vld.sshfl [vmem:[#allocation1 + $0x8] sm:$0xff pattern:$0x73625140] }
 0x48c   :  { %v4471_v8 = vsel %vm4470_vm1, %v8924_v9, %v8925_v30  ;;  %vm4585_vm13 = vcmp.eq.s32.totalorder %v14675_v40, %v13131_v37  ;;  %vm4574_vm9 = vcmp.eq.s32.totalorder %v14741_v32, %v13110_v15 }
 0x48d   :  { %v4357_v53 = vsel %vm4356_vm8, %v8974_v59, %v8975_v6 }
 0x48f   :  { %9142 = vrot.lane.b32.xlu2 %v9101_v3, %s9548_s16  ;;  %9147 = vrot.lane.b32.xlu1 %v9101_v3, %s9535_s11 }
 0x490   :  { %9122 = vrot.lane.b32.xlu0 %v9081_v4, %s9535_s11 }
 0x491   :  { %v8938_v52 = vpop.permute.xlu1 %8937 }
 0x492   :  { %v8943_v36 = vpop.permute.xlu0 %8942  ;;  %v13095_v49 = vpop.permute.xlu2 %8982  ;;  %v8940_v18 = vunpack.i.h.bf16 %v8938_v52  ;;  %v8939_v47 = vunpack.i.l.bf16 %v8938_v52 }
 0x493   :  { %v8945_v58 = vunpack.i.h.bf16 %v8943_v36  ;;  %v8944_v10 = vunpack.i.l.bf16 %v8943_v36  ;;  %v8985_v2 = vunpack.i.h.bf16 %v13095_v49  ;;  %v8984_v7 = vunpack.i.l.bf16 %v13095_v49  ;;  %v14737_v36 = vld [vmem:[#allocation34_spill] sm:$0xff] }
 0x494   :  { %v4402_v34 = vsel %vm4401_vm3, %v8939_v47, %v8940_v18  ;;  %vm4582_vm7 = vcmp.eq.s32.totalorder %v14737_v36, %v13110_v15  ;;  %v4519_v47 = vld.sshfl [vmem:[#allocation1] sm:$0xff pattern:$0x73625140] }
 0x495   :  { %v4472_v42 = vsel %vm4470_vm1, %v8944_v10, %v8945_v58  ;;  %vm4587_vm1 = vcmp.eq.s32.totalorder %v14672_v62, %v13131_v37  ;;  %v14738_v10 = vld [vmem:[#allocation35_spill] sm:$0xff]  ;;  %v4493_v13 = vsel %vm290_vm0, %v8984_v7, %v8985_v2 }
 0x496   :  { %4525 = vmatpush.msrb.mxu0 %v4472_v42  ;;  %8354 = vmatpush.msk.msrb.mxu3 %vm4587_vm1, %v14334_v46  ;;  %v14739_v42 = vld [vmem:[#allocation36_spill] sm:$0xff]  ;;  %vm4310_vm1 = vcmask 891904  }
 0x497   :  { %9152 = vrot.lane.b32.xlu2 %v9101_v3, %s9536_s13  ;;  %9162 = vrot.lane.b32.xlu1 %v9081_v4, %s9536_s13  ;;  %v14736_v3 = vld [vmem:[#allocation33_spill] sm:$0xff]  ;;  %vm4578_vm4 = vcmp.eq.s32.totalorder %v14739_v42, %v13110_v15 }
 0x498   :  { %4526 = vmatpush.msrb.mxu0 %v4471_v8  ;;  %9157 = vrot.lane.b32.xlu0 %v13017_v20, %s9536_s13  ;;  %v9166_v20 = vpack.i.bf16 %v13062_v29, %v4281_v63  ;;  %vm4584_vm12 = vcmp.eq.s32.totalorder %v14736_v3, %v13110_v15 }
 0x499   :  { %v8963_v61 = vpop.permute.xlu1 %8962  ;;  %8366 = vmatpush.msk.msrb.mxu1 %vm4584_vm12, %v14334_v46  ;;  %8355 = vmatpush.msk.msrb.mxu3 %vm4585_vm13, %v14334_v46  ;;  %vm4581_vm12 = vcmp.eq.s32.totalorder %v14737_v36, %v13131_v37 }
 0x49a   :  { %v8958_v19 = vpop.permute.xlu0 %8957  ;;  %v8965_v48 = vunpack.i.h.bf16 %v8963_v61  ;;  %v8964_v35 = vunpack.i.l.bf16 %v8963_v61  ;;  %4527 = vmatpush.msrb.mxu0 %v4449_v60  ;;  %v13102_v22 = vpop.permute.xlu2 %9007  ;;  %v14740_v60 = vld [vmem:[#allocation38_spill] sm:$0xff] }
 0x49b   :  { %v8960_v29 = vunpack.i.h.bf16 %v8958_v19  ;;  %v8959_v4 = vunpack.i.l.bf16 %v8958_v19  ;;  %8367 = vmatpush.msk.msrb.mxu1 %vm4582_vm7, %v14334_v46  ;;  %vm4576_vm10 = vcmp.eq.s32.totalorder %v14740_v60, %v13110_v15  ;;  %vm4579_vm7 = vcmp.eq.s32.totalorder %v14738_v10, %v13131_v37 }
 0x49c   :  { %4528 = vmatpush.msrb.mxu0 %v4448_v25  ;;  %v4426_v27 = vsel %vm4424_vm11, %v8964_v35, %v8965_v48  ;;  %v9010_v25 = vunpack.i.h.bf16 %v13102_v22  ;;  %vm4575_vm13 = vcmp.eq.s32.totalorder %v14740_v60, %v13131_v37 }
 0x49d   :  { %v4379_v52 = vsel %vm195_vm5, %v8959_v4, %v8960_v29  ;;  %vm4580_vm5 = vcmp.eq.s32.totalorder %v14738_v10, %v13110_v15 }
 0x49e   :  { %4529 = vmatpush.msrb.mxu0 %v4426_v27  ;;  %8368 = vmatpush.msk.msrb.mxu1 %vm4580_vm5, %v14334_v46  ;;  %v9009_v27 = vunpack.i.l.bf16 %v13102_v22  ;;  %vm4577_vm5 = vcmp.eq.s32.totalorder %v14739_v42, %v13131_v37 }
 0x49f   :  { %9167 = vrot.lane.b32.xlu2 %v9166_v20, %s9547_s0  ;;  %s14808_s0 = sld [smem:[#allocation20_spill]] }
 0x4a0   :  { %4530 = vmatpush.msrb.mxu0 %v4425_v12  ;;  %8369 = vmatpush.msk.msrb.mxu1 %vm4578_vm4, %v14334_v46  ;;  %v4311_v38 = vsel %vm4310_vm1, %v9009_v27, %v9010_v25  ;;  %vm4573_vm4 = vcmp.eq.s32.totalorder %v14741_v32, %v13131_v37 }
 0x4a1   :  { %v8968_v55 = vpop.permute.xlu1 %8967 }
 0x4a2   :  { %v8988_v11 = vpop.permute.xlu0 %8987  ;;  %v13112_v17 = vpop.permute.xlu2 %9022  ;;  %v8970_v33 = vunpack.i.h.bf16 %v8968_v55  ;;  %v8969_v0 = vunpack.i.l.bf16 %v8968_v55  ;;  %8370 = vmatpush.msk.msrb.mxu1 %vm4576_vm10, %v14334_v46  ;;  %vm5090_vm10 = vcmask 736256  }
 0x4a3   :  { %v8990_v21 = vunpack.i.h.bf16 %v8988_v11  ;;  %v8989_v39 = vunpack.i.l.bf16 %v8988_v11  ;;  %v9025_v4 = vunpack.i.h.bf16 %v13112_v17 }
 0x4a4   :  { %v4358_v56 = vsel %vm4356_vm8, %v8969_v0, %v8970_v33  ;;  %8371 = vmatpush.msk.msrb.mxu1 %vm4574_vm9, %v14334_v46 }
 0x4a5   :  { %v4403_v5 = vsel %vm4401_vm3, %v8989_v39, %v8990_v21  ;;  %vm4333_vm3 = vcmask 842752  }
 0x4a6   :  { %4531 = vmatpush.msrb.mxu0 %v4403_v5 }
 0x4a8   :  { %4532 = vmatpush.msrb.mxu0 %v4402_v34  ;;  %v9024_v34 = vunpack.i.l.bf16 %v13112_v17 }
 0x4a9   :  { %v8978_v54 = vpop.permute.xlu1 %8977 }
 0x4aa   :  { %v8993_v63 = vpop.permute.xlu0 %8992  ;;  %4533 = vmatpush.msrb.mxu0 %v4380_v31  ;;  %v8980_v30 = vunpack.i.h.bf16 %v8978_v54  ;;  %v8979_v49 = vunpack.i.l.bf16 %v8978_v54  ;;  %v13143_v9 = vpop.permute.xlu2 %9037  ;;  %v4992_v2 = vsel %vm927_vm14, %v9024_v34, %v9025_v4 }
 0x4ab   :  { %v8995_v28 = vunpack.i.h.bf16 %v8993_v63  ;;  %v8994_v23 = vunpack.i.l.bf16 %v8993_v63 }
 0x4ac   :  { %4534 = vmatpush.msrb.mxu0 %v4379_v52  ;;  %v4335_v8 = vsel %vm4333_vm3, %v8979_v49, %v8980_v30  ;;  %v9039_v30 = vunpack.i.l.bf16 %v13143_v9 }
 0x4ad   :  { %v4494_v58 = vsel %vm290_vm0, %v8994_v23, %v8995_v28  ;;  %vm4583_vm0 = vcmp.eq.s32.totalorder %v14736_v3, %v13131_v37 }
 0x4ae   :  { %4535 = vmatpush.msrb.mxu0 %v4358_v56  ;;  %4559 = vmatpush.msra.mxu2 %v4494_v58  ;;  %v9040_v56 = vunpack.i.h.bf16 %v13143_v9 }
 0x4af   :  { %8356 = vmatpush.msk.msrb.mxu3 %vm4583_vm0, %v14334_v46  ;;  %vm14277_vm0 = vcmask 883712  }
 0x4b0   :  { %4536 = vmatpush.msrb.mxu0 %v4357_v53  ;;  %4560 = vmatpush.msra.mxu2 %v4493_v13 }
 0x4b1   :  { %8334 = vmatmul.msk.f32.vlgmr.msra.gmra.mxu2 %vm4522_vm2, %v4520_v57  ;;  %v9003_v43 = vpop.permute.xlu1 %9002  ;;  %8357 = vmatpush.msk.msrb.mxu3 %vm4581_vm12, %v14334_v46  ;;  %vm4837_vm12 = vcmask 900096  }
 0x4b2   :  { %v8998_v61 = vpop.permute.xlu0 %8997  ;;  %4537 = vmatpush.msrb.mxu0 %v4335_v8  ;;  %v9005_v35 = vunpack.i.h.bf16 %v9003_v43  ;;  %v9004_v44 = vunpack.i.l.bf16 %v9003_v43  ;;  %v13181_v12 = vpop.permute.xlu2 %9072  ;;  %v4939_v8 = vsel %vm14277_vm0, %v9039_v30, %v9040_v56 }
 0x4b3   :  { %v9000_v19 = vunpack.i.h.bf16 %v8998_v61  ;;  %v8999_v48 = vunpack.i.l.bf16 %v8998_v61  ;;  %8358 = vmatpush.msk.msrb.mxu3 %vm4579_vm7, %v14334_v46 }
 0x4b4   :  { %v4312_v55 = vsel %vm4310_vm1, %v9004_v44, %v9005_v35 }
 0x4b5   :  { %v4334_v20 = vsel %vm4333_vm3, %v8999_v48, %v9000_v19  ;;  %vm5039_vm3 = vcmask 744448   ;;  %8359 = vmatpush.msk.msrb.mxu3 %vm4577_vm5, %v14334_v46 }
 0x4b6   :  { %4538 = vmatpush.msrb.mxu0 %v4334_v20 }
 0x4b7   :  { %8360 = vmatpush.msk.msrb.mxu3 %vm4575_vm13, %v14334_v46  ;;  %vm14750_vm13 = vcmask 588800  }
 0x4b8   :  { %4539 = vmatpush.msrb.mxu0 %v4312_v55  ;;  %v9074_v55 = vunpack.i.l.bf16 %v13181_v12 }
 0x4b9   :  { %v13185_v22 = vpop.permute.xlu1 %9012  ;;  %8361 = vmatpush.msk.msrb.mxu3 %vm4573_vm4, %v14334_v46  ;;  %vm14751_vm4 = vmmov %vm14750_vm13 }
 0x4ba   :  { %v13189_v11 = vpop.permute.xlu0 %4567  ;;  %v9015_v15 = vunpack.i.h.bf16 %v13185_v22  ;;  %v9014_v18 = vunpack.i.l.bf16 %v13185_v22  ;;  %4540 = vmatpush.msrb.mxu0 %v4311_v38 }
 0x4bb   :  { %4541 = vmatmul.f32.vlgmr.msrb.gmra.mxu0 %v4519_v47 }
 0x4bc   :  { %v5043_v21 = vsel %vm5039_vm3, %v9014_v18, %v9015_v15 }
 0x4bd   :  { %5169 = vmatpush.msrb.mxu2 %v5043_v21 }
 0x4c1   :  { %v13200_v39 = vpop.permute.xlu2 %9082  ;;  %v13202_v50 = vpop.permute.xlu1 %9027 }
 0x4c2   :  { %v9085_v26 = vunpack.i.h.bf16 %v13200_v39  ;;  %v9084_v5 = vunpack.i.l.bf16 %v13200_v39  ;;  %v13206_v29 = vpop.permute.xlu0 %9017  ;;  %v9030_v54 = vunpack.i.h.bf16 %v13202_v50  ;;  %v9029_v31 = vunpack.i.l.bf16 %v13202_v50 }
 0x4c3   :  { %v9020_v33 = vunpack.i.h.bf16 %v13206_v29  ;;  %v9019_v0 = vunpack.i.l.bf16 %v13206_v29 }
 0x4c4   :  { %v13215_v6 = vsel %vm927_vm14, %v9084_v5, %v9085_v26  ;;  %v4989_v7 = vsel %vm927_vm14, %v9029_v31, %v9030_v54 }
 0x4c5   :  { %v5040_v59 = vsel %vm5039_vm3, %v9019_v0, %v9020_v33 }
 0x4c6   :  { %5170 = vmatpush.msrb.mxu2 %v5040_v59 }
 0x4c8   :  { %5171 = vmatpush.msrb.mxu2 %v4992_v2 }
 0x4c9   :  { %v13225_v63 = vpop.permute.xlu2 %9092  ;;  %v13227_v37 = vpop.permute.xlu1 %9042 }
 0x4ca   :  { %v9095_v28 = vunpack.i.h.bf16 %v13225_v63  ;;  %v9094_v23 = vunpack.i.l.bf16 %v13225_v63  ;;  %v13234_v52 = vpop.permute.xlu0 %9032  ;;  %5172 = vmatpush.msrb.mxu2 %v4989_v7  ;;  %v9045_v13 = vunpack.i.h.bf16 %v13227_v37  ;;  %v9044_v57 = vunpack.i.l.bf16 %v13227_v37 }
 0x4cb   :  { %v9035_v49 = vunpack.i.h.bf16 %v13234_v52  ;;  %v9034_v58 = vunpack.i.l.bf16 %v13234_v52  ;;  %v9075_v7 = vunpack.i.h.bf16 %v13181_v12 }
 0x4cc   :  { %v13243_v53 = vsel %vm4310_vm1, %v9094_v23, %v9095_v28  ;;  %v4891_v48 = vsel %vm4310_vm1, %v9044_v57, %v9045_v13 }
 0x4cd   :  { %v4942_v43 = vsel %vm14277_vm0, %v9034_v58, %v9035_v49 }
 0x4ce   :  { %5173 = vmatpush.msrb.mxu2 %v4942_v43 }
 0x4d0   :  { %5174 = vmatpush.msrb.mxu2 %v4939_v8 }
 0x4d1   :  { %v9103_v61 = vpop.permute.xlu2 %9102  ;;  %v13253_v19 = vpop.permute.xlu1 %9052 }
 0x4d2   :  { %v9105_v35 = vunpack.i.h.bf16 %v9103_v61  ;;  %v9104_v44 = vunpack.i.l.bf16 %v9103_v61  ;;  %v9048_v25 = vpop.permute.xlu0 %9047  ;;  %v9055_v27 = vunpack.i.h.bf16 %v13253_v19  ;;  %v9054_v20 = vunpack.i.l.bf16 %v13253_v19  ;;  %5175 = vmatpush.msrb.mxu2 %v4891_v48 }
 0x4d3   :  { %v9050_v22 = vunpack.i.h.bf16 %v9048_v25  ;;  %v9049_v38 = vunpack.i.l.bf16 %v9048_v25 }
 0x4d4   :  { %v5044_v18 = vsel %vm5039_vm3, %v9015_v15, %v9104_v44  ;;  %v4888_v47 = vsel %vm4310_vm1, %v9054_v20, %v9055_v27  ;;  %v13266_v21 = vsel %vm5039_vm3, %v9104_v44, %v9105_v35 }
 0x4d5   :  { %5215 = vmatpush.msra.mxu1 %v5044_v18  ;;  %5176 = vmatpush.msrb.mxu2 %v4888_v47  ;;  %v5094_v26 = vsel %vm5090_vm10, %v9049_v38, %v9050_v22  ;;  %v5095_v34 = vsel %vm5090_vm10, %v9050_v22, %v9074_v55 }
 0x4d6   :  { %5206 = vmatpush.msra.mxu3 %v5094_v26  ;;  %5252 = vmatpush.msra.mxu0 %v5095_v34 }
 0x4d9   :  { %v13272_v0 = vpop.permute.xlu2 %9117  ;;  %v13274_v15 = vpop.permute.xlu1 %9062 }
 0x4da   :  { %v9058_v31 = vpop.permute.xlu0 %9057  ;;  %v14275_v59 = vunpack.i.h.bf16 %v13274_v15  ;;  %v9064_v2 = vunpack.i.l.bf16 %v13274_v15  ;;  %v9120_v17 = vunpack.i.h.bf16 %v13272_v0  ;;  %v14744_v12 = vunpack.i.h.bf16 %v13274_v15 }
 0x4db   :  { %v9060_v28 = vunpack.i.h.bf16 %v9058_v31  ;;  %v9059_v30 = vunpack.i.l.bf16 %v9058_v31 }
 0x4dc   :  { %v4841_v58 = vsel %vm4837_vm12, %v9064_v2, %v14275_v59 }
 0x4dd   :  { %5177 = vmatpush.msrb.mxu2 %v4841_v58  ;;  %v5091_v57 = vsel %vm5090_vm10, %v9059_v30, %v9060_v28  ;;  %v5092_v43 = vsel %vm5090_vm10, %v9060_v28, %v9075_v7 }
 0x4de   :  { %5207 = vmatpush.msra.mxu3 %v5091_v57  ;;  %5253 = vmatpush.msra.mxu0 %v5092_v43 }
 0x4e1   :  { %v13286_v8 = vpop.permute.xlu2 %9137  ;;  %v9078_v61 = vpop.permute.xlu1 %9077 }
 0x4e2   :  { %v9140_v48 = vunpack.i.h.bf16 %v13286_v8  ;;  %v9139_v35 = vunpack.i.l.bf16 %v13286_v8  ;;  %v13290_v44 = vpop.permute.xlu0 %9067  ;;  %v9080_v25 = vunpack.i.h.bf16 %v9078_v61  ;;  %v9079_v20 = vunpack.i.l.bf16 %v9078_v61 }
 0x4e3   :  { %v14274_v22 = vunpack.i.h.bf16 %v13290_v44  ;;  %v9069_v38 = vunpack.i.l.bf16 %v13290_v44  ;;  %v14745_v19 = vunpack.i.h.bf16 %v13290_v44 }
 0x4e4   :  { %v5041_v18 = vsel %vm5039_vm3, %v9020_v33, %v9079_v20  ;;  %v13298_v47 = vsel %vm5039_vm3, %v9079_v20, %v9080_v25  ;;  %v13301_v26 = vsel %vm4310_vm1, %v9139_v35, %v9140_v48 }
 0x4e5   :  { %v4838_v34 = vsel %vm4837_vm12, %v9069_v38, %v14274_v22  ;;  %5216 = vmatpush.msra.mxu1 %v5041_v18 }
 0x4e6   :  { %5178 = vmatpush.msrb.mxu2 %v4838_v34 }
 0x4e9   :  { %v9143_v31 = vpop.permute.xlu2 %9142  ;;  %v13306_v2 = vpop.permute.xlu1 %9097 }
 0x4ea   :  { %v9145_v28 = vunpack.i.h.bf16 %v9143_v31  ;;  %v9144_v30 = vunpack.i.l.bf16 %v9143_v31  ;;  %v9088_v29 = vpop.permute.xlu0 %9087  ;;  %v9100_v33 = vunpack.i.h.bf16 %v13306_v2  ;;  %v9099_v58 = vunpack.i.l.bf16 %v13306_v2 }
 0x4eb   :  { %v9090_v57 = vunpack.i.h.bf16 %v9088_v29  ;;  %v9089_v43 = vunpack.i.l.bf16 %v9088_v29 }
 0x4ec   :  { %v13311_v8 = vsel %vm4837_vm12, %v9144_v30, %v9145_v28  ;;  %v13314_v61 = vsel %vm4837_vm12, %v9099_v58, %v9100_v33 }
 0x4ed   :  { %v13317_v48 = vsel %vm14277_vm0, %v9089_v43, %v9090_v57  ;;  %v4940_v50 = vsel %vm14277_vm0, %v9040_v56, %v9089_v43 }
 0x4f1   :  { %v13319_v25 = vpop.permute.xlu2 %9152  ;;  %v9128_v20 = vpop.permute.xlu1 %9127 }
 0x4f2   :  { %v9155_v38 = vunpack.i.h.bf16 %v13319_v25  ;;  %v9154_v18 = vunpack.i.l.bf16 %v13319_v25  ;;  %v9108_v34 = vpop.permute.xlu0 %9107  ;;  %v9130_v31 = vunpack.i.h.bf16 %v9128_v20  ;;  %v9129_v2 = vunpack.i.l.bf16 %v9128_v20 }
 0x4f3   :  { %v9110_v29 = vunpack.i.h.bf16 %v9108_v34  ;;  %v9109_v22 = vunpack.i.l.bf16 %v9108_v34  ;;  %v4990_v25 = vsel %vm927_vm14, %v9030_v54, %v9084_v5 }
 0x4f4   :  { %v13324_v28 = vsel %vm14277_vm0, %v9129_v2, %v9130_v31  ;;  %v13327_v33 = vsel %vm14276_vm15, %v9154_v18, %v9155_v38  ;;  %v4943_v38 = vsel %vm14277_vm0, %v9035_v49, %v9129_v2 }
 0x4f5   :  { %v4993_v57 = vsel %vm927_vm14, %v9025_v4, %v9109_v22  ;;  %v13333_v59 = vsel %vm927_vm14, %v9109_v22, %v9110_v29  ;;  %v9119_v29 = vunpack.i.l.bf16 %v13272_v0  ;;  %vm14742_vm14 = vcmask 1031168  }
 0x4f6   :  { %5217 = vmatpush.msra.mxu1 %v4993_v57  ;;  %v4892_v0 = vsel %vm4310_vm1, %v9045_v13, %v9139_v35  ;;  %vm14743_vm9 = vmmov %vm14742_vm14 }
 0x4f7   :  { %v4787_v56 = vsel %vm14743_vm9, %v9119_v29, %v9120_v17  ;;  %vm14746_vm7 = vmmov %vm14743_vm9 }
 0x4f8   :  { %5218 = vmatpush.msra.mxu1 %v4990_v25 }
 0x4f9   :  { %v9168_v20 = vpop.permute.xlu2 %9167  ;;  %v9133_v34 = vpop.permute.xlu1 %9132 }
 0x4fa   :  { %v9170_v4 = vunpack.i.h.bf16 %v9168_v20  ;;  %v9169_v31 = vunpack.i.l.bf16 %v9168_v20  ;;  %v9113_v22 = vpop.permute.xlu0 %9112  ;;  %5219 = vmatpush.msra.mxu1 %v4943_v38  ;;  %v9135_v54 = vunpack.i.h.bf16 %v9133_v34  ;;  %v9134_v52 = vunpack.i.l.bf16 %v9133_v34 }
 0x4fb   :  { %v9115_v39 = vunpack.i.h.bf16 %v9113_v22  ;;  %v9114_v57 = vunpack.i.l.bf16 %v9113_v22 }
 0x4fc   :  { %v5096_v5 = vsel %vm5090_vm10, %v9074_v55, %v9169_v31  ;;  %5220 = vmatpush.msra.mxu1 %v4940_v50  ;;  %v5093_v9 = vsel %vm5090_vm10, %v9075_v7, %v9170_v4  ;;  %v4889_v55 = vsel %vm4310_vm1, %v9055_v27, %v9094_v23  ;;  %v4740_v13 = vsel %vm14276_vm15, %v9134_v52, %v9135_v54  ;;  %vm14747_vm1 = vmmov %vm14746_vm7 }
 0x4fd   :  { %5298 = vmatpush.msrb.mxu0 %v5096_v5  ;;  %v4790_v49 = vsel %vm14742_vm14, %v9114_v57, %v9115_v39  ;;  %v4842_v7 = vsel %vm4837_vm12, %v14744_v12, %v9144_v30  ;;  %v4839_v23 = vsel %vm4837_vm12, %v14745_v19, %v9099_v58  ;;  %vm14748_vm5 = vmmov %vm14747_vm1  ;;  %v4741_v38 = vsel %vm14276_vm15, %v9135_v54, %v9154_v18  ;;  %v4686_v18 = vld [vmem:[%s9621_s19] sm:$0xff]  ;;  %v4689_v57 = vld [vmem:[%s9621_s19 + $0x18] sm:$0xff] }
 0x4fe   :  { %5179 = vmatpush.msrb.mxu2 %v4790_v49  ;;  %5221 = vmatpush.msra.mxu1 %v4892_v0  ;;  %vm14749_vm3 = vmmov %vm14747_vm1  ;;  %vm14752_vm10 = vcmask 1040384  }
 0x4ff   :  { %5299 = vmatpush.msrb.mxu0 %v5093_v9 }
 0x500   :  { %5180 = vmatpush.msrb.mxu2 %v4787_v56  ;;  %5222 = vmatpush.msra.mxu1 %v4889_v55 }
 0x501   :  { %v9148_v37 = vpop.permute.xlu1 %9147 }
 0x502   :  { %v9123_v35 = vpop.permute.xlu0 %9122  ;;  %v9150_v43 = vunpack.i.h.bf16 %v9148_v37  ;;  %v9149_v2 = vunpack.i.l.bf16 %v9148_v37  ;;  %5181 = vmatpush.msrb.mxu2 %v4740_v13  ;;  %5223 = vmatpush.msra.mxu1 %v4842_v7 }
 0x503   :  { %v9125_v25 = vunpack.i.h.bf16 %v9123_v35  ;;  %v9124_v63 = vunpack.i.l.bf16 %v9123_v35  ;;  %v4690_v35 = vld [vmem:[%s9626_s24] sm:$0xff] }
 0x504   :  { %5224 = vmatpush.msra.mxu1 %v4839_v23  ;;  %v4791_v27 = vsel %vm14746_vm7, %v9115_v39, %v9149_v2  ;;  %v4792_v20 = vsel %vm14747_vm1, %v9149_v2, %v9150_v43  ;;  %v4688_v39 = vld [vmem:[%s9621_s19 + $0x10] sm:$0xff]  ;;  %v4692_v43 = vld [vmem:[%s9631_s30] sm:$0x3]  ;;  %s9552_s30 = smov 113  }
 0x505   :  { %v4789_v15 = vsel %vm14748_vm5, %v9124_v63, %v9125_v25  ;;  %v4788_v30 = vsel %vm14749_vm3, %v9120_v17, %v9124_v63  ;;  %v4687_v17 = vld [vmem:[%s9621_s19 + $0x8] sm:$0xff]  ;;  %v13423_v2 = vperm.slane %v4692_v43, 0  ;;  %v13425_v25 = vperm.slane %v4692_v43, 1  ;;  %s9550_s19 = smov 75  }
 0x506   :  { %5225 = vmatpush.msra.mxu1 %v4791_v27  ;;  %8375 = vmatmul.msk.f32.vlgmr.msra.gmra.mxu0 %vm4522_vm2, %v4687_v17  ;;  %v14754_v63 = vld [vmem:[#allocation23_spill] sm:$0xff] }
 0x507   :  { %vm5423_vm14 = vcmp.eq.s32.totalorder %v14754_v63, %v13423_v2  ;;  %vm5424_vm9 = vcmp.eq.s32.totalorder %v14754_v63, %v13425_v25 }
 0x508   :  { %5226 = vmatpush.msra.mxu1 %v4788_v30 }
 0x509   :  { %v9163_v34 = vpop.permute.xlu1 %9162 }
 0x50a   :  { %v9158_v4 = vpop.permute.xlu0 %9157  ;;  %v9164_v44 = vunpack.i.l.bf16 %v9163_v34  ;;  %5227 = vmatpush.msra.mxu1 %v4741_v38 }
 0x50b   :  { %v9160_v58 = vunpack.i.h.bf16 %v9158_v4  ;;  %v9159_v31 = vunpack.i.l.bf16 %v9158_v4 }
 0x50d   :  { %v4737_v22 = vsel %vm14276_vm15, %v9159_v31, %v9160_v58  ;;  %v4738_v29 = vsel %vm14276_vm15, %v9160_v58, %v9164_v44 }
 0x50e   :  { %5182 = vmatpush.msrb.mxu2 %v4737_v22  ;;  %5228 = vmatpush.msra.mxu1 %v4738_v29 }
 0x50f   :  { %8376 = vmatmul.msk.f32.gmra.mxu0 %vm4522_vm2, %v4689_v57 }
 0x510   :  { %5183 = vmatpush.msrb.mxu2 %v13013_v41  ;;  %5229 = vmatpush.msra.mxu1 %v12999_v24 }
 0x512   :  { %5184 = vmatpush.msrb.mxu2 %v13010_v45  ;;  %5230 = vmatpush.msra.mxu1 %v12985_v51  ;;  %v9165_v51 = vunpack.i.h.bf16 %v9163_v34 }
 0x513   :  { %5185 = vmatmul.f32.vlgmr.msrb.gmra.mxu2 %v4686_v18 }
 0x514   :  { %v4739_v45 = vsel %vm14276_vm15, %v9164_v44, %v9165_v51  ;;  %8451 = vmatpush.msk.msra.mxu2 %vm5423_vm14, %v14334_v46  ;;  %v14760_v51 = vld [vmem:[#allocation28_spill] sm:$0xff] }
 0x517   :  { %8377 = vmatmul.msk.f32.vlgmr.msrb.gmra.mxu0 %vm4522_vm2, %v4687_v17 }
 0x51b   :  { %5188 = vmatmul.f32.gmra.mxu2 %v4688_v39 }
 0x51f   :  { %8378 = vmatmul.msk.f32.gmra.mxu0 %vm4522_vm2, %v4689_v57 }
 0x534   :  { %v4562_v50 = vpop.f32.mrf.mxu2 }
 0x538   :  { %v4542_v41 = vpop.f32.mrf.mxu0 }
 0x539   :  { %v4563_v5 = vadd.f32 %v4562_v50, %v4542_v41  ;;  %v14756_v50 = vld [vmem:[#allocation25_spill] sm:$0xff]  ;;  %v14757_v41 = vld [vmem:[#allocation26_spill] sm:$0xff] }
 0x53a   :  { %vm5419_vm5 = vcmp.eq.s32.totalorder %v14756_v50, %v13423_v2  ;;  %vm5420_vm3 = vcmp.eq.s32.totalorder %v14756_v50, %v13425_v25 }
 0x53b   :  { %v4570_v24 = vadd.f32 %v13189_v11, %v4563_v5  ;;  %v14758_v5 = vld [vmem:[#allocation41_spill] sm:$0xff] }
 0x53d   :  { %8362 = vmatmul.msk.f32.vlgmr.msrb.gmra.mxu3 %vm14750_vm13, %v4570_v24  ;;  %8372 = vmatmul.msk.f32.vlgmr.msrb.gmra.mxu1 %vm14751_vm4, %v4570_v24  ;;  %vm5417_vm13 = vcmp.eq.s32.totalorder %v14757_v41, %v13423_v2  ;;  %vm5418_vm4 = vcmp.eq.s32.totalorder %v14757_v41, %v13425_v25  ;;  %v14759_v24 = vld [vmem:[#allocation27_spill] sm:$0xff] }
 0x53e   :  { %5261 = vmatpush.msrb.mxu3 %v13266_v21  ;;  %vm5415_vm14 = vcmp.eq.s32.totalorder %v14759_v24, %v13423_v2 }
 0x540   :  { %5262 = vmatpush.msrb.mxu3 %v13298_v47  ;;  %v9462_v47 = vld [vmem:[%s14808_s0] ss:$0 sm:$0xff] }
 0x542   :  { %5263 = vmatpush.msrb.mxu3 %v13333_v59 }
 0x544   :  { %5264 = vmatpush.msrb.mxu3 %v13215_v6 }
 0x545   :  { %8373 = vmatmul.msk.f32.vlgmr.msra.gmra.mxu3 %vm4522_vm2, %v4687_v17  ;;  %5231 = vmatmul.f32.vlgmr.msra.gmra.mxu1 %v4686_v18  ;;  %v4691_v17 = vld [vmem:[%s9626_s24 + $0x8] sm:$0xff]  ;;  %s9551_s24 = smov 95  }
 0x546   :  { %5265 = vmatpush.msrb.mxu3 %v13324_v28 }
 0x548   :  { %5266 = vmatpush.msrb.mxu3 %v13317_v48 }
 0x54a   :  { %5267 = vmatpush.msrb.mxu3 %v13301_v26 }
 0x54c   :  { %5268 = vmatpush.msrb.mxu3 %v13243_v53 }
 0x54d   :  { %8374 = vmatmul.msk.f32.gmra.mxu3 %vm4522_vm2, %v4689_v57  ;;  %5234 = vmatmul.f32.gmra.mxu1 %v4688_v39  ;;  %v14755_v57 = vld [vmem:[#allocation24_spill] sm:$0xff] }
 0x54e   :  { %5269 = vmatpush.msrb.mxu3 %v13311_v8  ;;  %vm5421_vm7 = vcmp.eq.s32.totalorder %v14755_v57, %v13423_v2  ;;  %vm5422_vm1 = vcmp.eq.s32.totalorder %v14755_v57, %v13425_v25 }
 0x54f   :  { %8452 = vmatpush.msk.msra.mxu2 %vm5421_vm7, %v14334_v46  ;;  %vm5413_vm7 = vcmp.eq.s32.totalorder %v14760_v51, %v13423_v2 }
 0x550   :  { %5270 = vmatpush.msrb.mxu3 %v13314_v61 }
 0x551   :  { %8453 = vmatpush.msk.msra.mxu2 %vm5419_vm5, %v14334_v46  ;;  %vm5414_vm5 = vcmp.eq.s32.totalorder %v14760_v51, %v13425_v25 }
 0x552   :  { %5271 = vmatpush.msrb.mxu3 %v4792_v20 }
 0x553   :  { %8454 = vmatpush.msk.msra.mxu2 %vm5417_vm13, %v14334_v46 }
 0x554   :  { %5272 = vmatpush.msrb.mxu3 %v4789_v15 }
 0x555   :  { %8455 = vmatpush.msk.msra.mxu2 %vm5415_vm14, %v14334_v46 }
 0x556   :  { %5273 = vmatpush.msrb.mxu3 %v13327_v33 }
 0x557   :  { %8456 = vmatpush.msk.msra.mxu2 %vm5413_vm7, %v14334_v46 }
 0x558   :  { %5274 = vmatpush.msrb.mxu3 %v4739_v45  ;;  %v14761_v45 = vld [vmem:[#allocation42_spill] sm:$0xff] }
 0x55a   :  { %5275 = vmatpush.msrb.mxu3 %v13001_v16  ;;  %v5758_v16 = vld [vmem:[%s9636_s6] sm:$0xf]  ;;  %s9553_s6 = smov 73  }
 0x55c   :  { %5276 = vmatpush.msrb.mxu3 %v12987_v1 }
 0x55d   :  { %5277 = vmatmul.f32.vlgmr.msrb.gmra.mxu3 %v4686_v18 }
 0x55e   :  { %8489 = vmatpush.msk.msra.mxu3 %vm5424_vm9, %v14334_v46  ;;  %vm5416_vm9 = vcmp.eq.s32.totalorder %v14759_v24, %v13425_v25 }
 0x560   :  { %8490 = vmatpush.msk.msra.mxu3 %vm5422_vm1, %v14334_v46  ;;  %vm5453_vm1 = vcmp.eq.s32.totalorder %v14761_v45, %v13423_v2 }
 0x562   :  { %8491 = vmatpush.msk.msra.mxu3 %vm5420_vm3, %v14334_v46 }
 0x564   :  { %8492 = vmatpush.msk.msra.mxu3 %vm5418_vm4, %v14334_v46 }
 0x565   :  { %5280 = vmatmul.f32.gmra.mxu3 %v4688_v39 }
 0x566   :  { %8493 = vmatpush.msk.msra.mxu3 %vm5416_vm9, %v14334_v46  ;;  %vm5410_vm9 = vcmp.eq.s32.totalorder %v14668_v14, %v13425_v25 }
 0x568   :  { %8494 = vmatpush.msk.msra.mxu3 %vm5414_vm5, %v14334_v46 }
 0x583   :  { %v5255_v6 = vpop.f32.mrf.mxu0 }
 0x58c   :  { %v5258_v28 = vpop.f32.mrf.mxu0 }
 0x594   :  { %v5301_v56 = vpop.f32.mrf.mxu0 }
 0x596   :  { %v5186_v61 = vpop.f32.mrf.mxu2 }
 0x59c   :  { %v5304_v13 = vpop.f32.mrf.mxu0 }
 0x59e   :  { %v5189_v49 = vpop.f32.mrf.mxu2 }
 0x5ba   :  { %v4667_v11 = vpop.f32.mrf.mxu1 }
 0x5bb   :  { %4679 = vst [vmem:[#allocation1 + $0x9] sm:$0xff] %v4667_v11  ;;  %v4672_v53 = vrot.slane %v4667_v11, 7  ;;  %v14762_v11 = vld [vmem:[#allocation29_spill] sm:$0xff] }
 0x5bc   :  { %vm5411_vm3 = vcmp.eq.s32.totalorder %v14762_v11, %v13423_v2  ;;  %vm5412_vm4 = vcmp.eq.s32.totalorder %v14762_v11, %v13425_v25 }
 0x5bd   :  { %8457 = vmatpush.msk.msra.mxu2 %vm5411_vm3, %v14334_v46  ;;  %8495 = vmatpush.msk.msra.mxu3 %vm5412_vm4, %v14334_v46 }
 0x5bf   :  { %8496 = vmatpush.msk.msra.mxu3 %vm5410_vm9, %v14334_v46  ;;  %vm5403_vm9 = vcmp.eq.s32.totalorder %v14736_v3, %v13423_v2 }
 0x5c0   :  { %v4647_v21 = vpop.f32.mrf.mxu3 }
 0x5c1   :  { %v4673_v59 = vsel %vm14752_vm10, %v4647_v21, %v4672_v53  ;;  %4678 = vst [vmem:[#allocation1] sm:$0xff] %v4647_v21  ;;  %vm5455_vm10 = vcmp.eq.s32.totalorder %v14758_v5, %v13423_v2  ;;  %v14764_v53 = vld [vmem:[#allocation45_spill] sm:$0xff]  ;;  %v14765_v21 = vld [vmem:[#allocation72_spill] sm:$0xff] }
 0x5c2   :  { %4676 = vst.msk [vmem:[#allocation5 + $0x2] ss:$8 sm:$0x3] %vm10463_vm6, %v4673_v59  ;;  %v5232_v26 = vpop.f32.mrf.mxu1  ;;  %8467 = vmatpush.msk.msra.mxu0 %vm5455_vm10, %v14334_v46  ;;  %vm5409_vm10 = vcmp.eq.s32.totalorder %v14668_v14, %v13423_v2  ;;  %vm5449_vm14 = vcmp.eq.s32.totalorder %v14764_v53, %v13423_v2  ;;  %vm5463_vm7 = vcmp.eq.s32.totalorder %v14765_v21, %v13423_v2  ;;  %v14766_v59 = vld [vmem:[#allocation47_spill] sm:$0xff] }
 0x5c3   :  { %v5256_v8 = vadd.f32 %v5255_v6, %v5232_v26  ;;  %v14763_v6 = vld [vmem:[#allocation43_spill] sm:$0xff]  ;;  %vm5447_vm5 = vcmp.eq.s32.totalorder %v14766_v59, %v13423_v2  ;;  %8483 = vmatpush.msk.msrb.mxu1 %vm5463_vm7, %v14334_v46  ;;  %8458 = vmatpush.msk.msra.mxu2 %vm5409_vm10, %v14334_v46  ;;  %vm5406_vm10 = vcmp.eq.s32.totalorder %v14675_v40, %v13425_v25 }
 0x5c4   :  { %8468 = vmatpush.msk.msra.mxu0 %vm5453_vm1, %v14334_v46  ;;  %vm5451_vm13 = vcmp.eq.s32.totalorder %v14763_v6, %v13423_v2  ;;  %vm5407_vm1 = vcmp.eq.s32.totalorder %v14672_v62, %v13423_v2  ;;  %v14767_v26 = vld [vmem:[#allocation75_spill] sm:$0xff] }
 0x5c5   :  { %5315 = vrot.lane.b32.xlu1 %v5256_v8, %s9536_s13  ;;  %vm5461_vm3 = vcmp.eq.s32.totalorder %v14767_v26, %v13423_v2  ;;  %8459 = vmatpush.msk.msra.mxu2 %vm5407_vm1, %v14334_v46  ;;  %vm5404_vm1 = vcmp.eq.s32.totalorder %v14736_v3, %v13425_v25 }
 0x5c6   :  { %8469 = vmatpush.msk.msra.mxu0 %vm5451_vm13, %v14334_v46  ;;  %vm5408_vm13 = vcmp.eq.s32.totalorder %v14672_v62, %v13425_v25  ;;  %8484 = vmatpush.msk.msrb.mxu1 %vm5461_vm3, %v14334_v46  ;;  %vm5401_vm3 = vcmp.eq.s32.totalorder %v14737_v36, %v13423_v2 }
 0x5c7   :  { %8497 = vmatpush.msk.msra.mxu3 %vm5408_vm13, %v14334_v46 }
 0x5c8   :  { %v4681_v1 = vld [vmem:[#allocation1 + $0x1] ss:$9 sm:$0xff]  ;;  %v5209_v48 = vpop.f32.mrf.mxu3  ;;  %8470 = vmatpush.msk.msra.mxu0 %vm5449_vm14, %v14334_v46 }
 0x5c9   :  { %4684 = vst.msk [vmem:[#allocation5 + $0x6] ss:$8 sm:$0x3] %vm10463_vm6, %v4681_v1  ;;  %v5210_v33 = vadd.f32 %v5209_v48, %v5186_v61  ;;  %v14769_v61 = vld [vmem:[#allocation52_spill] sm:$0xff]  ;;  %v14771_v1 = vld [vmem:[#allocation54_spill] sm:$0xff]  ;;  %8498 = vmatpush.msk.msra.mxu3 %vm5406_vm10, %v14334_v46  ;;  %vm5454_vm10 = vcmp.eq.s32.totalorder %v14761_v45, %v13425_v25 }
 0x5ca   :  { %5983 = vst [vmem:[#allocation1] ss:$4 sm:$0xff] %v5758_v16  ;;  %v5235_v54 = vpop.f32.mrf.mxu1  ;;  %vm5445_vm7 = vcmp.eq.s32.totalorder %v14769_v61, %v13423_v2  ;;  %8471 = vmatpush.msk.msra.mxu0 %vm5447_vm5, %v14334_v46  ;;  %v14770_v16 = vld [vmem:[#allocation80_spill] sm:$0xff]  ;;  %vm5443_vm0 = vcmp.eq.s32.totalorder %v14771_v1, %v13423_v2  ;;  %vm5456_vm5 = vcmp.eq.s32.totalorder %v14758_v5, %v13425_v25 }
 0x5cb   :  { %5313 = vrot.lane.b32.xlu0 %v5210_v33, %s9536_s13  ;;  %v5259_v52 = vadd.f32 %v5258_v28, %v5235_v54  ;;  %vm5457_vm14 = vcmp.eq.s32.totalorder %v14770_v16, %v13423_v2  ;;  %v14772_v48 = vld [vmem:[#allocation56_spill] sm:$0xff]  ;;  %8499 = vmatpush.msk.msra.mxu3 %vm5404_vm1, %v14334_v46  ;;  %v14773_v28 = vld [vmem:[#allocation58_spill] sm:$0xff]  ;;  %vm5398_vm1 = vcmp.eq.s32.totalorder %v14739_v42, %v13425_v25 }
 0x5cc   :  { %8472 = vmatpush.msk.msra.mxu0 %vm5445_vm7, %v14334_v46  ;;  %vm5441_vm13 = vcmp.eq.s32.totalorder %v14772_v48, %v13423_v2  ;;  %vm5439_vm7 = vcmp.eq.s32.totalorder %v14773_v28, %v13423_v2  ;;  %v14775_v54 = vld [vmem:[#allocation64_spill] sm:$0xff] }
 0x5cd   :  { %5321 = vrot.lane.b32.xlu1 %v5259_v52, %s9536_s13 }
 0x5ce   :  { %8473 = vmatpush.msk.msra.mxu0 %vm5443_vm0, %v14334_v46  ;;  %vm5400_vm0 = vcmp.eq.s32.totalorder %v14738_v10, %v13425_v25 }
 0x5d0   :  { %v5212_v0 = vpop.f32.mrf.mxu3  ;;  %8474 = vmatpush.msk.msra.mxu0 %vm5441_vm13, %v14334_v46  ;;  %vm5435_vm13 = vcmp.eq.s32.totalorder %v14775_v54, %v13423_v2 }
 0x5d1   :  { %v5213_v9 = vadd.f32 %v5212_v0, %v5189_v49  ;;  %v14777_v49 = vld [vmem:[#allocation70_spill] sm:$0xff]  ;;  %v14778_v0 = vld [vmem:[#allocation73_spill] sm:$0xff] }
 0x5d2   :  { %8475 = vmatpush.msk.msra.mxu0 %vm5439_vm7, %v14334_v46  ;;  %vm5393_vm7 = vcmp.eq.s32.totalorder %v14741_v32, %v13423_v2 }
 0x5d3   :  { %5319 = vrot.lane.b32.xlu0 %v5213_v9, %s9536_s13 }
 0x5e0   :  { %v5278_v55 = vpop.f32.mrf.mxu3 }
 0x5e1   :  { %v5302_v37 = vadd.f32 %v5301_v56, %v5278_v55  ;;  %v14780_v56 = vld [vmem:[#allocation37_spill] sm:$0xff] }
 0x5e3   :  { %5317 = vrot.lane.b32.xlu2 %v5302_v37, %s9536_s13 }
 0x5e8   :  { %v5281_v12 = vpop.f32.mrf.mxu3 }
 0x5e9   :  { %v5305_v7 = vadd.f32 %v5304_v13, %v5281_v12 }
 0x5eb   :  { %5323 = vrot.lane.b32.xlu2 %v5305_v7, %s9536_s13 }
 0x5f3   :  { %5377 = vperm.xlu2 %9171, %v4690_v35  }
 0x637   :  { %v5316_v19 = vpop.permute.xlu1 %5315 }
 0x63d   :  { %v5318_v23 = vpop.permute.xlu2 %5317  ;;  %v5314_v27 = vpop.permute.xlu0 %5313 }
 0x63e   :  { %v5326_v20 = vsel %vm14276_vm15, %v5316_v19, %v5318_v23  ;;  %v5325_v15 = vsel %vm14276_vm15, %v5314_v27, %v5316_v19  ;;  %v13445_v22 = vmax.f32 %v5302_v37, %v5318_v23 }
 0x63f   :  { %v13435_v30 = vmax.f32 %v5256_v8, %v5326_v20  ;;  %v13437_v34 = vmax.f32 %v5210_v33, %v5325_v15  ;;  %v5322_v38 = vpop.permute.xlu1 %5321  ;;  %v14768_v8 = vld [vmem:[#allocation78_spill] sm:$0xff] }
 0x640   :  { %vm5459_vm4 = vcmp.eq.s32.totalorder %v14768_v8, %v13423_v2  ;;  %v14774_v33 = vld [vmem:[#allocation62_spill] sm:$0xff] }
 0x641   :  { %5349 = vrot.lane.b32.xlu1 %v13435_v30, %s9548_s16  ;;  %5347 = vrot.lane.b32.xlu0 %v13437_v34, %s9548_s16 }
 0x642   :  { %8485 = vmatpush.msk.msrb.mxu1 %vm5459_vm4, %v14334_v46  ;;  %vm5399_vm4 = vcmp.eq.s32.totalorder %v14738_v10, %v13423_v2 }
 0x644   :  { %8486 = vmatpush.msk.msrb.mxu1 %vm5457_vm14, %v14334_v46  ;;  %vm5397_vm14 = vcmp.eq.s32.totalorder %v14739_v42, %v13423_v2 }
 0x645   :  { %v5324_v4 = vpop.permute.xlu2 %5323  ;;  %v5320_v44 = vpop.permute.xlu0 %5319 }
 0x646   :  { %v5328_v58 = vsel %vm14276_vm15, %v5322_v38, %v5324_v4  ;;  %v5327_v31 = vsel %vm14276_vm15, %v5320_v44, %v5322_v38  ;;  %v13458_v39 = vmax.f32 %v5305_v7, %v5324_v4  ;;  %vm5405_vm15 = vcmp.eq.s32.totalorder %v14675_v40, %v13423_v2  ;;  %8505 = vmatpush.msk.msra.mxu1 %vm5456_vm5, %v14334_v46 }
 0x647   :  { %v13447_v29 = vmax.f32 %v5259_v52, %v5328_v58  ;;  %v13449_v18 = vmax.f32 %v5213_v9, %v5327_v31  ;;  %8460 = vmatpush.msk.msra.mxu2 %vm5405_vm15, %v14334_v46  ;;  %vm5402_vm15 = vcmp.eq.s32.totalorder %v14737_v36, %v13425_v25  ;;  %vm5452_vm5 = vcmp.eq.s32.totalorder %v14763_v6, %v13425_v25  ;;  %v14776_v52 = vld [vmem:[#allocation67_spill] sm:$0xff]  ;;  %v14779_v9 = vld [vmem:[#allocation76_spill] sm:$0xff] }
 0x648   :  { %8500 = vmatpush.msk.msra.mxu3 %vm5402_vm15, %v14334_v46  ;;  %8506 = vmatpush.msk.msra.mxu1 %vm5454_vm10, %v14334_v46  ;;  %vm5396_vm15 = vcmp.eq.s32.totalorder %v14740_v60, %v13425_v25  ;;  %vm5394_vm10 = vcmp.eq.s32.totalorder %v14741_v32, %v13425_v25 }
 0x649   :  { %5355 = vrot.lane.b32.xlu2 %v13447_v29, %s9548_s16  ;;  %5351 = vrot.lane.b32.xlu0 %v13445_v22, %s9548_s16 }
 0x64a   :  { %5353 = vrot.lane.b32.xlu1 %v13449_v18, %s9548_s16  ;;  %8461 = vmatpush.msk.msra.mxu2 %vm5403_vm9, %v14334_v46  ;;  %vm5437_vm9 = vcmp.eq.s32.totalorder %v14774_v33, %v13423_v2 }
 0x64b   :  { %8501 = vmatpush.msk.msra.mxu3 %vm5400_vm0, %v14334_v46  ;;  %8476 = vmatpush.msk.msra.mxu0 %vm5437_vm9, %v14334_v46  ;;  %vm5433_vm0 = vcmp.eq.s32.totalorder %v14776_v52, %v13423_v2  ;;  %vm5431_vm9 = vcmp.eq.s32.totalorder %v14777_v49, %v13423_v2 }
 0x64c   :  { %8462 = vmatpush.msk.msra.mxu2 %vm5401_vm3, %v14334_v46  ;;  %vm5395_vm3 = vcmp.eq.s32.totalorder %v14740_v60, %v13423_v2  ;;  %8507 = vmatpush.msk.msra.mxu1 %vm5452_vm5, %v14334_v46  ;;  %vm5429_vm5 = vcmp.eq.s32.totalorder %v14778_v0, %v13423_v2 }
 0x64d   :  { %8502 = vmatpush.msk.msra.mxu3 %vm5398_vm1, %v14334_v46  ;;  %8477 = vmatpush.msk.msra.mxu0 %vm5435_vm13, %v14334_v46  ;;  %vm5446_vm1 = vcmp.eq.s32.totalorder %v14769_v61, %v13425_v25  ;;  %vm5427_vm13 = vcmp.eq.s32.totalorder %v14779_v9, %v13423_v2  ;;  %v5378_v13 = vpop.permute.xlu2 %5377 }
 0x64e   :  { %8463 = vmatpush.msk.msra.mxu2 %vm5399_vm4, %v14334_v46  ;;  %vm5450_vm4 = vcmp.eq.s32.totalorder %v14764_v53, %v13425_v25 }
 0x64f   :  { %8503 = vmatpush.msk.msra.mxu3 %vm5396_vm15, %v14334_v46  ;;  %8508 = vmatpush.msk.msra.mxu1 %vm5450_vm4, %v14334_v46  ;;  %vm5442_vm15 = vcmp.eq.s32.totalorder %v14772_v48, %v13425_v25  ;;  %vm5425_vm4 = vcmp.eq.s32.totalorder %v14780_v56, %v13423_v2 }
 0x650   :  { %8464 = vmatpush.msk.msra.mxu2 %vm5397_vm14, %v14334_v46  ;;  %vm5448_vm14 = vcmp.eq.s32.totalorder %v14766_v59, %v13425_v25  ;;  %8478 = vmatpush.msk.msra.mxu0 %vm5433_vm0, %v14334_v46  ;;  %vm5438_vm0 = vcmp.eq.s32.totalorder %v14774_v33, %v13425_v25 }
 0x651   :  { %5382 = vperm.xlu0 %8920, %v4691_v17   ;;  %8504 = vmatpush.msk.msra.mxu3 %vm5394_vm10, %v14334_v46  ;;  %vm5436_vm10 = vcmp.eq.s32.totalorder %v14775_v54, %v13425_v25  ;;  %v5759_v54 = vld [vmem:[%s14781_s18] sm:$0x3] }
 0x652   :  { %5357 = vrot.lane.b32.xlu1 %v13458_v39, %s9548_s16  ;;  %8465 = vmatpush.msk.msra.mxu2 %vm5395_vm3, %v14334_v46  ;;  %vm5444_vm3 = vcmp.eq.s32.totalorder %v14771_v1, %v13425_v25  ;;  %s7110_s16 = sshll.u32 %s9716_s4, 4  ;;  %s7111_s16 = int_to_ptr.hbm [resolvable:$true] %s7110_s16 }
 0x653   :  { %8509 = vmatpush.msk.msra.mxu1 %vm5448_vm14, %v14334_v46  ;;  %8479 = vmatpush.msk.msra.mxu0 %vm5431_vm9, %v14334_v46  ;;  %vm5434_vm14 = vcmp.eq.s32.totalorder %v14776_v52, %v13425_v25  ;;  %vm5464_vm9 = vcmp.eq.s32.totalorder %v14765_v21, %v13425_v25 }
 0x654   :  { %8466 = vmatpush.msk.msra.mxu2 %vm5393_vm7, %v14334_v46  ;;  %vm5440_vm7 = vcmp.eq.s32.totalorder %v14773_v28, %v13425_v25 }
 0x655   :  { %8510 = vmatpush.msk.msra.mxu1 %vm5446_vm1, %v14334_v46  ;;  %8480 = vmatpush.msk.msra.mxu0 %vm5429_vm5, %v14334_v46  ;;  %vm5432_vm1 = vcmp.eq.s32.totalorder %v14777_v49, %v13425_v25  ;;  %vm5462_vm5 = vcmp.eq.s32.totalorder %v14767_v26, %v13425_v25 }
 0x656   :  { %8521 = vmatpush.msk.msrb.mxu2 %vm5464_vm9, %v14334_v46  ;;  %vm14782_vm9 = vcmask 760832  }
 0x657   :  { %8511 = vmatpush.msk.msra.mxu1 %vm5444_vm3, %v14334_v46  ;;  %8481 = vmatpush.msk.msra.mxu0 %vm5427_vm13, %v14334_v46  ;;  %vm5460_vm3 = vcmp.eq.s32.totalorder %v14768_v8, %v13425_v25  ;;  %vm5430_vm13 = vcmp.eq.s32.totalorder %v14778_v0, %v13425_v25 }
 0x658   :  { %8522 = vmatpush.msk.msrb.mxu2 %vm5462_vm5, %v14334_v46  ;;  %vm14784_vm5 = vmmov %vm14782_vm9 }
 0x659   :  { %8512 = vmatpush.msk.msra.mxu1 %vm5442_vm15, %v14334_v46  ;;  %8482 = vmatpush.msk.msra.mxu0 %vm5425_vm4, %v14334_v46  ;;  %vm5458_vm15 = vcmp.eq.s32.totalorder %v14770_v16, %v13425_v25  ;;  %vm5428_vm4 = vcmp.eq.s32.totalorder %v14779_v9, %v13425_v25 }
 0x65a   :  { %8523 = vmatpush.msk.msrb.mxu2 %vm5460_vm3, %v14334_v46 }
 0x65b   :  { %8513 = vmatpush.msk.msra.mxu1 %vm5440_vm7, %v14334_v46  ;;  %vm5426_vm7 = vcmp.eq.s32.totalorder %v14780_v56, %v13425_v25 }
 0x65c   :  { %8524 = vmatpush.msk.msrb.mxu2 %vm5458_vm15, %v14334_v46  ;;  %vm5821_vm15 = vcmask 924672  }
 0x65d   :  { %8514 = vmatpush.msk.msra.mxu1 %vm5438_vm0, %v14334_v46  ;;  %vm5609_vm0 = vcmask 261120  }
 0x65f   :  { %8515 = vmatpush.msk.msra.mxu1 %vm5436_vm10, %v14334_v46  ;;  %vm5957_vm10 = vcmask 596992  }
 0x661   :  { %8516 = vmatpush.msk.msra.mxu1 %vm5434_vm14, %v14334_v46  ;;  %vm5911_vm14 = vcmask 629760  }
 0x663   :  { %8517 = vmatpush.msk.msra.mxu1 %vm5432_vm1, %v14334_v46  ;;  %vm5866_vm1 = vcmask 777216  }
 0x665   :  { %8518 = vmatpush.msk.msra.mxu1 %vm5430_vm13, %v14334_v46 }
 0x667   :  { %8519 = vmatpush.msk.msra.mxu1 %vm5428_vm4, %v14334_v46 }
 0x669   :  { %8520 = vmatpush.msk.msra.mxu1 %vm5426_vm7, %v14334_v46  ;;  %vm6288_vm7 = vcmask 875520  }
 0x6a3   :  { %v5356_v23 = vpop.permute.xlu2 %5355 }
 0x6b3   :  { %v5350_v55 = vpop.permute.xlu1 %5349  ;;  %v5348_v37 = vpop.permute.xlu0 %5347 }
 0x6b4   :  { %v5359_v12 = vsel %vm4837_vm12, %v5348_v37, %v5350_v55 }
 0x6b5   :  { %v5369_v7 = vmax.f32 %v13437_v34, %v5359_v12 }
 0x6b7   :  { %v5385_v35 = vadd.f32 %v5378_v13, %v5369_v7 }
 0x6b9   :  { %5632 = vmatmul.f32.vlgmr.msra.gmra.mxu2 %v5385_v35  ;;  %5701 = vmatmul.f32.vlgmr.msra.gmra.mxu3 %v5385_v35 }
 0x6bb   :  { %v5352_v43 = vpop.permute.xlu0 %5351 }
 0x6bc   :  { %v5354_v2 = vpop.permute.xlu1 %5353  ;;  %v5360_v63 = vsel %vm4837_vm12, %v5350_v55, %v5352_v43  ;;  %v5371_v25 = vmax.f32 %v13445_v22, %v5352_v43 }
 0x6bd   :  { %v5370_v19 = vmax.f32 %v13435_v30, %v5360_v63  ;;  %v5361_v20 = vsel %vm4837_vm12, %v5354_v2, %v5356_v23 }
 0x6be   :  { %v5387_v27 = vadd.f32 %v5378_v13, %v5371_v25  ;;  %v5372_v34 = vmax.f32 %v13449_v18, %v5361_v20 }
 0x6bf   :  { %v5386_v15 = vadd.f32 %v5378_v13, %v5370_v19 }
 0x6c0   :  { %8487 = vmatmul.msk.f32.vlgmr.msrb.gmra.mxu1 %vm5609_vm0, %v5387_v27 }
 0x6c1   :  { %5655 = vmatmul.f32.vlgmr.msra.gmra.mxu0 %v5386_v15 }
 0x6c3   :  { %v5383_v38 = vpop.permute.xlu0 %5382 }
 0x6c4   :  { %v5358_v4 = vpop.permute.xlu1 %5357  ;;  %v5388_v44 = vadd.f32 %v5383_v38, %v5372_v34 }
 0x6c5   :  { %v5362_v58 = vsel %vm4837_vm12, %v5356_v23, %v5358_v4  ;;  %v5374_v31 = vmax.f32 %v13458_v39, %v5358_v4  ;;  %vm5934_vm12 = vcmask 613376  }
 0x6c6   :  { %v5373_v30 = vmax.f32 %v13447_v29, %v5362_v58  ;;  %5635 = vmatmul.f32.gmra.mxu2 %v5388_v44  ;;  %5704 = vmatmul.f32.gmra.mxu3 %v5388_v44 }
 0x6c7   :  { %v5390_v22 = vadd.f32 %v5383_v38, %v5374_v31 }
 0x6c8   :  { %v5389_v17 = vadd.f32 %v5383_v38, %v5373_v30 }
 0x6c9   :  { %8488 = vmatmul.msk.f32.gmra.mxu1 %vm5609_vm0, %v5390_v22 }
 0x6ca   :  { %5658 = vmatmul.f32.gmra.mxu0 %v5389_v17 }
 0x6ce   :  { %8525 = vmatmul.msk.f32.vlgmr.msrb.gmra.mxu2 %vm5609_vm0, %v5387_v27 }
 0x6d1   :  { %5724 = vmatmul.f32.vlgmr.msra.gmra.mxu1 %v5386_v15 }
 0x6d6   :  { %8526 = vmatmul.msk.f32.gmra.mxu2 %vm5609_vm0, %v5390_v22 }
 0x6d9   :  { %5727 = vmatmul.f32.gmra.mxu1 %v5389_v17 }
 0x73c   :  { %v5633_v57 = vpop.f32.mrf.mxu2  ;;  %v5702_v24 = vpop.f32.mrf.mxu3 }
 0x73d   :  { %v5679_v18 = vpop.f32.mrf.mxu1 }
 0x73e   :  { %v5656_v39 = vpop.f32.mrf.mxu0 }
 0x73f   :  { %v5657_v5 = vadd.f32 %v5656_v39, %v5633_v57 }
 0x741   :  { %v13686_v6 = vadd.f32 %v5679_v18, %v5657_v5 }
 0x746   :  { %v5682_v50 = vpop.f32.mrf.mxu1 }
 0x747   :  { %v5659_v59 = vpop.f32.mrf.mxu0 }
 0x749   :  { %v5636_v41 = vpop.f32.mrf.mxu2  ;;  %v5705_v61 = vpop.f32.mrf.mxu3 }
 0x74a   :  { %v5660_v26 = vadd.f32 %v5659_v59, %v5636_v41 }
 0x74c   :  { %v13690_v48 = vadd.f32 %v5682_v50, %v5660_v26 }
 0x74e   :  { %v5725_v29 = vpop.f32.mrf.mxu1 }
 0x74f   :  { %v5726_v51 = vadd.f32 %v5725_v29, %v5702_v24 }
 0x751   :  { %v5748_v45 = vpop.f32.mrf.mxu2 }
 0x752   :  { %v5749_v53 = vadd.f32 %v5748_v45, %v5726_v51 }
 0x754   :  { %v9182_v21 = vpack.i.bf16 %v5749_v53, %v13686_v6 }
 0x756   :  { %v5728_v8 = vpop.f32.mrf.mxu1  ;;  %9183 = vrot.lane.b32.xlu1 %v9182_v21, %s9529_s23  ;;  %9178 = vrot.lane.b32.xlu2 %v9182_v21, %s9549_s14 }
 0x757   :  { %9173 = vrot.lane.b32.xlu0 %v9182_v21, %s9550_s19  ;;  %v5729_v16 = vadd.f32 %v5728_v8, %v5705_v61 }
 0x759   :  { %v5751_v1 = vpop.f32.mrf.mxu2 }
 0x75a   :  { %v5752_v28 = vadd.f32 %v5751_v1, %v5729_v16  ;;  %v13725_v1 = vld [vmem:[%s14783_s1] sm:$0x3] }
 0x75c   :  { %v9202_v33 = vpack.i.bf16 %v5752_v28, %v13690_v48 }
 0x75e   :  { %9203 = vrot.lane.b32.xlu1 %v9202_v33, %s9549_s14  ;;  %9193 = vrot.lane.b32.xlu2 %v9202_v33, %s9550_s19  ;;  %s9481_s19 = scalar_lea.hbm %s9716_s4, 2 }
 0x75f   :  { %9188 = vrot.lane.b32.xlu0 %v9182_v21, %s9551_s24 }
 0x766   :  { %9208 = vrot.lane.b32.xlu1 %v9182_v21, %s9552_s30  ;;  %9198 = vrot.lane.b32.xlu2 %v9182_v21, %s9542_s25 }
 0x767   :  { %9213 = vrot.lane.b32.xlu0 %v9202_v33, %s9529_s23  ;;  %s9555_s23 = smov 107  }
 0x76e   :  { %9223 = vrot.lane.b32.xlu1 %v9202_v33, %s9542_s25  ;;  %9218 = vrot.lane.b32.xlu2 %v9202_v33, %s9551_s24  ;;  %s9559_s25 = smov 121  }
 0x76f   :  { %9233 = vrot.lane.b32.xlu0 %v9202_v33, %s9552_s30 }
 0x776   :  { %9228 = vrot.lane.b32.xlu1 %v9182_v21, %s9553_s6  ;;  %9238 = vrot.lane.b32.xlu2 %v9202_v33, %s9553_s6 }
 0x777   :  { %9248 = vrot.lane.b32.xlu0 %v9202_v33, %s9522_s10 }
 0x77e   :  { %9258 = vrot.lane.b32.xlu1 %v9182_v21, %s9538_s5  ;;  %9243 = vrot.lane.b32.xlu2 %v9182_v21, %s9522_s10 }
 0x77f   :  { %9253 = vrot.lane.b32.xlu0 %v9202_v33, %s9538_s5 }
 0x786   :  { %9273 = vrot.lane.b32.xlu1 %v9182_v21, %s9554_s22  ;;  %9268 = vrot.lane.b32.xlu2 %v9182_v21, %s9546_s8 }
 0x787   :  { %9263 = vrot.lane.b32.xlu0 %v9182_v21, %s9555_s23 }
 0x78e   :  { %9293 = vrot.lane.b32.xlu1 %v9202_v33, %s9546_s8  ;;  %9283 = vrot.lane.b32.xlu2 %v9202_v33, %s9555_s23  ;;  %s14806_s8 = sld [smem:[#allocation19_spill]] }
 0x78f   :  { %9278 = vrot.lane.b32.xlu0 %v9182_v21, %s9538_s5 }
 0x796   :  { %9308 = vrot.lane.b32.xlu1 %v9202_v33, %s9556_s26  ;;  %9288 = vrot.lane.b32.xlu2 %v9182_v21, %s9556_s26 }
 0x797   :  { %9298 = vrot.lane.b32.xlu0 %v9202_v33, %s9554_s22 }
 0x79e   :  { %6031 = vperm.xlu1 %8764, %v5759_v54   ;;  %9303 = vrot.lane.b32.xlu2 %v9202_v33, %s9538_s5  ;;  %s14795_s5 = sld [smem:[#allocation13_spill]] }
 0x79f   :  { %9323 = vrot.lane.b32.xlu0 %v9202_v33, %s9535_s11 }
 0x7a6   :  { %9318 = vrot.lane.b32.xlu1 %v9182_v21, %s9536_s13  ;;  %9313 = vrot.lane.b32.xlu2 %v9182_v21, %s9535_s11 }
 0x7a7   :  { %9328 = vrot.lane.b32.xlu0 %v9202_v33, %s9536_s13 }
 0x7ae   :  { %9333 = vrot.lane.b32.xlu2 %v9202_v33, %s9557_s28  ;;  %v6035_v33 = vperm.slane %v13725_v1, 0 }
 0x7af   :  { %9338 = vrot.lane.b32.xlu0 %v9182_v21, %s9557_s28 }
 0x7b0   :  { %v9179_v52 = vpop.permute.xlu2 %9178  ;;  %vm6045_vm3 = vcmp.eq.s32.totalorder %v14737_v36, %v6035_v33  ;;  %vm6043_vm13 = vcmp.eq.s32.totalorder %v14738_v10, %v6035_v33  ;;  %vm6041_vm4 = vcmp.eq.s32.totalorder %v14739_v42, %v6035_v33  ;;  %vm6037_vm0 = vcmp.eq.s32.totalorder %v14741_v32, %v6035_v33 }
 0x7b1   :  { %v9181_v2 = vunpack.i.h.bf16 %v9179_v52  ;;  %v9180_v63 = vunpack.i.l.bf16 %v9179_v52  ;;  %8538 = vmatpush.msk.msra.mxu2 %vm6045_vm3, %v14334_v46  ;;  %vm6198_vm3 = vcmask 965632  }
 0x7b3   :  { %v5912_v44 = vsel %vm5911_vm14, %v9180_v63, %v9181_v2  ;;  %8539 = vmatpush.msk.msra.mxu2 %vm6043_vm13, %v14334_v46  ;;  %vm14789_vm13 = vcmask 1031168  }
 0x7b5   :  { %8540 = vmatpush.msk.msra.mxu2 %vm6041_vm4, %v14334_v46 }
 0x7b8   :  { %v9194_v49 = vpop.permute.xlu2 %9193 }
 0x7b9   :  { %v9196_v0 = vunpack.i.h.bf16 %v9194_v49  ;;  %v9195_v9 = vunpack.i.l.bf16 %v9194_v49 }
 0x7bb   :  { %v5936_v56 = vsel %vm5934_vm12, %v9195_v9, %v9196_v0 }
 0x7bc   :  { %5989 = vmatpush.msrb.mxu0 %v5936_v56 }
 0x7c0   :  { %v13713_v55 = vpop.permute.xlu2 %9198 }
 0x7c1   :  { %v9201_v8 = vunpack.i.h.bf16 %v13713_v55  ;;  %v9200_v61 = vunpack.i.l.bf16 %v13713_v55 }
 0x7c3   :  { %v5844_v9 = vsel %vm4356_vm8, %v9200_v61, %v9201_v8 }
 0x7c8   :  { %v9184_v37 = vpop.permute.xlu1 %9183  ;;  %v9219_v13 = vpop.permute.xlu2 %9218 }
 0x7c9   :  { %v9174_v12 = vpop.permute.xlu0 %9173  ;;  %v9186_v22 = vunpack.i.h.bf16 %v9184_v37  ;;  %v9185_v17 = vunpack.i.l.bf16 %v9184_v37  ;;  %v9221_v50 = vunpack.i.h.bf16 %v9219_v13  ;;  %v9220_v41 = vunpack.i.l.bf16 %v9219_v13 }
 0x7ca   :  { %v9176_v7 = vunpack.i.h.bf16 %v9174_v12  ;;  %v9175_v35 = vunpack.i.l.bf16 %v9174_v12 }
 0x7cb   :  { %v5889_v24 = vsel %vm14784_vm5, %v9185_v17, %v9186_v22  ;;  %v5868_v53 = vsel %vm5866_vm1, %v9220_v41, %v9221_v50  ;;  %v5984_v50 = vld.sshfl [vmem:[#allocation1] sm:$0xff pattern:$0x73625140]  ;;  %vm6243_vm5 = vcmask 949248  }
 0x7cc   :  { %v5935_v43 = vsel %vm5934_vm12, %v9175_v35, %v9176_v7  ;;  %vm14785_vm12 = vcmask 941056  }
 0x7cd   :  { %5990 = vmatpush.msrb.mxu0 %v5935_v43 }
 0x7d0   :  { %v9204_v25 = vpop.permute.xlu1 %9203  ;;  %v9239_v19 = vpop.permute.xlu2 %9238 }
 0x7d1   :  { %v9189_v23 = vpop.permute.xlu0 %9188  ;;  %v9206_v27 = vunpack.i.h.bf16 %v9204_v25  ;;  %v9205_v20 = vunpack.i.l.bf16 %v9204_v25  ;;  %v9241_v15 = vunpack.i.h.bf16 %v9239_v19  ;;  %v9240_v34 = vunpack.i.l.bf16 %v9239_v19 }
 0x7d2   :  { %v9191_v5 = vunpack.i.h.bf16 %v9189_v23  ;;  %v9190_v29 = vunpack.i.l.bf16 %v9189_v23 }
 0x7d3   :  { %v5913_v38 = vsel %vm5911_vm14, %v9205_v20, %v9206_v27  ;;  %v5959_v4 = vsel %vm5957_vm10, %v9240_v34, %v9241_v15  ;;  %v5985_v34 = vld.sshfl [vmem:[#allocation1 + $0x8] sm:$0xff pattern:$0x73625140]  ;;  %vm14786_vm14 = vmmov %vm14785_vm12 }
 0x7d4   :  { %5991 = vmatpush.msrb.mxu0 %v5913_v38  ;;  %6023 = vmatpush.msrb.mxu3 %v5959_v4  ;;  %v5867_v16 = vsel %vm5866_vm1, %v9190_v29, %v9191_v5  ;;  %vm6311_vm1 = vcmask 867328  }
 0x7d6   :  { %5992 = vmatpush.msrb.mxu0 %v5912_v44 }
 0x7d8   :  { %v9209_v58 = vpop.permute.xlu1 %9208  ;;  %v13716_v31 = vpop.permute.xlu2 %9243 }
 0x7d9   :  { %v9214_v30 = vpop.permute.xlu0 %9213  ;;  %v9211_v49 = vunpack.i.h.bf16 %v9209_v58  ;;  %v9210_v0 = vunpack.i.l.bf16 %v9209_v58  ;;  %v9246_v56 = vunpack.i.h.bf16 %v13716_v31  ;;  %v9245_v55 = vunpack.i.l.bf16 %v13716_v31 }
 0x7da   :  { %v9216_v18 = vunpack.i.h.bf16 %v9214_v30  ;;  %v9215_v57 = vunpack.i.l.bf16 %v9214_v30 }
 0x7db   :  { %v5822_v23 = vsel %vm5821_vm15, %v9210_v0, %v9211_v49  ;;  %v5799_v38 = vsel %vm14786_vm14, %v9245_v55, %v9246_v56 }
 0x7dc   :  { %v5890_v39 = vsel %vm14782_vm9, %v9215_v57, %v9216_v18 }
 0x7dd   :  { %5993 = vmatpush.msrb.mxu0 %v5890_v39 }
 0x7df   :  { %5994 = vmatpush.msrb.mxu0 %v5889_v24 }
 0x7e0   :  { %v9224_v51 = vpop.permute.xlu1 %9223  ;;  %v13720_v45 = vpop.permute.xlu2 %9268 }
 0x7e1   :  { %v9234_v21 = vpop.permute.xlu0 %9233  ;;  %v9226_v59 = vunpack.i.h.bf16 %v9224_v51  ;;  %v9225_v26 = vunpack.i.l.bf16 %v9224_v51  ;;  %5995 = vmatpush.msrb.mxu0 %v5868_v53 }
 0x7e2   :  { %v9236_v54 = vunpack.i.h.bf16 %v9234_v21  ;;  %v9235_v52 = vunpack.i.l.bf16 %v9234_v21 }
 0x7e3   :  { %5996 = vmatpush.msrb.mxu0 %v5867_v16  ;;  %v5845_v28 = vsel %vm4356_vm8, %v9225_v26, %v9226_v59  ;;  %vm6039_vm8 = vcmp.eq.s32.totalorder %v14740_v60, %v6035_v33  ;;  %v9271_v59 = vunpack.i.h.bf16 %v13720_v45  ;;  %v9270_v26 = vunpack.i.l.bf16 %v13720_v45 }
 0x7e4   :  { %v5823_v12 = vsel %vm5821_vm15, %v9235_v52, %v9236_v54  ;;  %8541 = vmatpush.msk.msra.mxu2 %vm6039_vm8, %v14334_v46  ;;  %vm14790_vm15 = vmmov %vm14789_vm13 }
 0x7e5   :  { %5997 = vmatpush.msrb.mxu0 %v5845_v28 }
 0x7e6   :  { %8542 = vmatpush.msk.msra.mxu2 %vm6037_vm0, %v14334_v46 }
 0x7e7   :  { %5998 = vmatpush.msrb.mxu0 %v5844_v9 }
 0x7e8   :  { %v9229_v37 = vpop.permute.xlu1 %9228  ;;  %v9284_v13 = vpop.permute.xlu2 %9283 }
 0x7e9   :  { %v9249_v7 = vpop.permute.xlu0 %9248  ;;  %v9231_v35 = vunpack.i.h.bf16 %v9229_v37  ;;  %v9230_v43 = vunpack.i.l.bf16 %v9229_v37  ;;  %v9286_v2 = vunpack.i.h.bf16 %v9284_v13  ;;  %v9285_v63 = vunpack.i.l.bf16 %v9284_v13  ;;  %5999 = vmatpush.msrb.mxu0 %v5823_v12 }
 0x7ea   :  { %v9251_v25 = vunpack.i.h.bf16 %v9249_v7  ;;  %v9250_v19 = vunpack.i.l.bf16 %v9249_v7 }
 0x7eb   :  { %6000 = vmatpush.msrb.mxu0 %v5822_v23  ;;  %v5958_v27 = vsel %vm5957_vm10, %v9230_v43, %v9231_v35  ;;  %v6290_v20 = vsel %vm6288_vm7, %v9285_v63, %v9286_v2  ;;  %vm14787_vm10 = vcmask 883712  }
 0x7ec   :  { %v5800_v15 = vsel %vm14785_vm12, %v9250_v19, %v9251_v25  ;;  %6024 = vmatpush.msrb.mxu3 %v5958_v27  ;;  %vm14788_vm9 = vmmov %vm14787_vm10 }
 0x7ed   :  { %6001 = vmatpush.msrb.mxu0 %v5800_v15  ;;  %8527 = vmatmul.msk.f32.vlgmr.msrb.gmra.mxu3 %vm4522_vm2, %v5985_v34  ;;  %v6266_v33 = vsel %vm14788_vm9, %v9270_v26, %v9271_v59  ;;  %vm14796_vm9 = vcmask 1040384  }
 0x7ee   :  { %6342 = vmatpush.msra.mxu3 %v6290_v20 }
 0x7ef   :  { %6002 = vmatpush.msrb.mxu0 %v5799_v38 }
 0x7f0   :  { %v9259_v4 = vpop.permute.xlu1 %9258  ;;  %v13751_v44 = vpop.permute.xlu2 %9288 }
 0x7f1   :  { %v9254_v58 = vpop.permute.xlu0 %9253  ;;  %v9261_v22 = vunpack.i.h.bf16 %v9259_v4  ;;  %v9260_v17 = vunpack.i.l.bf16 %v9259_v4  ;;  %v9291_v15 = vunpack.i.h.bf16 %v13751_v44  ;;  %v9290_v34 = vunpack.i.l.bf16 %v13751_v44 }
 0x7f2   :  { %v9256_v31 = vunpack.i.h.bf16 %v9254_v58  ;;  %v9255_v30 = vunpack.i.l.bf16 %v9254_v58 }
 0x7f3   :  { %v5777_v57 = vsel %vm4424_vm11, %v9260_v17, %v9261_v22  ;;  %v6199_v17 = vsel %vm6198_vm3, %v9290_v34, %v9291_v15 }
 0x7f4   :  { %v5778_v18 = vsel %vm4424_vm11, %v9255_v30, %v9256_v31 }
 0x7f5   :  { %6003 = vmatpush.msrb.mxu0 %v5778_v18 }
 0x7f7   :  { %6004 = vmatpush.msrb.mxu0 %v5777_v57 }
 0x7f8   :  { %6005 = vmatmul.f32.vlgmr.msrb.gmra.mxu0 %v5984_v50  ;;  %v9274_v41 = vpop.permute.xlu1 %9273  ;;  %v9304_v39 = vpop.permute.xlu2 %9303 }
 0x7f9   :  { %v9264_v5 = vpop.permute.xlu0 %9263  ;;  %v9276_v56 = vunpack.i.h.bf16 %v9274_v41  ;;  %v9275_v55 = vunpack.i.l.bf16 %v9274_v41  ;;  %v9306_v12 = vunpack.i.h.bf16 %v9304_v39  ;;  %v9305_v7 = vunpack.i.l.bf16 %v9304_v39 }
 0x7fa   :  { %v9266_v29 = vunpack.i.h.bf16 %v9264_v5  ;;  %v9265_v24 = vunpack.i.l.bf16 %v9264_v5 }
 0x7fb   :  { %v6244_v63 = vsel %vm6243_vm5, %v9275_v55, %v9276_v56  ;;  %v6222_v27 = vsel %vm4424_vm11, %v9305_v7, %v9306_v12  ;;  %v6539_v55 = vld [vmem:[%s14794_s7] sm:$0xf] }
 0x7fc   :  { %v6289_v51 = vsel %vm6288_vm7, %v9265_v24, %v9266_v29 }
 0x7fd   :  { %6343 = vmatpush.msra.mxu3 %v6289_v51 }
 0x800   :  { %v9294_v53 = vpop.permute.xlu1 %9293  ;;  %v9314_v21 = vpop.permute.xlu2 %9313 }
 0x801   :  { %v9279_v8 = vpop.permute.xlu0 %9278  ;;  %v9296_v61 = vunpack.i.h.bf16 %v9294_v53  ;;  %v9295_v16 = vunpack.i.l.bf16 %v9294_v53  ;;  %v9316_v30 = vunpack.i.h.bf16 %v9314_v21  ;;  %v9315_v22 = vunpack.i.l.bf16 %v9314_v21 }
 0x802   :  { %v9281_v43 = vunpack.i.h.bf16 %v9279_v8  ;;  %v9280_v2 = vunpack.i.l.bf16 %v9279_v8  ;;  %v6036_v8 = vperm.slane %v13725_v1, 1 }
 0x803   :  { %v6267_v28 = vsel %vm14787_vm10, %v9295_v16, %v9296_v61  ;;  %v6176_v41 = vsel %vm14790_vm15, %v9315_v22, %v9316_v30  ;;  %vm6067_vm10 = vcmask 326656  }
 0x804   :  { %6344 = vmatpush.msra.mxu3 %v6267_v28  ;;  %v6221_v38 = vsel %vm4424_vm11, %v9280_v2, %v9281_v43  ;;  %vm14791_vm11 = vcmask 1039360   ;;  %vm6046_vm7 = vcmp.eq.s32.totalorder %v14737_v36, %v6036_v8  ;;  %vm6044_vm8 = vcmp.eq.s32.totalorder %v14738_v10, %v6036_v8 }
 0x805   :  { %vm14792_vm4 = vmmov %vm14791_vm11  ;;  %8544 = vmatpush.msk.msrb.mxu1 %vm6046_vm7, %v14334_v46  ;;  %vm6042_vm0 = vcmp.eq.s32.totalorder %v14739_v42, %v6036_v8  ;;  %vm6040_vm12 = vcmp.eq.s32.totalorder %v14740_v60, %v6036_v8  ;;  %vm6038_vm14 = vcmp.eq.s32.totalorder %v14741_v32, %v6036_v8 }
 0x806   :  { %6345 = vmatpush.msra.mxu3 %v6266_v33  ;;  %v6128_v33 = vld [vmem:[%s14793_s2 + $0x8] sm:$0xff] }
 0x807   :  { %8545 = vmatpush.msk.msrb.mxu1 %vm6044_vm8, %v14334_v46 }
 0x808   :  { %v9309_v54 = vpop.permute.xlu1 %9308  ;;  %v9334_v52 = vpop.permute.xlu2 %9333 }
 0x809   :  { %v9299_v49 = vpop.permute.xlu0 %9298  ;;  %v9336_v0 = vunpack.i.h.bf16 %v9334_v52  ;;  %v9335_v9 = vunpack.i.l.bf16 %v9334_v52  ;;  %v9311_v25 = vunpack.i.h.bf16 %v9309_v54  ;;  %v9310_v19 = vunpack.i.l.bf16 %v9309_v54  ;;  %8546 = vmatpush.msk.msrb.mxu1 %vm6042_vm0, %v14334_v46  ;;  %v6130_v54 = vld [vmem:[%s14793_s2 + $0x18] sm:$0xff] }
 0x80a   :  { %v9301_v37 = vunpack.i.h.bf16 %v9299_v49  ;;  %v9300_v13 = vunpack.i.l.bf16 %v9299_v49 }
 0x80b   :  { %v6313_v45 = vsel %vm6311_vm1, %v9335_v9, %v9336_v0  ;;  %v6200_v31 = vsel %vm6198_vm3, %v9310_v19, %v9311_v25  ;;  %8547 = vmatpush.msk.msrb.mxu1 %vm6040_vm12, %v14334_v46 }
 0x80c   :  { %v6245_v35 = vsel %vm6243_vm5, %v9300_v13, %v9301_v37  ;;  %6379 = vmatpush.msrb.mxu2 %v6313_v45 }
 0x80d   :  { %6346 = vmatpush.msra.mxu3 %v6245_v35  ;;  %8548 = vmatpush.msk.msrb.mxu1 %vm6038_vm14, %v14334_v46  ;;  %v6131_v35 = vld [vmem:[%s14795_s5] sm:$0xff] }
 0x80f   :  { %6347 = vmatpush.msra.mxu3 %v6244_v63 }
 0x810   :  { %v6032_v23 = vpop.permute.xlu1 %6031 }
 0x811   :  { %v9324_v20 = vpop.permute.xlu0 %9323  ;;  %6348 = vmatpush.msra.mxu3 %v6222_v27  ;;  %v6133_v27 = vld [vmem:[%s14797_s9] sm:$0x3] }
 0x812   :  { %v9326_v4 = vunpack.i.h.bf16 %v9324_v20  ;;  %v9325_v58 = vunpack.i.l.bf16 %v9324_v20  ;;  %v6420_v20 = vperm.slane %v6133_v27, 0  ;;  %v6421_v15 = vperm.slane %v6133_v27, 1 }
 0x813   :  { %6349 = vmatpush.msra.mxu3 %v6221_v38 }
 0x814   :  { %v6177_v57 = vsel %vm14789_vm13, %v9325_v58, %v9326_v4  ;;  %vm6441_vm3 = vcmp.eq.s32.totalorder %v14762_v11, %v6421_v15  ;;  %vm6438_vm13 = vcmp.eq.s32.totalorder %v14668_v14, %v6420_v20  ;;  %vm6439_vm15 = vcmp.eq.s32.totalorder %v14668_v14, %v6421_v15 }
 0x815   :  { %6350 = vmatpush.msra.mxu3 %v6200_v31  ;;  %8584 = vmatpush.msk.msra.mxu1 %vm6441_vm3, %v14334_v46  ;;  %vm6434_vm7 = vcmp.eq.s32.totalorder %v14675_v40, %v6420_v20  ;;  %vm6435_vm8 = vcmp.eq.s32.totalorder %v14675_v40, %v6421_v15  ;;  %vm6432_vm0 = vcmp.eq.s32.totalorder %v14736_v3, %v6420_v20 }
 0x816   :  { %vm6433_vm12 = vcmp.eq.s32.totalorder %v14736_v3, %v6421_v15  ;;  %vm6430_vm14 = vcmp.eq.s32.totalorder %v14737_v36, %v6420_v20  ;;  %vm6426_vm3 = vcmp.eq.s32.totalorder %v14739_v42, %v6420_v20 }
 0x817   :  { %6351 = vmatpush.msra.mxu3 %v6199_v17  ;;  %8585 = vmatpush.msk.msra.mxu1 %vm6439_vm15, %v14334_v46  ;;  %vm6424_vm15 = vcmp.eq.s32.totalorder %v14740_v60, %v6420_v20  ;;  %v6540_v17 = vld [vmem:[%s14798_s17] sm:$0x3] }
 0x818   :  { %v9319_v18 = vpop.permute.xlu1 %9318 }
 0x819   :  { %v9329_v50 = vpop.permute.xlu0 %9328  ;;  %6352 = vmatpush.msra.mxu3 %v6177_v57  ;;  %v9321_v5 = vunpack.i.h.bf16 %v9319_v18  ;;  %v9320_v29 = vunpack.i.l.bf16 %v9319_v18 }
 0x81a   :  { %v9331_v44 = vunpack.i.h.bf16 %v9329_v50  ;;  %v9330_v39 = vunpack.i.l.bf16 %v9329_v50 }
 0x81b   :  { %6353 = vmatpush.msra.mxu3 %v6176_v41  ;;  %v6154_v51 = vsel %vm14792_vm4, %v9320_v29, %v9321_v5  ;;  %vm6437_vm4 = vcmp.eq.s32.totalorder %v14672_v62, %v6421_v15 }
 0x81c   :  { %v6155_v24 = vsel %vm14791_vm11, %v9330_v39, %v9331_v44  ;;  %vm6436_vm11 = vcmp.eq.s32.totalorder %v14672_v62, %v6420_v20  ;;  %8586 = vmatpush.msk.msra.mxu1 %vm6437_vm4, %v14334_v46  ;;  %vm6422_vm4 = vcmp.eq.s32.totalorder %v14741_v32, %v6420_v20 }
 0x81d   :  { %6354 = vmatpush.msra.mxu3 %v6155_v24 }
 0x81e   :  { %8587 = vmatpush.msk.msra.mxu1 %vm6435_vm8, %v14334_v46  ;;  %vm6482_vm8 = vcmask 654336  }
 0x81f   :  { %6355 = vmatpush.msra.mxu3 %v6154_v51 }
 0x820   :  { %8588 = vmatpush.msk.msra.mxu1 %vm6433_vm12, %v14334_v46 }
 0x821   :  { %v9339_v53 = vpop.permute.xlu0 %9338  ;;  %6356 = vmatpush.msra.mxu3 %v13690_v48  ;;  %v6129_v48 = vld [vmem:[%s14793_s2 + $0x10] sm:$0xff] }
 0x822   :  { %v9341_v21 = vunpack.i.h.bf16 %v9339_v53  ;;  %v9340_v59 = vunpack.i.l.bf16 %v9339_v53 }
 0x823   :  { %6357 = vmatpush.msra.mxu3 %v13686_v6  ;;  %v6127_v6 = vld [vmem:[%s14793_s2] sm:$0xff] }
 0x824   :  { %v6312_v26 = vsel %vm6311_vm1, %v9340_v59, %v9341_v21  ;;  %6358 = vmatmul.f32.vlgmr.msra.gmra.mxu3 %v6127_v6  ;;  %vm6440_vm1 = vcmp.eq.s32.totalorder %v14762_v11, %v6420_v20 }
 0x825   :  { %6380 = vmatpush.msrb.mxu2 %v6312_v26  ;;  %8572 = vmatpush.msk.msra.mxu0 %vm6440_vm1, %v14334_v46  ;;  %vm6429_vm1 = vcmp.eq.s32.totalorder %v14738_v10, %v6421_v15 }
 0x827   :  { %8573 = vmatpush.msk.msra.mxu0 %vm6438_vm13, %v14334_v46  ;;  %vm6427_vm13 = vcmp.eq.s32.totalorder %v14739_v42, %v6421_v15 }
 0x829   :  { %8574 = vmatpush.msk.msra.mxu0 %vm6436_vm11, %v14334_v46  ;;  %vm6425_vm11 = vcmp.eq.s32.totalorder %v14740_v60, %v6421_v15 }
 0x82b   :  { %8575 = vmatpush.msk.msra.mxu0 %vm6434_vm7, %v14334_v46  ;;  %vm6423_vm7 = vcmp.eq.s32.totalorder %v14741_v32, %v6421_v15 }
 0x82c   :  { %6361 = vmatmul.f32.gmra.mxu3 %v6129_v48 }
 0x82d   :  { %8576 = vmatpush.msk.msra.mxu0 %vm6432_vm0, %v14334_v46  ;;  %vm14799_vm0 = vcmask 941056  }
 0x82e   :  { %vm14800_vm12 = vmmov %vm14799_vm0 }
 0x82f   :  { %8577 = vmatpush.msk.msra.mxu0 %vm6430_vm14, %v14334_v46  ;;  %vm6652_vm14 = vcmask 982016  }
 0x870   :  { %v6026_v1 = vpop.f32.mrf.mxu3 }
 0x875   :  { %v6006_v61 = vpop.f32.mrf.mxu0 }
 0x876   :  { %v6027_v16 = vadd.f32 %v6026_v1, %v6006_v61 }
 0x878   :  { %v6034_v28 = vadd.f32 %v6032_v23, %v6027_v16  ;;  %v6132_v23 = vld [vmem:[%s14795_s5 + $0x8] sm:$0xff] }
 0x87a   :  { %8543 = vmatmul.msk.f32.vlgmr.msra.gmra.mxu2 %vm6067_vm10, %v6034_v28  ;;  %8549 = vmatmul.msk.f32.vlgmr.msrb.gmra.mxu1 %vm6067_vm10, %v6034_v28  ;;  %vm6431_vm10 = vcmp.eq.s32.totalorder %v14737_v36, %v6421_v15 }
 0x87b   :  { %8589 = vmatpush.msk.msra.mxu1 %vm6431_vm10, %v14334_v46  ;;  %vm6629_vm10 = vcmask 990208  }
 0x87d   :  { %8590 = vmatpush.msk.msra.mxu1 %vm6429_vm1, %v14334_v46  ;;  %vm14801_vm1 = vcmask 1031168  }
 0x87f   :  { %8591 = vmatpush.msk.msra.mxu1 %vm6427_vm13, %v14334_v46  ;;  %vm14803_vm13 = vcmask 1039360  }
 0x881   :  { %8592 = vmatpush.msk.msra.mxu1 %vm6425_vm11, %v14334_v46  ;;  %vm6719_vm11 = vcmask 932864  }
 0x882   :  { %8550 = vmatmul.msk.f32.vlgmr.msrb.gmra.mxu2 %vm4522_vm2, %v6128_v33 }
 0x883   :  { %8593 = vmatpush.msk.msra.mxu1 %vm6423_vm7, %v14334_v46 }
 0x88a   :  { %8551 = vmatmul.msk.f32.gmra.mxu2 %vm4522_vm2, %v6130_v54 }
 0x8a7   :  { %v6359_v56 = vpop.f32.mrf.mxu3 }
 0x8af   :  { %v6362_v12 = vpop.f32.mrf.mxu3 }
 0x8f7   :  { %v6108_v52 = vpop.f32.mrf.mxu1 }
 0x8f8   :  { %6120 = vst [vmem:[#allocation1 + $0x9] sm:$0xff] %v6108_v52  ;;  %v6113_v49 = vrot.slane %v6108_v52, 7 }
 0x8fd   :  { %v6088_v0 = vpop.f32.mrf.mxu2 }
 0x8fe   :  { %v6114_v9 = vsel %vm14796_vm9, %v6088_v0, %v6113_v49  ;;  %6119 = vst [vmem:[#allocation1] sm:$0xff] %v6088_v0  ;;  %vm6428_vm9 = vcmp.eq.s32.totalorder %v14738_v10, %v6420_v20 }
 0x8ff   :  { %6117 = vst.msk [vmem:[#allocation5 + $0x3] ss:$8 sm:$0x3] %vm10463_vm6, %v6114_v9  ;;  %8578 = vmatpush.msk.msra.mxu0 %vm6428_vm9, %v14334_v46  ;;  %vm6606_vm9 = vcmask 998400  }
 0x901   :  { %8579 = vmatpush.msk.msra.mxu0 %vm6426_vm3, %v14334_v46  ;;  %vm14802_vm3 = vmmov %vm14801_vm1 }
 0x903   :  { %8580 = vmatpush.msk.msra.mxu0 %vm6424_vm15, %v14334_v46  ;;  %vm14804_vm15 = vmmov %vm14803_vm13 }
 0x905   :  { %v6122_v37 = vld [vmem:[#allocation1 + $0x1] ss:$9 sm:$0xff]  ;;  %v6382_v13 = vpop.f32.mrf.mxu2  ;;  %8581 = vmatpush.msk.msra.mxu0 %vm6422_vm4, %v14334_v46 }
 0x906   :  { %6745 = vst [vmem:[#allocation1] ss:$4 sm:$0xff] %v6539_v55  ;;  %v6383_v45 = vadd.f32 %v6382_v13, %v6359_v56 }
 0x907   :  { %6125 = vst.msk [vmem:[#allocation5 + $0x7] ss:$8 sm:$0x3] %vm10463_vm6, %v6122_v37 }
 0x908   :  { %6390 = vrot.lane.b32.xlu1 %v6383_v45, %s9536_s13 }
 0x90d   :  { %v6385_v7 = vpop.f32.mrf.mxu2 }
 0x90e   :  { %v6386_v43 = vadd.f32 %v6385_v7, %v6362_v12 }
 0x910   :  { %6392 = vrot.lane.b32.xlu2 %v6386_v43, %s9536_s13  ;;  %6410 = vperm.xlu1 %8764, %v6131_v35  }
 0x96a   :  { %v6393_v2 = vpop.permute.xlu2 %6392 }
 0x96b   :  { %v6397_v63 = vmax.f32 %v6386_v43, %v6393_v2 }
 0x96d   :  { %6402 = vrot.lane.b32.xlu2 %v6397_v63, %s9556_s26 }
 0x97a   :  { %v6391_v25 = vpop.permute.xlu1 %6390 }
 0x97b   :  { %v6396_v19 = vmax.f32 %v6383_v45, %v6391_v25 }
 0x97d   :  { %6400 = vrot.lane.b32.xlu0 %v6396_v19, %s9556_s26 }
 0x982   :  { %v6411_v40 = vpop.permute.xlu1 %6410 }
 0x985   :  { %6415 = vperm.xlu0 %8920, %v6132_v23  }
 0x9c7   :  { %v6403_v36 = vpop.permute.xlu2 %6402 }
 0x9c8   :  { %v6407_v11 = vmax.f32 %v6397_v63, %v6403_v36 }
 0x9ef   :  { %v6401_v62 = vpop.permute.xlu0 %6400 }
 0x9f0   :  { %v6406_v14 = vmax.f32 %v6396_v19, %v6401_v62 }
 0x9f2   :  { %v6418_v3 = vadd.f32 %v6411_v40, %v6406_v14 }
 0x9f4   :  { %8582 = vmatmul.msk.f32.vlgmr.msra.gmra.mxu0 %vm6482_vm8, %v6418_v3  ;;  %8594 = vmatmul.msk.f32.vlgmr.msra.gmra.mxu1 %vm6482_vm8, %v6418_v3 }
 0x9f7   :  { %v6416_v10 = vpop.permute.xlu0 %6415 }
 0x9f8   :  { %v6419_v34 = vadd.f32 %v6416_v10, %v6407_v11 }
 0x9fc   :  { %8583 = vmatmul.msk.f32.gmra.mxu0 %vm6482_vm8, %v6419_v34  ;;  %8595 = vmatmul.msk.f32.gmra.mxu1 %vm6482_vm8, %v6419_v34 }
 0xa71   :  { %v13844_v38 = vpop.f32.mrf.mxu0  ;;  %v6529_v4 = vpop.f32.mrf.mxu1 }
 0xa72   :  { %v9347_v58 = vpack.i.bf16 %v6529_v4, %v13844_v38 }
 0xa74   :  { %9348 = vrot.lane.b32.xlu1 %v9347_v58, %s9554_s22  ;;  %9343 = vrot.lane.b32.xlu2 %v9347_v58, %s9522_s10 }
 0xa79   :  { %v13849_v31 = vpop.f32.mrf.mxu0  ;;  %v6532_v30 = vpop.f32.mrf.mxu1 }
 0xa7a   :  { %v9367_v22 = vpack.i.bf16 %v6532_v30, %v13849_v31 }
 0xa7c   :  { %9368 = vrot.lane.b32.xlu2 %v9367_v22, %s9558_s21  ;;  %9358 = vrot.lane.b32.xlu0 %v9367_v22, %s9554_s22 }
 0xa7d   :  { %9353 = vrot.lane.b32.xlu1 %v9367_v22, %s9522_s10 }
 0xa84   :  { %9373 = vrot.lane.b32.xlu2 %v9347_v58, %s9559_s25  ;;  %9363 = vrot.lane.b32.xlu0 %v9347_v58, %s9558_s21 }
 0xa85   :  { %9378 = vrot.lane.b32.xlu1 %v9367_v22, %s9559_s25 }
 0xa8c   :  { %9398 = vrot.lane.b32.xlu2 %v9367_v22, %s9535_s11  ;;  %9388 = vrot.lane.b32.xlu0 %v9367_v22, %s9560_s29 }
 0xa8d   :  { %9383 = vrot.lane.b32.xlu1 %v9347_v58, %s9560_s29 }
 0xa94   :  { %9408 = vrot.lane.b32.xlu2 %v9347_v58, %s9536_s13  ;;  %9393 = vrot.lane.b32.xlu0 %v9347_v58, %s9535_s11 }
 0xa95   :  { %9403 = vrot.lane.b32.xlu1 %v9367_v22, %s9536_s13 }
 0xa9c   :  { %6793 = vperm.xlu2 %9171, %v6540_v17   ;;  %9413 = vrot.lane.b32.xlu0 %v9367_v22, %s9561_s3 }
 0xa9d   :  { %9418 = vrot.lane.b32.xlu1 %v9347_v58, %s9561_s3 }
 0xace   :  { %v9344_v18 = vpop.permute.xlu2 %9343 }
 0xacf   :  { %v9346_v39 = vunpack.i.h.bf16 %v9344_v18  ;;  %v9345_v5 = vunpack.i.l.bf16 %v9344_v18 }
 0xad1   :  { %v6697_v6 = vsel %vm14800_vm12, %v9345_v5, %v9346_v39  ;;  %v6746_v5 = vld.sshfl [vmem:[#allocation1] sm:$0xff pattern:$0x73625140] }
 0xad6   :  { %v9369_v50 = vpop.permute.xlu2 %9368 }
 0xad7   :  { %v9371_v48 = vunpack.i.h.bf16 %v9369_v50  ;;  %v9370_v1 = vunpack.i.l.bf16 %v9369_v50 }
 0xad9   :  { %v6654_v9 = vsel %vm6652_vm14, %v9370_v1, %v9371_v48 }
 0xade   :  { %v9374_v51 = vpop.permute.xlu2 %9373 }
 0xadf   :  { %v9376_v56 = vunpack.i.h.bf16 %v9374_v51  ;;  %v9375_v55 = vunpack.i.l.bf16 %v9374_v51  ;;  %v6541_v51 = vld [vmem:[%s14805_s15] sm:$0x3] }
 0xae1   :  { %v6630_v25 = vsel %vm6629_vm10, %v9375_v55, %v9376_v56 }
 0xae6   :  { %v9349_v57 = vpop.permute.xlu1 %9348  ;;  %v9399_v37 = vpop.permute.xlu2 %9398 }
 0xae7   :  { %v9351_v26 = vunpack.i.h.bf16 %v9349_v57  ;;  %v9350_v8 = vunpack.i.l.bf16 %v9349_v57  ;;  %v9401_v23 = vunpack.i.h.bf16 %v9399_v37  ;;  %v9400_v27 = vunpack.i.l.bf16 %v9399_v37 }
 0xae9   :  { %v6675_v52 = vsel %vm6243_vm5, %v9350_v8, %v9351_v26  ;;  %v6585_v14 = vsel %vm14801_vm1, %v9400_v27, %v9401_v23 }
 0xaee   :  { %v9359_v41 = vpop.permute.xlu0 %9358  ;;  %v9409_v15 = vpop.permute.xlu2 %9408 }
 0xaef   :  { %v9354_v44 = vpop.permute.xlu1 %9353  ;;  %v9361_v53 = vunpack.i.h.bf16 %v9359_v41  ;;  %v9360_v21 = vunpack.i.l.bf16 %v9359_v41  ;;  %v9411_v34 = vunpack.i.h.bf16 %v9409_v15  ;;  %v9410_v4 = vunpack.i.l.bf16 %v9409_v15 }
 0xaf0   :  { %v9356_v29 = vunpack.i.h.bf16 %v9354_v44  ;;  %v9355_v24 = vunpack.i.l.bf16 %v9354_v44 }
 0xaf1   :  { %v6676_v16 = vsel %vm6243_vm5, %v9360_v21, %v9361_v53  ;;  %v6562_v22 = vsel %vm14804_vm15, %v9410_v4, %v9411_v34  ;;  %v6798_v53 = vperm.slane %v6541_v51, 1  ;;  %vm14809_vm15 = vcmask 941056  }
 0xaf2   :  { %v6698_v59 = vsel %vm14799_vm0, %v9355_v24, %v9356_v29  ;;  %v6747_v24 = vld.sshfl [vmem:[#allocation1 + $0x8] sm:$0xff pattern:$0x73625140] }
 0xaf3   :  { %6751 = vmatpush.msra.mxu2 %v6698_v59  ;;  %vm6804_vm4 = vcmp.eq.s32.totalorder %v14739_v42, %v6798_v53  ;;  %vm6802_vm7 = vcmp.eq.s32.totalorder %v14740_v60, %v6798_v53  ;;  %vm6800_vm8 = vcmp.eq.s32.totalorder %v14741_v32, %v6798_v53 }
 0xaf4   :  { %8607 = vmatpush.msk.msrb.mxu3 %vm6804_vm4, %v14334_v46  ;;  %vm7049_vm4 = vcmask 1043456  }
 0xaf5   :  { %6752 = vmatpush.msra.mxu2 %v6697_v6 }
 0xaf6   :  { %v9364_v61 = vpop.permute.xlu0 %9363  ;;  %8608 = vmatpush.msk.msrb.mxu3 %vm6802_vm7, %v14334_v46  ;;  %v6794_v26 = vpop.permute.xlu2 %6793  ;;  %vm7045_vm7 = vcmask 97280  }
 0xaf7   :  { %v9379_v28 = vpop.permute.xlu1 %9378  ;;  %6753 = vmatpush.msra.mxu2 %v6676_v16  ;;  %v9366_v33 = vunpack.i.h.bf16 %v9364_v61  ;;  %v9365_v54 = vunpack.i.l.bf16 %v9364_v61 }
 0xaf8   :  { %v9381_v49 = vunpack.i.h.bf16 %v9379_v28  ;;  %v9380_v0 = vunpack.i.l.bf16 %v9379_v28  ;;  %8609 = vmatpush.msk.msrb.mxu3 %vm6800_vm8, %v14334_v46  ;;  %vm7101_vm8 = vcmask 33792  }
 0xaf9   :  { %6754 = vmatpush.msra.mxu2 %v6675_v52  ;;  %v6653_v13 = vsel %vm6652_vm14, %v9365_v54, %v9366_v33  ;;  %v6877_v52 = vld [vmem:[%s14806_s8] sm:$0x3] }
 0xafa   :  { %v6631_v12 = vsel %vm6629_vm10, %v9380_v0, %v9381_v49 }
 0xafb   :  { %6755 = vmatpush.msra.mxu2 %v6654_v9 }
 0xafd   :  { %6756 = vmatpush.msra.mxu2 %v6653_v13 }
 0xafe   :  { %v9389_v45 = vpop.permute.xlu0 %9388 }
 0xaff   :  { %v9391_v7 = vunpack.i.h.bf16 %v9389_v45  ;;  %v9390_v35 = vunpack.i.l.bf16 %v9389_v45  ;;  %v9384_v43 = vpop.permute.xlu1 %9383  ;;  %6757 = vmatpush.msra.mxu2 %v6631_v12 }
 0xb00   :  { %v9386_v2 = vunpack.i.h.bf16 %v9384_v43  ;;  %v9385_v63 = vunpack.i.l.bf16 %v9384_v43 }
 0xb01   :  { %6758 = vmatpush.msra.mxu2 %v6630_v25  ;;  %v6608_v19 = vsel %vm6606_vm9, %v9390_v35, %v9391_v7 }
 0xb02   :  { %v6607_v20 = vsel %vm6606_vm9, %v9385_v63, %v9386_v2 }
 0xb03   :  { %6759 = vmatpush.msra.mxu2 %v6608_v19 }
 0xb05   :  { %6760 = vmatpush.msra.mxu2 %v6607_v20 }
 0xb06   :  { %v9394_v62 = vpop.permute.xlu0 %9393 }
 0xb07   :  { %v9396_v40 = vunpack.i.h.bf16 %v9394_v62  ;;  %v9395_v3 = vunpack.i.l.bf16 %v9394_v62  ;;  %v9404_v36 = vpop.permute.xlu1 %9403  ;;  %6761 = vmatpush.msra.mxu2 %v6585_v14 }
 0xb08   :  { %v9406_v10 = vunpack.i.h.bf16 %v9404_v36  ;;  %v9405_v11 = vunpack.i.l.bf16 %v9404_v36 }
 0xb09   :  { %v6584_v58 = vsel %vm14802_vm3, %v9395_v3, %v9396_v40  ;;  %vm6817_vm3 = vcmask 195584  }
 0xb0a   :  { %6762 = vmatpush.msra.mxu2 %v6584_v58  ;;  %v6563_v30 = vsel %vm14803_vm13, %v9405_v11, %v9406_v10  ;;  %vm14807_vm13 = vcmask 1040384  }
 0xb0c   :  { %6763 = vmatpush.msra.mxu2 %v6563_v30 }
 0xb0e   :  { %v9414_v17 = vpop.permute.xlu0 %9413  ;;  %6764 = vmatpush.msra.mxu2 %v6562_v22 }
 0xb0f   :  { %v9416_v18 = vunpack.i.h.bf16 %v9414_v17  ;;  %v9415_v57 = vunpack.i.l.bf16 %v9414_v17  ;;  %v9419_v50 = vpop.permute.xlu1 %9418  ;;  %v7041_v17 = vld [vmem:[%s9701_s12 + $0x8] sm:$0xff] }
 0xb10   :  { %v9421_v41 = vunpack.i.h.bf16 %v9419_v50  ;;  %v9420_v44 = vunpack.i.l.bf16 %v9419_v50  ;;  %6765 = vmatpush.msra.mxu2 %v13849_v31  ;;  %v6797_v31 = vperm.slane %v6541_v51, 0  ;;  %7090 = vmatpush.msra.mxu3 %v7041_v17 }
 0xb11   :  { %v6721_v39 = vsel %vm6719_vm11, %v9415_v57, %v9416_v18 }
 0xb12   :  { %6766 = vmatpush.msra.mxu2 %v13844_v38  ;;  %6785 = vmatpush.msrb.mxu0 %v6721_v39  ;;  %v6720_v29 = vsel %vm6719_vm11, %v9420_v44, %v9421_v41  ;;  %vm6803_vm0 = vcmp.eq.s32.totalorder %v14739_v42, %v6797_v31  ;;  %vm6801_vm12 = vcmp.eq.s32.totalorder %v14740_v60, %v6797_v31  ;;  %v7040_v41 = vld [vmem:[%s9701_s12] sm:$0xff]  ;;  %v7044_v44 = vld [vmem:[%s9706_s20 + $0x8] sm:$0xf] }
 0xb13   :  { %6767 = vmatmul.f32.vlgmr.msra.gmra.mxu2 %v6746_v5  ;;  %8603 = vmatpush.msk.msrb.mxu1 %vm6803_vm0, %v14334_v46  ;;  %vm6799_vm1 = vcmp.eq.s32.totalorder %v14741_v32, %v6797_v31  ;;  %v9463_v5 = vld [vmem:[%s9711_s27] ss:$0 sm:$0xff] }
 0xb14   :  { %6786 = vmatpush.msrb.mxu0 %v6720_v29  ;;  %7091 = vmatpush.msra.mxu3 %v7040_v41 }
 0xb15   :  { %8596 = vmatmul.msk.f32.vlgmr.msrb.gmra.mxu0 %vm4522_vm2, %v6747_v24  ;;  %8604 = vmatpush.msk.msrb.mxu1 %vm6801_vm12, %v14334_v46 }
 0xb17   :  { %8605 = vmatpush.msk.msrb.mxu1 %vm6799_vm1, %v14334_v46 }
 0xb19   :  { %8619 = vmatpush.msk.msra.mxu1 %vm7049_vm4, %v7044_v44 }
 0xb92   :  { %v6788_v38 = vpop.f32.mrf.mxu0 }
 0xb96   :  { %v6768_v21 = vpop.f32.mrf.mxu2 }
 0xb97   :  { %v6789_v59 = vadd.f32 %v6788_v38, %v6768_v21 }
 0xb99   :  { %v6796_v8 = vadd.f32 %v6794_v26, %v6789_v59 }
 0xb9b   :  { %8606 = vmatmul.msk.f32.vlgmr.msrb.gmra.mxu1 %vm6817_vm3, %v6796_v8  ;;  %8610 = vmatmul.msk.f32.vlgmr.msrb.gmra.mxu3 %vm6817_vm3, %v6796_v8 }
 0xc18   :  { %v6838_v6 = vpop.f32.mrf.mxu1 }
 0xc19   :  { %6868 = vst [vmem:[#allocation1] sm:$0xff] %v6838_v6 }
 0xc1e   :  { %v6858_v48 = vpop.f32.mrf.mxu3 }
 0xc1f   :  { %v6863_v1 = vrot.slane %v6858_v48, 7  ;;  %6869 = vst [vmem:[#allocation1 + $0x9] sm:$0xff] %v6858_v48 }
 0xc21   :  { %v6864_v61 = vsel %vm14807_vm13, %v6838_v6, %v6863_v1 }
 0xc22   :  { %6866 = vst.msk [vmem:[#allocation5] ss:$8 sm:$0x3] %vm10463_vm6, %v6864_v61 }
 0xc26   :  { %v6871_v16 = vld [vmem:[#allocation1 + $0x1] ss:$9 sm:$0xff] }
 0xc27   :  { %6874 = vst.msk [vmem:[#allocation5 + $0x4] ss:$8 sm:$0x3] %vm10463_vm6, %v6871_v16  ;;  %vm7010_vm6 = vcmp.eq.s32.totalorder %v14739_v42, %v9462_v47 }
 0xc28   :  { %8615 = vmatpush.msk.msrb.mxu2 %vm7010_vm6, %v14334_v46 }
 0xc2e   :  { %v6958_v28 = vld [vmem:[#allocation5] sm:$0xff]  ;;  %v6959_v33 = vld [vmem:[#allocation5 + $0x8] sm:$0xff] }
 0xc2f   :  { %v9422_v54 = vpack.i.bf16 %v6959_v33, %v6958_v28 }
 0xc31   :  { %9423 = vrot.lane.b32.xlu0 %v9422_v54, %s9561_s3  ;;  %9428 = vrot.lane.b32.xlu1 %v9422_v54, %s9522_s10  ;;  %s14810_s10 = sld [smem:[#allocation18_spill]] }
 0xc32   :  { %9433 = vrot.lane.b32.xlu2 %v9422_v54, %s9554_s22 }
 0xc37   :  { %v6876_v22 = vld [vmem:[%s14810_s10] sm:$0x3] }
 0xc39   :  { %9438 = vrot.lane.b32.xlu0 %v9422_v54, %s9558_s21  ;;  %9443 = vrot.lane.b32.xlu1 %v9422_v54, %s9559_s25 }
 0xc3a   :  { %9448 = vrot.lane.b32.xlu2 %v9422_v54, %s9560_s29 }
 0xc41   :  { %9453 = vrot.lane.b32.xlu0 %v9422_v54, %s9535_s11  ;;  %9458 = vrot.lane.b32.xlu1 %v9422_v54, %s9536_s13  ;;  %s14814_s11 = sld [smem:[#allocation21_spill]]  ;;  %s9562_s13 = smov [#allocation7]  }
 0xc42   :  { %7003 = vperm.xlu2 %9171, %v6877_v52   ;;  %s7108_s12 = sshll.u32 %s9562_s13, 4  ;;  %s7109_s12 = int_to_ptr.vmem [resolvable:$true] %s7108_s12 }
 0xc8c   :  { %v9434_v49 = vpop.permute.xlu2 %9433 }
 0xc8d   :  { %v9436_v45 = vunpack.i.h.bf16 %v9434_v49  ;;  %v9435_v12 = vunpack.i.l.bf16 %v9434_v49 }
 0xc8f   :  { %v6944_v42 = vsel %vm6243_vm5, %v9435_v12, %v9436_v45  ;;  %vm14811_vm5 = vcmask 1031168  }
 0xc94   :  { %v9449_v43 = vpop.permute.xlu2 %9448 }
 0xc95   :  { %v9451_v20 = vunpack.i.h.bf16 %v9449_v43  ;;  %v9450_v15 = vunpack.i.l.bf16 %v9449_v43 }
 0xc97   :  { %v6911_v40 = vsel %vm6606_vm9, %v9450_v15, %v9451_v20  ;;  %vm7008_vm9 = vcmp.eq.s32.totalorder %v14741_v32, %v9462_v47  ;;  %v7042_v32 = vld [vmem:[%s14814_s11] sm:$0x3] }
 0xc9c   :  { %v7004_v18 = vpop.permute.xlu2 %7003 }
 0xca3   :  { %v9424_v0 = vpop.permute.xlu0 %9423  ;;  %v9429_v9 = vpop.permute.xlu1 %9428 }
 0xca4   :  { %v9426_v56 = vunpack.i.h.bf16 %v9424_v0  ;;  %v9425_v55 = vunpack.i.l.bf16 %v9424_v0  ;;  %v9431_v37 = vunpack.i.h.bf16 %v9429_v9  ;;  %v9430_v13 = vunpack.i.l.bf16 %v9429_v9 }
 0xca6   :  { %v6966_v7 = vsel %vm6719_vm11, %v9425_v55, %v9426_v56  ;;  %v6955_v35 = vsel %vm14809_vm15, %v9430_v13, %v9431_v37  ;;  %vm14812_vm11 = vcmask 1039360  }
 0xca7   :  { %6988 = vmatpush.msra.mxu0 %v6966_v7 }
 0xca9   :  { %6989 = vmatpush.msra.mxu0 %v6955_v35 }
 0xcab   :  { %6990 = vmatpush.msra.mxu0 %v6944_v42  ;;  %v9439_v2 = vpop.permute.xlu0 %9438  ;;  %v9444_v63 = vpop.permute.xlu1 %9443 }
 0xcac   :  { %v9441_v25 = vunpack.i.h.bf16 %v9439_v2  ;;  %v9440_v19 = vunpack.i.l.bf16 %v9439_v2  ;;  %v9446_v23 = vunpack.i.h.bf16 %v9444_v63  ;;  %v9445_v27 = vunpack.i.l.bf16 %v9444_v63 }
 0xcae   :  { %v6933_v62 = vsel %vm6652_vm14, %v9440_v19, %v9441_v25  ;;  %v6922_v14 = vsel %vm6629_vm10, %v9445_v27, %v9446_v23  ;;  %vm14813_vm14 = vcmask 588800   ;;  %vm7009_vm10 = vcmp.eq.s32.totalorder %v14740_v60, %v9462_v47  ;;  %v7043_v60 = vld [vmem:[%s9706_s20] sm:$0xff]  ;;  %s9477_s20 = sshra.s32 %s7111_s16, 4  ;;  %s9478_s20 = int_to_ptr.hbm [resolvable:$true] %s9477_s20 }
 0xcaf   :  { %6991 = vmatpush.msra.mxu0 %v6933_v62  ;;  %8616 = vmatpush.msk.msrb.mxu2 %vm7009_vm10, %v14334_v46  ;;  %s9479_s14 = scalar_lea.hbm %s9478_s20, 2  ;;  %p9482_p1 = scmp.lt.s32.totalorder %s9478_s20, %s9716_s4 }
 0xcb0   :  { %7068 = vmatpush.msra.mxu1 %v7043_v60  ;;  %p9480_p0 = scmp.ne.s32.totalorder %s9478_s20, %s9479_s14  ;;  %p9483_p2 = scmp.lt.s32.totalorder %s9481_s19, %s9479_s14 }
 0xcb1   :  { %6992 = vmatpush.msra.mxu0 %v6922_v14  ;;  %8617 = vmatpush.msk.msrb.mxu2 %vm7008_vm9, %v14334_v46 }
 0xcb2   :  { %8620 = vmatmul.msk.f32.vlgmr.msra.gmra.mxu1 %vm7045_vm7, %v7042_v32  ;;  %p9484_p3 = por %p9483_p2, %p9482_p1 }
 0xcb3   :  { %6993 = vmatpush.msra.mxu0 %v6911_v40  ;;  %v9454_v3 = vpop.permute.xlu0 %9453  ;;  %v9459_v36 = vpop.permute.xlu1 %9458 }
 0xcb4   :  { %v9456_v10 = vunpack.i.h.bf16 %v9454_v3  ;;  %v9455_v11 = vunpack.i.l.bf16 %v9454_v3  ;;  %v9461_v34 = vunpack.i.h.bf16 %v9459_v36  ;;  %v9460_v4 = vunpack.i.l.bf16 %v9459_v36  ;;  %p9485_p4 = pnand %p9484_p3, %p9480_p0 }
 0xcb6   :  { %v6900_v58 = vsel %vm14811_vm5, %v9455_v11, %v9456_v10  ;;  %v6889_v30 = vsel %vm14812_vm11, %v9460_v4, %v9461_v34 }
 0xcb7   :  { %6994 = vmatpush.msra.mxu0 %v6900_v58 }
 0xcb9   :  { %6995 = vmatpush.msra.mxu0 %v6889_v30 }
 0xcbb   :  { %6996 = vmatpush.msra.mxu0 %v6958_v28 }
 0xcbc   :  { %8611 = vmatmul.msk.f32.vlgmr.msra.gmra.mxu0 %vm14813_vm14, %v6876_v22 }
 0xd2f   :  { %v7070_v46 = vpop.f32.mrf.mxu1 }
 0xd39   :  { %v6998_v57 = vpop.f32.mrf.mxu0 }
 0xd3a   :  { %v7006_v50 = vadd.f32 %v7004_v18, %v6998_v57 }
 0xd3c   :  { %8618 = vmatmul.msk.f32.vlgmr.msrb.gmra.mxu2 %vm6817_vm3, %v7006_v50 }
 0xdbf   :  { %v7037_v39 = vpop.f32.mrf.mxu2 }
 0xdc0   :  { %8621 = vmatmul.msk.f32.vlgmr.msra.gmra.mxu3 %vm4522_vm2, %v7037_v39 }
 0xe43   :  { %v7093_v29 = vpop.f32.mrf.mxu3 }
 0xe44   :  { %v7094_v24 = vadd.f32 %v7093_v29, %v7070_v46 }
 0xe46   :  { %v7100_v51 = vadd.f32 %v9463_v5, %v7094_v24 }
 0xe48   :  { %7102 = vst.msk [vmem:[#allocation7] sm:$0x3] %vm7101_vm8, %v7100_v51 }
 0xe49   :  { %9488 = shalt.err (!%p9485_p4)
}
 0xe4a   :  { %7113 = dma.vmem_to_hbm [thread:$0]  %s7109_s12, 32, %s7111_s16, [#allocation8]  }
 0xe4b   :  { %9489 = dma.done.wait [#allocation8], 32  }
 0xe4c   :  { %9490 = vsyncadd [#allocation8], 4294967264 }
 0xe4d   :  { %7118 = vsyncpa [#allocation8], 1 }

</bundles_post_ra>
